<compile_context>
chip_gen: v7x
topology: tpu7x:2x2x1
jax: 0.10.0
libtpu: 0.0.40
codegen_flags: <defaults>
</compile_context>

<pallas_src>
import math

import jax
import jax.numpy as jnp
from jax.experimental import pallas as pl
from jax.experimental.pallas import tpu as pltpu


_NEG_SLOPE = 0.01          # nn.LeakyReLU default negative slope
_BN_EPS = 1e-5             # nn.BatchNorm3d default eps


def _lrelu(x):
    return jnp.where(x > 0, x, _NEG_SLOPE * x)


# ----------------------------------------------------------------------------
# Kernel A: direct 3x3x3 conv (27 tap-shifted MXU matmuls) + BN partial stats.
# Optionally fuses the previous layer's BN affine + LeakyReLU into the input
# taps so raw bf16 conv outputs can be chained without an extra HBM pass.
# ----------------------------------------------------------------------------
def _make_conv_kernel(H, W, Cin, Cout, D, fuse_in):
    We = W + 2                 # W padded by 1 on each side
    PA = H * We                # rows of the per-slab output accumulator
    Pext = (H + 4) * We        # rows of the flattened, padded input slab

    def kernel(*refs):
        if fuse_in:
            (cmask_ref, imask_ref, sc_ref, sh_ref,
             x0, x1, x2, w_ref, y_ref, st_ref, xs_ref) = refs
        else:
            (cmask_ref, x0, x1, x2, w_ref, y_ref, st_ref, xs_ref) = refs
        xrefs = (x0, x1, x2)
        d = pl.program_id(1)

        # Stage the 3 depth slabs into f32 VMEM, applying the previous layer's
        # BN affine + LeakyReLU on the fly when fused (pad / garbage positions
        # are forced back to exact zero via the spatial mask and depth check).
        for k in range(3):
            v = xrefs[k][0, 0].astype(jnp.float32)              # (Pext, Cin)
            if fuse_in:
                v = _lrelu(v * sc_ref[...] + sh_ref[...])
                v = v * imask_ref[...]                           # zero H/W pad + garbage cols
                dvalid = jnp.logical_and(d + k >= 1, d + k <= D)
                v = v * dvalid.astype(jnp.float32)               # zero D pad slabs
            xs_ref[k] = v

        # 27 tap-shifted matmuls accumulated in f32 (MXU, bf16 operands).
        acc = jnp.zeros((PA, Cout), jnp.float32)
        for t in range(27):
            kd, r = divmod(t, 9)
            kh, kw = divmod(r, 3)
            off = (kh + 1) * We + kw - 1                         # flat tap offset
            xt = xs_ref[kd, pl.ds(off, PA), :].astype(jnp.bfloat16)
            acc = acc + jnp.dot(xt, w_ref[t],
                                preferred_element_type=jnp.float32)

        # Raw conv output, bf16, W-padded layout (border columns undefined).
        y_ref[0, 0] = acc.astype(y_ref.dtype)

        # BatchNorm partial stats over valid (interior) output columns only.
        cm = cmask_ref[...]                                      # (PA, 1)
        am = acc * cm
        s = jnp.sum(am, axis=0, keepdims=True)                   # (1, Cout)
        ss = jnp.sum(am * acc, axis=0, keepdims=True)            # (1, Cout)
        st_ref[0, 0] = jnp.concatenate([s, ss], axis=0)          # (2, Cout)

    return kernel


# ----------------------------------------------------------------------------
# Kernel B: BN affine + LeakyReLU apply (only used for the LAST conv of the
# block; earlier convs get this fused into the next conv's input staging).
# ----------------------------------------------------------------------------
def _bn_lrelu_kernel(cmask_ref, sc_ref, sh_ref, x_ref, o_ref):
    v = x_ref[0, 0].astype(jnp.float32) * sc_ref[...] + sh_ref[...]
    o_ref[0, 0] = _lrelu(v) * cmask_ref[...]


def _masks(H, W):
    """Validity masks for the W-padded output grid and the fully padded input."""
    We = W + 2
    ce = jnp.arange(We)
    col = ((ce >= 1) & (ce <= W)).astype(jnp.float32)            # (We,)
    cmask = jnp.tile(col, (H,)).reshape(H * We, 1)               # output grid (H, We)
    re = jnp.arange(H + 4)
    row = ((re >= 2) & (re <= H + 1)).astype(jnp.float32)        # (H+4,)
    imask = (row[:, None] * col[None, :]).reshape((H + 4) * We, 1)
    return cmask, imask


def conv3x3_bn(x, w, gamma, beta, *, in_scale=None, in_shift=None,
               spatial=None, from_padded=False):
    """Conv3d(k=3, pad=1, bias=False) + training-mode BatchNorm statistics.

    x: from_padded=False -> (N, D, H, W, Cin) activation in core layout.
       from_padded=True  -> (N, D, H*(W+2), Cin) raw bf16 output of a previous
                            conv3x3_bn call; its BN affine + LeakyReLU
                            (in_scale / in_shift) is fused into this conv.
    Returns (y_raw, scale, shift):
       y_raw: (N, D, H*(W+2), Cout) bf16 raw conv output (border cols undefined)
       scale, shift: (1, Cout) f32 BN affine derived from the batch statistics.
    """
    fuse_in = from_padded
    kkk = w.shape[0]
    assert kkk == 3
    Cin, Cout = w.shape[3], w.shape[4]

    if from_padded:
        assert spatial is not None
        H, W = spatial
        N, D = x.shape[0], x.shape[1]
        We = W + 2
        assert x.shape[2] == H * We and x.shape[3] == Cin
        x5 = x.reshape(N, D, H, We, Cin)
        xe = jnp.pad(x5, ((0, 0), (1, 1), (2, 2), (0, 0), (0, 0)))
    else:
        N, D, H, W, _ = x.shape
        assert x.shape[-1] == Cin
        We = W + 2
        xe = jnp.pad(x.astype(jnp.bfloat16),
                     ((0, 0), (1, 1), (2, 2), (1, 1), (0, 0)))
    PA = H * We
    Pext = (H + 4) * We
    xe = xe.reshape(N, D + 2, Pext, Cin).astype(jnp.bfloat16)

    wmat = w.reshape(27, Cin, Cout).astype(jnp.bfloat16)
    cmask, imask = _masks(H, W)

    kern = _make_conv_kernel(H, W, Cin, Cout, D, fuse_in)

    def x_spec(k):
        return pl.BlockSpec((1, 1, Pext, Cin),
                            lambda n, d, k=k: (n, d + k, 0, 0))

    def const2(shp):
        return pl.BlockSpec(shp, lambda n, d: (0, 0))

    in_specs = [const2((PA, 1))]
    inputs = [cmask]
    if fuse_in:
        in_specs += [const2((Pext, 1)), const2((1, Cin)), const2((1, Cin))]
        inputs += [imask,
                   in_scale.reshape(1, Cin).astype(jnp.float32),
                   in_shift.reshape(1, Cin).astype(jnp.float32)]
    in_specs += [x_spec(0), x_spec(1), x_spec(2),
                 pl.BlockSpec((27, Cin, Cout), lambda n, d: (0, 0, 0))]
    inputs += [xe, xe, xe, wmat]

    flops = 2 * N * D * 27 * PA * Cin * Cout
    bytes_acc = int(3 * xe.size * 2 + wmat.size * 2
                    + N * D * PA * Cout * 2 + N * D * 2 * Cout * 4)

    y_raw, stats = pl.pallas_call(
        kern,
        out_shape=(jax.ShapeDtypeStruct((N, D, PA, Cout), jnp.bfloat16),
                   jax.ShapeDtypeStruct((N, D, 2, Cout), jnp.float32)),
        grid_spec=pltpu.PrefetchScalarGridSpec(
            num_scalar_prefetch=0,
            grid=(N, D),
            in_specs=in_specs,
            out_specs=[pl.BlockSpec((1, 1, PA, Cout), lambda n, d: (n, d, 0, 0)),
                       pl.BlockSpec((1, 1, 2, Cout), lambda n, d: (n, d, 0, 0))],
            scratch_shapes=[pltpu.VMEM((3, Pext, Cin), jnp.float32)]),
        compiler_params=pltpu.CompilerParams(
            dimension_semantics=("parallel", "parallel"),
            vmem_limit_bytes=32 * 1024 * 1024),
        cost_estimate=pl.CostEstimate(flops=flops, transcendentals=0,
                                      bytes_accessed=bytes_acc),
    )(*inputs)

    # Global BatchNorm batch statistics (biased variance, eps=1e-5).
    # NOTE: variance via E[x^2]-E[x]^2 in f32; acceptable here, use Welford if
    # |mean| >> std for your data.
    count = N * D * H * W
    s = jnp.sum(stats[:, :, 0, :], axis=(0, 1))
    ss = jnp.sum(stats[:, :, 1, :], axis=(0, 1))
    mean = s / count
    var = jnp.maximum(ss / count - mean * mean, 0.0)
    inv = jax.lax.rsqrt(var + _BN_EPS)
    scale = (gamma * inv).reshape(1, Cout).astype(jnp.float32)
    shift = (beta - mean * gamma * inv).reshape(1, Cout).astype(jnp.float32)
    return y_raw, scale, shift


def bn_lrelu_finalize(y_raw, scale, shift, spatial):
    """Apply BN affine + LeakyReLU to the last raw conv output and return the
    core (N, D, H, W, Cout) f32 tensor."""
    H, W = spatial
    N, D, PA, Cout = y_raw.shape
    We = W + 2
    cmask, _ = _masks(H, W)
    out = pl.pallas_call(
        _bn_lrelu_kernel,
        out_shape=jax.ShapeDtypeStruct((N, D, PA, Cout), jnp.float32),
        grid_spec=pltpu.PrefetchScalarGridSpec(
            num_scalar_prefetch=0,
            grid=(N, D),
            in_specs=[pl.BlockSpec((PA, 1), lambda n, d: (0, 0)),
                      pl.BlockSpec((1, Cout), lambda n, d: (0, 0)),
                      pl.BlockSpec((1, Cout), lambda n, d: (0, 0)),
                      pl.BlockSpec((1, 1, PA, Cout), lambda n, d: (n, d, 0, 0))],
            out_specs=pl.BlockSpec((1, 1, PA, Cout), lambda n, d: (n, d, 0, 0))),
        compiler_params=pltpu.CompilerParams(
            dimension_semantics=("parallel", "parallel"),
            vmem_limit_bytes=32 * 1024 * 1024),
    )(cmask, scale, shift, y_raw)
    return out.reshape(N, D, H, We, Cout)[:, :, :, 1:W + 1, :]


# ----------------------------------------------------------------------------
# Trilinear 2x upsample, align_corners=False, via static-slice lerps (JAX glue,
# no gathers).  Even out i: 0.25*x[i-1] + 0.75*x[i]; odd: 0.75*x[i]+0.25*x[i+1],
# edge-clamped (matches PyTorch for scale_factor=2).
# ----------------------------------------------------------------------------
def _upsample2x_axis(x, axis):
    n = x.shape[axis]
    first = jax.lax.slice_in_dim(x, 0, 1, axis=axis)
    last = jax.lax.slice_in_dim(x, n - 1, n, axis=axis)
    x_prev = jnp.concatenate(
        [first, jax.lax.slice_in_dim(x, 0, n - 1, axis=axis)], axis=axis)
    x_next = jnp.concatenate(
        [jax.lax.slice_in_dim(x, 1, n, axis=axis), last], axis=axis)
    even = 0.25 * x_prev + 0.75 * x
    odd = 0.75 * x + 0.25 * x_next
    out = jnp.stack([even, odd], axis=axis + 1)
    shape = list(x.shape)
    shape[axis] = 2 * n
    return out.reshape(shape)


def upsample_trilinear_2x(x):
    for ax in (1, 2, 3):
        x = _upsample2x_axis(x, ax)
    return x


# ----------------------------------------------------------------------------
# DecoderBlock
# ----------------------------------------------------------------------------
def init_decoder_block(key, in_channels, out_channels, skip_channels):
    def conv_params(k, cin, cout):
        fan_in = cin * 27
        w = jax.random.normal(k, (3, 3, 3, cin, cout), jnp.float32) / math.sqrt(fan_in)
        return {"w": w,
                "gamma": jnp.ones((cout,), jnp.float32),
                "beta": jnp.zeros((cout,), jnp.float32)}

    k1, k2, k3 = jax.random.split(key, 3)
    return {
        "conv1": conv_params(k1, in_channels + 2 * skip_channels, out_channels),
        "conv2": conv_params(k2, out_channels, out_channels),
        "conv3": conv_params(k3, in_channels + skip_channels, out_channels),
    }


def decoder_block_forward(params, x, skip=None, skip2=None):
    # NDHWC layout.  Single 3-way channel concat (review item).
    x = upsample_trilinear_2x(x)
    parts = [x]
    if skip is not None:
        parts.append(skip)
    if skip2 is not None:
        parts.append(skip2)
    x = jnp.concatenate(parts, axis=-1) if len(parts) > 1 else x

    p_first = params["conv1"] if skip2 is not None else params["conv3"]
    assert x.shape[-1] == p_first["w"].shape[3], (
        "channel mismatch: got %d input channels, first conv expects %d"
        % (x.shape[-1], p_first["w"].shape[3]))

    N, D, H, W, _ = x.shape
    # First conv: raw bf16 output + BN affine (applied lazily).
    y1, sc1, sh1 = conv3x3_bn(x, p_first["w"], p_first["gamma"], p_first["beta"])
    # conv2: previous BN + LeakyReLU fused into the input taps.
    p2 = params["conv2"]
    y2, sc2, sh2 = conv3x3_bn(y1, p2["w"], p2["gamma"], p2["beta"],
                              in_scale=sc1, in_shift=sh1,
                              spatial=(H, W), from_padded=True)
    out = bn_lrelu_finalize(y2, sc2, sh2, (H, W))
    return out.astype(x.dtype)


if __name__ == "__main__":
    key = jax.random.PRNGKey(0)
    k_p, k_x, k_s1, k_s2 = jax.random.split(key, 4)

    in_ch, out_ch, skip_ch = 8, 8, 4
    N, D, H, W = 2, 4, 4, 4                 # pre-upsample spatial size

    params = init_decoder_block(k_p, in_ch, out_ch, skip_ch)

    # NDHWC inputs (PyTorch NCDHW equivalents: x (2,8,4,4,4), skips (2,4,8,8,8))
    x = jax.random.normal(k_x, (N, D, H, W, in_ch), jnp.float32)
    skip = jax.random.normal(k_s1, (N, 2 * D, 2 * H, 2 * W, skip_ch), jnp.float32)
    skip2 = jax.random.normal(k_s2, (N, 2 * D, 2 * H, 2 * W, skip_ch), jnp.float32)

    fwd = jax.jit(decoder_block_forward)

    # Path with both skips: up -> cat -> conv1 -> conv2
    y1 = jax.block_until_ready(fwd(params, x, skip, skip2))
    assert y1.shape == (N, 2 * D, 2 * H, 2 * W, out_ch)
    assert bool(jnp.all(jnp.isfinite(y1)))

    # Path with single skip: up -> cat -> conv3 -> conv2
    y2 = jax.block_until_ready(fwd(params, x, skip, None))
    assert y2.shape == (N, 2 * D, 2 * H, 2 * W, out_ch)
    assert bool(jnp.all(jnp.isfinite(y2)))

    print("KERNEL_OK")
</pallas_src>

<mosaic_0001>
module attributes {stable_mosaic.version = 11 : i64} {
  func.func @kernel(%arg0: i32, %arg1: i32, %arg2: memref<80x1xf32, #tpu.memory_space<vmem>>, %arg3: memref<1x1x120x16xbf16, #tpu.memory_space<vmem>>, %arg4: memref<1x1x120x16xbf16, #tpu.memory_space<vmem>>, %arg5: memref<1x1x120x16xbf16, #tpu.memory_space<vmem>>, %arg6: memref<27x16x8xbf16, #tpu.memory_space<vmem>>, %arg7: memref<1x1x80x8xbf16, #tpu.memory_space<vmem>>, %arg8: memref<1x1x2x8xf32, #tpu.memory_space<vmem>>, %arg9: memref<3x120x16xf32, #tpu.memory_space<vmem>>) attributes {dimension_semantics = [#tpu.dimension_semantics<parallel>, #tpu.dimension_semantics<parallel>], iteration_bounds = array<i64: 2, 8>, scalar_prefetch = 0 : i64, scratch_operands = 1 : i64, tpu.core_type = #tpu.core_type<tc>, window_params = [{pipeline_mode = #tpu.pipeline_mode<synchronous>, transform_indices = @transform_0, window_bounds = array<i64: 80, 1>}, {transform_indices = @transform_1, window_bounds = array<i64: 1, 1, 120, 16>}, {transform_indices = @transform_2, window_bounds = array<i64: 1, 1, 120, 16>}, {transform_indices = @transform_3, window_bounds = array<i64: 1, 1, 120, 16>}, {pipeline_mode = #tpu.pipeline_mode<synchronous>, transform_indices = @transform_4, window_bounds = array<i64: 27, 16, 8>}, {transform_indices = @transform_5, window_bounds = array<i64: 1, 1, 80, 8>}, {transform_indices = @transform_6, window_bounds = array<i64: 1, 1, 2, 8>}]} {
    %c0 = arith.constant 0 : index
    %c0_0 = arith.constant 0 : index
    %c0_1 = arith.constant 0 : index
    %c0_2 = arith.constant 0 : index
    %0 = vector.load %arg3[%c0, %c0_0, %c0_1, %c0_2] : memref<1x1x120x16xbf16, #tpu.memory_space<vmem>>, vector<1x1x120x16xbf16>
    %1 = vector.shape_cast %0 : vector<1x1x120x16xbf16> to vector<120x16xbf16>
    %2 = arith.extf %1 : vector<120x16xbf16> to vector<120x16xf32>
    %c0_3 = arith.constant 0 : index
    %c0_4 = arith.constant 0 : index
    %c0_5 = arith.constant 0 : index
    %3 = vector.load %arg9[%c0_3, %c0_4, %c0_5] : memref<3x120x16xf32, #tpu.memory_space<vmem>>, vector<1x120x16xf32>
    %4 = vector.shape_cast %3 : vector<1x120x16xf32> to vector<120x16xf32>
    %5 = vector.shape_cast %2 : vector<120x16xf32> to vector<1x120x16xf32>
    tpu.vector_store %arg9[%c0_3, %c0_4, %c0_5], %5 {strides = array<i32>} : memref<3x120x16xf32, #tpu.memory_space<vmem>>, vector<1x120x16xf32>,
    %c0_6 = arith.constant 0 : index
    %c0_7 = arith.constant 0 : index
    %c0_8 = arith.constant 0 : index
    %c0_9 = arith.constant 0 : index
    %6 = vector.load %arg4[%c0_6, %c0_7, %c0_8, %c0_9] : memref<1x1x120x16xbf16, #tpu.memory_space<vmem>>, vector<1x1x120x16xbf16>
    %7 = vector.shape_cast %6 : vector<1x1x120x16xbf16> to vector<120x16xbf16>
    %8 = arith.extf %7 : vector<120x16xbf16> to vector<120x16xf32>
    %c1 = arith.constant 1 : index
    %c0_10 = arith.constant 0 : index
    %c0_11 = arith.constant 0 : index
    %9 = vector.load %arg9[%c1, %c0_10, %c0_11] : memref<3x120x16xf32, #tpu.memory_space<vmem>>, vector<1x120x16xf32>
    %10 = vector.shape_cast %9 : vector<1x120x16xf32> to vector<120x16xf32>
    %11 = vector.shape_cast %8 : vector<120x16xf32> to vector<1x120x16xf32>
    tpu.vector_store %arg9[%c1, %c0_10, %c0_11], %11 {strides = array<i32>} : memref<3x120x16xf32, #tpu.memory_space<vmem>>, vector<1x120x16xf32>,
    %c0_12 = arith.constant 0 : index
    %c0_13 = arith.constant 0 : index
    %c0_14 = arith.constant 0 : index
    %c0_15 = arith.constant 0 : index
    %12 = vector.load %arg5[%c0_12, %c0_13, %c0_14, %c0_15] : memref<1x1x120x16xbf16, #tpu.memory_space<vmem>>, vector<1x1x120x16xbf16>
    %13 = vector.shape_cast %12 : vector<1x1x120x16xbf16> to vector<120x16xbf16>
    %14 = arith.extf %13 : vector<120x16xbf16> to vector<120x16xf32>
    %c2 = arith.constant 2 : index
    %c0_16 = arith.constant 0 : index
    %c0_17 = arith.constant 0 : index
    %15 = vector.load %arg9[%c2, %c0_16, %c0_17] : memref<3x120x16xf32, #tpu.memory_space<vmem>>, vector<1x120x16xf32>
    %16 = vector.shape_cast %15 : vector<1x120x16xf32> to vector<120x16xf32>
    %17 = vector.shape_cast %14 : vector<120x16xf32> to vector<1x120x16xf32>
    tpu.vector_store %arg9[%c2, %c0_16, %c0_17], %17 {strides = array<i32>} : memref<3x120x16xf32, #tpu.memory_space<vmem>>, vector<1x120x16xf32>,
    %cst = arith.constant 0.000000e+00 : f32
    %18 = vector.broadcast %cst : f32 to vector<80x8xf32>
    %c0_18 = arith.constant 0 : index
    %c9 = arith.constant 9 : index
    %c0_19 = arith.constant 0 : index
    %19 = vector.load %arg9[%c0_18, %c9, %c0_19] : memref<3x120x16xf32, #tpu.memory_space<vmem>>, vector<1x80x16xf32>
    %20 = vector.shape_cast %19 : vector<1x80x16xf32> to vector<80x16xf32>
    %21 = arith.truncf %20 : vector<80x16xf32> to vector<80x16xbf16>
    %c0_20 = arith.constant 0 : index
    %c0_21 = arith.constant 0 : index
    %c0_22 = arith.constant 0 : index
    %22 = vector.load %arg6[%c0_20, %c0_21, %c0_22] : memref<27x16x8xbf16, #tpu.memory_space<vmem>>, vector<1x16x8xbf16>
    %23 = vector.shape_cast %22 : vector<1x16x8xbf16> to vector<16x8xbf16>
    %cst_23 = arith.constant dense<0.000000e+00> : vector<80x8xf32>
    %24 = tpu.matmul %21, %23, %cst_23 {dimension_numbers = #tpu.dot_dimension_numbers<[1], [0], [0], [1], [0, 0, 1, 1], [], []>} : vector<80x16xbf16>, vector<16x8xbf16>, vector<80x8xf32> -> vector<80x8xf32>
    %25 = arith.addf %18, %24 : vector<80x8xf32>
    %c0_24 = arith.constant 0 : index
    %c10 = arith.constant 10 : index
    %c0_25 = arith.constant 0 : index
    %26 = vector.load %arg9[%c0_24, %c10, %c0_25] : memref<3x120x16xf32, #tpu.memory_space<vmem>>, vector<1x80x16xf32>
    %27 = vector.shape_cast %26 : vector<1x80x16xf32> to vector<80x16xf32>
    %28 = arith.truncf %27 : vector<80x16xf32> to vector<80x16xbf16>
    %c1_26 = arith.constant 1 : index
    %c0_27 = arith.constant 0 : index
    %c0_28 = arith.constant 0 : index
    %29 = vector.load %arg6[%c1_26, %c0_27, %c0_28] : memref<27x16x8xbf16, #tpu.memory_space<vmem>>, vector<1x16x8xbf16>
    %30 = vector.shape_cast %29 : vector<1x16x8xbf16> to vector<16x8xbf16>
    %cst_29 = arith.constant dense<0.000000e+00> : vector<80x8xf32>
    %31 = tpu.matmul %28, %30, %cst_29 {dimension_numbers = #tpu.dot_dimension_numbers<[1], [0], [0], [1], [0, 0, 1, 1], [], []>} : vector<80x16xbf16>, vector<16x8xbf16>, vector<80x8xf32> -> vector<80x8xf32>
    %32 = arith.addf %25, %31 : vector<80x8xf32>
    %c0_30 = arith.constant 0 : index
    %c11 = arith.constant 11 : index
    %c0_31 = arith.constant 0 : index
    %33 = vector.load %arg9[%c0_30, %c11, %c0_31] : memref<3x120x16xf32, #tpu.memory_space<vmem>>, vector<1x80x16xf32>
    %34 = vector.shape_cast %33 : vector<1x80x16xf32> to vector<80x16xf32>
    %35 = arith.truncf %34 : vector<80x16xf32> to vector<80x16xbf16>
    %c2_32 = arith.constant 2 : index
    %c0_33 = arith.constant 0 : index
    %c0_34 = arith.constant 0 : index
    %36 = vector.load %arg6[%c2_32, %c0_33, %c0_34] : memref<27x16x8xbf16, #tpu.memory_space<vmem>>, vector<1x16x8xbf16>
    %37 = vector.shape_cast %36 : vector<1x16x8xbf16> to vector<16x8xbf16>
    %cst_35 = arith.constant dense<0.000000e+00> : vector<80x8xf32>
    %38 = tpu.matmul %35, %37, %cst_35 {dimension_numbers = #tpu.dot_dimension_numbers<[1], [0], [0], [1], [0, 0, 1, 1], [], []>} : vector<80x16xbf16>, vector<16x8xbf16>, vector<80x8xf32> -> vector<80x8xf32>
    %39 = arith.addf %32, %38 : vector<80x8xf32>
    %c0_36 = arith.constant 0 : index
    %c19 = arith.constant 19 : index
    %c0_37 = arith.constant 0 : index
    %40 = vector.load %arg9[%c0_36, %c19, %c0_37] : memref<3x120x16xf32, #tpu.memory_space<vmem>>, vector<1x80x16xf32>
    %41 = vector.shape_cast %40 : vector<1x80x16xf32> to vector<80x16xf32>
    %42 = arith.truncf %41 : vector<80x16xf32> to vector<80x16xbf16>
    %c3 = arith.constant 3 : index
    %c0_38 = arith.constant 0 : index
    %c0_39 = arith.constant 0 : index
    %43 = vector.load %arg6[%c3, %c0_38, %c0_39] : memref<27x16x8xbf16, #tpu.memory_space<vmem>>, vector<1x16x8xbf16>
    %44 = vector.shape_cast %43 : vector<1x16x8xbf16> to vector<16x8xbf16>
    %cst_40 = arith.constant dense<0.000000e+00> : vector<80x8xf32>
    %45 = tpu.matmul %42, %44, %cst_40 {dimension_numbers = #tpu.dot_dimension_numbers<[1], [0], [0], [1], [0, 0, 1, 1], [], []>} : vector<80x16xbf16>, vector<16x8xbf16>, vector<80x8xf32> -> vector<80x8xf32>
    %46 = arith.addf %39, %45 : vector<80x8xf32>
    %c0_41 = arith.constant 0 : index
    %c20 = arith.constant 20 : index
    %c0_42 = arith.constant 0 : index
    %47 = vector.load %arg9[%c0_41, %c20, %c0_42] : memref<3x120x16xf32, #tpu.memory_space<vmem>>, vector<1x80x16xf32>
    %48 = vector.shape_cast %47 : vector<1x80x16xf32> to vector<80x16xf32>
    %49 = arith.truncf %48 : vector<80x16xf32> to vector<80x16xbf16>
    %c4 = arith.constant 4 : index
    %c0_43 = arith.constant 0 : index
    %c0_44 = arith.constant 0 : index
    %50 = vector.load %arg6[%c4, %c0_43, %c0_44] : memref<27x16x8xbf16, #tpu.memory_space<vmem>>, vector<1x16x8xbf16>
    %51 = vector.shape_cast %50 : vector<1x16x8xbf16> to vector<16x8xbf16>
    %cst_45 = arith.constant dense<0.000000e+00> : vector<80x8xf32>
    %52 = tpu.matmul %49, %51, %cst_45 {dimension_numbers = #tpu.dot_dimension_numbers<[1], [0], [0], [1], [0, 0, 1, 1], [], []>} : vector<80x16xbf16>, vector<16x8xbf16>, vector<80x8xf32> -> vector<80x8xf32>
    %53 = arith.addf %46, %52 : vector<80x8xf32>
    %c0_46 = arith.constant 0 : index
    %c21 = arith.constant 21 : index
    %c0_47 = arith.constant 0 : index
    %54 = vector.load %arg9[%c0_46, %c21, %c0_47] : memref<3x120x16xf32, #tpu.memory_space<vmem>>, vector<1x80x16xf32>
    %55 = vector.shape_cast %54 : vector<1x80x16xf32> to vector<80x16xf32>
    %56 = arith.truncf %55 : vector<80x16xf32> to vector<80x16xbf16>
    %c5 = arith.constant 5 : index
    %c0_48 = arith.constant 0 : index
    %c0_49 = arith.constant 0 : index
    %57 = vector.load %arg6[%c5, %c0_48, %c0_49] : memref<27x16x8xbf16, #tpu.memory_space<vmem>>, vector<1x16x8xbf16>
    %58 = vector.shape_cast %57 : vector<1x16x8xbf16> to vector<16x8xbf16>
    %cst_50 = arith.constant dense<0.000000e+00> : vector<80x8xf32>
    %59 = tpu.matmul %56, %58, %cst_50 {dimension_numbers = #tpu.dot_dimension_numbers<[1], [0], [0], [1], [0, 0, 1, 1], [], []>} : vector<80x16xbf16>, vector<16x8xbf16>, vector<80x8xf32> -> vector<80x8xf32>
    %60 = arith.addf %53, %59 : vector<80x8xf32>
    %c0_51 = arith.constant 0 : index
    %c29 = arith.constant 29 : index
    %c0_52 = arith.constant 0 : index
    %61 = vector.load %arg9[%c0_51, %c29, %c0_52] : memref<3x120x16xf32, #tpu.memory_space<vmem>>, vector<1x80x16xf32>
    %62 = vector.shape_cast %61 : vector<1x80x16xf32> to vector<80x16xf32>
    %63 = arith.truncf %62 : vector<80x16xf32> to vector<80x16xbf16>
    %c6 = arith.constant 6 : index
    %c0_53 = arith.constant 0 : index
    %c0_54 = arith.constant 0 : index
    %64 = vector.load %arg6[%c6, %c0_53, %c0_54] : memref<27x16x8xbf16, #tpu.memory_space<vmem>>, vector<1x16x8xbf16>
    %65 = vector.shape_cast %64 : vector<1x16x8xbf16> to vector<16x8xbf16>
    %cst_55 = arith.constant dense<0.000000e+00> : vector<80x8xf32>
    %66 = tpu.matmul %63, %65, %cst_55 {dimension_numbers = #tpu.dot_dimension_numbers<[1], [0], [0], [1], [0, 0, 1, 1], [], []>} : vector<80x16xbf16>, vector<16x8xbf16>, vector<80x8xf32> -> vector<80x8xf32>
    %67 = arith.addf %60, %66 : vector<80x8xf32>
    %c0_56 = arith.constant 0 : index
    %c30 = arith.constant 30 : index
    %c0_57 = arith.constant 0 : index
    %68 = vector.load %arg9[%c0_56, %c30, %c0_57] : memref<3x120x16xf32, #tpu.memory_space<vmem>>, vector<1x80x16xf32>
    %69 = vector.shape_cast %68 : vector<1x80x16xf32> to vector<80x16xf32>
    %70 = arith.truncf %69 : vector<80x16xf32> to vector<80x16xbf16>
    %c7 = arith.constant 7 : index
    %c0_58 = arith.constant 0 : index
    %c0_59 = arith.constant 0 : index
    %71 = vector.load %arg6[%c7, %c0_58, %c0_59] : memref<27x16x8xbf16, #tpu.memory_space<vmem>>, vector<1x16x8xbf16>
    %72 = vector.shape_cast %71 : vector<1x16x8xbf16> to vector<16x8xbf16>
    %cst_60 = arith.constant dense<0.000000e+00> : vector<80x8xf32>
    %73 = tpu.matmul %70, %72, %cst_60 {dimension_numbers = #tpu.dot_dimension_numbers<[1], [0], [0], [1], [0, 0, 1, 1], [], []>} : vector<80x16xbf16>, vector<16x8xbf16>, vector<80x8xf32> -> vector<80x8xf32>
    %74 = arith.addf %67, %73 : vector<80x8xf32>
    %c0_61 = arith.constant 0 : index
    %c31 = arith.constant 31 : index
    %c0_62 = arith.constant 0 : index
    %75 = vector.load %arg9[%c0_61, %c31, %c0_62] : memref<3x120x16xf32, #tpu.memory_space<vmem>>, vector<1x80x16xf32>
    %76 = vector.shape_cast %75 : vector<1x80x16xf32> to vector<80x16xf32>
    %77 = arith.truncf %76 : vector<80x16xf32> to vector<80x16xbf16>
    %c8 = arith.constant 8 : index
    %c0_63 = arith.constant 0 : index
    %c0_64 = arith.constant 0 : index
    %78 = vector.load %arg6[%c8, %c0_63, %c0_64] : memref<27x16x8xbf16, #tpu.memory_space<vmem>>, vector<1x16x8xbf16>
    %79 = vector.shape_cast %78 : vector<1x16x8xbf16> to vector<16x8xbf16>
    %cst_65 = arith.constant dense<0.000000e+00> : vector<80x8xf32>
    %80 = tpu.matmul %77, %79, %cst_65 {dimension_numbers = #tpu.dot_dimension_numbers<[1], [0], [0], [1], [0, 0, 1, 1], [], []>} : vector<80x16xbf16>, vector<16x8xbf16>, vector<80x8xf32> -> vector<80x8xf32>
    %81 = arith.addf %74, %80 : vector<80x8xf32>
    %c1_66 = arith.constant 1 : index
    %c9_67 = arith.constant 9 : index
    %c0_68 = arith.constant 0 : index
    %82 = vector.load %arg9[%c1_66, %c9_67, %c0_68] : memref<3x120x16xf32, #tpu.memory_space<vmem>>, vector<1x80x16xf32>
    %83 = vector.shape_cast %82 : vector<1x80x16xf32> to vector<80x16xf32>
    %84 = arith.truncf %83 : vector<80x16xf32> to vector<80x16xbf16>
    %c9_69 = arith.constant 9 : index
    %c0_70 = arith.constant 0 : index
    %c0_71 = arith.constant 0 : index
    %85 = vector.load %arg6[%c9_69, %c0_70, %c0_71] : memref<27x16x8xbf16, #tpu.memory_space<vmem>>, vector<1x16x8xbf16>
    %86 = vector.shape_cast %85 : vector<1x16x8xbf16> to vector<16x8xbf16>
    %cst_72 = arith.constant dense<0.000000e+00> : vector<80x8xf32>
    %87 = tpu.matmul %84, %86, %cst_72 {dimension_numbers = #tpu.dot_dimension_numbers<[1], [0], [0], [1], [0, 0, 1, 1], [], []>} : vector<80x16xbf16>, vector<16x8xbf16>, vector<80x8xf32> -> vector<80x8xf32>
    %88 = arith.addf %81, %87 : vector<80x8xf32>
    %c1_73 = arith.constant 1 : index
    %c10_74 = arith.constant 10 : index
    %c0_75 = arith.constant 0 : index
    %89 = vector.load %arg9[%c1_73, %c10_74, %c0_75] : memref<3x120x16xf32, #tpu.memory_space<vmem>>, vector<1x80x16xf32>
    %90 = vector.shape_cast %89 : vector<1x80x16xf32> to vector<80x16xf32>
    %91 = arith.truncf %90 : vector<80x16xf32> to vector<80x16xbf16>
    %c10_76 = arith.constant 10 : index
    %c0_77 = arith.constant 0 : index
    %c0_78 = arith.constant 0 : index
    %92 = vector.load %arg6[%c10_76, %c0_77, %c0_78] : memref<27x16x8xbf16, #tpu.memory_space<vmem>>, vector<1x16x8xbf16>
    %93 = vector.shape_cast %92 : vector<1x16x8xbf16> to vector<16x8xbf16>
    %cst_79 = arith.constant dense<0.000000e+00> : vector<80x8xf32>
    %94 = tpu.matmul %91, %93, %cst_79 {dimension_numbers = #tpu.dot_dimension_numbers<[1], [0], [0], [1], [0, 0, 1, 1], [], []>} : vector<80x16xbf16>, vector<16x8xbf16>, vector<80x8xf32> -> vector<80x8xf32>
    %95 = arith.addf %88, %94 : vector<80x8xf32>
    %c1_80 = arith.constant 1 : index
    %c11_81 = arith.constant 11 : index
    %c0_82 = arith.constant 0 : index
    %96 = vector.load %arg9[%c1_80, %c11_81, %c0_82] : memref<3x120x16xf32, #tpu.memory_space<vmem>>, vector<1x80x16xf32>
    %97 = vector.shape_cast %96 : vector<1x80x16xf32> to vector<80x16xf32>
    %98 = arith.truncf %97 : vector<80x16xf32> to vector<80x16xbf16>
    %c11_83 = arith.constant 11 : index
    %c0_84 = arith.constant 0 : index
    %c0_85 = arith.constant 0 : index
    %99 = vector.load %arg6[%c11_83, %c0_84, %c0_85] : memref<27x16x8xbf16, #tpu.memory_space<vmem>>, vector<1x16x8xbf16>
    %100 = vector.shape_cast %99 : vector<1x16x8xbf16> to vector<16x8xbf16>
    %cst_86 = arith.constant dense<0.000000e+00> : vector<80x8xf32>
    %101 = tpu.matmul %98, %100, %cst_86 {dimension_numbers = #tpu.dot_dimension_numbers<[1], [0], [0], [1], [0, 0, 1, 1], [], []>} : vector<80x16xbf16>, vector<16x8xbf16>, vector<80x8xf32> -> vector<80x8xf32>
    %102 = arith.addf %95, %101 : vector<80x8xf32>
    %c1_87 = arith.constant 1 : index
    %c19_88 = arith.constant 19 : index
    %c0_89 = arith.constant 0 : index
    %103 = vector.load %arg9[%c1_87, %c19_88, %c0_89] : memref<3x120x16xf32, #tpu.memory_space<vmem>>, vector<1x80x16xf32>
    %104 = vector.shape_cast %103 : vector<1x80x16xf32> to vector<80x16xf32>
    %105 = arith.truncf %104 : vector<80x16xf32> to vector<80x16xbf16>
    %c12 = arith.constant 12 : index
    %c0_90 = arith.constant 0 : index
    %c0_91 = arith.constant 0 : index
    %106 = vector.load %arg6[%c12, %c0_90, %c0_91] : memref<27x16x8xbf16, #tpu.memory_space<vmem>>, vector<1x16x8xbf16>
    %107 = vector.shape_cast %106 : vector<1x16x8xbf16> to vector<16x8xbf16>
    %cst_92 = arith.constant dense<0.000000e+00> : vector<80x8xf32>
    %108 = tpu.matmul %105, %107, %cst_92 {dimension_numbers = #tpu.dot_dimension_numbers<[1], [0], [0], [1], [0, 0, 1, 1], [], []>} : vector<80x16xbf16>, vector<16x8xbf16>, vector<80x8xf32> -> vector<80x8xf32>
    %109 = arith.addf %102, %108 : vector<80x8xf32>
    %c1_93 = arith.constant 1 : index
    %c20_94 = arith.constant 20 : index
    %c0_95 = arith.constant 0 : index
    %110 = vector.load %arg9[%c1_93, %c20_94, %c0_95] : memref<3x120x16xf32, #tpu.memory_space<vmem>>, vector<1x80x16xf32>
    %111 = vector.shape_cast %110 : vector<1x80x16xf32> to vector<80x16xf32>
    %112 = arith.truncf %111 : vector<80x16xf32> to vector<80x16xbf16>
    %c13 = arith.constant 13 : index
    %c0_96 = arith.constant 0 : index
    %c0_97 = arith.constant 0 : index
    %113 = vector.load %arg6[%c13, %c0_96, %c0_97] : memref<27x16x8xbf16, #tpu.memory_space<vmem>>, vector<1x16x8xbf16>
    %114 = vector.shape_cast %113 : vector<1x16x8xbf16> to vector<16x8xbf16>
    %cst_98 = arith.constant dense<0.000000e+00> : vector<80x8xf32>
    %115 = tpu.matmul %112, %114, %cst_98 {dimension_numbers = #tpu.dot_dimension_numbers<[1], [0], [0], [1], [0, 0, 1, 1], [], []>} : vector<80x16xbf16>, vector<16x8xbf16>, vector<80x8xf32> -> vector<80x8xf32>
    %116 = arith.addf %109, %115 : vector<80x8xf32>
    %c1_99 = arith.constant 1 : index
    %c21_100 = arith.constant 21 : index
    %c0_101 = arith.constant 0 : index
    %117 = vector.load %arg9[%c1_99, %c21_100, %c0_101] : memref<3x120x16xf32, #tpu.memory_space<vmem>>, vector<1x80x16xf32>
    %118 = vector.shape_cast %117 : vector<1x80x16xf32> to vector<80x16xf32>
    %119 = arith.truncf %118 : vector<80x16xf32> to vector<80x16xbf16>
    %c14 = arith.constant 14 : index
    %c0_102 = arith.constant 0 : index
    %c0_103 = arith.constant 0 : index
    %120 = vector.load %arg6[%c14, %c0_102, %c0_103] : memref<27x16x8xbf16, #tpu.memory_space<vmem>>, vector<1x16x8xbf16>
    %121 = vector.shape_cast %120 : vector<1x16x8xbf16> to vector<16x8xbf16>
    %cst_104 = arith.constant dense<0.000000e+00> : vector<80x8xf32>
    %122 = tpu.matmul %119, %121, %cst_104 {dimension_numbers = #tpu.dot_dimension_numbers<[1], [0], [0], [1], [0, 0, 1, 1], [], []>} : vector<80x16xbf16>, vector<16x8xbf16>, vector<80x8xf32> -> vector<80x8xf32>
    %123 = arith.addf %116, %122 : vector<80x8xf32>
    %c1_105 = arith.constant 1 : index
    %c29_106 = arith.constant 29 : index
    %c0_107 = arith.constant 0 : index
    %124 = vector.load %arg9[%c1_105, %c29_106, %c0_107] : memref<3x120x16xf32, #tpu.memory_space<vmem>>, vector<1x80x16xf32>
    %125 = vector.shape_cast %124 : vector<1x80x16xf32> to vector<80x16xf32>
    %126 = arith.truncf %125 : vector<80x16xf32> to vector<80x16xbf16>
    %c15 = arith.constant 15 : index
    %c0_108 = arith.constant 0 : index
    %c0_109 = arith.constant 0 : index
    %127 = vector.load %arg6[%c15, %c0_108, %c0_109] : memref<27x16x8xbf16, #tpu.memory_space<vmem>>, vector<1x16x8xbf16>
    %128 = vector.shape_cast %127 : vector<1x16x8xbf16> to vector<16x8xbf16>
    %cst_110 = arith.constant dense<0.000000e+00> : vector<80x8xf32>
    %129 = tpu.matmul %126, %128, %cst_110 {dimension_numbers = #tpu.dot_dimension_numbers<[1], [0], [0], [1], [0, 0, 1, 1], [], []>} : vector<80x16xbf16>, vector<16x8xbf16>, vector<80x8xf32> -> vector<80x8xf32>
    %130 = arith.addf %123, %129 : vector<80x8xf32>
    %c1_111 = arith.constant 1 : index
    %c30_112 = arith.constant 30 : index
    %c0_113 = arith.constant 0 : index
    %131 = vector.load %arg9[%c1_111, %c30_112, %c0_113] : memref<3x120x16xf32, #tpu.memory_space<vmem>>, vector<1x80x16xf32>
    %132 = vector.shape_cast %131 : vector<1x80x16xf32> to vector<80x16xf32>
    %133 = arith.truncf %132 : vector<80x16xf32> to vector<80x16xbf16>
    %c16 = arith.constant 16 : index
    %c0_114 = arith.constant 0 : index
    %c0_115 = arith.constant 0 : index
    %134 = vector.load %arg6[%c16, %c0_114, %c0_115] : memref<27x16x8xbf16, #tpu.memory_space<vmem>>, vector<1x16x8xbf16>
    %135 = vector.shape_cast %134 : vector<1x16x8xbf16> to vector<16x8xbf16>
    %cst_116 = arith.constant dense<0.000000e+00> : vector<80x8xf32>
    %136 = tpu.matmul %133, %135, %cst_116 {dimension_numbers = #tpu.dot_dimension_numbers<[1], [0], [0], [1], [0, 0, 1, 1], [], []>} : vector<80x16xbf16>, vector<16x8xbf16>, vector<80x8xf32> -> vector<80x8xf32>
    %137 = arith.addf %130, %136 : vector<80x8xf32>
    %c1_117 = arith.constant 1 : index
    %c31_118 = arith.constant 31 : index
    %c0_119 = arith.constant 0 : index
    %138 = vector.load %arg9[%c1_117, %c31_118, %c0_119] : memref<3x120x16xf32, #tpu.memory_space<vmem>>, vector<1x80x16xf32>
    %139 = vector.shape_cast %138 : vector<1x80x16xf32> to vector<80x16xf32>
    %140 = arith.truncf %139 : vector<80x16xf32> to vector<80x16xbf16>
    %c17 = arith.constant 17 : index
    %c0_120 = arith.constant 0 : index
    %c0_121 = arith.constant 0 : index
    %141 = vector.load %arg6[%c17, %c0_120, %c0_121] : memref<27x16x8xbf16, #tpu.memory_space<vmem>>, vector<1x16x8xbf16>
    %142 = vector.shape_cast %141 : vector<1x16x8xbf16> to vector<16x8xbf16>
    %cst_122 = arith.constant dense<0.000000e+00> : vector<80x8xf32>
    %143 = tpu.matmul %140, %142, %cst_122 {dimension_numbers = #tpu.dot_dimension_numbers<[1], [0], [0], [1], [0, 0, 1, 1], [], []>} : vector<80x16xbf16>, vector<16x8xbf16>, vector<80x8xf32> -> vector<80x8xf32>
    %144 = arith.addf %137, %143 : vector<80x8xf32>
    %c2_123 = arith.constant 2 : index
    %c9_124 = arith.constant 9 : index
    %c0_125 = arith.constant 0 : index
    %145 = vector.load %arg9[%c2_123, %c9_124, %c0_125] : memref<3x120x16xf32, #tpu.memory_space<vmem>>, vector<1x80x16xf32>
    %146 = vector.shape_cast %145 : vector<1x80x16xf32> to vector<80x16xf32>
    %147 = arith.truncf %146 : vector<80x16xf32> to vector<80x16xbf16>
    %c18 = arith.constant 18 : index
    %c0_126 = arith.constant 0 : index
    %c0_127 = arith.constant 0 : index
    %148 = vector.load %arg6[%c18, %c0_126, %c0_127] : memref<27x16x8xbf16, #tpu.memory_space<vmem>>, vector<1x16x8xbf16>
    %149 = vector.shape_cast %148 : vector<1x16x8xbf16> to vector<16x8xbf16>
    %cst_128 = arith.constant dense<0.000000e+00> : vector<80x8xf32>
    %150 = tpu.matmul %147, %149, %cst_128 {dimension_numbers = #tpu.dot_dimension_numbers<[1], [0], [0], [1], [0, 0, 1, 1], [], []>} : vector<80x16xbf16>, vector<16x8xbf16>, vector<80x8xf32> -> vector<80x8xf32>
    %151 = arith.addf %144, %150 : vector<80x8xf32>
    %c2_129 = arith.constant 2 : index
    %c10_130 = arith.constant 10 : index
    %c0_131 = arith.constant 0 : index
    %152 = vector.load %arg9[%c2_129, %c10_130, %c0_131] : memref<3x120x16xf32, #tpu.memory_space<vmem>>, vector<1x80x16xf32>
    %153 = vector.shape_cast %152 : vector<1x80x16xf32> to vector<80x16xf32>
    %154 = arith.truncf %153 : vector<80x16xf32> to vector<80x16xbf16>
    %c19_132 = arith.constant 19 : index
    %c0_133 = arith.constant 0 : index
    %c0_134 = arith.constant 0 : index
    %155 = vector.load %arg6[%c19_132, %c0_133, %c0_134] : memref<27x16x8xbf16, #tpu.memory_space<vmem>>, vector<1x16x8xbf16>
    %156 = vector.shape_cast %155 : vector<1x16x8xbf16> to vector<16x8xbf16>
    %cst_135 = arith.constant dense<0.000000e+00> : vector<80x8xf32>
    %157 = tpu.matmul %154, %156, %cst_135 {dimension_numbers = #tpu.dot_dimension_numbers<[1], [0], [0], [1], [0, 0, 1, 1], [], []>} : vector<80x16xbf16>, vector<16x8xbf16>, vector<80x8xf32> -> vector<80x8xf32>
    %158 = arith.addf %151, %157 : vector<80x8xf32>
    %c2_136 = arith.constant 2 : index
    %c11_137 = arith.constant 11 : index
    %c0_138 = arith.constant 0 : index
    %159 = vector.load %arg9[%c2_136, %c11_137, %c0_138] : memref<3x120x16xf32, #tpu.memory_space<vmem>>, vector<1x80x16xf32>
    %160 = vector.shape_cast %159 : vector<1x80x16xf32> to vector<80x16xf32>
    %161 = arith.truncf %160 : vector<80x16xf32> to vector<80x16xbf16>
    %c20_139 = arith.constant 20 : index
    %c0_140 = arith.constant 0 : index
    %c0_141 = arith.constant 0 : index
    %162 = vector.load %arg6[%c20_139, %c0_140, %c0_141] : memref<27x16x8xbf16, #tpu.memory_space<vmem>>, vector<1x16x8xbf16>
    %163 = vector.shape_cast %162 : vector<1x16x8xbf16> to vector<16x8xbf16>
    %cst_142 = arith.constant dense<0.000000e+00> : vector<80x8xf32>
    %164 = tpu.matmul %161, %163, %cst_142 {dimension_numbers = #tpu.dot_dimension_numbers<[1], [0], [0], [1], [0, 0, 1, 1], [], []>} : vector<80x16xbf16>, vector<16x8xbf16>, vector<80x8xf32> -> vector<80x8xf32>
    %165 = arith.addf %158, %164 : vector<80x8xf32>
    %c2_143 = arith.constant 2 : index
    %c19_144 = arith.constant 19 : index
    %c0_145 = arith.constant 0 : index
    %166 = vector.load %arg9[%c2_143, %c19_144, %c0_145] : memref<3x120x16xf32, #tpu.memory_space<vmem>>, vector<1x80x16xf32>
    %167 = vector.shape_cast %166 : vector<1x80x16xf32> to vector<80x16xf32>
    %168 = arith.truncf %167 : vector<80x16xf32> to vector<80x16xbf16>
    %c21_146 = arith.constant 21 : index
    %c0_147 = arith.constant 0 : index
    %c0_148 = arith.constant 0 : index
    %169 = vector.load %arg6[%c21_146, %c0_147, %c0_148] : memref<27x16x8xbf16, #tpu.memory_space<vmem>>, vector<1x16x8xbf16>
    %170 = vector.shape_cast %169 : vector<1x16x8xbf16> to vector<16x8xbf16>
    %cst_149 = arith.constant dense<0.000000e+00> : vector<80x8xf32>
    %171 = tpu.matmul %168, %170, %cst_149 {dimension_numbers = #tpu.dot_dimension_numbers<[1], [0], [0], [1], [0, 0, 1, 1], [], []>} : vector<80x16xbf16>, vector<16x8xbf16>, vector<80x8xf32> -> vector<80x8xf32>
    %172 = arith.addf %165, %171 : vector<80x8xf32>
    %c2_150 = arith.constant 2 : index
    %c20_151 = arith.constant 20 : index
    %c0_152 = arith.constant 0 : index
    %173 = vector.load %arg9[%c2_150, %c20_151, %c0_152] : memref<3x120x16xf32, #tpu.memory_space<vmem>>, vector<1x80x16xf32>
    %174 = vector.shape_cast %173 : vector<1x80x16xf32> to vector<80x16xf32>
    %175 = arith.truncf %174 : vector<80x16xf32> to vector<80x16xbf16>
    %c22 = arith.constant 22 : index
    %c0_153 = arith.constant 0 : index
    %c0_154 = arith.constant 0 : index
    %176 = vector.load %arg6[%c22, %c0_153, %c0_154] : memref<27x16x8xbf16, #tpu.memory_space<vmem>>, vector<1x16x8xbf16>
    %177 = vector.shape_cast %176 : vector<1x16x8xbf16> to vector<16x8xbf16>
    %cst_155 = arith.constant dense<0.000000e+00> : vector<80x8xf32>
    %178 = tpu.matmul %175, %177, %cst_155 {dimension_numbers = #tpu.dot_dimension_numbers<[1], [0], [0], [1], [0, 0, 1, 1], [], []>} : vector<80x16xbf16>, vector<16x8xbf16>, vector<80x8xf32> -> vector<80x8xf32>
    %179 = arith.addf %172, %178 : vector<80x8xf32>
    %c2_156 = arith.constant 2 : index
    %c21_157 = arith.constant 21 : index
    %c0_158 = arith.constant 0 : index
    %180 = vector.load %arg9[%c2_156, %c21_157, %c0_158] : memref<3x120x16xf32, #tpu.memory_space<vmem>>, vector<1x80x16xf32>
    %181 = vector.shape_cast %180 : vector<1x80x16xf32> to vector<80x16xf32>
    %182 = arith.truncf %181 : vector<80x16xf32> to vector<80x16xbf16>
    %c23 = arith.constant 23 : index
    %c0_159 = arith.constant 0 : index
    %c0_160 = arith.constant 0 : index
    %183 = vector.load %arg6[%c23, %c0_159, %c0_160] : memref<27x16x8xbf16, #tpu.memory_space<vmem>>, vector<1x16x8xbf16>
    %184 = vector.shape_cast %183 : vector<1x16x8xbf16> to vector<16x8xbf16>
    %cst_161 = arith.constant dense<0.000000e+00> : vector<80x8xf32>
    %185 = tpu.matmul %182, %184, %cst_161 {dimension_numbers = #tpu.dot_dimension_numbers<[1], [0], [0], [1], [0, 0, 1, 1], [], []>} : vector<80x16xbf16>, vector<16x8xbf16>, vector<80x8xf32> -> vector<80x8xf32>
    %186 = arith.addf %179, %185 : vector<80x8xf32>
    %c2_162 = arith.constant 2 : index
    %c29_163 = arith.constant 29 : index
    %c0_164 = arith.constant 0 : index
    %187 = vector.load %arg9[%c2_162, %c29_163, %c0_164] : memref<3x120x16xf32, #tpu.memory_space<vmem>>, vector<1x80x16xf32>
    %188 = vector.shape_cast %187 : vector<1x80x16xf32> to vector<80x16xf32>
    %189 = arith.truncf %188 : vector<80x16xf32> to vector<80x16xbf16>
    %c24 = arith.constant 24 : index
    %c0_165 = arith.constant 0 : index
    %c0_166 = arith.constant 0 : index
    %190 = vector.load %arg6[%c24, %c0_165, %c0_166] : memref<27x16x8xbf16, #tpu.memory_space<vmem>>, vector<1x16x8xbf16>
    %191 = vector.shape_cast %190 : vector<1x16x8xbf16> to vector<16x8xbf16>
    %cst_167 = arith.constant dense<0.000000e+00> : vector<80x8xf32>
    %192 = tpu.matmul %189, %191, %cst_167 {dimension_numbers = #tpu.dot_dimension_numbers<[1], [0], [0], [1], [0, 0, 1, 1], [], []>} : vector<80x16xbf16>, vector<16x8xbf16>, vector<80x8xf32> -> vector<80x8xf32>
    %193 = arith.addf %186, %192 : vector<80x8xf32>
    %c2_168 = arith.constant 2 : index
    %c30_169 = arith.constant 30 : index
    %c0_170 = arith.constant 0 : index
    %194 = vector.load %arg9[%c2_168, %c30_169, %c0_170] : memref<3x120x16xf32, #tpu.memory_space<vmem>>, vector<1x80x16xf32>
    %195 = vector.shape_cast %194 : vector<1x80x16xf32> to vector<80x16xf32>
    %196 = arith.truncf %195 : vector<80x16xf32> to vector<80x16xbf16>
    %c25 = arith.constant 25 : index
    %c0_171 = arith.constant 0 : index
    %c0_172 = arith.constant 0 : index
    %197 = vector.load %arg6[%c25, %c0_171, %c0_172] : memref<27x16x8xbf16, #tpu.memory_space<vmem>>, vector<1x16x8xbf16>
    %198 = vector.shape_cast %197 : vector<1x16x8xbf16> to vector<16x8xbf16>
    %cst_173 = arith.constant dense<0.000000e+00> : vector<80x8xf32>
    %199 = tpu.matmul %196, %198, %cst_173 {dimension_numbers = #tpu.dot_dimension_numbers<[1], [0], [0], [1], [0, 0, 1, 1], [], []>} : vector<80x16xbf16>, vector<16x8xbf16>, vector<80x8xf32> -> vector<80x8xf32>
    %200 = arith.addf %193, %199 : vector<80x8xf32>
    %c2_174 = arith.constant 2 : index
    %c31_175 = arith.constant 31 : index
    %c0_176 = arith.constant 0 : index
    %201 = vector.load %arg9[%c2_174, %c31_175, %c0_176] : memref<3x120x16xf32, #tpu.memory_space<vmem>>, vector<1x80x16xf32>
    %202 = vector.shape_cast %201 : vector<1x80x16xf32> to vector<80x16xf32>
    %203 = arith.truncf %202 : vector<80x16xf32> to vector<80x16xbf16>
    %c26 = arith.constant 26 : index
    %c0_177 = arith.constant 0 : index
    %c0_178 = arith.constant 0 : index
    %204 = vector.load %arg6[%c26, %c0_177, %c0_178] : memref<27x16x8xbf16, #tpu.memory_space<vmem>>, vector<1x16x8xbf16>
    %205 = vector.shape_cast %204 : vector<1x16x8xbf16> to vector<16x8xbf16>
    %cst_179 = arith.constant dense<0.000000e+00> : vector<80x8xf32>
    %206 = tpu.matmul %203, %205, %cst_179 {dimension_numbers = #tpu.dot_dimension_numbers<[1], [0], [0], [1], [0, 0, 1, 1], [], []>} : vector<80x16xbf16>, vector<16x8xbf16>, vector<80x8xf32> -> vector<80x8xf32>
    %207 = arith.addf %200, %206 : vector<80x8xf32>
    %208 = arith.truncf %207 : vector<80x8xf32> to vector<80x8xbf16>
    %c0_180 = arith.constant 0 : index
    %c0_181 = arith.constant 0 : index
    %c0_182 = arith.constant 0 : index
    %c0_183 = arith.constant 0 : index
    %209 = vector.load %arg7[%c0_180, %c0_181, %c0_182, %c0_183] : memref<1x1x80x8xbf16, #tpu.memory_space<vmem>>, vector<1x1x80x8xbf16>
    %210 = vector.shape_cast %209 : vector<1x1x80x8xbf16> to vector<80x8xbf16>
    %211 = vector.shape_cast %208 : vector<80x8xbf16> to vector<1x1x80x8xbf16>
    tpu.vector_store %arg7[%c0_180, %c0_181, %c0_182, %c0_183], %211 {strides = array<i32>} : memref<1x1x80x8xbf16, #tpu.memory_space<vmem>>, vector<1x1x80x8xbf16>,
    %c0_184 = arith.constant 0 : index
    %c0_185 = arith.constant 0 : index
    %212 = vector.load %arg2[%c0_184, %c0_185] : memref<80x1xf32, #tpu.memory_space<vmem>>, vector<80x1xf32>
    %213 = vector.broadcast %212 : vector<80x1xf32> to vector<80x8xf32>
    %214 = arith.mulf %207, %213 : vector<80x8xf32>
    %cst_186 = arith.constant dense<0.000000e+00> : vector<8xf32>
    %215 = vector.multi_reduction <add>, %214, %cst_186 [0] : vector<80x8xf32> to vector<8xf32>
    %216 = vector.shape_cast %215 : vector<8xf32> to vector<1x8xf32>
    %217 = arith.mulf %214, %207 : vector<80x8xf32>
    %cst_187 = arith.constant dense<0.000000e+00> : vector<8xf32>
    %218 = vector.multi_reduction <add>, %217, %cst_187 [0] : vector<80x8xf32> to vector<8xf32>
    %219 = vector.shape_cast %218 : vector<8xf32> to vector<1x8xf32>
    %220 = tpu.concatenate %216, %219 in 0 : vector<1x8xf32>, vector<1x8xf32> -> vector<2x8xf32>
    %c0_188 = arith.constant 0 : index
    %c0_189 = arith.constant 0 : index
    %c0_190 = arith.constant 0 : index
    %c0_191 = arith.constant 0 : index
    %221 = vector.load %arg8[%c0_188, %c0_189, %c0_190, %c0_191] : memref<1x1x2x8xf32, #tpu.memory_space<vmem>>, vector<1x1x2x8xf32>
    %222 = vector.shape_cast %221 : vector<1x1x2x8xf32> to vector<2x8xf32>
    %223 = vector.shape_cast %220 : vector<2x8xf32> to vector<1x1x2x8xf32>
    tpu.vector_store %arg8[%c0_188, %c0_189, %c0_190, %c0_191], %223 {strides = array<i32>} : memref<1x1x2x8xf32, #tpu.memory_space<vmem>>, vector<1x1x2x8xf32>,
    return
  }
  func.func @transform_0(%arg0: i32, %arg1: i32) -> (i32, i32) {
    %c0_i32 = arith.constant 0 : i32
    %c0_i32_0 = arith.constant 0 : i32
    %c0_i32_1 = arith.constant 0 : i32
    return %c0_i32, %c0_i32_0 : i32, i32
  }
  func.func @transform_1(%arg0: i32, %arg1: i32) -> (i32, i32, i32, i32) {
    %c0_i32 = arith.constant 0 : i32
    %0 = arith.addi %arg1, %c0_i32 : i32
    %c0_i32_0 = arith.constant 0 : i32
    %c0_i32_1 = arith.constant 0 : i32
    %c0_i32_2 = arith.constant 0 : i32
    return %arg0, %0, %c0_i32_0, %c0_i32_1 : i32, i32, i32, i32
  }
  func.func @transform_2(%arg0: i32, %arg1: i32) -> (i32, i32, i32, i32) {
    %c1_i32 = arith.constant 1 : i32
    %0 = arith.addi %arg1, %c1_i32 : i32
    %c0_i32 = arith.constant 0 : i32
    %c0_i32_0 = arith.constant 0 : i32
    %c0_i32_1 = arith.constant 0 : i32
    return %arg0, %0, %c0_i32, %c0_i32_0 : i32, i32, i32, i32
  }
  func.func @transform_3(%arg0: i32, %arg1: i32) -> (i32, i32, i32, i32) {
    %c2_i32 = arith.constant 2 : i32
    %0 = arith.addi %arg1, %c2_i32 : i32
    %c0_i32 = arith.constant 0 : i32
    %c0_i32_0 = arith.constant 0 : i32
    %c0_i32_1 = arith.constant 0 : i32
    return %arg0, %0, %c0_i32, %c0_i32_0 : i32, i32, i32, i32
  }
  func.func @transform_4(%arg0: i32, %arg1: i32) -> (i32, i32, i32) {
    %c0_i32 = arith.constant 0 : i32
    %c0_i32_0 = arith.constant 0 : i32
    %c0_i32_1 = arith.constant 0 : i32
    %c0_i32_2 = arith.constant 0 : i32
    return %c0_i32, %c0_i32_0, %c0_i32_1 : i32, i32, i32
  }
  func.func @transform_5(%arg0: i32, %arg1: i32) -> (i32, i32, i32, i32) {
    %c0_i32 = arith.constant 0 : i32
    %c0_i32_0 = arith.constant 0 : i32
    %c0_i32_1 = arith.constant 0 : i32
    return %arg0, %arg1, %c0_i32, %c0_i32_0 : i32, i32, i32, i32
  }
  func.func @transform_6(%arg0: i32, %arg1: i32) -> (i32, i32, i32, i32) {
    %c0_i32 = arith.constant 0 : i32
    %c0_i32_0 = arith.constant 0 : i32
    %c0_i32_1 = arith.constant 0 : i32
    return %arg0, %arg1, %c0_i32, %c0_i32_0 : i32, i32, i32, i32
  }
}

module attributes {stable_mosaic.version = 11 : i64} {
  func.func @kernel(%arg0: i32, %arg1: i32, %arg2: memref<80x1xf32, #tpu.memory_space<vmem>>, %arg3: memref<120x1xf32, #tpu.memory_space<vmem>>, %arg4: memref<1x8xf32, #tpu.memory_space<vmem>>, %arg5: memref<1x8xf32, #tpu.memory_space<vmem>>, %arg6: memref<1x1x120x8xbf16, #tpu.memory_space<vmem>>, %arg7: memref<1x1x120x8xbf16, #tpu.memory_space<vmem>>, %arg8: memref<1x1x120x8xbf16, #tpu.memory_space<vmem>>, %arg9: memref<27x8x8xbf16, #tpu.memory_space<vmem>>, %arg10: memref<1x1x80x8xbf16, #tpu.memory_space<vmem>>, %arg11: memref<1x1x2x8xf32, #tpu.memory_space<vmem>>, %arg12: memref<3x120x8xf32, #tpu.memory_space<vmem>>) attributes {dimension_semantics = [#tpu.dimension_semantics<parallel>, #tpu.dimension_semantics<parallel>], iteration_bounds = array<i64: 2, 8>, scalar_prefetch = 0 : i64, scratch_operands = 1 : i64, tpu.core_type = #tpu.core_type<tc>, window_params = [{pipeline_mode = #tpu.pipeline_mode<synchronous>, transform_indices = @transform_0, window_bounds = array<i64: 80, 1>}, {pipeline_mode = #tpu.pipeline_mode<synchronous>, transform_indices = @transform_1, window_bounds = array<i64: 120, 1>}, {pipeline_mode = #tpu.pipeline_mode<synchronous>, transform_indices = @transform_2, window_bounds = array<i64: 1, 8>}, {pipeline_mode = #tpu.pipeline_mode<synchronous>, transform_indices = @transform_3, window_bounds = array<i64: 1, 8>}, {transform_indices = @transform_4, window_bounds = array<i64: 1, 1, 120, 8>}, {transform_indices = @transform_5, window_bounds = array<i64: 1, 1, 120, 8>}, {transform_indices = @transform_6, window_bounds = array<i64: 1, 1, 120, 8>}, {pipeline_mode = #tpu.pipeline_mode<synchronous>, transform_indices = @transform_7, window_bounds = array<i64: 27, 8, 8>}, {transform_indices = @transform_8, window_bounds = array<i64: 1, 1, 80, 8>}, {transform_indices = @transform_9, window_bounds = array<i64: 1, 1, 2, 8>}]} {
    %c0 = arith.constant 0 : index
    %c0_0 = arith.constant 0 : index
    %c0_1 = arith.constant 0 : index
    %c0_2 = arith.constant 0 : index
    %0 = vector.load %arg6[%c0, %c0_0, %c0_1, %c0_2] : memref<1x1x120x8xbf16, #tpu.memory_space<vmem>>, vector<1x1x120x8xbf16>
    %1 = vector.shape_cast %0 : vector<1x1x120x8xbf16> to vector<120x8xbf16>
    %2 = arith.extf %1 : vector<120x8xbf16> to vector<120x8xf32>
    %c0_3 = arith.constant 0 : index
    %c0_4 = arith.constant 0 : index
    %3 = vector.load %arg4[%c0_3, %c0_4] : memref<1x8xf32, #tpu.memory_space<vmem>>, vector<1x8xf32>
    %4 = vector.broadcast %3 : vector<1x8xf32> to vector<120x8xf32>
    %5 = arith.mulf %2, %4 : vector<120x8xf32>
    %c0_5 = arith.constant 0 : index
    %c0_6 = arith.constant 0 : index
    %6 = vector.load %arg5[%c0_5, %c0_6] : memref<1x8xf32, #tpu.memory_space<vmem>>, vector<1x8xf32>
    %7 = vector.broadcast %6 : vector<1x8xf32> to vector<120x8xf32>
    %8 = arith.addf %5, %7 : vector<120x8xf32>
    %cst = arith.constant 0.000000e+00 : f32
    %9 = vector.broadcast %cst : f32 to vector<120x8xf32>
    %10 = arith.cmpf ogt, %8, %9 : vector<120x8xf32>
    %cst_7 = arith.constant 0.00999999977 : f32
    %11 = vector.broadcast %cst_7 : f32 to vector<120x8xf32>
    %12 = arith.mulf %11, %8 : vector<120x8xf32>
    %13 = arith.select %10, %8, %12 : vector<120x8xi1>, vector<120x8xf32>
    %c0_8 = arith.constant 0 : index
    %c0_9 = arith.constant 0 : index
    %14 = vector.load %arg3[%c0_8, %c0_9] : memref<120x1xf32, #tpu.memory_space<vmem>>, vector<120x1xf32>
    %15 = vector.broadcast %14 : vector<120x1xf32> to vector<120x8xf32>
    %16 = arith.mulf %13, %15 : vector<120x8xf32>
    %c0_i32 = arith.constant 0 : i32
    %17 = arith.addi %arg1, %c0_i32 : i32
    %c1_i32 = arith.constant 1 : i32
    %18 = arith.cmpi sge, %17, %c1_i32 : i32
    %c0_i32_10 = arith.constant 0 : i32
    %19 = arith.addi %arg1, %c0_i32_10 : i32
    %c8_i32 = arith.constant 8 : i32
    %20 = arith.cmpi sle, %19, %c8_i32 : i32
    %21 = arith.andi %18, %20 : i1
    %22 = arith.extui %21 : i1 to i32
    %23 = arith.sitofp %22 : i32 to f32
    %24 = vector.broadcast %23 : f32 to vector<120x8xf32>
    %25 = arith.mulf %16, %24 : vector<120x8xf32>
    %c0_11 = arith.constant 0 : index
    %c0_12 = arith.constant 0 : index
    %c0_13 = arith.constant 0 : index
    %26 = vector.load %arg12[%c0_11, %c0_12, %c0_13] : memref<3x120x8xf32, #tpu.memory_space<vmem>>, vector<1x120x8xf32>
    %27 = vector.shape_cast %26 : vector<1x120x8xf32> to vector<120x8xf32>
    %28 = vector.shape_cast %25 : vector<120x8xf32> to vector<1x120x8xf32>
    tpu.vector_store %arg12[%c0_11, %c0_12, %c0_13], %28 {strides = array<i32>} : memref<3x120x8xf32, #tpu.memory_space<vmem>>, vector<1x120x8xf32>,
    %c0_14 = arith.constant 0 : index
    %c0_15 = arith.constant 0 : index
    %c0_16 = arith.constant 0 : index
    %c0_17 = arith.constant 0 : index
    %29 = vector.load %arg7[%c0_14, %c0_15, %c0_16, %c0_17] : memref<1x1x120x8xbf16, #tpu.memory_space<vmem>>, vector<1x1x120x8xbf16>
    %30 = vector.shape_cast %29 : vector<1x1x120x8xbf16> to vector<120x8xbf16>
    %31 = arith.extf %30 : vector<120x8xbf16> to vector<120x8xf32>
    %c0_18 = arith.constant 0 : index
    %c0_19 = arith.constant 0 : index
    %32 = vector.load %arg4[%c0_18, %c0_19] : memref<1x8xf32, #tpu.memory_space<vmem>>, vector<1x8xf32>
    %33 = vector.broadcast %32 : vector<1x8xf32> to vector<120x8xf32>
    %34 = arith.mulf %31, %33 : vector<120x8xf32>
    %c0_20 = arith.constant 0 : index
    %c0_21 = arith.constant 0 : index
    %35 = vector.load %arg5[%c0_20, %c0_21] : memref<1x8xf32, #tpu.memory_space<vmem>>, vector<1x8xf32>
    %36 = vector.broadcast %35 : vector<1x8xf32> to vector<120x8xf32>
    %37 = arith.addf %34, %36 : vector<120x8xf32>
    %cst_22 = arith.constant 0.000000e+00 : f32
    %38 = vector.broadcast %cst_22 : f32 to vector<120x8xf32>
    %39 = arith.cmpf ogt, %37, %38 : vector<120x8xf32>
    %cst_23 = arith.constant 0.00999999977 : f32
    %40 = vector.broadcast %cst_23 : f32 to vector<120x8xf32>
    %41 = arith.mulf %40, %37 : vector<120x8xf32>
    %42 = arith.select %39, %37, %41 : vector<120x8xi1>, vector<120x8xf32>
    %c0_24 = arith.constant 0 : index
    %c0_25 = arith.constant 0 : index
    %43 = vector.load %arg3[%c0_24, %c0_25] : memref<120x1xf32, #tpu.memory_space<vmem>>, vector<120x1xf32>
    %44 = vector.broadcast %43 : vector<120x1xf32> to vector<120x8xf32>
    %45 = arith.mulf %42, %44 : vector<120x8xf32>
    %c1_i32_26 = arith.constant 1 : i32
    %46 = arith.addi %arg1, %c1_i32_26 : i32
    %c1_i32_27 = arith.constant 1 : i32
    %47 = arith.cmpi sge, %46, %c1_i32_27 : i32
    %c1_i32_28 = arith.constant 1 : i32
    %48 = arith.addi %arg1, %c1_i32_28 : i32
    %c8_i32_29 = arith.constant 8 : i32
    %49 = arith.cmpi sle, %48, %c8_i32_29 : i32
    %50 = arith.andi %47, %49 : i1
    %51 = arith.extui %50 : i1 to i32
    %52 = arith.sitofp %51 : i32 to f32
    %53 = vector.broadcast %52 : f32 to vector<120x8xf32>
    %54 = arith.mulf %45, %53 : vector<120x8xf32>
    %c1 = arith.constant 1 : index
    %c0_30 = arith.constant 0 : index
    %c0_31 = arith.constant 0 : index
    %55 = vector.load %arg12[%c1, %c0_30, %c0_31] : memref<3x120x8xf32, #tpu.memory_space<vmem>>, vector<1x120x8xf32>
    %56 = vector.shape_cast %55 : vector<1x120x8xf32> to vector<120x8xf32>
    %57 = vector.shape_cast %54 : vector<120x8xf32> to vector<1x120x8xf32>
    tpu.vector_store %arg12[%c1, %c0_30, %c0_31], %57 {strides = array<i32>} : memref<3x120x8xf32, #tpu.memory_space<vmem>>, vector<1x120x8xf32>,
    %c0_32 = arith.constant 0 : index
    %c0_33 = arith.constant 0 : index
    %c0_34 = arith.constant 0 : index
    %c0_35 = arith.constant 0 : index
    %58 = vector.load %arg8[%c0_32, %c0_33, %c0_34, %c0_35] : memref<1x1x120x8xbf16, #tpu.memory_space<vmem>>, vector<1x1x120x8xbf16>
    %59 = vector.shape_cast %58 : vector<1x1x120x8xbf16> to vector<120x8xbf16>
    %60 = arith.extf %59 : vector<120x8xbf16> to vector<120x8xf32>
    %c0_36 = arith.constant 0 : index
    %c0_37 = arith.constant 0 : index
    %61 = vector.load %arg4[%c0_36, %c0_37] : memref<1x8xf32, #tpu.memory_space<vmem>>, vector<1x8xf32>
    %62 = vector.broadcast %61 : vector<1x8xf32> to vector<120x8xf32>
    %63 = arith.mulf %60, %62 : vector<120x8xf32>
    %c0_38 = arith.constant 0 : index
    %c0_39 = arith.constant 0 : index
    %64 = vector.load %arg5[%c0_38, %c0_39] : memref<1x8xf32, #tpu.memory_space<vmem>>, vector<1x8xf32>
    %65 = vector.broadcast %64 : vector<1x8xf32> to vector<120x8xf32>
    %66 = arith.addf %63, %65 : vector<120x8xf32>
    %cst_40 = arith.constant 0.000000e+00 : f32
    %67 = vector.broadcast %cst_40 : f32 to vector<120x8xf32>
    %68 = arith.cmpf ogt, %66, %67 : vector<120x8xf32>
    %cst_41 = arith.constant 0.00999999977 : f32
    %69 = vector.broadcast %cst_41 : f32 to vector<120x8xf32>
    %70 = arith.mulf %69, %66 : vector<120x8xf32>
    %71 = arith.select %68, %66, %70 : vector<120x8xi1>, vector<120x8xf32>
    %c0_42 = arith.constant 0 : index
    %c0_43 = arith.constant 0 : index
    %72 = vector.load %arg3[%c0_42, %c0_43] : memref<120x1xf32, #tpu.memory_space<vmem>>, vector<120x1xf32>
    %73 = vector.broadcast %72 : vector<120x1xf32> to vector<120x8xf32>
    %74 = arith.mulf %71, %73 : vector<120x8xf32>
    %c2_i32 = arith.constant 2 : i32
    %75 = arith.addi %arg1, %c2_i32 : i32
    %c1_i32_44 = arith.constant 1 : i32
    %76 = arith.cmpi sge, %75, %c1_i32_44 : i32
    %c2_i32_45 = arith.constant 2 : i32
    %77 = arith.addi %arg1, %c2_i32_45 : i32
    %c8_i32_46 = arith.constant 8 : i32
    %78 = arith.cmpi sle, %77, %c8_i32_46 : i32
    %79 = arith.andi %76, %78 : i1
    %80 = arith.extui %79 : i1 to i32
    %81 = arith.sitofp %80 : i32 to f32
    %82 = vector.broadcast %81 : f32 to vector<120x8xf32>
    %83 = arith.mulf %74, %82 : vector<120x8xf32>
    %c2 = arith.constant 2 : index
    %c0_47 = arith.constant 0 : index
    %c0_48 = arith.constant 0 : index
    %84 = vector.load %arg12[%c2, %c0_47, %c0_48] : memref<3x120x8xf32, #tpu.memory_space<vmem>>, vector<1x120x8xf32>
    %85 = vector.shape_cast %84 : vector<1x120x8xf32> to vector<120x8xf32>
    %86 = vector.shape_cast %83 : vector<120x8xf32> to vector<1x120x8xf32>
    tpu.vector_store %arg12[%c2, %c0_47, %c0_48], %86 {strides = array<i32>} : memref<3x120x8xf32, #tpu.memory_space<vmem>>, vector<1x120x8xf32>,
    %cst_49 = arith.constant 0.000000e+00 : f32
    %87 = vector.broadcast %cst_49 : f32 to vector<80x8xf32>
    %c0_50 = arith.constant 0 : index
    %c9 = arith.constant 9 : index
    %c0_51 = arith.constant 0 : index
    %88 = vector.load %arg12[%c0_50, %c9, %c0_51] : memref<3x120x8xf32, #tpu.memory_space<vmem>>, vector<1x80x8xf32>
    %89 = vector.shape_cast %88 : vector<1x80x8xf32> to vector<80x8xf32>
    %90 = arith.truncf %89 : vector<80x8xf32> to vector<80x8xbf16>
    %c0_52 = arith.constant 0 : index
    %c0_53 = arith.constant 0 : index
    %c0_54 = arith.constant 0 : index
    %91 = vector.load %arg9[%c0_52, %c0_53, %c0_54] : memref<27x8x8xbf16, #tpu.memory_space<vmem>>, vector<1x8x8xbf16>
    %92 = vector.shape_cast %91 : vector<1x8x8xbf16> to vector<8x8xbf16>
    %cst_55 = arith.constant dense<0.000000e+00> : vector<80x8xf32>
    %93 = tpu.matmul %90, %92, %cst_55 {dimension_numbers = #tpu.dot_dimension_numbers<[1], [0], [0], [1], [0, 0, 1, 1], [], []>} : vector<80x8xbf16>, vector<8x8xbf16>, vector<80x8xf32> -> vector<80x8xf32>
    %94 = arith.addf %87, %93 : vector<80x8xf32>
    %c0_56 = arith.constant 0 : index
    %c10 = arith.constant 10 : index
    %c0_57 = arith.constant 0 : index
    %95 = vector.load %arg12[%c0_56, %c10, %c0_57] : memref<3x120x8xf32, #tpu.memory_space<vmem>>, vector<1x80x8xf32>
    %96 = vector.shape_cast %95 : vector<1x80x8xf32> to vector<80x8xf32>
    %97 = arith.truncf %96 : vector<80x8xf32> to vector<80x8xbf16>
    %c1_58 = arith.constant 1 : index
    %c0_59 = arith.constant 0 : index
    %c0_60 = arith.constant 0 : index
    %98 = vector.load %arg9[%c1_58, %c0_59, %c0_60] : memref<27x8x8xbf16, #tpu.memory_space<vmem>>, vector<1x8x8xbf16>
    %99 = vector.shape_cast %98 : vector<1x8x8xbf16> to vector<8x8xbf16>
    %cst_61 = arith.constant dense<0.000000e+00> : vector<80x8xf32>
    %100 = tpu.matmul %97, %99, %cst_61 {dimension_numbers = #tpu.dot_dimension_numbers<[1], [0], [0], [1], [0, 0, 1, 1], [], []>} : vector<80x8xbf16>, vector<8x8xbf16>, vector<80x8xf32> -> vector<80x8xf32>
    %101 = arith.addf %94, %100 : vector<80x8xf32>
    %c0_62 = arith.constant 0 : index
    %c11 = arith.constant 11 : index
    %c0_63 = arith.constant 0 : index
    %102 = vector.load %arg12[%c0_62, %c11, %c0_63] : memref<3x120x8xf32, #tpu.memory_space<vmem>>, vector<1x80x8xf32>
    %103 = vector.shape_cast %102 : vector<1x80x8xf32> to vector<80x8xf32>
    %104 = arith.truncf %103 : vector<80x8xf32> to vector<80x8xbf16>
    %c2_64 = arith.constant 2 : index
    %c0_65 = arith.constant 0 : index
    %c0_66 = arith.constant 0 : index
    %105 = vector.load %arg9[%c2_64, %c0_65, %c0_66] : memref<27x8x8xbf16, #tpu.memory_space<vmem>>, vector<1x8x8xbf16>
    %106 = vector.shape_cast %105 : vector<1x8x8xbf16> to vector<8x8xbf16>
    %cst_67 = arith.constant dense<0.000000e+00> : vector<80x8xf32>
    %107 = tpu.matmul %104, %106, %cst_67 {dimension_numbers = #tpu.dot_dimension_numbers<[1], [0], [0], [1], [0, 0, 1, 1], [], []>} : vector<80x8xbf16>, vector<8x8xbf16>, vector<80x8xf32> -> vector<80x8xf32>
    %108 = arith.addf %101, %107 : vector<80x8xf32>
    %c0_68 = arith.constant 0 : index
    %c19 = arith.constant 19 : index
    %c0_69 = arith.constant 0 : index
    %109 = vector.load %arg12[%c0_68, %c19, %c0_69] : memref<3x120x8xf32, #tpu.memory_space<vmem>>, vector<1x80x8xf32>
    %110 = vector.shape_cast %109 : vector<1x80x8xf32> to vector<80x8xf32>
    %111 = arith.truncf %110 : vector<80x8xf32> to vector<80x8xbf16>
    %c3 = arith.constant 3 : index
    %c0_70 = arith.constant 0 : index
    %c0_71 = arith.constant 0 : index
    %112 = vector.load %arg9[%c3, %c0_70, %c0_71] : memref<27x8x8xbf16, #tpu.memory_space<vmem>>, vector<1x8x8xbf16>
    %113 = vector.shape_cast %112 : vector<1x8x8xbf16> to vector<8x8xbf16>
    %cst_72 = arith.constant dense<0.000000e+00> : vector<80x8xf32>
    %114 = tpu.matmul %111, %113, %cst_72 {dimension_numbers = #tpu.dot_dimension_numbers<[1], [0], [0], [1], [0, 0, 1, 1], [], []>} : vector<80x8xbf16>, vector<8x8xbf16>, vector<80x8xf32> -> vector<80x8xf32>
    %115 = arith.addf %108, %114 : vector<80x8xf32>
    %c0_73 = arith.constant 0 : index
    %c20 = arith.constant 20 : index
    %c0_74 = arith.constant 0 : index
    %116 = vector.load %arg12[%c0_73, %c20, %c0_74] : memref<3x120x8xf32, #tpu.memory_space<vmem>>, vector<1x80x8xf32>
    %117 = vector.shape_cast %116 : vector<1x80x8xf32> to vector<80x8xf32>
    %118 = arith.truncf %117 : vector<80x8xf32> to vector<80x8xbf16>
    %c4 = arith.constant 4 : index
    %c0_75 = arith.constant 0 : index
    %c0_76 = arith.constant 0 : index
    %119 = vector.load %arg9[%c4, %c0_75, %c0_76] : memref<27x8x8xbf16, #tpu.memory_space<vmem>>, vector<1x8x8xbf16>
    %120 = vector.shape_cast %119 : vector<1x8x8xbf16> to vector<8x8xbf16>
    %cst_77 = arith.constant dense<0.000000e+00> : vector<80x8xf32>
    %121 = tpu.matmul %118, %120, %cst_77 {dimension_numbers = #tpu.dot_dimension_numbers<[1], [0], [0], [1], [0, 0, 1, 1], [], []>} : vector<80x8xbf16>, vector<8x8xbf16>, vector<80x8xf32> -> vector<80x8xf32>
    %122 = arith.addf %115, %121 : vector<80x8xf32>
    %c0_78 = arith.constant 0 : index
    %c21 = arith.constant 21 : index
    %c0_79 = arith.constant 0 : index
    %123 = vector.load %arg12[%c0_78, %c21, %c0_79] : memref<3x120x8xf32, #tpu.memory_space<vmem>>, vector<1x80x8xf32>
    %124 = vector.shape_cast %123 : vector<1x80x8xf32> to vector<80x8xf32>
    %125 = arith.truncf %124 : vector<80x8xf32> to vector<80x8xbf16>
    %c5 = arith.constant 5 : index
    %c0_80 = arith.constant 0 : index
    %c0_81 = arith.constant 0 : index
    %126 = vector.load %arg9[%c5, %c0_80, %c0_81] : memref<27x8x8xbf16, #tpu.memory_space<vmem>>, vector<1x8x8xbf16>
    %127 = vector.shape_cast %126 : vector<1x8x8xbf16> to vector<8x8xbf16>
    %cst_82 = arith.constant dense<0.000000e+00> : vector<80x8xf32>
    %128 = tpu.matmul %125, %127, %cst_82 {dimension_numbers = #tpu.dot_dimension_numbers<[1], [0], [0], [1], [0, 0, 1, 1], [], []>} : vector<80x8xbf16>, vector<8x8xbf16>, vector<80x8xf32> -> vector<80x8xf32>
    %129 = arith.addf %122, %128 : vector<80x8xf32>
    %c0_83 = arith.constant 0 : index
    %c29 = arith.constant 29 : index
    %c0_84 = arith.constant 0 : index
    %130 = vector.load %arg12[%c0_83, %c29, %c0_84] : memref<3x120x8xf32, #tpu.memory_space<vmem>>, vector<1x80x8xf32>
    %131 = vector.shape_cast %130 : vector<1x80x8xf32> to vector<80x8xf32>
    %132 = arith.truncf %131 : vector<80x8xf32> to vector<80x8xbf16>
    %c6 = arith.constant 6 : index
    %c0_85 = arith.constant 0 : index
    %c0_86 = arith.constant 0 : index
    %133 = vector.load %arg9[%c6, %c0_85, %c0_86] : memref<27x8x8xbf16, #tpu.memory_space<vmem>>, vector<1x8x8xbf16>
    %134 = vector.shape_cast %133 : vector<1x8x8xbf16> to vector<8x8xbf16>
    %cst_87 = arith.constant dense<0.000000e+00> : vector<80x8xf32>
    %135 = tpu.matmul %132, %134, %cst_87 {dimension_numbers = #tpu.dot_dimension_numbers<[1], [0], [0], [1], [0, 0, 1, 1], [], []>} : vector<80x8xbf16>, vector<8x8xbf16>, vector<80x8xf32> -> vector<80x8xf32>
    %136 = arith.addf %129, %135 : vector<80x8xf32>
    %c0_88 = arith.constant 0 : index
    %c30 = arith.constant 30 : index
    %c0_89 = arith.constant 0 : index
    %137 = vector.load %arg12[%c0_88, %c30, %c0_89] : memref<3x120x8xf32, #tpu.memory_space<vmem>>, vector<1x80x8xf32>
    %138 = vector.shape_cast %137 : vector<1x80x8xf32> to vector<80x8xf32>
    %139 = arith.truncf %138 : vector<80x8xf32> to vector<80x8xbf16>
    %c7 = arith.constant 7 : index
    %c0_90 = arith.constant 0 : index
    %c0_91 = arith.constant 0 : index
    %140 = vector.load %arg9[%c7, %c0_90, %c0_91] : memref<27x8x8xbf16, #tpu.memory_space<vmem>>, vector<1x8x8xbf16>
    %141 = vector.shape_cast %140 : vector<1x8x8xbf16> to vector<8x8xbf16>
    %cst_92 = arith.constant dense<0.000000e+00> : vector<80x8xf32>
    %142 = tpu.matmul %139, %141, %cst_92 {dimension_numbers = #tpu.dot_dimension_numbers<[1], [0], [0], [1], [0, 0, 1, 1], [], []>} : vector<80x8xbf16>, vector<8x8xbf16>, vector<80x8xf32> -> vector<80x8xf32>
    %143 = arith.addf %136, %142 : vector<80x8xf32>
    %c0_93 = arith.constant 0 : index
    %c31 = arith.constant 31 : index
    %c0_94 = arith.constant 0 : index
    %144 = vector.load %arg12[%c0_93, %c31, %c0_94] : memref<3x120x8xf32, #tpu.memory_space<vmem>>, vector<1x80x8xf32>
    %145 = vector.shape_cast %144 : vector<1x80x8xf32> to vector<80x8xf32>
    %146 = arith.truncf %145 : vector<80x8xf32> to vector<80x8xbf16>
    %c8 = arith.constant 8 : index
    %c0_95 = arith.constant 0 : index
    %c0_96 = arith.constant 0 : index
    %147 = vector.load %arg9[%c8, %c0_95, %c0_96] : memref<27x8x8xbf16, #tpu.memory_space<vmem>>, vector<1x8x8xbf16>
    %148 = vector.shape_cast %147 : vector<1x8x8xbf16> to vector<8x8xbf16>
    %cst_97 = arith.constant dense<0.000000e+00> : vector<80x8xf32>
    %149 = tpu.matmul %146, %148, %cst_97 {dimension_numbers = #tpu.dot_dimension_numbers<[1], [0], [0], [1], [0, 0, 1, 1], [], []>} : vector<80x8xbf16>, vector<8x8xbf16>, vector<80x8xf32> -> vector<80x8xf32>
    %150 = arith.addf %143, %149 : vector<80x8xf32>
    %c1_98 = arith.constant 1 : index
    %c9_99 = arith.constant 9 : index
    %c0_100 = arith.constant 0 : index
    %151 = vector.load %arg12[%c1_98, %c9_99, %c0_100] : memref<3x120x8xf32, #tpu.memory_space<vmem>>, vector<1x80x8xf32>
    %152 = vector.shape_cast %151 : vector<1x80x8xf32> to vector<80x8xf32>
    %153 = arith.truncf %152 : vector<80x8xf32> to vector<80x8xbf16>
    %c9_101 = arith.constant 9 : index
    %c0_102 = arith.constant 0 : index
    %c0_103 = arith.constant 0 : index
    %154 = vector.load %arg9[%c9_101, %c0_102, %c0_103] : memref<27x8x8xbf16, #tpu.memory_space<vmem>>, vector<1x8x8xbf16>
    %155 = vector.shape_cast %154 : vector<1x8x8xbf16> to vector<8x8xbf16>
    %cst_104 = arith.constant dense<0.000000e+00> : vector<80x8xf32>
    %156 = tpu.matmul %153, %155, %cst_104 {dimension_numbers = #tpu.dot_dimension_numbers<[1], [0], [0], [1], [0, 0, 1, 1], [], []>} : vector<80x8xbf16>, vector<8x8xbf16>, vector<80x8xf32> -> vector<80x8xf32>
    %157 = arith.addf %150, %156 : vector<80x8xf32>
    %c1_105 = arith.constant 1 : index
    %c10_106 = arith.constant 10 : index
    %c0_107 = arith.constant 0 : index
    %158 = vector.load %arg12[%c1_105, %c10_106, %c0_107] : memref<3x120x8xf32, #tpu.memory_space<vmem>>, vector<1x80x8xf32>
    %159 = vector.shape_cast %158 : vector<1x80x8xf32> to vector<80x8xf32>
    %160 = arith.truncf %159 : vector<80x8xf32> to vector<80x8xbf16>
    %c10_108 = arith.constant 10 : index
    %c0_109 = arith.constant 0 : index
    %c0_110 = arith.constant 0 : index
    %161 = vector.load %arg9[%c10_108, %c0_109, %c0_110] : memref<27x8x8xbf16, #tpu.memory_space<vmem>>, vector<1x8x8xbf16>
    %162 = vector.shape_cast %161 : vector<1x8x8xbf16> to vector<8x8xbf16>
    %cst_111 = arith.constant dense<0.000000e+00> : vector<80x8xf32>
    %163 = tpu.matmul %160, %162, %cst_111 {dimension_numbers = #tpu.dot_dimension_numbers<[1], [0], [0], [1], [0, 0, 1, 1], [], []>} : vector<80x8xbf16>, vector<8x8xbf16>, vector<80x8xf32> -> vector<80x8xf32>
    %164 = arith.addf %157, %163 : vector<80x8xf32>
    %c1_112 = arith.constant 1 : index
    %c11_113 = arith.constant 11 : index
    %c0_114 = arith.constant 0 : index
    %165 = vector.load %arg12[%c1_112, %c11_113, %c0_114] : memref<3x120x8xf32, #tpu.memory_space<vmem>>, vector<1x80x8xf32>
    %166 = vector.shape_cast %165 : vector<1x80x8xf32> to vector<80x8xf32>
    %167 = arith.truncf %166 : vector<80x8xf32> to vector<80x8xbf16>
    %c11_115 = arith.constant 11 : index
    %c0_116 = arith.constant 0 : index
    %c0_117 = arith.constant 0 : index
    %168 = vector.load %arg9[%c11_115, %c0_116, %c0_117] : memref<27x8x8xbf16, #tpu.memory_space<vmem>>, vector<1x8x8xbf16>
    %169 = vector.shape_cast %168 : vector<1x8x8xbf16> to vector<8x8xbf16>
    %cst_118 = arith.constant dense<0.000000e+00> : vector<80x8xf32>
    %170 = tpu.matmul %167, %169, %cst_118 {dimension_numbers = #tpu.dot_dimension_numbers<[1], [0], [0], [1], [0, 0, 1, 1], [], []>} : vector<80x8xbf16>, vector<8x8xbf16>, vector<80x8xf32> -> vector<80x8xf32>
    %171 = arith.addf %164, %170 : vector<80x8xf32>
    %c1_119 = arith.constant 1 : index
    %c19_120 = arith.constant 19 : index
    %c0_121 = arith.constant 0 : index
    %172 = vector.load %arg12[%c1_119, %c19_120, %c0_121] : memref<3x120x8xf32, #tpu.memory_space<vmem>>, vector<1x80x8xf32>
    %173 = vector.shape_cast %172 : vector<1x80x8xf32> to vector<80x8xf32>
    %174 = arith.truncf %173 : vector<80x8xf32> to vector<80x8xbf16>
    %c12 = arith.constant 12 : index
    %c0_122 = arith.constant 0 : index
    %c0_123 = arith.constant 0 : index
    %175 = vector.load %arg9[%c12, %c0_122, %c0_123] : memref<27x8x8xbf16, #tpu.memory_space<vmem>>, vector<1x8x8xbf16>
    %176 = vector.shape_cast %175 : vector<1x8x8xbf16> to vector<8x8xbf16>
    %cst_124 = arith.constant dense<0.000000e+00> : vector<80x8xf32>
    %177 = tpu.matmul %174, %176, %cst_124 {dimension_numbers = #tpu.dot_dimension_numbers<[1], [0], [0], [1], [0, 0, 1, 1], [], []>} : vector<80x8xbf16>, vector<8x8xbf16>, vector<80x8xf32> -> vector<80x8xf32>
    %178 = arith.addf %171, %177 : vector<80x8xf32>
    %c1_125 = arith.constant 1 : index
    %c20_126 = arith.constant 20 : index
    %c0_127 = arith.constant 0 : index
    %179 = vector.load %arg12[%c1_125, %c20_126, %c0_127] : memref<3x120x8xf32, #tpu.memory_space<vmem>>, vector<1x80x8xf32>
    %180 = vector.shape_cast %179 : vector<1x80x8xf32> to vector<80x8xf32>
    %181 = arith.truncf %180 : vector<80x8xf32> to vector<80x8xbf16>
    %c13 = arith.constant 13 : index
    %c0_128 = arith.constant 0 : index
    %c0_129 = arith.constant 0 : index
    %182 = vector.load %arg9[%c13, %c0_128, %c0_129] : memref<27x8x8xbf16, #tpu.memory_space<vmem>>, vector<1x8x8xbf16>
    %183 = vector.shape_cast %182 : vector<1x8x8xbf16> to vector<8x8xbf16>
    %cst_130 = arith.constant dense<0.000000e+00> : vector<80x8xf32>
    %184 = tpu.matmul %181, %183, %cst_130 {dimension_numbers = #tpu.dot_dimension_numbers<[1], [0], [0], [1], [0, 0, 1, 1], [], []>} : vector<80x8xbf16>, vector<8x8xbf16>, vector<80x8xf32> -> vector<80x8xf32>
    %185 = arith.addf %178, %184 : vector<80x8xf32>
    %c1_131 = arith.constant 1 : index
    %c21_132 = arith.constant 21 : index
    %c0_133 = arith.constant 0 : index
    %186 = vector.load %arg12[%c1_131, %c21_132, %c0_133] : memref<3x120x8xf32, #tpu.memory_space<vmem>>, vector<1x80x8xf32>
    %187 = vector.shape_cast %186 : vector<1x80x8xf32> to vector<80x8xf32>
    %188 = arith.truncf %187 : vector<80x8xf32> to vector<80x8xbf16>
    %c14 = arith.constant 14 : index
    %c0_134 = arith.constant 0 : index
    %c0_135 = arith.constant 0 : index
    %189 = vector.load %arg9[%c14, %c0_134, %c0_135] : memref<27x8x8xbf16, #tpu.memory_space<vmem>>, vector<1x8x8xbf16>
    %190 = vector.shape_cast %189 : vector<1x8x8xbf16> to vector<8x8xbf16>
    %cst_136 = arith.constant dense<0.000000e+00> : vector<80x8xf32>
    %191 = tpu.matmul %188, %190, %cst_136 {dimension_numbers = #tpu.dot_dimension_numbers<[1], [0], [0], [1], [0, 0, 1, 1], [], []>} : vector<80x8xbf16>, vector<8x8xbf16>, vector<80x8xf32> -> vector<80x8xf32>
    %192 = arith.addf %185, %191 : vector<80x8xf32>
    %c1_137 = arith.constant 1 : index
    %c29_138 = arith.constant 29 : index
    %c0_139 = arith.constant 0 : index
    %193 = vector.load %arg12[%c1_137, %c29_138, %c0_139] : memref<3x120x8xf32, #tpu.memory_space<vmem>>, vector<1x80x8xf32>
    %194 = vector.shape_cast %193 : vector<1x80x8xf32> to vector<80x8xf32>
    %195 = arith.truncf %194 : vector<80x8xf32> to vector<80x8xbf16>
    %c15 = arith.constant 15 : index
    %c0_140 = arith.constant 0 : index
    %c0_141 = arith.constant 0 : index
    %196 = vector.load %arg9[%c15, %c0_140, %c0_141] : memref<27x8x8xbf16, #tpu.memory_space<vmem>>, vector<1x8x8xbf16>
    %197 = vector.shape_cast %196 : vector<1x8x8xbf16> to vector<8x8xbf16>
    %cst_142 = arith.constant dense<0.000000e+00> : vector<80x8xf32>
    %198 = tpu.matmul %195, %197, %cst_142 {dimension_numbers = #tpu.dot_dimension_numbers<[1], [0], [0], [1], [0, 0, 1, 1], [], []>} : vector<80x8xbf16>, vector<8x8xbf16>, vector<80x8xf32> -> vector<80x8xf32>
    %199 = arith.addf %192, %198 : vector<80x8xf32>
    %c1_143 = arith.constant 1 : index
    %c30_144 = arith.constant 30 : index
    %c0_145 = arith.constant 0 : index
    %200 = vector.load %arg12[%c1_143, %c30_144, %c0_145] : memref<3x120x8xf32, #tpu.memory_space<vmem>>, vector<1x80x8xf32>
    %201 = vector.shape_cast %200 : vector<1x80x8xf32> to vector<80x8xf32>
    %202 = arith.truncf %201 : vector<80x8xf32> to vector<80x8xbf16>
    %c16 = arith.constant 16 : index
    %c0_146 = arith.constant 0 : index
    %c0_147 = arith.constant 0 : index
    %203 = vector.load %arg9[%c16, %c0_146, %c0_147] : memref<27x8x8xbf16, #tpu.memory_space<vmem>>, vector<1x8x8xbf16>
    %204 = vector.shape_cast %203 : vector<1x8x8xbf16> to vector<8x8xbf16>
    %cst_148 = arith.constant dense<0.000000e+00> : vector<80x8xf32>
    %205 = tpu.matmul %202, %204, %cst_148 {dimension_numbers = #tpu.dot_dimension_numbers<[1], [0], [0], [1], [0, 0, 1, 1], [], []>} : vector<80x8xbf16>, vector<8x8xbf16>, vector<80x8xf32> -> vector<80x8xf32>
    %206 = arith.addf %199, %205 : vector<80x8xf32>
    %c1_149 = arith.constant 1 : index
    %c31_150 = arith.constant 31 : index
    %c0_151 = arith.constant 0 : index
    %207 = vector.load %arg12[%c1_149, %c31_150, %c0_151] : memref<3x120x8xf32, #tpu.memory_space<vmem>>, vector<1x80x8xf32>
    %208 = vector.shape_cast %207 : vector<1x80x8xf32> to vector<80x8xf32>
    %209 = arith.truncf %208 : vector<80x8xf32> to vector<80x8xbf16>
    %c17 = arith.constant 17 : index
    %c0_152 = arith.constant 0 : index
    %c0_153 = arith.constant 0 : index
    %210 = vector.load %arg9[%c17, %c0_152, %c0_153] : memref<27x8x8xbf16, #tpu.memory_space<vmem>>, vector<1x8x8xbf16>
    %211 = vector.shape_cast %210 : vector<1x8x8xbf16> to vector<8x8xbf16>
    %cst_154 = arith.constant dense<0.000000e+00> : vector<80x8xf32>
    %212 = tpu.matmul %209, %211, %cst_154 {dimension_numbers = #tpu.dot_dimension_numbers<[1], [0], [0], [1], [0, 0, 1, 1], [], []>} : vector<80x8xbf16>, vector<8x8xbf16>, vector<80x8xf32> -> vector<80x8xf32>
    %213 = arith.addf %206, %212 : vector<80x8xf32>
    %c2_155 = arith.constant 2 : index
    %c9_156 = arith.constant 9 : index
    %c0_157 = arith.constant 0 : index
    %214 = vector.load %arg12[%c2_155, %c9_156, %c0_157] : memref<3x120x8xf32, #tpu.memory_space<vmem>>, vector<1x80x8xf32>
    %215 = vector.shape_cast %214 : vector<1x80x8xf32> to vector<80x8xf32>
    %216 = arith.truncf %215 : vector<80x8xf32> to vector<80x8xbf16>
    %c18 = arith.constant 18 : index
    %c0_158 = arith.constant 0 : index
    %c0_159 = arith.constant 0 : index
    %217 = vector.load %arg9[%c18, %c0_158, %c0_159] : memref<27x8x8xbf16, #tpu.memory_space<vmem>>, vector<1x8x8xbf16>
    %218 = vector.shape_cast %217 : vector<1x8x8xbf16> to vector<8x8xbf16>
    %cst_160 = arith.constant dense<0.000000e+00> : vector<80x8xf32>
    %219 = tpu.matmul %216, %218, %cst_160 {dimension_numbers = #tpu.dot_dimension_numbers<[1], [0], [0], [1], [0, 0, 1, 1], [], []>} : vector<80x8xbf16>, vector<8x8xbf16>, vector<80x8xf32> -> vector<80x8xf32>
    %220 = arith.addf %213, %219 : vector<80x8xf32>
    %c2_161 = arith.constant 2 : index
    %c10_162 = arith.constant 10 : index
    %c0_163 = arith.constant 0 : index
    %221 = vector.load %arg12[%c2_161, %c10_162, %c0_163] : memref<3x120x8xf32, #tpu.memory_space<vmem>>, vector<1x80x8xf32>
    %222 = vector.shape_cast %221 : vector<1x80x8xf32> to vector<80x8xf32>
    %223 = arith.truncf %222 : vector<80x8xf32> to vector<80x8xbf16>
    %c19_164 = arith.constant 19 : index
    %c0_165 = arith.constant 0 : index
    %c0_166 = arith.constant 0 : index
    %224 = vector.load %arg9[%c19_164, %c0_165, %c0_166] : memref<27x8x8xbf16, #tpu.memory_space<vmem>>, vector<1x8x8xbf16>
    %225 = vector.shape_cast %224 : vector<1x8x8xbf16> to vector<8x8xbf16>
    %cst_167 = arith.constant dense<0.000000e+00> : vector<80x8xf32>
    %226 = tpu.matmul %223, %225, %cst_167 {dimension_numbers = #tpu.dot_dimension_numbers<[1], [0], [0], [1], [0, 0, 1, 1], [], []>} : vector<80x8xbf16>, vector<8x8xbf16>, vector<80x8xf32> -> vector<80x8xf32>
    %227 = arith.addf %220, %226 : vector<80x8xf32>
    %c2_168 = arith.constant 2 : index
    %c11_169 = arith.constant 11 : index
    %c0_170 = arith.constant 0 : index
    %228 = vector.load %arg12[%c2_168, %c11_169, %c0_170] : memref<3x120x8xf32, #tpu.memory_space<vmem>>, vector<1x80x8xf32>
    %229 = vector.shape_cast %228 : vector<1x80x8xf32> to vector<80x8xf32>
    %230 = arith.truncf %229 : vector<80x8xf32> to vector<80x8xbf16>
    %c20_171 = arith.constant 20 : index
    %c0_172 = arith.constant 0 : index
    %c0_173 = arith.constant 0 : index
    %231 = vector.load %arg9[%c20_171, %c0_172, %c0_173] : memref<27x8x8xbf16, #tpu.memory_space<vmem>>, vector<1x8x8xbf16>
    %232 = vector.shape_cast %231 : vector<1x8x8xbf16> to vector<8x8xbf16>
    %cst_174 = arith.constant dense<0.000000e+00> : vector<80x8xf32>
    %233 = tpu.matmul %230, %232, %cst_174 {dimension_numbers = #tpu.dot_dimension_numbers<[1], [0], [0], [1], [0, 0, 1, 1], [], []>} : vector<80x8xbf16>, vector<8x8xbf16>, vector<80x8xf32> -> vector<80x8xf32>
    %234 = arith.addf %227, %233 : vector<80x8xf32>
    %c2_175 = arith.constant 2 : index
    %c19_176 = arith.constant 19 : index
    %c0_177 = arith.constant 0 : index
    %235 = vector.load %arg12[%c2_175, %c19_176, %c0_177] : memref<3x120x8xf32, #tpu.memory_space<vmem>>, vector<1x80x8xf32>
    %236 = vector.shape_cast %235 : vector<1x80x8xf32> to vector<80x8xf32>
    %237 = arith.truncf %236 : vector<80x8xf32> to vector<80x8xbf16>
    %c21_178 = arith.constant 21 : index
    %c0_179 = arith.constant 0 : index
    %c0_180 = arith.constant 0 : index
    %238 = vector.load %arg9[%c21_178, %c0_179, %c0_180] : memref<27x8x8xbf16, #tpu.memory_space<vmem>>, vector<1x8x8xbf16>
    %239 = vector.shape_cast %238 : vector<1x8x8xbf16> to vector<8x8xbf16>
    %cst_181 = arith.constant dense<0.000000e+00> : vector<80x8xf32>
    %240 = tpu.matmul %237, %239, %cst_181 {dimension_numbers = #tpu.dot_dimension_numbers<[1], [0], [0], [1], [0, 0, 1, 1], [], []>} : vector<80x8xbf16>, vector<8x8xbf16>, vector<80x8xf32> -> vector<80x8xf32>
    %241 = arith.addf %234, %240 : vector<80x8xf32>
    %c2_182 = arith.constant 2 : index
    %c20_183 = arith.constant 20 : index
    %c0_184 = arith.constant 0 : index
    %242 = vector.load %arg12[%c2_182, %c20_183, %c0_184] : memref<3x120x8xf32, #tpu.memory_space<vmem>>, vector<1x80x8xf32>
    %243 = vector.shape_cast %242 : vector<1x80x8xf32> to vector<80x8xf32>
    %244 = arith.truncf %243 : vector<80x8xf32> to vector<80x8xbf16>
    %c22 = arith.constant 22 : index
    %c0_185 = arith.constant 0 : index
    %c0_186 = arith.constant 0 : index
    %245 = vector.load %arg9[%c22, %c0_185, %c0_186] : memref<27x8x8xbf16, #tpu.memory_space<vmem>>, vector<1x8x8xbf16>
    %246 = vector.shape_cast %245 : vector<1x8x8xbf16> to vector<8x8xbf16>
    %cst_187 = arith.constant dense<0.000000e+00> : vector<80x8xf32>
    %247 = tpu.matmul %244, %246, %cst_187 {dimension_numbers = #tpu.dot_dimension_numbers<[1], [0], [0], [1], [0, 0, 1, 1], [], []>} : vector<80x8xbf16>, vector<8x8xbf16>, vector<80x8xf32> -> vector<80x8xf32>
    %248 = arith.addf %241, %247 : vector<80x8xf32>
    %c2_188 = arith.constant 2 : index
    %c21_189 = arith.constant 21 : index
    %c0_190 = arith.constant 0 : index
    %249 = vector.load %arg12[%c2_188, %c21_189, %c0_190] : memref<3x120x8xf32, #tpu.memory_space<vmem>>, vector<1x80x8xf32>
    %250 = vector.shape_cast %249 : vector<1x80x8xf32> to vector<80x8xf32>
    %251 = arith.truncf %250 : vector<80x8xf32> to vector<80x8xbf16>
    %c23 = arith.constant 23 : index
    %c0_191 = arith.constant 0 : index
    %c0_192 = arith.constant 0 : index
    %252 = vector.load %arg9[%c23, %c0_191, %c0_192] : memref<27x8x8xbf16, #tpu.memory_space<vmem>>, vector<1x8x8xbf16>
    %253 = vector.shape_cast %252 : vector<1x8x8xbf16> to vector<8x8xbf16>
    %cst_193 = arith.constant dense<0.000000e+00> : vector<80x8xf32>
    %254 = tpu.matmul %251, %253, %cst_193 {dimension_numbers = #tpu.dot_dimension_numbers<[1], [0], [0], [1], [0, 0, 1, 1], [], []>} : vector<80x8xbf16>, vector<8x8xbf16>, vector<80x8xf32> -> vector<80x8xf32>
    %255 = arith.addf %248, %254 : vector<80x8xf32>
    %c2_194 = arith.constant 2 : index
    %c29_195 = arith.constant 29 : index
    %c0_196 = arith.constant 0 : index
    %256 = vector.load %arg12[%c2_194, %c29_195, %c0_196] : memref<3x120x8xf32, #tpu.memory_space<vmem>>, vector<1x80x8xf32>
    %257 = vector.shape_cast %256 : vector<1x80x8xf32> to vector<80x8xf32>
    %258 = arith.truncf %257 : vector<80x8xf32> to vector<80x8xbf16>
    %c24 = arith.constant 24 : index
    %c0_197 = arith.constant 0 : index
    %c0_198 = arith.constant 0 : index
    %259 = vector.load %arg9[%c24, %c0_197, %c0_198] : memref<27x8x8xbf16, #tpu.memory_space<vmem>>, vector<1x8x8xbf16>
    %260 = vector.shape_cast %259 : vector<1x8x8xbf16> to vector<8x8xbf16>
    %cst_199 = arith.constant dense<0.000000e+00> : vector<80x8xf32>
    %261 = tpu.matmul %258, %260, %cst_199 {dimension_numbers = #tpu.dot_dimension_numbers<[1], [0], [0], [1], [0, 0, 1, 1], [], []>} : vector<80x8xbf16>, vector<8x8xbf16>, vector<80x8xf32> -> vector<80x8xf32>
    %262 = arith.addf %255, %261 : vector<80x8xf32>
    %c2_200 = arith.constant 2 : index
    %c30_201 = arith.constant 30 : index
    %c0_202 = arith.constant 0 : index
    %263 = vector.load %arg12[%c2_200, %c30_201, %c0_202] : memref<3x120x8xf32, #tpu.memory_space<vmem>>, vector<1x80x8xf32>
    %264 = vector.shape_cast %263 : vector<1x80x8xf32> to vector<80x8xf32>
    %265 = arith.truncf %264 : vector<80x8xf32> to vector<80x8xbf16>
    %c25 = arith.constant 25 : index
    %c0_203 = arith.constant 0 : index
    %c0_204 = arith.constant 0 : index
    %266 = vector.load %arg9[%c25, %c0_203, %c0_204] : memref<27x8x8xbf16, #tpu.memory_space<vmem>>, vector<1x8x8xbf16>
    %267 = vector.shape_cast %266 : vector<1x8x8xbf16> to vector<8x8xbf16>
    %cst_205 = arith.constant dense<0.000000e+00> : vector<80x8xf32>
    %268 = tpu.matmul %265, %267, %cst_205 {dimension_numbers = #tpu.dot_dimension_numbers<[1], [0], [0], [1], [0, 0, 1, 1], [], []>} : vector<80x8xbf16>, vector<8x8xbf16>, vector<80x8xf32> -> vector<80x8xf32>
    %269 = arith.addf %262, %268 : vector<80x8xf32>
    %c2_206 = arith.constant 2 : index
    %c31_207 = arith.constant 31 : index
    %c0_208 = arith.constant 0 : index
    %270 = vector.load %arg12[%c2_206, %c31_207, %c0_208] : memref<3x120x8xf32, #tpu.memory_space<vmem>>, vector<1x80x8xf32>
    %271 = vector.shape_cast %270 : vector<1x80x8xf32> to vector<80x8xf32>
    %272 = arith.truncf %271 : vector<80x8xf32> to vector<80x8xbf16>
    %c26 = arith.constant 26 : index
    %c0_209 = arith.constant 0 : index
    %c0_210 = arith.constant 0 : index
    %273 = vector.load %arg9[%c26, %c0_209, %c0_210] : memref<27x8x8xbf16, #tpu.memory_space<vmem>>, vector<1x8x8xbf16>
    %274 = vector.shape_cast %273 : vector<1x8x8xbf16> to vector<8x8xbf16>
    %cst_211 = arith.constant dense<0.000000e+00> : vector<80x8xf32>
    %275 = tpu.matmul %272, %274, %cst_211 {dimension_numbers = #tpu.dot_dimension_numbers<[1], [0], [0], [1], [0, 0, 1, 1], [], []>} : vector<80x8xbf16>, vector<8x8xbf16>, vector<80x8xf32> -> vector<80x8xf32>
    %276 = arith.addf %269, %275 : vector<80x8xf32>
    %277 = arith.truncf %276 : vector<80x8xf32> to vector<80x8xbf16>
    %c0_212 = arith.constant 0 : index
    %c0_213 = arith.constant 0 : index
    %c0_214 = arith.constant 0 : index
    %c0_215 = arith.constant 0 : index
    %278 = vector.load %arg10[%c0_212, %c0_213, %c0_214, %c0_215] : memref<1x1x80x8xbf16, #tpu.memory_space<vmem>>, vector<1x1x80x8xbf16>
    %279 = vector.shape_cast %278 : vector<1x1x80x8xbf16> to vector<80x8xbf16>
    %280 = vector.shape_cast %277 : vector<80x8xbf16> to vector<1x1x80x8xbf16>
    tpu.vector_store %arg10[%c0_212, %c0_213, %c0_214, %c0_215], %280 {strides = array<i32>} : memref<1x1x80x8xbf16, #tpu.memory_space<vmem>>, vector<1x1x80x8xbf16>,
    %c0_216 = arith.constant 0 : index
    %c0_217 = arith.constant 0 : index
    %281 = vector.load %arg2[%c0_216, %c0_217] : memref<80x1xf32, #tpu.memory_space<vmem>>, vector<80x1xf32>
    %282 = vector.broadcast %281 : vector<80x1xf32> to vector<80x8xf32>
    %283 = arith.mulf %276, %282 : vector<80x8xf32>
    %cst_218 = arith.constant dense<0.000000e+00> : vector<8xf32>
    %284 = vector.multi_reduction <add>, %283, %cst_218 [0] : vector<80x8xf32> to vector<8xf32>
    %285 = vector.shape_cast %284 : vector<8xf32> to vector<1x8xf32>
    %286 = arith.mulf %283, %276 : vector<80x8xf32>
    %cst_219 = arith.constant dense<0.000000e+00> : vector<8xf32>
    %287 = vector.multi_reduction <add>, %286, %cst_219 [0] : vector<80x8xf32> to vector<8xf32>
    %288 = vector.shape_cast %287 : vector<8xf32> to vector<1x8xf32>
    %289 = tpu.concatenate %285, %288 in 0 : vector<1x8xf32>, vector<1x8xf32> -> vector<2x8xf32>
    %c0_220 = arith.constant 0 : index
    %c0_221 = arith.constant 0 : index
    %c0_222 = arith.constant 0 : index
    %c0_223 = arith.constant 0 : index
    %290 = vector.load %arg11[%c0_220, %c0_221, %c0_222, %c0_223] : memref<1x1x2x8xf32, #tpu.memory_space<vmem>>, vector<1x1x2x8xf32>
    %291 = vector.shape_cast %290 : vector<1x1x2x8xf32> to vector<2x8xf32>
    %292 = vector.shape_cast %289 : vector<2x8xf32> to vector<1x1x2x8xf32>
    tpu.vector_store %arg11[%c0_220, %c0_221, %c0_222, %c0_223], %292 {strides = array<i32>} : memref<1x1x2x8xf32, #tpu.memory_space<vmem>>, vector<1x1x2x8xf32>,
    return
  }
  func.func @transform_0(%arg0: i32, %arg1: i32) -> (i32, i32) {
    %c0_i32 = arith.constant 0 : i32
    %c0_i32_0 = arith.constant 0 : i32
    %c0_i32_1 = arith.constant 0 : i32
    return %c0_i32, %c0_i32_0 : i32, i32
  }
  func.func @transform_1(%arg0: i32, %arg1: i32) -> (i32, i32) {
    %c0_i32 = arith.constant 0 : i32
    %c0_i32_0 = arith.constant 0 : i32
    %c0_i32_1 = arith.constant 0 : i32
    return %c0_i32, %c0_i32_0 : i32, i32
  }
  func.func @transform_2(%arg0: i32, %arg1: i32) -> (i32, i32) {
    %c0_i32 = arith.constant 0 : i32
    %c0_i32_0 = arith.constant 0 : i32
    %c0_i32_1 = arith.constant 0 : i32
    return %c0_i32, %c0_i32_0 : i32, i32
  }
  func.func @transform_3(%arg0: i32, %arg1: i32) -> (i32, i32) {
    %c0_i32 = arith.constant 0 : i32
    %c0_i32_0 = arith.constant 0 : i32
    %c0_i32_1 = arith.constant 0 : i32
    return %c0_i32, %c0_i32_0 : i32, i32
  }
  func.func @transform_4(%arg0: i32, %arg1: i32) -> (i32, i32, i32, i32) {
    %c0_i32 = arith.constant 0 : i32
    %0 = arith.addi %arg1, %c0_i32 : i32
    %c0_i32_0 = arith.constant 0 : i32
    %c0_i32_1 = arith.constant 0 : i32
    %c0_i32_2 = arith.constant 0 : i32
    return %arg0, %0, %c0_i32_0, %c0_i32_1 : i32, i32, i32, i32
  }
  func.func @transform_5(%arg0: i32, %arg1: i32) -> (i32, i32, i32, i32) {
    %c1_i32 = arith.constant 1 : i32
    %0 = arith.addi %arg1, %c1_i32 : i32
    %c0_i32 = arith.constant 0 : i32
    %c0_i32_0 = arith.constant 0 : i32
    %c0_i32_1 = arith.constant 0 : i32
    return %arg0, %0, %c0_i32, %c0_i32_0 : i32, i32, i32, i32
  }
  func.func @transform_6(%arg0: i32, %arg1: i32) -> (i32, i32, i32, i32) {
    %c2_i32 = arith.constant 2 : i32
    %0 = arith.addi %arg1, %c2_i32 : i32
    %c0_i32 = arith.constant 0 : i32
    %c0_i32_0 = arith.constant 0 : i32
    %c0_i32_1 = arith.constant 0 : i32
    return %arg0, %0, %c0_i32, %c0_i32_0 : i32, i32, i32, i32
  }
  func.func @transform_7(%arg0: i32, %arg1: i32) -> (i32, i32, i32) {
    %c0_i32 = arith.constant 0 : i32
    %c0_i32_0 = arith.constant 0 : i32
    %c0_i32_1 = arith.constant 0 : i32
    %c0_i32_2 = arith.constant 0 : i32
    return %c0_i32, %c0_i32_0, %c0_i32_1 : i32, i32, i32
  }
  func.func @transform_8(%arg0: i32, %arg1: i32) -> (i32, i32, i32, i32) {
    %c0_i32 = arith.constant 0 : i32
    %c0_i32_0 = arith.constant 0 : i32
    %c0_i32_1 = arith.constant 0 : i32
    return %arg0, %arg1, %c0_i32, %c0_i32_0 : i32, i32, i32, i32
  }
  func.func @transform_9(%arg0: i32, %arg1: i32) -> (i32, i32, i32, i32) {
    %c0_i32 = arith.constant 0 : i32
    %c0_i32_0 = arith.constant 0 : i32
    %c0_i32_1 = arith.constant 0 : i32
    return %arg0, %arg1, %c0_i32, %c0_i32_0 : i32, i32, i32, i32
  }
}

module attributes {stable_mosaic.version = 11 : i64} {
  func.func @_bn_lrelu_kernel(%arg0: i32, %arg1: i32, %arg2: memref<80x1xf32, #tpu.memory_space<vmem>>, %arg3: memref<1x8xf32, #tpu.memory_space<vmem>>, %arg4: memref<1x8xf32, #tpu.memory_space<vmem>>, %arg5: memref<1x1x80x8xbf16, #tpu.memory_space<vmem>>, %arg6: memref<1x1x80x8xf32, #tpu.memory_space<vmem>>) attributes {dimension_semantics = [#tpu.dimension_semantics<parallel>, #tpu.dimension_semantics<parallel>], iteration_bounds = array<i64: 2, 8>, scalar_prefetch = 0 : i64, scratch_operands = 0 : i64, tpu.core_type = #tpu.core_type<tc>, window_params = [{pipeline_mode = #tpu.pipeline_mode<synchronous>, transform_indices = @transform_0, window_bounds = array<i64: 80, 1>}, {pipeline_mode = #tpu.pipeline_mode<synchronous>, transform_indices = @transform_1, window_bounds = array<i64: 1, 8>}, {pipeline_mode = #tpu.pipeline_mode<synchronous>, transform_indices = @transform_2, window_bounds = array<i64: 1, 8>}, {transform_indices = @transform_3, window_bounds = array<i64: 1, 1, 80, 8>}, {transform_indices = @transform_4, window_bounds = array<i64: 1, 1, 80, 8>}]} {
    %c0 = arith.constant 0 : index
    %c0_0 = arith.constant 0 : index
    %c0_1 = arith.constant 0 : index
    %c0_2 = arith.constant 0 : index
    %0 = vector.load %arg5[%c0, %c0_0, %c0_1, %c0_2] : memref<1x1x80x8xbf16, #tpu.memory_space<vmem>>, vector<1x1x80x8xbf16>
    %1 = vector.shape_cast %0 : vector<1x1x80x8xbf16> to vector<80x8xbf16>
    %2 = arith.extf %1 : vector<80x8xbf16> to vector<80x8xf32>
    %c0_3 = arith.constant 0 : index
    %c0_4 = arith.constant 0 : index
    %3 = vector.load %arg3[%c0_3, %c0_4] : memref<1x8xf32, #tpu.memory_space<vmem>>, vector<1x8xf32>
    %4 = vector.broadcast %3 : vector<1x8xf32> to vector<80x8xf32>
    %5 = arith.mulf %2, %4 : vector<80x8xf32>
    %c0_5 = arith.constant 0 : index
    %c0_6 = arith.constant 0 : index
    %6 = vector.load %arg4[%c0_5, %c0_6] : memref<1x8xf32, #tpu.memory_space<vmem>>, vector<1x8xf32>
    %7 = vector.broadcast %6 : vector<1x8xf32> to vector<80x8xf32>
    %8 = arith.addf %5, %7 : vector<80x8xf32>
    %cst = arith.constant 0.000000e+00 : f32
    %9 = vector.broadcast %cst : f32 to vector<80x8xf32>
    %10 = arith.cmpf ogt, %8, %9 : vector<80x8xf32>
    %cst_7 = arith.constant 0.00999999977 : f32
    %11 = vector.broadcast %cst_7 : f32 to vector<80x8xf32>
    %12 = arith.mulf %11, %8 : vector<80x8xf32>
    %13 = arith.select %10, %8, %12 : vector<80x8xi1>, vector<80x8xf32>
    %c0_8 = arith.constant 0 : index
    %c0_9 = arith.constant 0 : index
    %14 = vector.load %arg2[%c0_8, %c0_9] : memref<80x1xf32, #tpu.memory_space<vmem>>, vector<80x1xf32>
    %15 = vector.broadcast %14 : vector<80x1xf32> to vector<80x8xf32>
    %16 = arith.mulf %13, %15 : vector<80x8xf32>
    %c0_10 = arith.constant 0 : index
    %c0_11 = arith.constant 0 : index
    %c0_12 = arith.constant 0 : index
    %c0_13 = arith.constant 0 : index
    %17 = vector.load %arg6[%c0_10, %c0_11, %c0_12, %c0_13] : memref<1x1x80x8xf32, #tpu.memory_space<vmem>>, vector<1x1x80x8xf32>
    %18 = vector.shape_cast %17 : vector<1x1x80x8xf32> to vector<80x8xf32>
    %19 = vector.shape_cast %16 : vector<80x8xf32> to vector<1x1x80x8xf32>
    tpu.vector_store %arg6[%c0_10, %c0_11, %c0_12, %c0_13], %19 {strides = array<i32>} : memref<1x1x80x8xf32, #tpu.memory_space<vmem>>, vector<1x1x80x8xf32>,
    return
  }
  func.func @transform_0(%arg0: i32, %arg1: i32) -> (i32, i32) {
    %c0_i32 = arith.constant 0 : i32
    %c0_i32_0 = arith.constant 0 : i32
    %c0_i32_1 = arith.constant 0 : i32
    return %c0_i32, %c0_i32_0 : i32, i32
  }
  func.func @transform_1(%arg0: i32, %arg1: i32) -> (i32, i32) {
    %c0_i32 = arith.constant 0 : i32
    %c0_i32_0 = arith.constant 0 : i32
    %c0_i32_1 = arith.constant 0 : i32
    return %c0_i32, %c0_i32_0 : i32, i32
  }
  func.func @transform_2(%arg0: i32, %arg1: i32) -> (i32, i32) {
    %c0_i32 = arith.constant 0 : i32
    %c0_i32_0 = arith.constant 0 : i32
    %c0_i32_1 = arith.constant 0 : i32
    return %c0_i32, %c0_i32_0 : i32, i32
  }
  func.func @transform_3(%arg0: i32, %arg1: i32) -> (i32, i32, i32, i32) {
    %c0_i32 = arith.constant 0 : i32
    %c0_i32_0 = arith.constant 0 : i32
    %c0_i32_1 = arith.constant 0 : i32
    return %arg0, %arg1, %c0_i32, %c0_i32_0 : i32, i32, i32, i32
  }
  func.func @transform_4(%arg0: i32, %arg1: i32) -> (i32, i32, i32, i32) {
    %c0_i32 = arith.constant 0 : i32
    %c0_i32_0 = arith.constant 0 : i32
    %c0_i32_1 = arith.constant 0 : i32
    return %arg0, %arg1, %c0_i32, %c0_i32_0 : i32, i32, i32, i32
  }
}

</mosaic_0001>

<bundles_post_ra>
// kernel: tile.28
= control target key start
LH: loop header
LB: loop body
LE: loop exit
PB: predicated region body
PF: predicated region fallthrough
CT: control target
= control target key end

     0   :  { %s22_s0 = inlined_call_operand.vmem [shape: f32[10], index: 0, kind: input, shape index: {}]   ;;  %s23_s1 = inlined_call_operand.vmem [shape: f32[8,10], index: 1, kind: output, shape index: {}]  }
   0x1   :  { %v4_v0 = vld [vmem:[%s22_s0] ss:$0 sm:$0xff] }
   0x2   :  { %5 = vst [vmem:[%s23_s1] sm:$0xff] %v4_v0 }

// kernel: tile.0
= control target key start
LH: loop header
LB: loop body
LE: loop exit
PB: predicated region body
PF: predicated region fallthrough
CT: control target
= control target key end

     0   :  { %s140_s10 = smov 127   ;;  %vm3_vm0 = vcmask 7168   ;;  %s141_s11 = smov 125   ;;  %s295_s0 = inlined_call_operand.vmem [shape: f32[8,10], index: 0, kind: input, shape index: {}]   ;;  %s296_s1 = inlined_call_operand.vmem [shape: f32[80,1], index: 1, kind: output, shape index: {}]  }
   0x1   :  { %v5_v0 = vld.sshfl [vmem:[%s295_s0] sm:$0xff pattern:$0x36251470]   ;;  %s143_s18 = smov 124   ;;  %s144_s19 = smov 123  }
   0x2   :  { %v29_v1 = vld.sshfl [vmem:[%s295_s0] sm:$0xff pattern:$0x62514703]   ;;  %6 = vrot.lane.b32.xlu0 %v5_v0, %s140_s10  ;;  %s145_s20 = smov 122   ;;  %s146_s21 = smov 121  }
   0x3   :  { %30 = vrot.lane.b32.xlu1 %v29_v1, %s141_s11  ;;  %v2_v2 = vld [vmem:[%s295_s0] sm:$0xff]   ;;  %s147_s22 = smov 120   ;;  %s148_s23 = smov 119  }
   0x4   :  { %4 = vst.msk [vmem:[%s296_s1] ss:$10 sm:$0xff] %vm3_vm0, %v2_v2   ;;  %v41_v3 = vld.sshfl [vmem:[%s295_s0] sm:$0xff pattern:$0x25147036]   ;;  %s142_s0 = smov 126  }
   0x6   :  { %18 = vrot.lane.b32.xlu0 %v29_v1, %s142_s0 }
   0x7   :  { %42 = vrot.lane.b32.xlu1 %v41_v3, %s143_s18 }
   0xa   :  { %52 = vrot.lane.b32.xlu0 %v41_v3, %s144_s19 }
   0xb   :  { %62 = vrot.lane.b32.xlu1 %v41_v3, %s145_s20 }
   0xe   :  { %72 = vrot.lane.b32.xlu0 %v41_v3, %s146_s21 }
   0xf   :  { %82 = vrot.lane.b32.xlu1 %v41_v3, %s147_s22 }
  0x12   :  { %92 = vrot.lane.b32.xlu0 %v41_v3, %s148_s23 }
  0x74   :  { %v7_v4 = vpop.permute.xlu0 %6  }
  0x75   :  { %v31_v5 = vpop.permute.xlu1 %30   ;;  %101 = vst.msk [vmem:[%s296_s1 + $0x1] ss:$70 sm:$0x3] %vm3_vm0, %v7_v4   ;;  %102 = vst.msk [vmem:[%s296_s1 + $0x65] ss:$-30 sm:$0xc] %vm3_vm0, %v7_v4  }
  0x76   :  { %103 = vst.msk [vmem:[%s296_s1 + $0xab] ss:$-30 sm:$0x30] %vm3_vm0, %v7_v4   ;;  %104 = vst.msk [vmem:[%s296_s1 + $0xf1] ss:$-30 sm:$0xc0] %vm3_vm0, %v7_v4  }
  0x77   :  { %109 = vst.msk [vmem:[%s296_s1 + $0x21] ss:$-30 sm:$0x3] %vm3_vm0, %v31_v5   ;;  %110 = vst.msk [vmem:[%s296_s1 + $0x85] ss:$-30 sm:$0x1c] %vm3_vm0, %v31_v5  }
  0x78   :  { %111 = vst.msk [vmem:[%s296_s1 + $0xcb] ss:$-30 sm:$0x60] %vm3_vm0, %v31_v5   ;;  %112 = vst.msk [vmem:[%s296_s1 + $0x38] sm:$0x80] %vm3_vm0, %v31_v5   ;;  %v19_v6 = vpop.permute.xlu0 %18  }
  0x79   :  { %v43_v7 = vpop.permute.xlu1 %42   ;;  %105 = vst.msk [vmem:[%s296_s1 + $0x20] ss:$-30 sm:$0x3] %vm3_vm0, %v19_v6   ;;  %106 = vst.msk [vmem:[%s296_s1 + $0x84] ss:$-30 sm:$0x1c] %vm3_vm0, %v19_v6  }
  0x7a   :  { %107 = vst.msk [vmem:[%s296_s1 + $0xca] ss:$-30 sm:$0x60] %vm3_vm0, %v19_v6   ;;  %108 = vst.msk [vmem:[%s296_s1 + $0x37] sm:$0x80] %vm3_vm0, %v19_v6  }
  0x7b   :  { %113 = vst.msk [vmem:[%s296_s1 + $0x40] ss:$-30 sm:$0x7] %vm3_vm0, %v43_v7   ;;  %114 = vst.msk [vmem:[%s296_s1 + $0xa4] ss:$-30 sm:$0x38] %vm3_vm0, %v43_v7  }
  0x7c   :  { %115 = vst.msk [vmem:[%s296_s1 + $0xea] ss:$-30 sm:$0xc0] %vm3_vm0, %v43_v7   ;;  %v53_v8 = vpop.permute.xlu0 %52  }
  0x7d   :  { %v63_v9 = vpop.permute.xlu1 %62   ;;  %116 = vst.msk [vmem:[%s296_s1 + $0x41] ss:$-30 sm:$0x7] %vm3_vm0, %v53_v8   ;;  %117 = vst.msk [vmem:[%s296_s1 + $0xa5] ss:$-30 sm:$0x38] %vm3_vm0, %v53_v8  }
  0x7e   :  { %118 = vst.msk [vmem:[%s296_s1 + $0xeb] ss:$-30 sm:$0xc0] %vm3_vm0, %v53_v8   ;;  %119 = vst.msk [vmem:[%s296_s1 + $0x42] ss:$-30 sm:$0x7] %vm3_vm0, %v63_v9  }
  0x7f   :  { %120 = vst.msk [vmem:[%s296_s1 + $0xa6] ss:$-30 sm:$0x38] %vm3_vm0, %v63_v9   ;;  %121 = vst.msk [vmem:[%s296_s1 + $0xec] ss:$-30 sm:$0xc0] %vm3_vm0, %v63_v9  }
  0x80   :  { %v73_v10 = vpop.permute.xlu0 %72  }
  0x81   :  { %v83_v11 = vpop.permute.xlu1 %82   ;;  %122 = vst.msk [vmem:[%s296_s1 + $0x43] ss:$-30 sm:$0x7] %vm3_vm0, %v73_v10   ;;  %123 = vst.msk [vmem:[%s296_s1 + $0xa7] ss:$-30 sm:$0x38] %vm3_vm0, %v73_v10  }
  0x82   :  { %124 = vst.msk [vmem:[%s296_s1 + $0xed] ss:$-30 sm:$0xc0] %vm3_vm0, %v73_v10   ;;  %125 = vst.msk [vmem:[%s296_s1 + $0x44] ss:$-30 sm:$0x7] %vm3_vm0, %v83_v11  }
  0x83   :  { %126 = vst.msk [vmem:[%s296_s1 + $0xa8] ss:$-30 sm:$0x38] %vm3_vm0, %v83_v11   ;;  %127 = vst.msk [vmem:[%s296_s1 + $0xee] ss:$-30 sm:$0xc0] %vm3_vm0, %v83_v11  }
  0x84   :  { %v93_v12 = vpop.permute.xlu0 %92  }
  0x85   :  { %128 = vst.msk [vmem:[%s296_s1 + $0x45] ss:$-30 sm:$0x7] %vm3_vm0, %v93_v12   ;;  %129 = vst.msk [vmem:[%s296_s1 + $0xa9] ss:$-30 sm:$0x38] %vm3_vm0, %v93_v12  }
  0x86   :  { %130 = vst.msk [vmem:[%s296_s1 + $0xef] ss:$-30 sm:$0xc0] %vm3_vm0, %v93_v12  }

// kernel: decoder_block_forward.3
= control target key start
LH: loop header
LB: loop body
LE: loop exit
PB: predicated region body
PF: predicated region fallthrough
CT: control target
= control target key end

     0   :  { %s5947_s21 = smov 0   ;;  %s5949_s22 = smov 0   ;;  %s6782_s0 = inlined_call_operand.vmem [shape: f32[80,1], index: 0, kind: input, shape index: {}]   ;;  %s6783_s1 = inlined_call_operand.vmem [shape: bf16[2,10,120,16], index: 1, kind: input, shape index: {}, may-alias: {1,2,3}]   ;;  %s6784_s2 = inlined_call_operand.vmem [shape: bf16[2,10,120,16], index: 2, kind: input, shape index: {}, may-alias: {1,2,3}]   ;;  %s6785_s3 = inlined_call_operand.vmem [shape: bf16[2,10,120,16], index: 3, kind: input, shape index: {}, may-alias: {1,2,3}]   ;;  %s6786_s4 = inlined_call_operand.vmem [shape: bf16[27,16,8], index: 4, kind: input, shape index: {}]   ;;  %s6787_s5 = inlined_call_operand.vmem [shape: bf16[2,8,80,8], index: 5, kind: output, shape index: {0}]   ;;  %s6788_s6 = inlined_call_operand.vmem [shape: f32[2,8,2,8], index: 6, kind: output, shape index: {1}]  }
   0x1   :  { %s5951_s23 = smov 0   ;;  %s5953_s24 = smov 0  }
   0x2   :  { %s5955_s25 = smov 0  }
   0x3 LB: > { %s26_s26 = sadd.s32 1, %s5899_s23  ;;  %s29_s27 = sadd.s32 1, %s5903_s24  ;;  %s5907_s25 = sphi %s5955_s25, %s17_s25   ;;  %s5903_s24 = sphi %s5953_s24, %s6792_s24   ;;  %s5899_s23 = sphi %s5951_s23, %s6791_s23   ;;  %s5895_s22 = sphi %s5949_s22, %s6790_s22   ;;  %s5891_s21 = sphi %s5947_s21, %s6789_s21  }
   0x4   : > { %p27_p0 = scmp.ge.s32.totalorder %s26_s26, 8  ;;  %p4177_p1 = scmp.ge.s32.totalorder %s5907_s25, 1 }
   0x5   : > { %p277_p2 = scmp.lt.s32.totalorder %s5907_s25, 17 }
   0x6   : > { %s6794_s26 = smov (%p27_p0, %s26_s26), 0  ;;  %s6796_s27 = smov (!%p27_p0, %s29_s27), %s5903_s24 }
   0x7   : > { %p278_p3 = pnand %p4177_p1, %p277_p2  ;;  %p31_p4 = scmp.ge.s32.totalorder %s6796_s27, 2 }
   0x8   : > { %v5841_v0 = vld [vmem:[%s6786_s4 + $0x8] sm:$0xff] (!%p278_p3)   ;;  %v5909_v1 = vmov (!%p278_p3), 0.0   ;;  %vm5910_vm0 = vmmov (!%p278_p3), 0   ;;  %p343_p5 = scmp.lt.s32.totalorder (!%p278_p3), %s5895_s22, 1  ;;  %p345_p6 = scmp.lt.s32.totalorder (!%p278_p3), %s5891_s21, 9  ;;  %vm422_vm1 = vcmask (!%p278_p3), 130048  }
   0x9   : > { %s6798_s27 = smov (%p31_p4, %s6796_s27), 0  ;;  %281 = sbr.rel (%p278_p3) target bundleno = 816 (0x330), region = 40 }
   0xa   : > { %4684 = vmatprep.subr.bf16.mxu1 (!%p278_p3), %v5909_v1  ;;  %4970 = vmatprep.subr.bf16.mxu0 (!%p278_p3), %v5909_v1  ;;  %v5842_v2 = vld [vmem:[%s6786_s4 + $0x68] sm:$0xff] (!%p278_p3)   ;;  %s352_s11 = sadd.s32 (!%p278_p3), 1, %s5891_s21  ;;  %v5844_v20 = vld [vmem:[%s6786_s4] sm:$0xff] (!%p278_p3)   ;;  %v5843_v47 = vld [vmem:[%s6786_s4 + $0x70] sm:$0xff] (!%p278_p3)   ;;  %p376_p9 = scmp.lt.s32.totalorder (!%p278_p3), %s5891_s21, 7  ;;  %vm3843_vm2 = vcmask (!%p278_p3), 60416  }
   0xb   : > { %4685 = vmatpush3.bf16.msra.mxu1 (!%p278_p3), %v5841_v0  ;;  %4686 = vmatprep.mubr.msk.bf16.mxu1 (!%p278_p3), %vm5910_vm0, %v5909_v1  ;;  %p355_p7 = scmp.lt.s32.totalorder (!%p278_p3), %s352_s11, 9  ;;  %vm3924_vm3 = vcmask (!%p278_p3), 64512   ;;  %vm3985_vm4 = vcmask (!%p278_p3), 1040384   ;;  %vm3987_vm5 = vcmask (!%p278_p3), 58368  }
   0xc   : > { %4971 = vmatpush3.bf16.msra.mxu0 (!%p278_p3), %v5842_v2  ;;  %4972 = vmatprep.mubr.msk.bf16.mxu0 (!%p278_p3), %vm5910_vm0, %v5909_v1 }
   0xd   : > { %4992 = vmatprep.subr.bf16.mxu0 (!%p278_p3), %v5909_v1  ;;  %4706 = vmatprep.subr.bf16.mxu1 (!%p278_p3), %v5909_v1 }
  0x10   : > { %s6800_s22 = smov (!%p343_p5, %s5895_s22), 1  ;;  %s6802_s11 = smov (!%p355_p7, %s352_s11), 9 }
  0x11   : > { %s346_s8 = scalar_select %p345_p6, %s5891_s21, 9 }
  0x12   : > { %s5998_s9 = smul.u32 150, %s6800_s22 }
  0x13   : > { %s5790_s10 = smul.u32 15, %s346_s8  ;;  %s4182_s8 = sshll.u32 %s6800_s22, 3 }
  0x14   : > { %s5792_s17 = smul.u32 15, %s6802_s11  ;;  %s363_s11 = sadd.s32 2, %s5891_s21 }
  0x15   : > { %s349_s12 = sadd.s32 %s5998_s9, %s5790_s10  ;;  %p366_p8 = scmp.lt.s32.totalorder %s363_s11, 9 }
  0x16   : > { %s4178_s13 = sshll.u32 %s349_s12, 2  ;;  %s359_s18 = sadd.s32 %s5792_s17, %s5998_s9 }
  0x17   : > { %s6005_s16 = scalar_lea.vmem %s6783_s1, %s4178_s13  ;;  %s4179_s19 = sshll.u32 %s359_s18, 2 }
  0x18   : > { %v4421_v3 = vld [vmem:[%s6005_s16] sm:$0xff]   ;;  %v4504_v4 = vld [vmem:[%s6005_s16 + $0x8] sm:$0xff]   ;;  %v4505_v8 = vld [vmem:[%s6005_s16 + $0x10] sm:$0xff]   ;;  %s6028_s29 = scalar_lea.vmem %s6784_s2, %s4179_s19  ;;  %s6804_s11 = smov (!%p366_p8, %s363_s11), 9 }
  0x19   : > { %v4423_v5 = vunpack.c.h.bf16 %v4421_v3  ;;  %v4426_v6 = vunpack.c.l.bf16 %v4504_v4  ;;  %v4427_v7 = vunpack.c.h.bf16 %v4504_v4  ;;  %v4506_v9 = vld [vmem:[%s6005_s16 + $0x18] sm:$0xff]   ;;  %v4507_v10 = vld [vmem:[%s6005_s16 + $0x20] sm:$0xff]   ;;  %v4430_v11 = vunpack.c.l.bf16 %v4505_v8  ;;  %v4508_v14 = vld [vmem:[%s6005_s16 + $0x28] sm:$0xff]   ;;  %s6806_s21 = smov (!%p376_p9, %s5891_s21), 7 }
  0x1a   : > { %v4431_v12 = vunpack.c.h.bf16 %v4505_v8  ;;  %v4434_v13 = vunpack.c.l.bf16 %v4506_v9  ;;  %v4435_v15 = vunpack.c.h.bf16 %v4506_v9  ;;  %v4438_v16 = vunpack.c.l.bf16 %v4507_v10  ;;  %v4510_v21 = vld [vmem:[%s6028_s29 + $0x8] sm:$0xff]   ;;  %v4511_v22 = vld [vmem:[%s6028_s29 + $0x10] sm:$0xff]   ;;  %v4512_v28 = vld [vmem:[%s6028_s29 + $0x18] sm:$0xff]   ;;  %s5794_s19 = smul.u32 10, %s6806_s21  ;;  %s388_s10 = sadd.s32 %s4182_s8, %s6806_s21 }
  0x1b   : > { %424 = vst.msk [vmem:[#allocation2 + $0x8] sm:$0xff] %vm422_vm1, %v4423_v5  ;;  %425 = vst.msk [vmem:[#allocation2 + $0x10] sm:$0xff] %vm422_vm1, %v4426_v6  ;;  %v4439_v17 = vunpack.c.h.bf16 %v4507_v10  ;;  %v4442_v18 = vunpack.c.l.bf16 %v4508_v14  ;;  %v4443_v19 = vunpack.c.h.bf16 %v4508_v14  ;;  %v4454_v25 = vunpack.c.l.bf16 %v4510_v21  ;;  %v4513_v33 = vld [vmem:[%s6028_s29 + $0x20] sm:$0xff]   ;;  %v4514_v38 = vld [vmem:[%s6028_s29 + $0x28] sm:$0xff]  }
  0x1c   : > { %426 = vst.msk [vmem:[#allocation2 + $0x18] sm:$0xff] %vm422_vm1, %v4427_v7  ;;  %427 = vst.msk [vmem:[#allocation2 + $0x20] sm:$0xff] %vm422_vm1, %v4430_v11  ;;  %v4455_v26 = vunpack.c.h.bf16 %v4510_v21  ;;  %v4458_v27 = vunpack.c.l.bf16 %v4511_v22  ;;  %v4459_v30 = vunpack.c.h.bf16 %v4511_v22  ;;  %v4462_v31 = vunpack.c.l.bf16 %v4512_v28  ;;  %v4515_v41 = vld [vmem:[%s6028_s29 + $0x30] sm:$0xff]   ;;  %v5845_v6 = vld [vmem:[%s6786_s4 + $0x78] sm:$0xff]  }
  0x1d   : > { %428 = vst.msk [vmem:[#allocation2 + $0x28] sm:$0xff] %vm422_vm1, %v4431_v12  ;;  %429 = vst.msk [vmem:[#allocation2 + $0x30] sm:$0xff] %vm422_vm1, %v4434_v13  ;;  %v4463_v32 = vunpack.c.h.bf16 %v4512_v28  ;;  %v4466_v34 = vunpack.c.l.bf16 %v4513_v33  ;;  %v4467_v35 = vunpack.c.h.bf16 %v4513_v33  ;;  %v4470_v39 = vunpack.c.l.bf16 %v4514_v38  ;;  %v6072_v59 = vld [vmem:[%s6005_s16 + $0x30] sm:$0xff]   ;;  %s5793_s16 = smul.u32 15, %s6804_s11  ;;  %s4183_s11 = sshll.u32 %s388_s10, 1 }
  0x1e   : > { %430 = vst.msk [vmem:[#allocation2 + $0x38] sm:$0xff] %vm422_vm1, %v4435_v15  ;;  %431 = vst.msk [vmem:[#allocation2 + $0x40] sm:$0xff] %vm422_vm1, %v4438_v16  ;;  %v4471_v40 = vunpack.c.h.bf16 %v4514_v38  ;;  %v4474_v43 = vunpack.c.l.bf16 %v4515_v41  ;;  %v4475_v44 = vunpack.c.h.bf16 %v4515_v41  ;;  %v4446_v61 = vunpack.c.l.bf16 %v6072_v59  ;;  %v5846_v13 = vld [vmem:[%s6786_s4 + $0x10] sm:$0xff]   ;;  %s390_s14 = scalar_lea.vmem %s6788_s6, %s4183_s11 }
  0x1f   : > { %432 = vst.msk [vmem:[#allocation2 + $0x48] sm:$0xff] %vm422_vm1, %v4439_v17  ;;  %433 = vst.msk [vmem:[#allocation2 + $0x50] sm:$0xff] %vm422_vm1, %v4442_v18  ;;  %s370_s17 = sadd.s32 %s5793_s16, %s5998_s9  ;;  %s5795_s9 = smul.u32 80, %s6800_s22 }
  0x20   : > { %434 = vst.msk [vmem:[#allocation2 + $0x58] sm:$0xff] %vm422_vm1, %v4443_v19  ;;  %471 = vst.msk [vmem:[#allocation2 + $0x88] sm:$0xff] %vm422_vm1, %v4454_v25  ;;  %s4180_s18 = sshll.u32 %s370_s17, 2 }
  0x21   : > { %472 = vst.msk [vmem:[#allocation2 + $0x90] sm:$0xff] %vm422_vm1, %v4455_v26  ;;  %473 = vst.msk [vmem:[#allocation2 + $0x98] sm:$0xff] %vm422_vm1, %v4458_v27  ;;  %s6132_s20 = scalar_lea.vmem %s6785_s3, %s4180_s18  ;;  %s380_s28 = sadd.s32 %s5795_s9, %s5794_s19 }
  0x22   : > { %v547_v23 = vld [vmem:[#allocation2 + $0xa] sm:$0xff]  ;;  %474 = vst.msk [vmem:[#allocation2 + $0xa0] sm:$0xff] %vm422_vm1, %v4459_v30  ;;  %475 = vst.msk [vmem:[#allocation2 + $0xa8] sm:$0xff] %vm422_vm1, %v4462_v31  ;;  %v4477_v25 = vld [vmem:[%s6132_s20] sm:$0xff]  }
  0x23   : > { %v548_v24 = vld [vmem:[#allocation2 + $0x12] sm:$0xff]  ;;  %476 = vst.msk [vmem:[#allocation2 + $0xb0] sm:$0xff] %vm422_vm1, %v4463_v32  ;;  %v549_v36 = vld [vmem:[#allocation2 + $0x1a] sm:$0xff]  ;;  %477 = vst.msk [vmem:[#allocation2 + $0xb8] sm:$0xff] %vm422_vm1, %v4466_v34  ;;  %v4479_v28 = vunpack.c.h.bf16 %v4477_v25 }
  0x24   : > { %v557_v29 = vpack.c.bf16 %v548_v24, %v547_v23  ;;  %v550_v37 = vld [vmem:[#allocation2 + $0x22] sm:$0xff]  ;;  %478 = vst.msk [vmem:[#allocation2 + $0xc0] sm:$0xff] %vm422_vm1, %v4467_v35  ;;  %479 = vst.msk [vmem:[#allocation2 + $0xc8] sm:$0xff] %vm422_vm1, %v4470_v39  ;;  %v551_v49 = vld [vmem:[#allocation2 + $0x2a] sm:$0xff] }
  0x25   : > { %v558_v42 = vpack.c.bf16 %v550_v37, %v549_v36  ;;  %480 = vst.msk [vmem:[#allocation2 + $0xd0] sm:$0xff] %vm422_vm1, %v4471_v40  ;;  %481 = vst.msk [vmem:[#allocation2 + $0xd8] sm:$0xff] %vm422_vm1, %v4474_v43  ;;  %v552_v50 = vld [vmem:[#allocation2 + $0x32] sm:$0xff]  ;;  %v553_v55 = vld [vmem:[#allocation2 + $0x3a] sm:$0xff] }
  0x26   : > { %4687 = vmatmul.mubr.msk.bf16.vlgmr.msra.gmra.mrb[0].mxu1 %vm422_vm1, %v557_v29  ;;  %482 = vst.msk [vmem:[#allocation2 + $0xe0] sm:$0xff] %vm422_vm1, %v4475_v44  ;;  %v559_v53 = vpack.c.bf16 %v552_v50, %v551_v49  ;;  %v554_v56 = vld [vmem:[#allocation2 + $0x42] sm:$0xff]  ;;  %435 = vst.msk [vmem:[#allocation2 + $0x60] sm:$0xff] %vm422_vm1, %v4446_v61  ;;  %v555_v63 = vld [vmem:[#allocation2 + $0x4a] sm:$0xff] }
  0x27   : > { %4690 = vmatprep.mubr.msk.bf16.mxu1 %vm5910_vm0, %v5909_v1  ;;  %4707 = vmatpush3.bf16.msra.mxu1 %v5844_v20  ;;  %v560_v60 = vpack.c.bf16 %v554_v56, %v553_v55  ;;  %v556_v0 = vld [vmem:[#allocation2 + $0x52] sm:$0xff]  ;;  %v530_v7 = vld [vmem:[#allocation2 + $0x9] sm:$0xff]  ;;  %v533_v15 = vld [vmem:[#allocation2 + $0x21] sm:$0xff]  ;;  %516 = vst.msk [vmem:[#allocation2 + $0xf8] sm:$0xff] %vm422_vm1, %v4479_v28 }
  0x28   : > { %4728 = vmatprep.subr.bf16.mxu1 %v5909_v1  ;;  %v2095_v45 = vld [vmem:[#allocation2 + $0x8c] sm:$0xff]  ;;  %v2096_v46 = vld [vmem:[#allocation2 + $0x94] sm:$0xff]  ;;  %v561_v4 = vpack.c.bf16 %v556_v0, %v555_v63  ;;  %v537_v32 = vld [vmem:[#allocation2 + $0x41] sm:$0xff] }
  0x29   : > { %v2105_v48 = vpack.c.bf16 %v2096_v46, %v2095_v45  ;;  %v2097_v51 = vld [vmem:[#allocation2 + $0x9c] sm:$0xff]  ;;  %v2098_v52 = vld [vmem:[#allocation2 + $0xa4] sm:$0xff]  ;;  %v2217_v2 = vld [vmem:[#allocation2 + $0x8d] sm:$0xff] }
  0x2a   : > { %v2106_v54 = vpack.c.bf16 %v2098_v52, %v2097_v51  ;;  %v2099_v57 = vld [vmem:[#allocation2 + $0xac] sm:$0xff]  ;;  %v2100_v58 = vld [vmem:[#allocation2 + $0xb4] sm:$0xff]  ;;  %v6095_v9 = vld [vmem:[#allocation2 + $0x9d] sm:$0xff] }
  0x2b   : > { %4973 = vmatmul.mubr.msk.bf16.vlgmr.msra.gmra.mrb[0].mxu0 %vm422_vm1, %v2105_v48  ;;  %v2107_v62 = vpack.c.bf16 %v2100_v58, %v2099_v57  ;;  %v6082_v3 = vld [vmem:[#allocation2 + $0x95] sm:$0xff]  ;;  %v6097_v10 = vld [vmem:[#allocation2 + $0xa5] sm:$0xff]  ;;  %v6111_v16 = vld [vmem:[#allocation2 + $0xad] sm:$0xff] }
  0x2c   : > { %4993 = vmatpush3.bf16.msra.mxu0 %v5843_v47  ;;  %4976 = vmatprep.mubr.msk.bf16.mxu0 %vm5910_vm0, %v5909_v1  ;;  %v2227_v5 = vpack.c.bf16 %v6082_v3, %v2217_v2  ;;  %v531_v8 = vld [vmem:[#allocation2 + $0x11] sm:$0xff]  ;;  %v2228_v12 = vpack.c.bf16 %v6097_v10, %v6095_v9  ;;  %v532_v14 = vld [vmem:[#allocation2 + $0x19] sm:$0xff]  ;;  %v534_v20 = vld [vmem:[#allocation2 + $0x29] sm:$0xff]  ;;  %v2349_v44 = vpack.c.bf16 %v6095_v9, %v6082_v3 }
  0x2d   : > { %5014 = vmatprep.subr.bf16.mxu0 %v5909_v1  ;;  %v540_v11 = vpack.c.bf16 %v531_v8, %v530_v7  ;;  %v6113_v17 = vld [vmem:[#allocation2 + $0xb5] sm:$0xff]  ;;  %v541_v18 = vpack.c.bf16 %v533_v15, %v532_v14  ;;  %v6125_v22 = vld [vmem:[#allocation2 + $0xbd] sm:$0xff]  ;;  %v6127_v23 = vld [vmem:[#allocation2 + $0xc5] sm:$0xff]  ;;  %v2350_v52 = vpack.c.bf16 %v6111_v16, %v6097_v10 }
  0x2e   : > { %4691 = vmatmul.mubr.msk.bf16.gmra.mrb[4].mxu1 %vm422_vm1, %v558_v42  ;;  %v2229_v19 = vpack.c.bf16 %v6113_v17, %v6111_v16  ;;  %v535_v21 = vld [vmem:[#allocation2 + $0x31] sm:$0xff]  ;;  %v4516_v26 = vld [vmem:[%s6132_s20 + $0x8] sm:$0xff]   ;;  %v2230_v27 = vpack.c.bf16 %v6127_v23, %v6125_v22  ;;  %v536_v31 = vld [vmem:[#allocation2 + $0x39] sm:$0xff]  ;;  %v2351_v61 = vpack.c.bf16 %v6125_v22, %v6113_v17 }
  0x2f   : > { %4694 = vmatprep.mubr.msk.bf16.mxu1 %vm5910_vm0, %v5909_v1  ;;  %v542_v24 = vpack.c.bf16 %v535_v21, %v534_v20  ;;  %v4482_v29 = vunpack.c.l.bf16 %v4516_v26  ;;  %v4483_v30 = vunpack.c.h.bf16 %v4516_v26  ;;  %v6147_v33 = vld [vmem:[#allocation2 + $0xcd] sm:$0xff]  ;;  %v6149_v34 = vld [vmem:[#allocation2 + $0xd5] sm:$0xff]  ;;  %v543_v35 = vpack.c.bf16 %v537_v32, %v536_v31  ;;  %v5847_v47 = vld [vmem:[%s6786_s4 + $0x80] sm:$0xff]  }
  0x30   : > { %v4517_v36 = vld [vmem:[%s6132_s20 + $0x10] sm:$0xff]   ;;  %v2231_v37 = vpack.c.bf16 %v6149_v34, %v6147_v33  ;;  %v4518_v43 = vld [vmem:[%s6132_s20 + $0x18] sm:$0xff]   ;;  %v4519_v51 = vld [vmem:[%s6132_s20 + $0x20] sm:$0xff]  }
  0x31   : > { %517 = vst.msk [vmem:[#allocation2 + $0x100] sm:$0xff] %vm422_vm1, %v4482_v29  ;;  %518 = vst.msk [vmem:[#allocation2 + $0x108] sm:$0xff] %vm422_vm1, %v4483_v30  ;;  %v4486_v38 = vunpack.c.l.bf16 %v4517_v36  ;;  %v4487_v39 = vunpack.c.h.bf16 %v4517_v36  ;;  %v538_v40 = vld [vmem:[#allocation2 + $0x49] sm:$0xff]  ;;  %v539_v41 = vld [vmem:[#allocation2 + $0x51] sm:$0xff]  ;;  %v4490_v45 = vunpack.c.l.bf16 %v4518_v43  ;;  %v4491_v46 = vunpack.c.h.bf16 %v4518_v43 }
  0x32   : > { %v544_v42 = vpack.c.bf16 %v539_v41, %v538_v40  ;;  %v753_v48 = vld [vmem:[#allocation2 + $0xb] sm:$0xff]  ;;  %v6174_v49 = vld [vmem:[#allocation2 + $0x13] sm:$0xff]  ;;  %v755_v56 = vld [vmem:[#allocation2 + $0x1b] sm:$0xff] }
  0x33   : > { %4977 = vmatmul.mubr.msk.bf16.gmra.mrb[4].mxu0 %vm422_vm1, %v2106_v54  ;;  %519 = vst.msk [vmem:[#allocation2 + $0x110] sm:$0xff] %vm422_vm1, %v4486_v38  ;;  %520 = vst.msk [vmem:[#allocation2 + $0x118] sm:$0xff] %vm422_vm1, %v4487_v39  ;;  %v763_v50 = vpack.c.bf16 %v6174_v49, %v753_v48  ;;  %v4495_v54 = vunpack.c.h.bf16 %v4519_v51  ;;  %v5848_v55 = vld [vmem:[%s6786_s4 + $0x18] sm:$0xff]   ;;  %v756_v57 = vld [vmem:[#allocation2 + $0x23] sm:$0xff] }
  0x34   : > { %4980 = vmatprep.mubr.msk.bf16.mxu0 %vm5910_vm0, %v5909_v1  ;;  %521 = vst.msk [vmem:[#allocation2 + $0x120] sm:$0xff] %vm422_vm1, %v4490_v45  ;;  %522 = vst.msk [vmem:[#allocation2 + $0x128] sm:$0xff] %vm422_vm1, %v4491_v46  ;;  %v764_v58 = vpack.c.bf16 %v756_v57, %v755_v56  ;;  %v757_v0 = vld [vmem:[#allocation2 + $0x2b] sm:$0xff]  ;;  %v758_v2 = vld [vmem:[#allocation2 + $0x33] sm:$0xff] }
  0x35   : > { %524 = vst.msk [vmem:[#allocation2 + $0x138] sm:$0xff] %vm422_vm1, %v4495_v54  ;;  %v765_v3 = vpack.c.bf16 %v758_v2, %v757_v0  ;;  %v2348_v7 = vld [vmem:[#allocation2 + $0xdd] sm:$0xff]  ;;  %v761_v10 = vld [vmem:[#allocation2 + $0x4b] sm:$0xff]  ;;  %v997_v40 = vld [vmem:[#allocation2 + $0x14] sm:$0xff] }
  0x36   : > { %4695 = vmatmul.mubr.msk.bf16.gmra.mrb[8].mxu1 %vm422_vm1, %v559_v53  ;;  %v4494_v53 = vunpack.c.l.bf16 %v4519_v51  ;;  %v2353_v9 = vpack.c.bf16 %v2348_v7, %v6149_v34  ;;  %v5849_v16 = vld [vmem:[%s6786_s4 + $0x88] sm:$0xff]   ;;  %v5850_v21 = vld [vmem:[%s6786_s4 + $0x20] sm:$0xff]   ;;  %v2465_v22 = vld [vmem:[#allocation2 + $0xb6] sm:$0xff] }
  0x37   : > { %4698 = vmatprep.mubr.msk.bf16.mxu1 %vm5910_vm0, %v5909_v1  ;;  %v2463_v17 = vld [vmem:[#allocation2 + $0xa6] sm:$0xff]  ;;  %v2469_v30 = vld [vmem:[#allocation2 + $0xd6] sm:$0xff]  ;;  %v2470_v31 = vld [vmem:[#allocation2 + $0xde] sm:$0xff] }
  0x38   : > { %523 = vst.msk [vmem:[#allocation2 + $0x130] sm:$0xff] %vm422_vm1, %v4494_v53  ;;  %v2467_v26 = vld [vmem:[#allocation2 + $0xc6] sm:$0xff]  ;;  %v2475_v34 = vpack.c.bf16 %v2470_v31, %v2469_v30  ;;  %v2583_v36 = vld [vmem:[#allocation2 + $0x97] sm:$0xff]  ;;  %v2586_v43 = vld [vmem:[#allocation2 + $0xaf] sm:$0xff] }
  0x39   : > { %v998_v41 = vld [vmem:[#allocation2 + $0x1c] sm:$0xff]  ;;  %v5852_v46 = vld [vmem:[%s6786_s4 + $0x28] sm:$0xff]   ;;  %v1001_v53 = vld [vmem:[#allocation2 + $0x34] sm:$0xff] }
  0x3a   : > { %v1000_v48 = vld [vmem:[#allocation2 + $0x2c] sm:$0xff]  ;;  %v1002_v54 = vld [vmem:[#allocation2 + $0x3c] sm:$0xff] }
  0x3b   : > { %4981 = vmatmul.mubr.msk.bf16.gmra.mrb[8].mxu0 %vm422_vm1, %v2107_v62  ;;  %v1125_v31 = vld [vmem:[#allocation2 + $0x45] sm:$0xff] }
  0x3c   : > { %4994 = vmatprep.mubr.msk.bf16.mxu0 %vm5910_vm0, %v5909_v1 }
  0x3e   : > { %4699 = vmatmul.mubr.msk.bf16.gmra.mrb[12].mxu1 %vm422_vm1, %v560_v60  ;;  %v4520_v60 = vld [vmem:[%s6132_s20 + $0x28] sm:$0xff]  }
  0x3f   : > { %4702 = vmatprep.mubr.msk.bf16.mxu1 %vm5910_vm0, %v5909_v1  ;;  %v4498_v62 = vunpack.c.l.bf16 %v4520_v60  ;;  %v4499_v63 = vunpack.c.h.bf16 %v4520_v60  ;;  %v1003_v60 = vld [vmem:[#allocation2 + $0x44] sm:$0xff] }
  0x41   : > { %525 = vst.msk [vmem:[#allocation2 + $0x140] sm:$0xff] %vm422_vm1, %v4498_v62  ;;  %526 = vst.msk [vmem:[#allocation2 + $0x148] sm:$0xff] %vm422_vm1, %v4499_v63  ;;  %v2591_v62 = vld [vmem:[#allocation2 + $0xd7] sm:$0xff]  ;;  %v2592_v63 = vld [vmem:[#allocation2 + $0xdf] sm:$0xff] }
  0x43   : > { %4995 = vmatmul.mubr.msk.bf16.vlgmr.msra.gmra.mrb[0].mxu0 %vm422_vm1, %v2227_v5  ;;  %v759_v5 = vld [vmem:[#allocation2 + $0x3b] sm:$0xff] }
  0x44   : > { %5015 = vmatpush3.bf16.msra.mxu0 %v5845_v6  ;;  %4998 = vmatprep.mubr.msk.bf16.mxu0 %vm5910_vm0, %v5909_v1  ;;  %v760_v6 = vld [vmem:[#allocation2 + $0x43] sm:$0xff]  ;;  %v887_v28 = vpack.c.bf16 %v759_v5, %v758_v2  ;;  %v2597_v2 = vpack.c.bf16 %v2592_v63, %v2591_v62 }
  0x45   : > { %5036 = vmatprep.subr.bf16.mxu0 %v5909_v1  ;;  %v766_v8 = vpack.c.bf16 %v760_v6, %v759_v5  ;;  %v888_v32 = vpack.c.bf16 %v761_v10, %v760_v6  ;;  %v2705_v5 = vld [vmem:[#allocation2 + $0xf9] sm:$0xff]  ;;  %v2706_v6 = vld [vmem:[#allocation2 + $0x101] sm:$0xff] }
  0x46   : > { %4703 = vmatmul.mubr.msk.bf16.gmra.mrb[16].mxu1 %vm422_vm1, %v561_v4  ;;  %v2352_v4 = vpack.c.bf16 %v6147_v33, %v6127_v23  ;;  %v2466_v23 = vld [vmem:[#allocation2 + $0xbe] sm:$0xff]  ;;  %v4447_v33 = vunpack.c.h.bf16 %v6072_v59  ;;  %v5851_v59 = vld [vmem:[%s6786_s4 + $0x90] sm:$0xff]  }
  0x47   : > { %4708 = vmatprep.mubr.msk.bf16.mxu1 %vm5910_vm0, %v5909_v1  ;;  %v2473_v25 = vpack.c.bf16 %v2466_v23, %v2465_v22  ;;  %v6327_v22 = vld [vmem:[%s6132_s20 + $0x30] sm:$0xff]   ;;  %s4181_s20 = sshll.u32 %s380_s28, 2 }
  0x48   : > { %436 = vst.msk [vmem:[#allocation2 + $0x68] sm:$0xff] %vm422_vm1, %v4447_v33  ;;  %v2713_v33 = vld [vmem:[#allocation2 + $0x139] sm:$0xff]  ;;  %s6718_s7 = scalar_lea.vmem %s6787_s5, %s4181_s20 }
  0x4b   : > { %4999 = vmatmul.mubr.msk.bf16.gmra.mrb[4].mxu0 %vm422_vm1, %v2228_v12  ;;  %v2461_v12 = vld [vmem:[#allocation2 + $0x96] sm:$0xff] }
  0x4c   : > { %5002 = vmatprep.mubr.msk.bf16.mxu0 %vm5910_vm0, %v5909_v1 }
  0x4e   : > { %4709 = vmatmul.mubr.msk.bf16.vlgmr.msra.gmra.mrb[0].mxu1 %vm422_vm1, %v540_v11  ;;  %v762_v11 = vld [vmem:[#allocation2 + $0x53] sm:$0xff] }
  0x4f   : > { %4712 = vmatprep.mubr.msk.bf16.mxu1 %vm5910_vm0, %v5909_v1  ;;  %4729 = vmatpush3.bf16.msra.mxu1 %v5846_v13  ;;  %v2462_v13 = vld [vmem:[#allocation2 + $0x9e] sm:$0xff]  ;;  %v767_v14 = vpack.c.bf16 %v762_v11, %v761_v10  ;;  %v1119_v10 = vld [vmem:[#allocation2 + $0x15] sm:$0xff] }
  0x50   : > { %4750 = vmatprep.subr.bf16.mxu1 %v5909_v1  ;;  %v2471_v15 = vpack.c.bf16 %v2462_v13, %v2461_v12  ;;  %v2707_v12 = vld [vmem:[#allocation2 + $0x109] sm:$0xff]  ;;  %v2708_v13 = vld [vmem:[#allocation2 + $0x111] sm:$0xff] }
  0x51   : > { %v1250_v63 = vld [vmem:[#allocation2 + $0x65] sm:$0xff] }
  0x53   : > { %5003 = vmatmul.mubr.msk.bf16.gmra.mrb[8].mxu0 %vm422_vm1, %v2229_v19  ;;  %v885_v19 = vpack.c.bf16 %v755_v56, %v6174_v49  ;;  %v2587_v49 = vld [vmem:[#allocation2 + $0xb7] sm:$0xff]  ;;  %v2590_v56 = vld [vmem:[#allocation2 + $0xcf] sm:$0xff] }
  0x54   : > { %5006 = vmatprep.mubr.msk.bf16.mxu0 %vm5910_vm0, %v5909_v1 }
  0x56   : > { %4713 = vmatmul.mubr.msk.bf16.gmra.mrb[4].mxu1 %vm422_vm1, %v541_v18  ;;  %v2464_v18 = vld [vmem:[#allocation2 + $0xae] sm:$0xff] }
  0x57   : > { %4716 = vmatprep.mubr.msk.bf16.mxu1 %vm5910_vm0, %v5909_v1  ;;  %v2472_v20 = vpack.c.bf16 %v2464_v18, %v2463_v17  ;;  %v1121_v17 = vld [vmem:[#allocation2 + $0x25] sm:$0xff]  ;;  %v6320_v18 = vld [vmem:[#allocation2 + $0x2d] sm:$0xff] }
  0x5b   : > { %5007 = vmatmul.mubr.msk.bf16.gmra.mrb[12].mxu0 %vm422_vm1, %v2230_v27  ;;  %v2468_v27 = vld [vmem:[#allocation2 + $0xce] sm:$0xff] }
  0x5c   : > { %5010 = vmatprep.mubr.msk.bf16.mxu0 %vm5910_vm0, %v5909_v1  ;;  %v2474_v29 = vpack.c.bf16 %v2468_v27, %v2467_v26  ;;  %v1124_v26 = vld [vmem:[#allocation2 + $0x3d] sm:$0xff]  ;;  %v2711_v27 = vld [vmem:[#allocation2 + $0x129] sm:$0xff] }
  0x5e   : > { %4717 = vmatmul.mubr.msk.bf16.gmra.mrb[8].mxu1 %vm422_vm1, %v542_v24  ;;  %v886_v24 = vpack.c.bf16 %v757_v0, %v756_v57  ;;  %v1009_v57 = vpack.c.bf16 %v1002_v54, %v1001_v53  ;;  %v2833_v54 = vld [vmem:[#allocation2 + $0x12a] sm:$0xff] }
  0x5f   : > { %4720 = vmatprep.mubr.msk.bf16.mxu1 %vm5910_vm0, %v5909_v1 }
  0x63   : > { %5011 = vmatmul.mubr.msk.bf16.gmra.mrb[16].mxu0 %vm422_vm1, %v2231_v37  ;;  %v2584_v37 = vld [vmem:[#allocation2 + $0x9f] sm:$0xff] }
  0x64   : > { %5016 = vmatprep.mubr.msk.bf16.mxu0 %vm5910_vm0, %v5909_v1  ;;  %v2593_v39 = vpack.c.bf16 %v2584_v37, %v2583_v36  ;;  %v1127_v37 = vld [vmem:[#allocation2 + $0x55] sm:$0xff] }
  0x66   : > { %4721 = vmatmul.mubr.msk.bf16.gmra.mrb[12].mxu1 %vm422_vm1, %v543_v35  ;;  %v884_v35 = vld [vmem:[#allocation2 + $0x5b] sm:$0xff] }
  0x67   : > { %4724 = vmatprep.mubr.msk.bf16.mxu1 %vm5910_vm0, %v5909_v1  ;;  %v889_v38 = vpack.c.bf16 %v884_v35, %v762_v11  ;;  %v6307_v11 = vld [vmem:[#allocation2 + $0x1d] sm:$0xff] }
  0x6b   : > { %5017 = vmatmul.mubr.msk.bf16.vlgmr.msra.gmra.mrb[0].mxu0 %vm422_vm1, %v2349_v44  ;;  %v1007_v44 = vpack.c.bf16 %v998_v41, %v997_v40  ;;  %v4449_v40 = vld [vmem:[%s6028_s29] sm:$0xff]  }
  0x6c   : > { %5037 = vmatpush3.bf16.msra.mxu0 %v5847_v47  ;;  %5020 = vmatprep.mubr.msk.bf16.mxu0 %vm5910_vm0, %v5909_v1  ;;  %v999_v47 = vld [vmem:[#allocation2 + $0x24] sm:$0xff] }
  0x6d   : > { %5058 = vmatprep.subr.bf16.mxu0 %v5909_v1  ;;  %v1008_v51 = vpack.c.bf16 %v1000_v48, %v999_v47  ;;  %v1251_v47 = vpack.c.bf16 %v1121_v17, %v6307_v11 }
  0x6e   : > { %4725 = vmatmul.mubr.msk.bf16.gmra.mrb[16].mxu1 %vm422_vm1, %v544_v42  ;;  %v2585_v42 = vld [vmem:[#allocation2 + $0xa7] sm:$0xff] }
  0x6f   : > { %4730 = vmatprep.mubr.msk.bf16.mxu1 %vm5910_vm0, %v5909_v1  ;;  %v2594_v45 = vpack.c.bf16 %v2586_v43, %v2585_v42  ;;  %v4451_v42 = vunpack.c.h.bf16 %v4449_v40  ;;  %v5860_v40 = vld [vmem:[%s6786_s4 + $0x48] sm:$0xff]  }
  0x71   : > { %470 = vst.msk [vmem:[#allocation2 + $0x80] sm:$0xff] %vm422_vm1, %v4451_v42  ;;  %v1488_v42 = vld [vmem:[#allocation2 + $0x37] sm:$0xff] }
  0x73   : > { %5021 = vmatmul.mubr.msk.bf16.gmra.mrb[4].mxu0 %vm422_vm1, %v2350_v52 }
  0x74   : > { %5024 = vmatprep.mubr.msk.bf16.mxu0 %vm5910_vm0, %v5909_v1 }
  0x76   : > { %4731 = vmatmul.mubr.msk.bf16.vlgmr.msra.gmra.mrb[0].mxu1 %vm422_vm1, %v763_v50  ;;  %v2588_v50 = vld [vmem:[#allocation2 + $0xbf] sm:$0xff] }
  0x77   : > { %4734 = vmatprep.mubr.msk.bf16.mxu1 %vm5910_vm0, %v5909_v1  ;;  %4751 = vmatpush3.bf16.msra.mxu1 %v5848_v55  ;;  %v2595_v52 = vpack.c.bf16 %v2588_v50, %v2587_v49  ;;  %v2589_v55 = vld [vmem:[#allocation2 + $0xc7] sm:$0xff]  ;;  %v5856_v49 = vld [vmem:[%s6786_s4 + $0x38] sm:$0xff]  }
  0x78   : > { %4772 = vmatprep.subr.bf16.mxu1 %v5909_v1  ;;  %v2831_v50 = vld [vmem:[#allocation2 + $0x11a] sm:$0xff] }
  0x7b   : > { %5025 = vmatmul.mubr.msk.bf16.gmra.mrb[8].mxu0 %vm422_vm1, %v2351_v61  ;;  %v1004_v61 = vld [vmem:[#allocation2 + $0x4c] sm:$0xff] }
  0x7c   : > { %5028 = vmatprep.mubr.msk.bf16.mxu0 %vm5910_vm0, %v5909_v1  ;;  %v1010_v0 = vpack.c.bf16 %v1004_v61, %v1003_v60  ;;  %v2836_v60 = vld [vmem:[#allocation2 + $0x142] sm:$0xff] }
  0x7e   : > { %4735 = vmatmul.mubr.msk.bf16.gmra.mrb[4].mxu1 %vm422_vm1, %v764_v58  ;;  %v2596_v58 = vpack.c.bf16 %v2590_v56, %v2589_v55  ;;  %v2834_v55 = vld [vmem:[#allocation2 + $0x132] sm:$0xff]  ;;  %v1253_v56 = vpack.c.bf16 %v1125_v31, %v1124_v26 }
  0x7f   : > { %4738 = vmatprep.mubr.msk.bf16.mxu1 %vm5910_vm0, %v5909_v1 }
  0x83   : > { %5029 = vmatmul.mubr.msk.bf16.gmra.mrb[12].mxu0 %vm422_vm1, %v2352_v4  ;;  %v1006_v4 = vld [vmem:[#allocation2 + $0x5c] sm:$0xff] }
  0x84   : > { %5032 = vmatprep.mubr.msk.bf16.mxu0 %vm5910_vm0, %v5909_v1 }
  0x86   : > { %4739 = vmatmul.mubr.msk.bf16.gmra.mrb[8].mxu1 %vm422_vm1, %v765_v3  ;;  %v1005_v3 = vld [vmem:[#allocation2 + $0x54] sm:$0xff] }
  0x87   : > { %4742 = vmatprep.mubr.msk.bf16.mxu1 %vm5910_vm0, %v5909_v1  ;;  %v1011_v7 = vpack.c.bf16 %v1006_v4, %v1005_v3 }
  0x8b   : > { %5033 = vmatmul.mubr.msk.bf16.gmra.mrb[16].mxu0 %vm422_vm1, %v2353_v9  ;;  %v5853_v9 = vld [vmem:[%s6786_s4 + $0x98] sm:$0xff]  }
  0x8c   : > { %5038 = vmatprep.mubr.msk.bf16.mxu0 %vm5910_vm0, %v5909_v1 }
  0x8e   : > { %4743 = vmatmul.mubr.msk.bf16.gmra.mrb[12].mxu1 %vm422_vm1, %v766_v8  ;;  %v2715_v8 = vpack.c.bf16 %v2706_v6, %v2705_v5  ;;  %v5857_v5 = vld [vmem:[%s6786_s4 + $0xa8] sm:$0xff]   ;;  %v1363_v6 = vld [vmem:[#allocation2 + $0x1e] sm:$0xff] }
  0x8f   : > { %4746 = vmatprep.mubr.msk.bf16.mxu1 %vm5910_vm0, %v5909_v1 }
  0x93   : > { %5039 = vmatmul.mubr.msk.bf16.vlgmr.msra.gmra.mrb[0].mxu0 %vm422_vm1, %v2471_v15  ;;  %v2716_v15 = vpack.c.bf16 %v2708_v13, %v2707_v12  ;;  %v5858_v12 = vld [vmem:[%s6786_s4 + $0x40] sm:$0xff]   ;;  %v1365_v13 = vld [vmem:[#allocation2 + $0x2e] sm:$0xff] }
  0x94   : > { %5059 = vmatpush3.bf16.msra.mxu0 %v5849_v16  ;;  %5042 = vmatprep.mubr.msk.bf16.mxu0 %vm5910_vm0, %v5909_v1  ;;  %v5854_v16 = vld [vmem:[%s6786_s4 + $0x30] sm:$0xff]  }
  0x95   : > { %5080 = vmatprep.subr.bf16.mxu0 %v5909_v1 }
  0x96   : > { %4747 = vmatmul.mubr.msk.bf16.gmra.mrb[16].mxu1 %vm422_vm1, %v767_v14  ;;  %v1129_v14 = vpack.c.bf16 %v6307_v11, %v1119_v10 }
  0x97   : > { %4752 = vmatprep.mubr.msk.bf16.mxu1 %vm5910_vm0, %v5909_v1 }
  0x9b   : > { %5043 = vmatmul.mubr.msk.bf16.gmra.mrb[4].mxu0 %vm422_vm1, %v2472_v20  ;;  %v2710_v20 = vld [vmem:[#allocation2 + $0x121] sm:$0xff] }
  0x9c   : > { %5046 = vmatprep.mubr.msk.bf16.mxu0 %vm5910_vm0, %v5909_v1 }
  0x9e   : > { %4753 = vmatmul.mubr.msk.bf16.vlgmr.msra.gmra.mrb[0].mxu1 %vm422_vm1, %v885_v19  ;;  %v2709_v19 = vld [vmem:[#allocation2 + $0x119] sm:$0xff] }
  0x9f   : > { %4756 = vmatprep.mubr.msk.bf16.mxu1 %vm5910_vm0, %v5909_v1  ;;  %4773 = vmatpush3.bf16.msra.mxu1 %v5850_v21  ;;  %v1130_v21 = vpack.c.bf16 %v6320_v18, %v1121_v17  ;;  %v2717_v23 = vpack.c.bf16 %v2710_v20, %v2709_v19  ;;  %v1367_v19 = vld [vmem:[#allocation2 + $0x3e] sm:$0xff]  ;;  %v1368_v20 = vld [vmem:[#allocation2 + $0x46] sm:$0xff] }
  0xa0   : > { %4794 = vmatprep.subr.bf16.mxu1 %v5909_v1 }
  0xa3   : > { %5047 = vmatmul.mubr.msk.bf16.gmra.mrb[8].mxu0 %vm422_vm1, %v2473_v25  ;;  %v1123_v25 = vld [vmem:[#allocation2 + $0x35] sm:$0xff] }
  0xa4   : > { %5050 = vmatprep.mubr.msk.bf16.mxu0 %vm5910_vm0, %v5909_v1 }
  0xa6   : > { %4757 = vmatmul.mubr.msk.bf16.gmra.mrb[4].mxu1 %vm422_vm1, %v886_v24  ;;  %v4502_v24 = vunpack.c.l.bf16 %v6327_v22 }
  0xa7   : > { %4760 = vmatprep.mubr.msk.bf16.mxu1 %vm5910_vm0, %v5909_v1 }
  0xa8   : > { %527 = vst.msk [vmem:[#allocation2 + $0x150] sm:$0xff] %vm422_vm1, %v4502_v24  ;;  %v1375_v24 = vpack.c.bf16 %v1368_v20, %v1367_v19  ;;  %v1614_v19 = vld [vmem:[#allocation2 + $0xb9] sm:$0xff]  ;;  %v3201_v20 = vld [vmem:[#allocation2 + $0x144] sm:$0xff] }
  0xab   : > { %5051 = vmatmul.mubr.msk.bf16.gmra.mrb[12].mxu0 %vm422_vm1, %v2474_v29  ;;  %v1131_v29 = vpack.c.bf16 %v1124_v26, %v1123_v25  ;;  %v1369_v26 = vld [vmem:[#allocation2 + $0x4e] sm:$0xff] }
  0xac   : > { %5054 = vmatprep.mubr.msk.bf16.mxu0 %vm5910_vm0, %v5909_v1 }
  0xae   : > { %4761 = vmatmul.mubr.msk.bf16.gmra.mrb[8].mxu1 %vm422_vm1, %v887_v28  ;;  %v2712_v28 = vld [vmem:[#allocation2 + $0x131] sm:$0xff] }
  0xaf   : > { %4764 = vmatprep.mubr.msk.bf16.mxu1 %vm5910_vm0, %v5909_v1  ;;  %v2718_v30 = vpack.c.bf16 %v2712_v28, %v2711_v27  ;;  %v1370_v27 = vld [vmem:[#allocation2 + $0x56] sm:$0xff] }
  0xb0   : > { %v2957_v28 = vld [vmem:[#allocation2 + $0x13b] sm:$0xff] }
  0xb3   : > { %5055 = vmatmul.mubr.msk.bf16.gmra.mrb[16].mxu0 %vm422_vm1, %v2475_v34  ;;  %v2714_v34 = vld [vmem:[#allocation2 + $0x141] sm:$0xff] }
  0xb4   : > { %5060 = vmatprep.mubr.msk.bf16.mxu0 %vm5910_vm0, %v5909_v1  ;;  %v2719_v36 = vpack.c.bf16 %v2714_v34, %v2713_v33  ;;  %v1372_v33 = vld [vmem:[#allocation2 + $0x66] sm:$0xff] }
  0xb6   : > { %4765 = vmatmul.mubr.msk.bf16.gmra.mrb[12].mxu1 %vm422_vm1, %v888_v32  ;;  %v1126_v32 = vld [vmem:[#allocation2 + $0x4d] sm:$0xff] }
  0xb7   : > { %4768 = vmatprep.mubr.msk.bf16.mxu1 %vm5910_vm0, %v5909_v1  ;;  %v1132_v35 = vpack.c.bf16 %v1126_v32, %v1125_v31  ;;  %v1254_v61 = vpack.c.bf16 %v1127_v37, %v1126_v32  ;;  %v1371_v32 = vld [vmem:[#allocation2 + $0x5e] sm:$0xff] }
  0xb8   : > { %v1377_v34 = vpack.c.bf16 %v1372_v33, %v1371_v32  ;;  %v1729_v32 = vld [vmem:[#allocation2 + $0x82] sm:$0xff]  ;;  %v1730_v33 = vld [vmem:[#allocation2 + $0x8a] sm:$0xff] }
  0xbb   : > { %5061 = vmatmul.mubr.msk.bf16.vlgmr.msra.gmra.mrb[0].mxu0 %vm422_vm1, %v2593_v39  ;;  %v2827_v39 = vld [vmem:[#allocation2 + $0xfa] sm:$0xff] }
  0xbc   : > { %5081 = vmatpush3.bf16.msra.mxu0 %v5851_v59  ;;  %5064 = vmatprep.mubr.msk.bf16.mxu0 %vm5910_vm0, %v5909_v1  ;;  %v2828_v59 = vld [vmem:[#allocation2 + $0x102] sm:$0xff] }
  0xbd   : > { %5102 = vmatprep.subr.bf16.mxu0 %v5909_v1  ;;  %v2837_v43 = vpack.c.bf16 %v2828_v59, %v2827_v39 }
  0xbe   : > { %4769 = vmatmul.mubr.msk.bf16.gmra.mrb[16].mxu1 %vm422_vm1, %v889_v38  ;;  %v1128_v38 = vld [vmem:[#allocation2 + $0x5d] sm:$0xff] }
  0xbf   : > { %4774 = vmatprep.mubr.msk.bf16.mxu1 %vm5910_vm0, %v5909_v1  ;;  %v1133_v41 = vpack.c.bf16 %v1128_v38, %v1127_v37  ;;  %v1255_v3 = vpack.c.bf16 %v1250_v63, %v1128_v38  ;;  %v1485_v37 = vld [vmem:[#allocation2 + $0x1f] sm:$0xff]  ;;  %v1486_v38 = vld [vmem:[#allocation2 + $0x27] sm:$0xff] }
  0xc0   : > { %v1495_v39 = vpack.c.bf16 %v1486_v38, %v1485_v37  ;;  %v1608_v63 = vld [vmem:[#allocation2 + $0x89] sm:$0xff]  ;;  %v5864_v38 = vld [vmem:[%s6786_s4 + $0x58] sm:$0xff]  }
  0xc3   : > { %5065 = vmatmul.mubr.msk.bf16.gmra.mrb[4].mxu0 %vm422_vm1, %v2594_v45  ;;  %v2829_v45 = vld [vmem:[#allocation2 + $0x10a] sm:$0xff] }
  0xc4   : > { %5068 = vmatprep.mubr.msk.bf16.mxu0 %vm5910_vm0, %v5909_v1 }
  0xc6   : > { %4775 = vmatmul.mubr.msk.bf16.vlgmr.msra.gmra.mrb[0].mxu1 %vm422_vm1, %v1007_v44  ;;  %v5855_v44 = vld [vmem:[%s6786_s4 + $0xa0] sm:$0xff]  }
  0xc7   : > { %4778 = vmatprep.mubr.msk.bf16.mxu1 %vm5910_vm0, %v5909_v1  ;;  %4795 = vmatpush3.bf16.msra.mxu1 %v5852_v46  ;;  %v2830_v46 = vld [vmem:[#allocation2 + $0x112] sm:$0xff] }
  0xc8   : > { %4816 = vmatprep.subr.bf16.mxu1 %v5909_v1  ;;  %v2838_v48 = vpack.c.bf16 %v2830_v46, %v2829_v45  ;;  %v4503_v45 = vunpack.c.h.bf16 %v6327_v22  ;;  %v1489_v46 = vld [vmem:[#allocation2 + $0x3f] sm:$0xff]  ;;  %v1491_v22 = vld [vmem:[#allocation2 + $0x4f] sm:$0xff] }
  0xca   : > { %528 = vst.msk [vmem:[#allocation2 + $0x158] sm:$0xff] %vm422_vm1, %v4503_v45  ;;  %v1734_v45 = vld [vmem:[#allocation2 + $0xaa] sm:$0xff] }
  0xcb   : > { %5069 = vmatmul.mubr.msk.bf16.gmra.mrb[8].mxu0 %vm422_vm1, %v2595_v52  ;;  %v1252_v52 = vpack.c.bf16 %v1123_v25, %v6320_v18 }
  0xcc   : > { %5072 = vmatprep.mubr.msk.bf16.mxu0 %vm5910_vm0, %v5909_v1 }
  0xce   : > { %4779 = vmatmul.mubr.msk.bf16.gmra.mrb[4].mxu1 %vm422_vm1, %v1008_v51  ;;  %v2832_v51 = vld [vmem:[#allocation2 + $0x122] sm:$0xff] }
  0xcf   : > { %4782 = vmatprep.mubr.msk.bf16.mxu1 %vm5910_vm0, %v5909_v1  ;;  %v2839_v53 = vpack.c.bf16 %v2832_v51, %v2831_v50  ;;  %v1492_v50 = vld [vmem:[#allocation2 + $0x57] sm:$0xff]  ;;  %v3080_v51 = vld [vmem:[#allocation2 + $0x14b] sm:$0xff] }
  0xd3   : > { %5073 = vmatmul.mubr.msk.bf16.gmra.mrb[12].mxu0 %vm422_vm1, %v2596_v58  ;;  %v2835_v58 = vld [vmem:[#allocation2 + $0x13a] sm:$0xff] }
  0xd4   : > { %5076 = vmatprep.mubr.msk.bf16.mxu0 %vm5910_vm0, %v5909_v1  ;;  %v2841_v62 = vpack.c.bf16 %v2836_v60, %v2835_v58 }
  0xd6   : > { %4783 = vmatmul.mubr.msk.bf16.gmra.mrb[8].mxu1 %vm422_vm1, %v1009_v57  ;;  %v2840_v57 = vpack.c.bf16 %v2834_v55, %v2833_v54  ;;  %v1493_v54 = vld [vmem:[#allocation2 + $0x5f] sm:$0xff]  ;;  %v1494_v55 = vld [vmem:[#allocation2 + $0x67] sm:$0xff] }
  0xd7   : > { %4786 = vmatprep.mubr.msk.bf16.mxu1 %vm5910_vm0, %v5909_v1  ;;  %v1499_v58 = vpack.c.bf16 %v1494_v55, %v1493_v54  ;;  %v6568_v54 = vld [vmem:[#allocation2 + $0x14d] sm:$0xff]  ;;  %v5911_v55 = vmov 0  }
  0xd8   : > { %5839 = vset.pattern.permute.xlu0 %v5911_v55  ;;  %5840 = vset.pattern.permute.xlu1 %v5911_v55  ;;  %v2101_v55 = vld [vmem:[#allocation2 + $0xbc] sm:$0xff] }
  0xdb   : > { %5077 = vmatmul.mubr.msk.bf16.gmra.mrb[16].mxu0 %vm422_vm1, %v2597_v2  ;;  %v2950_v2 = vld [vmem:[#allocation2 + $0x103] sm:$0xff] }
  0xdc   : > { %5082 = vmatprep.mubr.msk.bf16.mxu0 %vm5910_vm0, %v5909_v1 }
  0xde   : > { %4787 = vmatmul.mubr.msk.bf16.gmra.mrb[12].mxu1 %vm422_vm1, %v1010_v0  ;;  %v2949_v0 = vld [vmem:[#allocation2 + $0xfb] sm:$0xff] }
  0xdf   : > { %4790 = vmatprep.mubr.msk.bf16.mxu1 %vm5910_vm0, %v5909_v1  ;;  %v2959_v4 = vpack.c.bf16 %v2950_v2, %v2949_v0  ;;  %v3195_v0 = vld [vmem:[#allocation2 + $0x114] sm:$0xff] }
  0xe3   : > { %5083 = vmatmul.mubr.msk.bf16.vlgmr.msra.gmra.mrb[0].mxu0 %vm422_vm1, %v2715_v8  ;;  %v2951_v8 = vld [vmem:[#allocation2 + $0x10b] sm:$0xff] }
  0xe4   : > { %5103 = vmatpush3.bf16.msra.mxu0 %v5853_v9  ;;  %5086 = vmatprep.mubr.msk.bf16.mxu0 %vm5910_vm0, %v5909_v1  ;;  %v2952_v9 = vld [vmem:[#allocation2 + $0x113] sm:$0xff] }
  0xe5   : > { %5124 = vmatprep.subr.bf16.mxu0 %v5909_v1  ;;  %v2960_v11 = vpack.c.bf16 %v2952_v9, %v2951_v8 }
  0xe6   : > { %4791 = vmatmul.mubr.msk.bf16.gmra.mrb[16].mxu1 %vm422_vm1, %v1011_v7  ;;  %v1364_v7 = vld [vmem:[#allocation2 + $0x26] sm:$0xff] }
  0xe7   : > { %4796 = vmatprep.mubr.msk.bf16.mxu1 %vm5910_vm0, %v5909_v1  ;;  %v1373_v10 = vpack.c.bf16 %v1364_v7, %v1363_v6  ;;  %v1609_v6 = vld [vmem:[#allocation2 + $0x91] sm:$0xff]  ;;  %v1610_v7 = vld [vmem:[#allocation2 + $0x99] sm:$0xff] }
  0xeb   : > { %5087 = vmatmul.mubr.msk.bf16.gmra.mrb[4].mxu0 %vm422_vm1, %v2716_v15  ;;  %v2953_v15 = vld [vmem:[#allocation2 + $0x11b] sm:$0xff] }
  0xec   : > { %5090 = vmatprep.mubr.msk.bf16.mxu0 %vm5910_vm0, %v5909_v1  ;;  %v3082_v59 = vpack.c.bf16 %v2953_v15, %v2952_v9  ;;  %v3198_v9 = vld [vmem:[#allocation2 + $0x12c] sm:$0xff] }
  0xee   : > { %4797 = vmatmul.mubr.msk.bf16.vlgmr.msra.gmra.mrb[0].mxu1 %vm422_vm1, %v1129_v14  ;;  %v1366_v14 = vld [vmem:[#allocation2 + $0x36] sm:$0xff] }
  0xef   : > { %4800 = vmatprep.mubr.msk.bf16.mxu1 %vm5910_vm0, %v5909_v1  ;;  %4817 = vmatpush3.bf16.msra.mxu1 %v5854_v16  ;;  %v2954_v16 = vld [vmem:[#allocation2 + $0x123] sm:$0xff]  ;;  %v1374_v17 = vpack.c.bf16 %v1366_v14, %v1365_v13  ;;  %v3199_v14 = vld [vmem:[#allocation2 + $0x134] sm:$0xff] }
  0xf0   : > { %4838 = vmatprep.subr.bf16.mxu1 %v5909_v1  ;;  %v2961_v18 = vpack.c.bf16 %v2954_v16, %v2953_v15  ;;  %v1612_v13 = vld [vmem:[#allocation2 + $0xa9] sm:$0xff]  ;;  %v3200_v15 = vld [vmem:[#allocation2 + $0x13c] sm:$0xff] }
  0xf3   : > { %5091 = vmatmul.mubr.msk.bf16.gmra.mrb[8].mxu0 %vm422_vm1, %v2717_v23  ;;  %v2956_v23 = vld [vmem:[#allocation2 + $0x133] sm:$0xff] }
  0xf4   : > { %5094 = vmatprep.mubr.msk.bf16.mxu0 %vm5910_vm0, %v5909_v1 }
  0xf6   : > { %4801 = vmatmul.mubr.msk.bf16.gmra.mrb[4].mxu1 %vm422_vm1, %v1130_v21  ;;  %v2955_v21 = vld [vmem:[#allocation2 + $0x12b] sm:$0xff] }
  0xf7   : > { %4804 = vmatprep.mubr.msk.bf16.mxu1 %vm5910_vm0, %v5909_v1  ;;  %v2962_v25 = vpack.c.bf16 %v2956_v23, %v2955_v21 }
  0xfb   : > { %5095 = vmatmul.mubr.msk.bf16.gmra.mrb[12].mxu0 %vm422_vm1, %v2718_v30  ;;  %v1376_v30 = vpack.c.bf16 %v1370_v27, %v1369_v26  ;;  %v1616_v26 = vld [vmem:[#allocation2 + $0xc9] sm:$0xff] }
  0xfc   : > { %5098 = vmatprep.mubr.msk.bf16.mxu0 %vm5910_vm0, %v5909_v1  ;;  %v3315_v27 = vld [vmem:[#allocation2 + $0x105] sm:$0xff] }
  0xfe   : > { %4805 = vmatmul.mubr.msk.bf16.gmra.mrb[8].mxu1 %vm422_vm1, %v1131_v29  ;;  %v2958_v29 = vld [vmem:[#allocation2 + $0x143] sm:$0xff] }
  0xff   : > { %4808 = vmatprep.mubr.msk.bf16.mxu1 %vm5910_vm0, %v5909_v1  ;;  %v2963_v31 = vpack.c.bf16 %v2958_v29, %v2957_v28 }
 0x103   : > { %5099 = vmatmul.mubr.msk.bf16.gmra.mrb[16].mxu0 %vm422_vm1, %v2719_v36  ;;  %v5859_v36 = vld [vmem:[%s6786_s4 + $0xb0] sm:$0xff]  }
 0x104   : > { %5104 = vmatprep.mubr.msk.bf16.mxu0 %vm5910_vm0, %v5909_v1 }
 0x106   : > { %4809 = vmatmul.mubr.msk.bf16.gmra.mrb[12].mxu1 %vm422_vm1, %v1132_v35  ;;  %v3081_v35 = vpack.c.bf16 %v2951_v8, %v2950_v2  ;;  %v3196_v2 = vld [vmem:[#allocation2 + $0x11c] sm:$0xff]  ;;  %v3197_v8 = vld [vmem:[#allocation2 + $0x124] sm:$0xff] }
 0x107   : > { %4812 = vmatprep.mubr.msk.bf16.mxu1 %vm5910_vm0, %v5909_v1 }
 0x10b   : > { %5105 = vmatmul.mubr.msk.bf16.vlgmr.msra.gmra.mrb[0].mxu0 %vm422_vm1, %v2837_v43 }
 0x10c   : > { %5125 = vmatpush3.bf16.msra.mxu0 %v5855_v44  ;;  %5108 = vmatprep.mubr.msk.bf16.mxu0 %vm5910_vm0, %v5909_v1  ;;  %v3083_v44 = vpack.c.bf16 %v2955_v21, %v2954_v16  ;;  %v3202_v21 = vld [vmem:[#allocation2 + $0x14c] sm:$0xff] }
 0x10d   : > { %5146 = vmatprep.subr.bf16.mxu0 %v5909_v1 }
 0x10e   : > { %4813 = vmatmul.mubr.msk.bf16.gmra.mrb[16].mxu1 %vm422_vm1, %v1133_v41  ;;  %v1487_v41 = vld [vmem:[#allocation2 + $0x2f] sm:$0xff] }
 0x10f   : > { %4818 = vmatprep.mubr.msk.bf16.mxu1 %vm5910_vm0, %v5909_v1  ;;  %v1496_v43 = vpack.c.bf16 %v1488_v42, %v1487_v41  ;;  %v6537_v41 = vld [vmem:[#allocation2 + $0x12d] sm:$0xff] }
 0x113   : > { %5109 = vmatmul.mubr.msk.bf16.gmra.mrb[4].mxu0 %vm422_vm1, %v2838_v48 }
 0x114   : > { %5112 = vmatprep.mubr.msk.bf16.mxu0 %vm5910_vm0, %v5909_v1 }
 0x116   : > { %4819 = vmatmul.mubr.msk.bf16.vlgmr.msra.gmra.mrb[0].mxu1 %vm422_vm1, %v1251_v47  ;;  %v1490_v47 = vld [vmem:[#allocation2 + $0x47] sm:$0xff] }
 0x117   : > { %4822 = vmatprep.mubr.msk.bf16.mxu1 %vm5910_vm0, %v5909_v1  ;;  %4839 = vmatpush3.bf16.msra.mxu1 %v5856_v49  ;;  %v1497_v48 = vpack.c.bf16 %v1490_v47, %v1489_v46  ;;  %v3084_v49 = vpack.c.bf16 %v2957_v28, %v2956_v23  ;;  %v6507_v28 = vld [vmem:[#allocation2 + $0x10d] sm:$0xff]  ;;  %v6548_v46 = vld [vmem:[#allocation2 + $0x135] sm:$0xff]  ;;  %v6550_v47 = vld [vmem:[#allocation2 + $0x13d] sm:$0xff] }
 0x118   : > { %4860 = vmatprep.subr.bf16.mxu1 %v5909_v1 }
 0x11b   : > { %5113 = vmatmul.mubr.msk.bf16.gmra.mrb[8].mxu0 %vm422_vm1, %v2839_v53  ;;  %v3085_v53 = vpack.c.bf16 %v3080_v51, %v2958_v29  ;;  %v3854_v51 = vld [vmem:[%s6782_s0] sm:$0xff] }
 0x11c   : > { %5116 = vmatprep.mubr.msk.bf16.mxu0 %vm5910_vm0, %v5909_v1  ;;  %3866 = vperm.xlu0 %5839, %v3854_v51   ;;  %v3681_v51 = vld [vmem:[#allocation2 + $0x10f] sm:$0xff] }
 0x11e   : > { %4823 = vmatmul.mubr.msk.bf16.gmra.mrb[4].mxu1 %vm422_vm1, %v1252_v52  ;;  %v1498_v52 = vpack.c.bf16 %v1492_v50, %v1491_v22  ;;  %v1735_v22 = vld [vmem:[#allocation2 + $0xb2] sm:$0xff]  ;;  %v1736_v50 = vld [vmem:[#allocation2 + $0xba] sm:$0xff] }
 0x11f   : > { %4826 = vmatprep.mubr.msk.bf16.mxu1 %vm5910_vm0, %v5909_v1 }
 0x123   : > { %5117 = vmatmul.mubr.msk.bf16.gmra.mrb[12].mxu0 %vm422_vm1, %v2840_v57  ;;  %v3194_v57 = vld [vmem:[#allocation2 + $0x10c] sm:$0xff] }
 0x124   : > { %5120 = vmatprep.mubr.msk.bf16.mxu0 %vm5910_vm0, %v5909_v1 }
 0x126   : > { %4827 = vmatmul.mubr.msk.bf16.gmra.mrb[8].mxu1 %vm422_vm1, %v1253_v56  ;;  %v3193_v56 = vld [vmem:[#allocation2 + $0x104] sm:$0xff] }
 0x127   : > { %4830 = vmatprep.mubr.msk.bf16.mxu1 %vm5910_vm0, %v5909_v1  ;;  %v3203_v60 = vpack.c.bf16 %v3194_v57, %v3193_v56  ;;  %v1742_v56 = vpack.c.bf16 %v1736_v50, %v1735_v22  ;;  %v3855_v57 = vld [vmem:[%s6782_s0 + $0x8] sm:$0xff]  ;;  %v1982_v50 = vld [vmem:[#allocation2 + $0xd3] sm:$0xff] }
 0x128   : > { %3871 = vperm.xlu0 %5839, %v3855_v57   ;;  %v3683_v57 = vld [vmem:[#allocation2 + $0x11f] sm:$0xff] }
 0x12b   : > { %5121 = vmatmul.mubr.msk.bf16.gmra.mrb[16].mxu0 %vm422_vm1, %v2841_v62  ;;  %v1607_v62 = vld [vmem:[#allocation2 + $0x81] sm:$0xff] }
 0x12c   : > { %5126 = vmatprep.mubr.msk.bf16.mxu0 %vm5910_vm0, %v5909_v1 }
 0x12e   : > { %4831 = vmatmul.mubr.msk.bf16.gmra.mrb[12].mxu1 %vm422_vm1, %v1254_v61  ;;  %v5861_v61 = vld [vmem:[%s6786_s4 + $0xb8] sm:$0xff]  }
 0x12f   : > { %4834 = vmatprep.mubr.msk.bf16.mxu1 %vm5910_vm0, %v5909_v1 }
 0x133   : > { %5127 = vmatmul.mubr.msk.bf16.vlgmr.msra.gmra.mrb[0].mxu0 %vm422_vm1, %v2959_v4  ;;  %v3204_v4 = vpack.c.bf16 %v3196_v2, %v3195_v0  ;;  %v3859_v0 = vld [vmem:[%s6782_s0 + $0x28] sm:$0xff] }
 0x134   : > { %5147 = vmatpush3.bf16.msra.mxu0 %v5857_v5  ;;  %5130 = vmatprep.mubr.msk.bf16.mxu0 %vm5910_vm0, %v5909_v1  ;;  %v5862_v5 = vld [vmem:[%s6786_s4 + $0x50] sm:$0xff]  }
 0x135   : > { %5168 = vmatprep.subr.bf16.mxu0 %v5909_v1 }
 0x136   : > { %4835 = vmatmul.mubr.msk.bf16.gmra.mrb[16].mxu1 %vm422_vm1, %v1255_v3  ;;  %v1617_v3 = vpack.c.bf16 %v1608_v63, %v1607_v62  ;;  %v1737_v62 = vld [vmem:[#allocation2 + $0xc2] sm:$0xff]  ;;  %v1738_v63 = vld [vmem:[#allocation2 + $0xca] sm:$0xff] }
 0x137   : > { %4840 = vmatprep.mubr.msk.bf16.mxu1 %vm5910_vm0, %v5909_v1  ;;  %v1743_v2 = vpack.c.bf16 %v1738_v63, %v1737_v62  ;;  %v2103_v62 = vld [vmem:[#allocation2 + $0xcc] sm:$0xff]  ;;  %v2104_v63 = vld [vmem:[#allocation2 + $0xd4] sm:$0xff] }
 0x13b   : > { %5131 = vmatmul.mubr.msk.bf16.gmra.mrb[4].mxu0 %vm422_vm1, %v2960_v11  ;;  %v3205_v11 = vpack.c.bf16 %v3198_v9, %v3197_v8  ;;  %v1851_v8 = vld [vmem:[#allocation2 + $0x83] sm:$0xff]  ;;  %v1852_v9 = vld [vmem:[#allocation2 + $0x8b] sm:$0xff] }
 0x13c   : > { %5134 = vmatprep.mubr.msk.bf16.mxu0 %vm5910_vm0, %v5909_v1 }
 0x13e   : > { %4841 = vmatmul.mubr.msk.bf16.vlgmr.msra.gmra.mrb[0].mxu1 %vm422_vm1, %v1373_v10  ;;  %v1618_v10 = vpack.c.bf16 %v1610_v7, %v1609_v6  ;;  %v5865_v6 = vld [vmem:[%s6786_s4 + $0xc8] sm:$0xff]   ;;  %v3862_v7 = vld [vmem:[%s6782_s0 + $0x40] sm:$0xff] }
 0x13f   : > { %4844 = vmatprep.mubr.msk.bf16.mxu1 %vm5910_vm0, %v5909_v1  ;;  %4861 = vmatpush3.bf16.msra.mxu1 %v5858_v12  ;;  %v1611_v12 = vld [vmem:[#allocation2 + $0xa1] sm:$0xff] }
 0x140   : > { %4882 = vmatprep.subr.bf16.mxu1 %v5909_v1  ;;  %v1619_v16 = vpack.c.bf16 %v1612_v13, %v1611_v12  ;;  %v5866_v13 = vld [vmem:[%s6786_s4 + $0x60] sm:$0xff]  }
 0x143   : > { %5135 = vmatmul.mubr.msk.bf16.gmra.mrb[8].mxu0 %vm422_vm1, %v2961_v18  ;;  %v1613_v18 = vld [vmem:[#allocation2 + $0xb1] sm:$0xff] }
 0x144   : > { %5138 = vmatprep.mubr.msk.bf16.mxu0 %vm5910_vm0, %v5909_v1  ;;  %v1620_v23 = vpack.c.bf16 %v1614_v19, %v1613_v18  ;;  %v1855_v18 = vld [vmem:[#allocation2 + $0xa3] sm:$0xff]  ;;  %v1856_v19 = vld [vmem:[#allocation2 + $0xab] sm:$0xff] }
 0x146   : > { %4845 = vmatmul.mubr.msk.bf16.gmra.mrb[4].mxu1 %vm422_vm1, %v1374_v17  ;;  %v3206_v17 = vpack.c.bf16 %v3200_v15, %v3199_v14  ;;  %v1853_v14 = vld [vmem:[#allocation2 + $0x93] sm:$0xff]  ;;  %v1854_v15 = vld [vmem:[#allocation2 + $0x9b] sm:$0xff] }
 0x147   : > { %4848 = vmatprep.mubr.msk.bf16.mxu1 %vm5910_vm0, %v5909_v1 }
 0x14b   : > { %5139 = vmatmul.mubr.msk.bf16.gmra.mrb[12].mxu0 %vm422_vm1, %v2962_v25  ;;  %v1615_v25 = vld [vmem:[#allocation2 + $0xc1] sm:$0xff] }
 0x14c   : > { %5142 = vmatprep.mubr.msk.bf16.mxu0 %vm5910_vm0, %v5909_v1  ;;  %v1621_v29 = vpack.c.bf16 %v1616_v26, %v1615_v25  ;;  %v3446_v25 = vld [vmem:[#allocation2 + $0x155] sm:$0xff] }
 0x14e   : > { %4849 = vmatmul.mubr.msk.bf16.gmra.mrb[8].mxu1 %vm422_vm1, %v1375_v24  ;;  %v3207_v24 = vpack.c.bf16 %v3202_v21, %v3201_v20  ;;  %v1863_v20 = vpack.c.bf16 %v1856_v19, %v1855_v18 }
 0x14f   : > { %4852 = vmatprep.mubr.msk.bf16.mxu1 %vm5910_vm0, %v5909_v1 }
 0x153   : > { %5143 = vmatmul.mubr.msk.bf16.gmra.mrb[16].mxu0 %vm422_vm1, %v2963_v31  ;;  %v5863_v31 = vld [vmem:[%s6786_s4 + $0xc0] sm:$0xff]  }
 0x154   : > { %5148 = vmatprep.mubr.msk.bf16.mxu0 %vm5910_vm0, %v5909_v1 }
 0x156   : > { %4853 = vmatmul.mubr.msk.bf16.gmra.mrb[12].mxu1 %vm422_vm1, %v1376_v30  ;;  %v3325_v30 = vpack.c.bf16 %v6507_v28, %v3315_v27  ;;  %v3451_v27 = vpack.c.bf16 %v3446_v25, %v6568_v54 }
 0x157   : > { %4856 = vmatprep.mubr.msk.bf16.mxu1 %vm5910_vm0, %v5909_v1 }
 0x15b   : > { %5149 = vmatmul.mubr.msk.bf16.vlgmr.msra.gmra.mrb[0].mxu0 %vm422_vm1, %v3081_v35  ;;  %v6521_v35 = vld [vmem:[#allocation2 + $0x11d] sm:$0xff] }
 0x15c   : > { %5169 = vmatpush3.bf16.msra.mxu0 %v5859_v36  ;;  %5152 = vmatprep.mubr.msk.bf16.mxu0 %vm5910_vm0, %v5909_v1  ;;  %v1739_v36 = vpack.c.bf16 %v1730_v33, %v1729_v32 }
 0x15d   : > { %5190 = vmatprep.subr.bf16.mxu0 %v5909_v1 }
 0x15e   : > { %4857 = vmatmul.mubr.msk.bf16.gmra.mrb[16].mxu1 %vm422_vm1, %v1377_v34  ;;  %v6519_v34 = vld [vmem:[#allocation2 + $0x115] sm:$0xff] }
 0x15f   : > { %4862 = vmatprep.mubr.msk.bf16.mxu1 %vm5910_vm0, %v5909_v1  ;;  %v3326_v37 = vpack.c.bf16 %v6521_v35, %v6519_v34 }
 0x163   : > { %5153 = vmatmul.mubr.msk.bf16.gmra.mrb[4].mxu0 %vm422_vm1, %v3082_v59  ;;  %v1732_v59 = vld [vmem:[#allocation2 + $0x9a] sm:$0xff] }
 0x164   : > { %5156 = vmatprep.mubr.msk.bf16.mxu0 %vm5910_vm0, %v5909_v1 }
 0x166   : > { %4863 = vmatmul.mubr.msk.bf16.vlgmr.msra.gmra.mrb[0].mxu1 %vm422_vm1, %v1495_v39  ;;  %v1731_v39 = vld [vmem:[#allocation2 + $0x92] sm:$0xff] }
 0x167   : > { %4866 = vmatprep.mubr.msk.bf16.mxu1 %vm5910_vm0, %v5909_v1  ;;  %4883 = vmatpush3.bf16.msra.mxu1 %v5860_v40  ;;  %v6535_v40 = vld [vmem:[#allocation2 + $0x125] sm:$0xff]  ;;  %v1740_v42 = vpack.c.bf16 %v1732_v59, %v1731_v39  ;;  %v3563_v39 = vld [vmem:[#allocation2 + $0x12e] sm:$0xff]  ;;  %v3564_v59 = vld [vmem:[#allocation2 + $0x136] sm:$0xff] }
 0x168   : > { %4904 = vmatprep.subr.bf16.mxu1 %v5909_v1  ;;  %v3448_v12 = vpack.c.bf16 %v6535_v40, %v6521_v35  ;;  %v3561_v35 = vld [vmem:[#allocation2 + $0x11e] sm:$0xff] }
 0x16b   : > { %5157 = vmatmul.mubr.msk.bf16.gmra.mrb[8].mxu0 %vm422_vm1, %v3083_v44  ;;  %v1733_v44 = vld [vmem:[#allocation2 + $0xa2] sm:$0xff] }
 0x16c   : > { %5160 = vmatprep.mubr.msk.bf16.mxu0 %vm5910_vm0, %v5909_v1 }
 0x16e   : > { %4867 = vmatmul.mubr.msk.bf16.gmra.mrb[4].mxu1 %vm422_vm1, %v1496_v43  ;;  %v3327_v43 = vpack.c.bf16 %v6537_v41, %v6535_v40  ;;  %v5868_v40 = vld [vmem:[%s6786_s4 + $0x68] sm:$0xff]  }
 0x16f   : > { %4870 = vmatprep.mubr.msk.bf16.mxu1 %vm5910_vm0, %v5909_v1 }
 0x173   : > { %5161 = vmatmul.mubr.msk.bf16.gmra.mrb[12].mxu0 %vm422_vm1, %v3084_v49  ;;  %v3328_v49 = vpack.c.bf16 %v6550_v47, %v6548_v46 }
 0x174   : > { %5164 = vmatprep.mubr.msk.bf16.mxu0 %vm5910_vm0, %v5909_v1 }
 0x176   : > { %4871 = vmatmul.mubr.msk.bf16.gmra.mrb[8].mxu1 %vm422_vm1, %v1497_v48  ;;  %v1741_v48 = vpack.c.bf16 %v1734_v45, %v1733_v44  ;;  %v3566_v44 = vld [vmem:[#allocation2 + $0x146] sm:$0xff] }
 0x177   : > { %4874 = vmatprep.mubr.msk.bf16.mxu1 %vm5910_vm0, %v5909_v1 }
 0x17b   : > { %5165 = vmatmul.mubr.msk.bf16.gmra.mrb[16].mxu0 %vm422_vm1, %v3085_v53  ;;  %v6566_v53 = vld [vmem:[#allocation2 + $0x145] sm:$0xff] }
 0x17c   : > { %5170 = vmatprep.mubr.msk.bf16.mxu0 %vm5910_vm0, %v5909_v1  ;;  %v3450_v21 = vpack.c.bf16 %v6566_v53, %v6550_v47  ;;  %v3567_v47 = vld [vmem:[#allocation2 + $0x14e] sm:$0xff] }
 0x17e   : > { %4875 = vmatmul.mubr.msk.bf16.gmra.mrb[12].mxu1 %vm422_vm1, %v1498_v52  ;;  %v3856_v52 = vld [vmem:[%s6782_s0 + $0x10] sm:$0xff] }
 0x17f   : > { %4878 = vmatprep.mubr.msk.bf16.mxu1 %vm5910_vm0, %v5909_v1  ;;  %3876 = vperm.xlu1 %5840, %v3856_v52   ;;  %v3682_v52 = vld [vmem:[#allocation2 + $0x117] sm:$0xff] }
 0x183   : > { %5171 = vmatmul.mubr.msk.bf16.vlgmr.msra.gmra.mrb[0].mxu0 %vm422_vm1, %v3203_v60  ;;  %v3857_v60 = vld [vmem:[%s6782_s0 + $0x18] sm:$0xff] }
 0x184   : > { %5191 = vmatpush3.bf16.msra.mxu0 %v5861_v61  ;;  %5174 = vmatprep.mubr.msk.bf16.mxu0 %vm5910_vm0, %v5909_v1  ;;  %v3858_v61 = vld [vmem:[%s6782_s0 + $0x20] sm:$0xff] }
 0x185   : > { %5212 = vmatprep.subr.bf16.mxu0 %v5909_v1  ;;  %3881 = vperm.xlu1 %5840, %v3857_v60  }
 0x186   : > { %4879 = vmatmul.mubr.msk.bf16.gmra.mrb[16].mxu1 %vm422_vm1, %v1499_v58  ;;  %v3329_v58 = vpack.c.bf16 %v6568_v54, %v6566_v53  ;;  %3886 = vperm.xlu0 %5839, %v3858_v61   ;;  %v3691_v54 = vpack.c.bf16 %v3682_v52, %v3681_v51 }
 0x187   : > { %4884 = vmatprep.mubr.msk.bf16.mxu1 %vm5910_vm0, %v5909_v1 }
 0x189   : > { %3891 = vperm.xlu1 %5840, %v3859_v0   ;;  %v3685_v0 = vld [vmem:[#allocation2 + $0x12f] sm:$0xff] }
 0x18b   : > { %5175 = vmatmul.mubr.msk.bf16.gmra.mrb[4].mxu0 %vm422_vm1, %v3204_v4  ;;  %v3447_v4 = vpack.c.bf16 %v6519_v34, %v6507_v28  ;;  %v1859_v28 = vld [vmem:[#allocation2 + $0xc3] sm:$0xff]  ;;  %v5867_v34 = vld [vmem:[%s6786_s4 + $0xd0] sm:$0xff]  }
 0x18c   : > { %5178 = vmatprep.mubr.msk.bf16.mxu0 %vm5910_vm0, %v5909_v1 }
 0x18e   : > { %4885 = vmatmul.mubr.msk.bf16.vlgmr.msra.gmra.mrb[0].mxu1 %vm422_vm1, %v1617_v3  ;;  %v3860_v3 = vld [vmem:[%s6782_s0 + $0x30] sm:$0xff] }
 0x18f   : > { %4888 = vmatprep.mubr.msk.bf16.mxu1 %vm5910_vm0, %v5909_v1  ;;  %4905 = vmatpush3.bf16.msra.mxu1 %v5862_v5  ;;  %v3861_v5 = vld [vmem:[%s6782_s0 + $0x38] sm:$0xff] }
 0x190   : > { %4926 = vmatprep.subr.bf16.mxu1 %v5909_v1  ;;  %3896 = vperm.xlu0 %5839, %v3860_v3   ;;  %v2109_v3 = vpack.c.bf16 %v2104_v63, %v2103_v62 }
 0x191   : > { %3901 = vperm.xlu1 %5840, %v3861_v5   ;;  %v3687_v5 = vld [vmem:[#allocation2 + $0x13f] sm:$0xff] }
 0x193   : > { %5179 = vmatmul.mubr.msk.bf16.gmra.mrb[8].mxu0 %vm422_vm1, %v3205_v11  ;;  %v1861_v11 = vpack.c.bf16 %v1852_v9, %v1851_v8  ;;  %v3689_v8 = vld [vmem:[#allocation2 + $0x14f] sm:$0xff] }
 0x194   : > { %5182 = vmatprep.mubr.msk.bf16.mxu0 %vm5910_vm0, %v5909_v1  ;;  %3906 = vperm.xlu0 %5839, %v3862_v7  }
 0x196   : > { %4889 = vmatmul.mubr.msk.bf16.gmra.mrb[4].mxu1 %vm422_vm1, %v1618_v10  ;;  %v3863_v10 = vld [vmem:[%s6782_s0 + $0x48] sm:$0xff] }
 0x197   : > { %4892 = vmatprep.mubr.msk.bf16.mxu1 %vm5910_vm0, %v5909_v1  ;;  %3911 = vperm.xlu1 %5840, %v3863_v10  }
 0x19b   : > { %5183 = vmatmul.mubr.msk.bf16.gmra.mrb[12].mxu0 %vm422_vm1, %v3206_v17  ;;  %v3449_v17 = vpack.c.bf16 %v6548_v46, %v6537_v41  ;;  %v1984_v41 = vpack.c.bf16 %v1855_v18, %v1854_v15 }
 0x19c   : > { %5186 = vmatprep.mubr.msk.bf16.mxu0 %vm5910_vm0, %v5909_v1 }
 0x19e   : > { %4893 = vmatmul.mubr.msk.bf16.gmra.mrb[8].mxu1 %vm422_vm1, %v1619_v16  ;;  %v1862_v16 = vpack.c.bf16 %v1854_v15, %v1853_v14 }
 0x19f   : > { %4896 = vmatprep.mubr.msk.bf16.mxu1 %vm5910_vm0, %v5909_v1 }
 0x1a3   : > { %5187 = vmatmul.mubr.msk.bf16.gmra.mrb[16].mxu0 %vm422_vm1, %v3207_v24  ;;  %v1858_v24 = vld [vmem:[#allocation2 + $0xbb] sm:$0xff] }
 0x1a4   : > { %5192 = vmatprep.mubr.msk.bf16.mxu0 %vm5910_vm0, %v5909_v1 }
 0x1a6   : > { %4897 = vmatmul.mubr.msk.bf16.gmra.mrb[12].mxu1 %vm422_vm1, %v1620_v23  ;;  %v1857_v23 = vld [vmem:[#allocation2 + $0xb3] sm:$0xff] }
 0x1a7   : > { %4900 = vmatprep.mubr.msk.bf16.mxu1 %vm5910_vm0, %v5909_v1  ;;  %v1864_v26 = vpack.c.bf16 %v1858_v24, %v1857_v23  ;;  %v1985_v45 = vpack.c.bf16 %v1857_v23, %v1856_v19  ;;  %v3867_v23 = vpop.permute.xlu0 %3866 }
 0x1ab   : > { %5193 = vmatmul.mubr.msk.bf16.vlgmr.msra.gmra.mrb[0].mxu0 %vm422_vm1, %v3325_v30  ;;  %v3559_v30 = vld [vmem:[#allocation2 + $0x10e] sm:$0xff] }
 0x1ac   : > { %5213 = vmatpush3.bf16.msra.mxu0 %v5863_v31  ;;  %5196 = vmatprep.mubr.msk.bf16.mxu0 %vm5910_vm0, %v5909_v1  ;;  %v3560_v31 = vld [vmem:[#allocation2 + $0x116] sm:$0xff] }
 0x1ad   : > { %5234 = vmatprep.subr.bf16.mxu0 %v5909_v1  ;;  %v3569_v33 = vpack.c.bf16 %v3560_v31, %v3559_v30 }
 0x1ae   : > { %4901 = vmatmul.mubr.msk.bf16.gmra.mrb[16].mxu1 %vm422_vm1, %v1621_v29  ;;  %v1860_v29 = vld [vmem:[#allocation2 + $0xcb] sm:$0xff] }
 0x1af   : > { %4906 = vmatprep.mubr.msk.bf16.mxu1 %vm5910_vm0, %v5909_v1  ;;  %v1865_v32 = vpack.c.bf16 %v1860_v29, %v1859_v28  ;;  %v1987_v53 = vpack.c.bf16 %v1982_v50, %v1860_v29 }
 0x1b3   : > { %5197 = vmatmul.mubr.msk.bf16.gmra.mrb[4].mxu0 %vm422_vm1, %v3326_v37  ;;  %v1983_v37 = vpack.c.bf16 %v1853_v14, %v1852_v9  ;;  %v3690_v9 = vld [vmem:[#allocation2 + $0x157] sm:$0xff] }
 0x1b4   : > { %5200 = vmatprep.mubr.msk.bf16.mxu0 %vm5910_vm0, %v5909_v1  ;;  %v3695_v10 = vpack.c.bf16 %v3690_v9, %v3689_v8 }
 0x1b6   : > { %4907 = vmatmul.mubr.msk.bf16.vlgmr.msra.gmra.mrb[0].mxu1 %vm422_vm1, %v1739_v36  ;;  %v3562_v36 = vld [vmem:[#allocation2 + $0x126] sm:$0xff] }
 0x1b7   : > { %4910 = vmatprep.mubr.msk.bf16.mxu1 %vm5910_vm0, %v5909_v1  ;;  %4927 = vmatpush3.bf16.msra.mxu1 %v5864_v38  ;;  %v3570_v38 = vpack.c.bf16 %v3562_v36, %v3561_v35 }
 0x1b8   : > { %4948 = vmatprep.subr.bf16.mxu1 %v5909_v1 }
 0x1bb   : > { %5201 = vmatmul.mubr.msk.bf16.gmra.mrb[8].mxu0 %vm422_vm1, %v3327_v43  ;;  %v3565_v43 = vld [vmem:[#allocation2 + $0x13e] sm:$0xff] }
 0x1bc   : > { %5204 = vmatprep.mubr.msk.bf16.mxu0 %vm5910_vm0, %v5909_v1  ;;  %v3572_v46 = vpack.c.bf16 %v3566_v44, %v3565_v43 }
 0x1be   : > { %4911 = vmatmul.mubr.msk.bf16.gmra.mrb[4].mxu1 %vm422_vm1, %v1740_v42  ;;  %v3571_v42 = vpack.c.bf16 %v3564_v59, %v3563_v39 }
 0x1bf   : > { %4914 = vmatprep.mubr.msk.bf16.mxu1 %vm5910_vm0, %v5909_v1 }
 0x1c3   : > { %5205 = vmatmul.mubr.msk.bf16.gmra.mrb[12].mxu0 %vm422_vm1, %v3328_v49  ;;  %v1986_v49 = vpack.c.bf16 %v1859_v28, %v1858_v24  ;;  %v3872_v28 = vpop.permute.xlu0 %3871 }
 0x1c4   : > { %5208 = vmatprep.mubr.msk.bf16.mxu0 %vm5910_vm0, %v5909_v1 }
 0x1c6   : > { %4915 = vmatmul.mubr.msk.bf16.gmra.mrb[8].mxu1 %vm422_vm1, %v1741_v48  ;;  %v3568_v48 = vld [vmem:[#allocation2 + $0x156] sm:$0xff] }
 0x1c7   : > { %4918 = vmatprep.mubr.msk.bf16.mxu1 %vm5910_vm0, %v5909_v1  ;;  %v3573_v22 = vpack.c.bf16 %v3568_v48, %v3567_v47 }
 0x1cb   : > { %5209 = vmatmul.mubr.msk.bf16.gmra.mrb[16].mxu0 %vm422_vm1, %v3329_v58  ;;  %v3684_v58 = vld [vmem:[#allocation2 + $0x127] sm:$0xff] }
 0x1cc   : > { %5214 = vmatprep.mubr.msk.bf16.mxu0 %vm5910_vm0, %v5909_v1  ;;  %v3692_v61 = vpack.c.bf16 %v3684_v58, %v3683_v57 }
 0x1ce   : > { %4919 = vmatmul.mubr.msk.bf16.gmra.mrb[12].mxu1 %vm422_vm1, %v1742_v56  ;;  %v2102_v56 = vld [vmem:[#allocation2 + $0xc4] sm:$0xff] }
 0x1cf   : > { %4922 = vmatprep.mubr.msk.bf16.mxu1 %vm5910_vm0, %v5909_v1  ;;  %v2108_v60 = vpack.c.bf16 %v2102_v56, %v2101_v55 }
 0x1d3   : > { %5215 = vmatmul.mubr.msk.bf16.vlgmr.msra.gmra.mrb[0].mxu0 %vm422_vm1, %v3447_v4 }
 0x1d4   : > { %5235 = vmatpush3.bf16.msra.mxu0 %v5865_v6  ;;  %5218 = vmatprep.mubr.msk.bf16.mxu0 %vm5910_vm0, %v5909_v1  ;;  %v3688_v6 = vld [vmem:[#allocation2 + $0x147] sm:$0xff] }
 0x1d5   : > { %5256 = vmatprep.subr.bf16.mxu0 %v5909_v1  ;;  %v3694_v7 = vpack.c.bf16 %v3688_v6, %v3687_v5 }
 0x1d6   : > { %4923 = vmatmul.mubr.msk.bf16.gmra.mrb[16].mxu1 %vm422_vm1, %v1743_v2  ;;  %v3686_v2 = vld [vmem:[#allocation2 + $0x137] sm:$0xff] }
 0x1d7   : > { %4928 = vmatprep.mubr.msk.bf16.mxu1 %vm5910_vm0, %v5909_v1  ;;  %v3693_v4 = vpack.c.bf16 %v3686_v2, %v3685_v0 }
 0x1db   : > { %5219 = vmatmul.mubr.msk.bf16.gmra.mrb[4].mxu0 %vm422_vm1, %v3448_v12 }
 0x1dc   : > { %5222 = vmatprep.mubr.msk.bf16.mxu0 %vm5910_vm0, %v5909_v1 }
 0x1de   : > { %4929 = vmatmul.mubr.msk.bf16.vlgmr.msra.gmra.mrb[0].mxu1 %vm422_vm1, %v1861_v11 }
 0x1df   : > { %4932 = vmatprep.mubr.msk.bf16.mxu1 %vm5910_vm0, %v5909_v1  ;;  %4949 = vmatpush3.bf16.msra.mxu1 %v5866_v13 }
 0x1e0   : > { %5278 = vmatprep.subr.bf16.mxu1 %v5909_v1 }
 0x1e3   : > { %5223 = vmatmul.mubr.msk.bf16.gmra.mrb[8].mxu0 %vm422_vm1, %v3449_v17 }
 0x1e4   : > { %5226 = vmatprep.mubr.msk.bf16.mxu0 %vm5910_vm0, %v5909_v1 }
 0x1e6   : > { %4933 = vmatmul.mubr.msk.bf16.gmra.mrb[4].mxu1 %vm422_vm1, %v1862_v16 }
 0x1e7   : > { %4936 = vmatprep.mubr.msk.bf16.mxu1 %vm5910_vm0, %v5909_v1 }
 0x1eb   : > { %5227 = vmatmul.mubr.msk.bf16.gmra.mrb[12].mxu0 %vm422_vm1, %v3450_v21 }
 0x1ec   : > { %5230 = vmatprep.mubr.msk.bf16.mxu0 %vm5910_vm0, %v5909_v1 }
 0x1ee   : > { %4937 = vmatmul.mubr.msk.bf16.gmra.mrb[8].mxu1 %vm422_vm1, %v1863_v20 }
 0x1ef   : > { %4940 = vmatprep.mubr.msk.bf16.mxu1 %vm5910_vm0, %v5909_v1 }
 0x1f3   : > { %5231 = vmatmul.mubr.msk.bf16.gmra.mrb[16].mxu0 %vm422_vm1, %v3451_v27 }
 0x1f4   : > { %5236 = vmatprep.mubr.msk.bf16.mxu0 %vm5910_vm0, %v5909_v1 }
 0x1f6   : > { %4941 = vmatmul.mubr.msk.bf16.gmra.mrb[12].mxu1 %vm422_vm1, %v1864_v26 }
 0x1f7   : > { %4944 = vmatprep.mubr.msk.bf16.mxu1 %vm5910_vm0, %v5909_v1 }
 0x1fb   : > { %5237 = vmatmul.mubr.msk.bf16.vlgmr.msra.gmra.mrb[0].mxu0 %vm422_vm1, %v3569_v33 }
 0x1fc   : > { %5257 = vmatpush3.bf16.msra.mxu0 %v5867_v34  ;;  %5240 = vmatprep.mubr.msk.bf16.mxu0 %vm5910_vm0, %v5909_v1 }
 0x1fe   : > { %4945 = vmatmul.mubr.msk.bf16.gmra.mrb[16].mxu1 %vm422_vm1, %v1865_v32  ;;  %v3877_v36 = vpop.permute.xlu1 %3876 }
 0x1ff   : > { %4950 = vmatprep.mubr.msk.bf16.mxu1 %vm5910_vm0, %v5909_v1 }
 0x203   : > { %5241 = vmatmul.mubr.msk.bf16.gmra.mrb[4].mxu0 %vm422_vm1, %v3570_v38 }
 0x204   : > { %5244 = vmatprep.mubr.msk.bf16.mxu0 %vm5910_vm0, %v5909_v1 }
 0x206   : > { %4951 = vmatmul.mubr.msk.bf16.vlgmr.msra.gmra.mrb[0].mxu1 %vm422_vm1, %v1983_v37 }
 0x207   : > { %4954 = vmatprep.mubr.msk.bf16.mxu1 %vm5910_vm0, %v5909_v1  ;;  %5279 = vmatpush3.bf16.msra.mxu1 %v5868_v40 }
 0x20b   : > { %5245 = vmatmul.mubr.msk.bf16.gmra.mrb[8].mxu0 %vm422_vm1, %v3571_v42 }
 0x20c   : > { %5248 = vmatprep.mubr.msk.bf16.mxu0 %vm5910_vm0, %v5909_v1 }
 0x20e   : > { %4955 = vmatmul.mubr.msk.bf16.gmra.mrb[4].mxu1 %vm422_vm1, %v1984_v41 }
 0x20f   : > { %4958 = vmatprep.mubr.msk.bf16.mxu1 %vm5910_vm0, %v5909_v1 }
 0x213   : > { %5249 = vmatmul.mubr.msk.bf16.gmra.mrb[12].mxu0 %vm422_vm1, %v3572_v46 }
 0x214   : > { %5252 = vmatprep.mubr.msk.bf16.mxu0 %vm5910_vm0, %v5909_v1 }
 0x216   : > { %4959 = vmatmul.mubr.msk.bf16.gmra.mrb[8].mxu1 %vm422_vm1, %v1985_v45 }
 0x217   : > { %4962 = vmatprep.mubr.msk.bf16.mxu1 %vm5910_vm0, %v5909_v1 }
 0x21b   : > { %5253 = vmatmul.mubr.msk.bf16.gmra.mrb[16].mxu0 %vm422_vm1, %v3573_v22 }
 0x21c   : > { %5258 = vmatprep.mubr.msk.bf16.mxu0 %vm5910_vm0, %v5909_v1 }
 0x21e   : > { %4963 = vmatmul.mubr.msk.bf16.gmra.mrb[12].mxu1 %vm422_vm1, %v1986_v49 }
 0x21f   : > { %4966 = vmatprep.mubr.msk.bf16.mxu1 %vm5910_vm0, %v5909_v1 }
 0x223   : > { %5259 = vmatmul.mubr.msk.bf16.vlgmr.msra.gmra.mrb[0].mxu0 %vm422_vm1, %v3691_v54  ;;  %v3882_v54 = vpop.permute.xlu1 %3881 }
 0x224   : > { %5262 = vmatprep.mubr.msk.bf16.mxu0 %vm5910_vm0, %v5909_v1 }
 0x226   : > { %4967 = vmatmul.mubr.msk.bf16.gmra.mrb[16].mxu1 %vm422_vm1, %v1987_v53 }
 0x227   : > { %4984 = vmatprep.mubr.msk.bf16.mxu1 %vm5910_vm0, %v5909_v1 }
 0x22b   : > { %5263 = vmatmul.mubr.msk.bf16.gmra.mrb[4].mxu0 %vm422_vm1, %v3692_v61  ;;  %v3887_v61 = vpop.permute.xlu0 %3886 }
 0x22c   : > { %5266 = vmatprep.mubr.msk.bf16.mxu0 %vm5910_vm0, %v5909_v1 }
 0x22e   : > { %4985 = vmatmul.mubr.msk.bf16.vlgmr.msra.gmra.mrb[12].mxu1 %vm422_vm1, %v2108_v60 }
 0x22f   : > { %4988 = vmatprep.mubr.msk.bf16.mxu1 %vm5910_vm0, %v5909_v1 }
 0x233   : > { %5267 = vmatmul.mubr.msk.bf16.gmra.mrb[8].mxu0 %vm422_vm1, %v3693_v4 }
 0x234   : > { %5270 = vmatprep.mubr.msk.bf16.mxu0 %vm5910_vm0, %v5909_v1 }
 0x236   : > { %4989 = vmatmul.mubr.msk.bf16.gmra.mrb[16].mxu1 %vm422_vm1, %v2109_v3 }
 0x23b   : > { %5271 = vmatmul.mubr.msk.bf16.gmra.mrb[12].mxu0 %vm422_vm1, %v3694_v7 }
 0x23c   : > { %5274 = vmatprep.mubr.msk.bf16.mxu0 %vm5910_vm0, %v5909_v1 }
 0x243   : > { %5275 = vmatmul.mubr.msk.bf16.gmra.mrb[16].mxu0 %vm422_vm1, %v3695_v10 }
 0x2d9   : > { %v2046_v11 = vpop.f32.mrb[0].mxu1 }
 0x2da   : > { %v4952_v12 = vpop.f32.mrb[1].mxu1 }
 0x2db   : > { %v2049_v13 = vpop.f32.mrb[2].mxu1 }
 0x2dc   : > { %v4953_v14 = vpop.f32.mrb[3].mxu1 }
 0x2e1   : > { %v2054_v15 = vpop.f32.mrb[4].mxu1 }
 0x2e2   : > { %v4956_v16 = vpop.f32.mrb[5].mxu1 }
 0x2e3   : > { %v2057_v17 = vpop.f32.mrb[6].mxu1 }
 0x2e4   : > { %v4957_v18 = vpop.f32.mrb[7].mxu1 }
 0x2e5   : > { %v3892_v18 = vpop.permute.xlu1 %3891 }
 0x2e9   : > { %v6705_v19 = vpop.f32.mrb[8].mxu1 }
 0x2ea   : > { %v4960_v20 = vpop.f32.mrb[9].mxu1 }
 0x2eb   : > { %v6708_v1 = vpop.f32.mrb[10].mxu1 }
 0x2ec   : > { %v4961_v21 = vpop.f32.mrb[11].mxu1 }
 0x2f6   : > { %v3754_v24 = vpop.f32.mrb[0].mxu0 }
 0x2f7   : > { %v5280_v25 = vadd.f32 %v3754_v24, %v2046_v11  ;;  %v5260_v26 = vpop.f32.mrb[1].mxu0 }
 0x2f8   : > { %v3757_v27 = vpop.f32.mrb[2].mxu0 }
 0x2f9   : > { %v4410_v29 = vpack.c.bf16 %v5280_v25, %v5280_v25  ;;  %v3914_v30 = vmul.f32 %v5280_v25, %v3867_v23  ;;  %v5281_v31 = vadd.f32 %v3757_v27, %v2049_v13  ;;  %v5261_v32 = vpop.f32.mrb[3].mxu0 }
 0x2fb   : > { %3844 = vst.msk [vmem:[%s6718_s7] sm:$0xf] %vm3843_vm2, %v4410_v29  ;;  %v3950_v33 = vmul.f32 %v5280_v25, %v3914_v30  ;;  %v4411_v34 = vpack.c.bf16 %v5281_v31, %v5281_v31  ;;  %v3915_v35 = vmul.f32 %v5281_v31, %v3872_v28  ;;  %v3925_v37 = vsel %vm3924_vm3, %v3914_v30, 0.0 }
 0x2fd   : > { %3845 = vst.msk [vmem:[%s6718_s7 + $0x4] sm:$0xf] %vm3843_vm2, %v4411_v34  ;;  %v3926_v38 = vsel %vm3924_vm3, %v3915_v35, 0.0  ;;  %v3951_v39 = vmul.f32 %v5281_v31, %v3915_v35  ;;  %v3960_v43 = vsel %vm3924_vm3, %v3950_v33, 0.0  ;;  %v3897_v33 = vpop.permute.xlu0 %3896 }
 0x2fe   : > { %v3927_v40 = vadd.f32 %v3926_v38, %v3925_v37  ;;  %v3762_v41 = vpop.f32.mrb[4].mxu0 }
 0x2ff   : > { %v3961_v44 = vsel %vm3924_vm3, %v3951_v39, 0.0  ;;  %v5282_v45 = vadd.f32 %v3762_v41, %v2054_v15  ;;  %v5264_v46 = vpop.f32.mrb[5].mxu0 }
 0x300   : > { %v3962_v48 = vadd.f32 %v3961_v44, %v3960_v43  ;;  %v3765_v49 = vpop.f32.mrb[6].mxu0 }
 0x301   : > { %v2192_v59 = vpop.f32.mrb[12].mxu1  ;;  %v4412_v50 = vpack.c.bf16 %v5282_v45, %v5282_v45  ;;  %v3916_v51 = vmul.f32 %v5282_v45, %v3877_v36  ;;  %v5283_v52 = vadd.f32 %v3765_v49, %v2057_v17  ;;  %v5265_v53 = vpop.f32.mrb[7].mxu0 }
 0x302   : > { %v4986_v42 = vpop.f32.mrb[13].mxu1  ;;  %v3907_v53 = vpop.permute.xlu0 %3906 }
 0x303   : > { %v2195_v47 = vpop.f32.mrb[14].mxu1  ;;  %3846 = vst.msk [vmem:[%s6718_s7 + $0x8] sm:$0xf] %vm3843_vm2, %v4412_v50  ;;  %v3928_v55 = vsel %vm3924_vm3, %v3916_v51, 0.0  ;;  %v3952_v56 = vmul.f32 %v5282_v45, %v3916_v51  ;;  %v4413_v57 = vpack.c.bf16 %v5283_v52, %v5283_v52  ;;  %v3917_v58 = vmul.f32 %v5283_v52, %v3882_v54 }
 0x304   : > { %v4987_v22 = vpop.f32.mrb[15].mxu1  ;;  %v3929_v60 = vadd.f32 %v3928_v55, %v3927_v40  ;;  %v3902_v40 = vpop.permute.xlu1 %3901 }
 0x305   : > { %v3963_v62 = vsel %vm3924_vm3, %v3952_v56, 0.0  ;;  %3847 = vst.msk [vmem:[%s6718_s7 + $0xc] sm:$0xf] %vm3843_vm2, %v4413_v57  ;;  %v3930_v63 = vsel %vm3924_vm3, %v3917_v58, 0.0  ;;  %v3953_v0 = vmul.f32 %v5283_v52, %v3917_v58 }
 0x306   : > { %v3964_v3 = vadd.f32 %v3963_v62, %v3962_v48  ;;  %v3931_v4 = vadd.f32 %v3930_v63, %v3929_v60  ;;  %v3770_v5 = vpop.f32.mrb[8].mxu0 }
 0x307   : > { %v3965_v7 = vsel %vm3924_vm3, %v3953_v0, 0.0  ;;  %v5284_v8 = vadd.f32 %v3770_v5, %v6705_v19  ;;  %v5268_v9 = vpop.f32.mrb[9].mxu0 }
 0x308   : > { %v3966_v11 = vadd.f32 %v3965_v7, %v3964_v3  ;;  %v3773_v12 = vpop.f32.mrb[10].mxu0 }
 0x309   : > { %v2200_v2 = vpop.f32.mrb[16].mxu1  ;;  %v4414_v14 = vpack.c.bf16 %v5284_v8, %v5284_v8  ;;  %v3918_v15 = vmul.f32 %v5284_v8, %v3887_v61  ;;  %v5285_v16 = vadd.f32 %v3773_v12, %v6708_v1  ;;  %v5269_v17 = vpop.f32.mrb[11].mxu0 }
 0x30a   : > { %v4990_v6 = vpop.f32.mrb[17].mxu1  ;;  %v3912_v61 = vpop.permute.xlu1 %3911 }
 0x30b   : > { %v2203_v10 = vpop.f32.mrb[18].mxu1  ;;  %3848 = vst.msk [vmem:[%s6718_s7 + $0x10] sm:$0xf] %vm3843_vm2, %v4414_v14  ;;  %v3932_v20 = vsel %vm3924_vm3, %v3918_v15, 0.0  ;;  %v3954_v21 = vmul.f32 %v5284_v8, %v3918_v15  ;;  %v4415_v23 = vpack.c.bf16 %v5285_v16, %v5285_v16  ;;  %v3919_v24 = vmul.f32 %v5285_v16, %v3892_v18 }
 0x30c   : > { %v4991_v13 = vpop.f32.mrb[19].mxu1  ;;  %v3933_v19 = vadd.f32 %v3932_v20, %v3931_v4 }
 0x30d   : > { %v3967_v25 = vsel %vm3924_vm3, %v3954_v21, 0.0  ;;  %3849 = vst.msk [vmem:[%s6718_s7 + $0x14] sm:$0xf] %vm3843_vm2, %v4415_v23  ;;  %v3934_v26 = vsel %vm3924_vm3, %v3919_v24, 0.0  ;;  %v3955_v27 = vmul.f32 %v5285_v16, %v3919_v24 }
 0x30e   : > { %v3968_v28 = vadd.f32 %v3967_v25, %v3966_v11  ;;  %v3935_v1 = vadd.f32 %v3934_v26, %v3933_v19  ;;  %v3778_v29 = vpop.f32.mrb[12].mxu0 }
 0x30f   : > { %v3969_v30 = vsel %vm3924_vm3, %v3955_v27, 0.0  ;;  %v5286_v31 = vadd.f32 %v3778_v29, %v2192_v59  ;;  %v5272_v32 = vpop.f32.mrb[13].mxu0 }
 0x310   : > { %v3970_v34 = vadd.f32 %v3969_v30, %v3968_v28  ;;  %v3781_v35 = vpop.f32.mrb[14].mxu0 }
 0x311   : > { %v4416_v36 = vpack.c.bf16 %v5286_v31, %v5286_v31  ;;  %v3920_v37 = vmul.f32 %v5286_v31, %v3897_v33  ;;  %v5287_v38 = vadd.f32 %v3781_v35, %v2195_v47  ;;  %v5273_v39 = vpop.f32.mrb[15].mxu0 }
 0x313   : > { %3850 = vst.msk [vmem:[%s6718_s7 + $0x18] sm:$0xf] %vm3843_vm2, %v4416_v36  ;;  %v3936_v41 = vsel %vm3924_vm3, %v3920_v37, 0.0  ;;  %v3956_v42 = vmul.f32 %v5286_v31, %v3920_v37  ;;  %v4417_v43 = vpack.c.bf16 %v5287_v38, %v5287_v38  ;;  %v3921_v44 = vmul.f32 %v5287_v38, %v3902_v40 }
 0x314   : > { %v3937_v45 = vadd.f32 %v3936_v41, %v3935_v1 }
 0x315   : > { %v3971_v59 = vsel %vm3924_vm3, %v3956_v42, 0.0  ;;  %3851 = vst.msk [vmem:[%s6718_s7 + $0x1c] sm:$0xf] %vm3843_vm2, %v4417_v43  ;;  %v3938_v46 = vsel %vm3924_vm3, %v3921_v44, 0.0  ;;  %v3957_v48 = vmul.f32 %v5287_v38, %v3921_v44 }
 0x316   : > { %v3972_v49 = vadd.f32 %v3971_v59, %v3970_v34  ;;  %v3939_v47 = vadd.f32 %v3938_v46, %v3937_v45  ;;  %v3786_v22 = vpop.f32.mrb[16].mxu0 }
 0x317   : > { %v3973_v50 = vsel %vm3924_vm3, %v3957_v48, 0.0  ;;  %v5288_v51 = vadd.f32 %v3786_v22, %v2200_v2  ;;  %v5276_v52 = vpop.f32.mrb[17].mxu0 }
 0x318   : > { %v3974_v54 = vadd.f32 %v3973_v50, %v3972_v49  ;;  %v3789_v55 = vpop.f32.mrb[18].mxu0 }
 0x319   : > { %v4418_v56 = vpack.c.bf16 %v5288_v51, %v5288_v51  ;;  %v3922_v57 = vmul.f32 %v5288_v51, %v3907_v53  ;;  %v5289_v58 = vadd.f32 %v3789_v55, %v2203_v10  ;;  %v5277_v60 = vpop.f32.mrb[19].mxu0 }
 0x31b   : > { %3852 = vst.msk [vmem:[%s6718_s7 + $0x20] sm:$0xf] %vm3843_vm2, %v4418_v56  ;;  %v3940_v62 = vsel %vm3924_vm3, %v3922_v57, 0.0  ;;  %v3958_v63 = vmul.f32 %v5288_v51, %v3922_v57  ;;  %v4419_v0 = vpack.c.bf16 %v5289_v58, %v5289_v58  ;;  %v3923_v3 = vmul.f32 %v5289_v58, %v3912_v61 }
 0x31c   : > { %v3941_v2 = vadd.f32 %v3940_v62, %v3939_v47 }
 0x31d   : > { %v3975_v4 = vsel %vm3924_vm3, %v3958_v63, 0.0  ;;  %3853 = vst.msk [vmem:[%s6718_s7 + $0x24] sm:$0xf] %vm3843_vm2, %v4419_v0  ;;  %v3942_v5 = vsel %vm3924_vm3, %v3923_v3, 0.0  ;;  %v3959_v6 = vmul.f32 %v5289_v58, %v3923_v3 }
 0x31e   : > { %v3976_v7 = vadd.f32 %v3975_v4, %v3974_v54  ;;  %v3943_v8 = vadd.f32 %v3942_v5, %v3941_v2 }
 0x31f   : > { %v3977_v9 = vsel %vm3924_vm3, %v3959_v6, 0.0 }
 0x320   : > { %v3944_v10 = vrot.slane %v3943_v8, 4  ;;  %v3978_v11 = vadd.f32 %v3977_v9, %v3976_v7 }
 0x322   : > { %v3945_v12 = vadd.f32 %v3944_v10, %v3943_v8  ;;  %v3979_v13 = vrot.slane %v3978_v11, 4 }
 0x324   : > { %v3946_v14 = vrot.slane %v3945_v12, 2  ;;  %v3980_v15 = vadd.f32 %v3979_v13, %v3978_v11 }
 0x326   : > { %v3947_v16 = vadd.f32 %v3946_v14, %v3945_v12  ;;  %v3981_v17 = vrot.slane %v3980_v15, 2 }
 0x328   : > { %v3948_v18 = vrot.slane %v3947_v16, 1  ;;  %v3982_v20 = vadd.f32 %v3981_v17, %v3980_v15 }
 0x32a   : > { %v3983_v21 = vrot.slane %v3982_v20, 1  ;;  %v3949_v23 = vadd.f32 %v3948_v18, %v3947_v16 }
 0x32c   : > { %v3984_v24 = vadd.f32 %v3983_v21, %v3982_v20 }
 0x32e   : > { %v3986_v19 = vsel %vm3985_vm4, %v3949_v23, %v3984_v24 }
 0x32f   : > { %3988 = vst.msk [vmem:[%s390_s14] sm:$0x3] %vm3987_vm5, %v3986_v19 }
 0x330 PF: > { %s17_s25 = sadd.s32 1, %s5907_s25   ;;  %s6789_s21 = smov %s5899_s23 }
 0x331   : > { %p14_p10 = scmp.ge.s32.totalorder %s17_s25, 18   ;;  %s6790_s22 = smov %s5903_s24 }
 0x332   : > { %s6791_s23 = smov %s6794_s26  ;;  %s6792_s24 = smov %s6798_s27 }
 0x333   :  { %16 = sbr.rel (!%p14_p10) target bundleno = 3 (0x3), region = 116 }

// kernel: decoder_block_forward.5
= control target key start
LH: loop header
LB: loop body
LE: loop exit
PB: predicated region body
PF: predicated region fallthrough
CT: control target
= control target key end

     0   :  { %s640_s15 = smov 0   ;;  %s642_s16 = smov 0   ;;  %s763_s0 = inlined_call_operand.vmem [shape: f32[80,1], index: 0, kind: input, shape index: {}]   ;;  %s764_s1 = inlined_call_operand.vmem [shape: f32[1,8], index: 1, kind: input, shape index: {}]   ;;  %s765_s2 = inlined_call_operand.vmem [shape: f32[1,8], index: 2, kind: input, shape index: {}]   ;;  %s766_s3 = inlined_call_operand.vmem [shape: bf16[2,8,80,8], index: 3, kind: input, shape index: {}]   ;;  %s767_s4 = inlined_call_operand.vmem [shape: f32[2,8,80,8], index: 4, kind: output, shape index: {}]  }
   0x1   :  { %s644_s17 = smov 0   ;;  %s646_s18 = smov 0  }
   0x2   :  { %s648_s19 = smov 0  }
   0x3 LB: > { %s23_s20 = sadd.s32 1, %s604_s17  ;;  %s26_s21 = sadd.s32 1, %s608_s18  ;;  %s612_s19 = sphi %s648_s19, %s14_s19   ;;  %s608_s18 = sphi %s646_s18, %s771_s18   ;;  %s604_s17 = sphi %s644_s17, %s770_s17   ;;  %s600_s16 = sphi %s642_s16, %s769_s16   ;;  %s596_s15 = sphi %s640_s15, %s768_s15  }
   0x4   : > { %p24_p0 = scmp.ge.s32.totalorder %s23_s20, 8  ;;  %p498_p1 = scmp.ge.s32.totalorder %s612_s19, 1 }
   0x5   : > { %p182_p2 = scmp.lt.s32.totalorder %s612_s19, 17 }
   0x6   : > { %s773_s20 = smov (%p24_p0, %s23_s20), 0  ;;  %s775_s21 = smov (!%p24_p0, %s26_s21), %s608_s18 }
   0x7   : > { %p183_p3 = pnand %p498_p1, %p182_p2  ;;  %p28_p4 = scmp.ge.s32.totalorder %s775_s21, 2 }
   0x8   : > { %v320_v0 = vld [vmem:[%s763_s0 + $0x10] sm:$0xff] (!%p183_p3)  ;;  %v318_v1 = vld [vmem:[%s763_s0] sm:$0xff] (!%p183_p3)  ;;  %v614_v2 = vmov (!%p183_p3), 0   ;;  %v321_v3 = vld [vmem:[%s763_s0 + $0x18] sm:$0xff] (!%p183_p3)  ;;  %p216_p5 = scmp.lt.s32.totalorder (!%p183_p3), %s600_s16, 1  ;;  %p218_p6 = scmp.lt.s32.totalorder (!%p183_p3), %s596_s15, 7 }
   0x9   : > { %s777_s21 = smov (%p28_p4, %s775_s21), 0  ;;  %186 = sbr.rel (%p183_p3) target bundleno = 158 (0x9e), region = 36 }
   0xa   : > { %573 = vset.pattern.permute.xlu1 (!%p183_p3), %v614_v2  ;;  %572 = vset.pattern.permute.xlu0 (!%p183_p3), %v614_v2  ;;  %v319_v4 = vld [vmem:[%s763_s0 + $0x8] sm:$0xff] (!%p183_p3)  ;;  %v322_v6 = vld [vmem:[%s763_s0 + $0x20] sm:$0xff] (!%p183_p3)  ;;  %v325_v7 = vld [vmem:[%s763_s0 + $0x38] sm:$0xff] (!%p183_p3)  ;;  %vm388_vm4 = vcmask (!%p183_p3), 64512  }
   0xb   : > { %340 = vperm.xlu1 (!%p183_p3), %573, %v320_v0   ;;  %330 = vperm.xlu0 (!%p183_p3), %572, %v318_v1   ;;  %v323_v5 = vld [vmem:[%s763_s0 + $0x28] sm:$0xff] (!%p183_p3)  ;;  %v324_v8 = vld [vmem:[%s763_s0 + $0x30] sm:$0xff] (!%p183_p3)  ;;  %v326_v10 = vld [vmem:[%s763_s0 + $0x40] sm:$0xff] (!%p183_p3) }
   0xc   : > { %v327_v9 = vld [vmem:[%s763_s0 + $0x48] sm:$0xff] (!%p183_p3)  ;;  %v501_v15 = vld [vmem:[%s764_s1] ss:$0 sm:$0xff] (!%p183_p3) }
   0xd   : > { %v502_v21 = vld [vmem:[%s765_s2] ss:$0 sm:$0xff] (!%p183_p3) }
   0xf   : > { %345 = vperm.xlu1 (!%p183_p3), %573, %v321_v3   ;;  %335 = vperm.xlu0 (!%p183_p3), %572, %v319_v4  }
  0x10   : > { %s779_s16 = smov (!%p216_p5, %s600_s16), 1  ;;  %s781_s15 = smov (!%p218_p6, %s596_s15), 7 }
  0x11   : > { %s530_s23 = smul.u32 80, %s779_s16 }
  0x12   : > { %s529_s24 = smul.u32 10, %s781_s15 }
  0x13   : > { %355 = vperm.xlu1 %573, %v323_v5   ;;  %350 = vperm.xlu0 %572, %v322_v6  }
  0x14   : > { %s708_s25 = sadd.s32 %s530_s23, %s529_s24 }
  0x15   : > { %s499_s26 = sshll.u32 %s708_s25, 2  ;;  %s500_s6 = sshll.u32 %s708_s25, 3 }
  0x16   : > { %s224_s29 = scalar_lea.vmem %s766_s3, %s499_s26  ;;  %s724_s9 = scalar_lea.vmem %s767_s4, %s500_s6 }
  0x17   : > { %365 = vperm.xlu1 %573, %v325_v7   ;;  %360 = vperm.xlu0 %572, %v324_v8   ;;  %v525_v11 = vld [vmem:[%s224_s29 + $0x8] sm:$0xff]   ;;  %v506_v12 = vld [vmem:[%s224_s29] sm:$0xff]   ;;  %v526_v18 = vld [vmem:[%s224_s29 + $0x10] sm:$0xff]  }
  0x18   : > { %v511_v13 = vunpack.c.l.bf16 %v525_v11  ;;  %v507_v14 = vunpack.c.l.bf16 %v506_v12  ;;  %v512_v16 = vunpack.c.h.bf16 %v525_v11  ;;  %v508_v17 = vunpack.c.h.bf16 %v506_v12  ;;  %v527_v26 = vld [vmem:[%s224_s29 + $0x18] sm:$0xff]   ;;  %v528_v35 = vld [vmem:[%s224_s29 + $0x20] sm:$0xff]  }
  0x19   : > { %v516_v22 = vunpack.c.h.bf16 %v526_v18  ;;  %v515_v23 = vunpack.c.l.bf16 %v526_v18  ;;  %v520_v31 = vunpack.c.h.bf16 %v527_v26  ;;  %v519_v34 = vunpack.c.l.bf16 %v527_v26 }
  0x1a   : > { %v263_v19 = vmul.f32 %v511_v13, %v501_v15  ;;  %v261_v20 = vmul.f32 %v507_v14, %v501_v15  ;;  %v264_v24 = vmul.f32 %v512_v16, %v501_v15  ;;  %v262_v25 = vmul.f32 %v508_v17, %v501_v15 }
  0x1b   : > { %375 = vperm.xlu1 %573, %v327_v9   ;;  %370 = vperm.xlu0 %572, %v326_v10   ;;  %v266_v29 = vmul.f32 %v516_v22, %v501_v15  ;;  %v265_v30 = vmul.f32 %v515_v23, %v501_v15  ;;  %v268_v40 = vmul.f32 %v520_v31, %v501_v15  ;;  %v524_v41 = vunpack.c.h.bf16 %v528_v35 }
  0x1c   : > { %v280_v27 = vadd.f32 %v502_v21, %v263_v19  ;;  %v278_v28 = vadd.f32 %v502_v21, %v261_v20  ;;  %v281_v32 = vadd.f32 %v502_v21, %v264_v24  ;;  %v279_v33 = vadd.f32 %v502_v21, %v262_v25 }
  0x1d   : > { %v283_v38 = vadd.f32 %v502_v21, %v266_v29  ;;  %v282_v39 = vadd.f32 %v502_v21, %v265_v30  ;;  %v267_v44 = vmul.f32 %v519_v34, %v501_v15  ;;  %v523_v47 = vunpack.c.l.bf16 %v528_v35 }
  0x1e   : > { %v300_v36 = vmul.f32 0.01, %v280_v27  ;;  %v298_v37 = vmul.f32 0.01, %v278_v28  ;;  %vm290_vm0 = vcmp.gt.f32.partialorder %v280_v27, 0.0  ;;  %vm288_vm1 = vcmp.gt.f32.partialorder %v278_v28, 0.0 }
  0x1f   : > { %vm291_vm2 = vcmp.gt.f32.partialorder %v281_v32, 0.0  ;;  %v301_v42 = vmul.f32 0.01, %v281_v32  ;;  %v299_v43 = vmul.f32 0.01, %v279_v33  ;;  %vm289_vm3 = vcmp.gt.f32.partialorder %v279_v33, 0.0 }
  0x20   : > { %v310_v45 = vsel %vm290_vm0, %v280_v27, %v300_v36  ;;  %v308_v46 = vsel %vm288_vm1, %v278_v28, %v298_v37  ;;  %vm293_vm5 = vcmp.gt.f32.partialorder %v283_v38, 0.0  ;;  %v303_v50 = vmul.f32 0.01, %v283_v38 }
  0x21   : > { %v285_v51 = vadd.f32 %v502_v21, %v268_v40  ;;  %v311_v54 = vsel %vm291_vm2, %v281_v32, %v301_v42  ;;  %v309_v55 = vsel %vm289_vm3, %v279_v33, %v299_v43  ;;  %v302_v56 = vmul.f32 0.01, %v282_v39 }
  0x22   : > { %v284_v57 = vadd.f32 %v502_v21, %v267_v44  ;;  %v270_v58 = vmul.f32 %v524_v41, %v501_v15  ;;  %v269_v59 = vmul.f32 %v523_v47, %v501_v15  ;;  %vm292_vm6 = vcmp.gt.f32.partialorder %v282_v39, 0.0 }
  0x23   : > { %v313_v0 = vsel %vm293_vm5, %v283_v38, %v303_v50  ;;  %v305_v1 = vmul.f32 0.01, %v285_v51  ;;  %v312_v2 = vsel %vm292_vm6, %v282_v39, %v302_v56  ;;  %vm295_vm7 = vcmp.gt.f32.partialorder %v285_v51, 0.0 }
  0x24   : > { %v304_v3 = vmul.f32 0.01, %v284_v57  ;;  %v287_v4 = vadd.f32 %v502_v21, %v270_v58  ;;  %v286_v5 = vadd.f32 %v502_v21, %v269_v59  ;;  %vm294_vm8 = vcmp.gt.f32.partialorder %v284_v57, 0.0 }
  0x25   : > { %v315_v10 = vsel %vm295_vm7, %v285_v51, %v305_v1 }
  0x26   : > { %v314_v11 = vsel %vm294_vm8, %v284_v57, %v304_v3  ;;  %v307_v12 = vmul.f32 0.01, %v287_v4  ;;  %v306_v13 = vmul.f32 0.01, %v286_v5  ;;  %vm297_vm9 = vcmp.gt.f32.partialorder %v287_v4, 0.0 }
  0x27   : > { %vm296_vm10 = vcmp.gt.f32.partialorder %v286_v5, 0.0 }
  0x28   : > { %v317_v18 = vsel %vm297_vm9, %v287_v4, %v307_v12  ;;  %v316_v19 = vsel %vm296_vm10, %v286_v5, %v306_v13 }
  0x8a   : > { %v341_v48 = vpop.permute.xlu1 %340  ;;  %v331_v49 = vpop.permute.xlu0 %330 }
  0x8b   : > { %v380_v52 = vmul.f32 %v341_v48, %v310_v45  ;;  %v378_v53 = vmul.f32 %v331_v49, %v308_v46 }
  0x8d   : > { %391 = vst.msk [vmem:[%s724_s9 + $0x10] sm:$0xff] %vm388_vm4, %v380_v52  ;;  %389 = vst.msk [vmem:[%s724_s9] sm:$0xff] %vm388_vm4, %v378_v53 }
  0x8e   : > { %v346_v60 = vpop.permute.xlu1 %345  ;;  %v336_v61 = vpop.permute.xlu0 %335 }
  0x8f   : > { %v381_v62 = vmul.f32 %v346_v60, %v311_v54  ;;  %v379_v63 = vmul.f32 %v336_v61, %v309_v55 }
  0x91   : > { %392 = vst.msk [vmem:[%s724_s9 + $0x18] sm:$0xff] %vm388_vm4, %v381_v62  ;;  %390 = vst.msk [vmem:[%s724_s9 + $0x8] sm:$0xff] %vm388_vm4, %v379_v63 }
  0x92   : > { %v356_v6 = vpop.permute.xlu1 %355  ;;  %v351_v7 = vpop.permute.xlu0 %350 }
  0x93   : > { %v383_v8 = vmul.f32 %v356_v6, %v313_v0  ;;  %v382_v9 = vmul.f32 %v351_v7, %v312_v2 }
  0x95   : > { %394 = vst.msk [vmem:[%s724_s9 + $0x28] sm:$0xff] %vm388_vm4, %v383_v8  ;;  %393 = vst.msk [vmem:[%s724_s9 + $0x20] sm:$0xff] %vm388_vm4, %v382_v9 }
  0x96   : > { %v366_v14 = vpop.permute.xlu1 %365  ;;  %v361_v15 = vpop.permute.xlu0 %360 }
  0x97   : > { %v385_v16 = vmul.f32 %v366_v14, %v315_v10  ;;  %v384_v17 = vmul.f32 %v361_v15, %v314_v11 }
  0x99   : > { %396 = vst.msk [vmem:[%s724_s9 + $0x38] sm:$0xff] %vm388_vm4, %v385_v16  ;;  %395 = vst.msk [vmem:[%s724_s9 + $0x30] sm:$0xff] %vm388_vm4, %v384_v17 }
  0x9a   : > { %v376_v20 = vpop.permute.xlu1 %375  ;;  %v371_v21 = vpop.permute.xlu0 %370 }
  0x9b   : > { %v387_v22 = vmul.f32 %v376_v20, %v317_v18  ;;  %v386_v23 = vmul.f32 %v371_v21, %v316_v19 }
  0x9d   : > { %398 = vst.msk [vmem:[%s724_s9 + $0x48] sm:$0xff] %vm388_vm4, %v387_v22  ;;  %397 = vst.msk [vmem:[%s724_s9 + $0x40] sm:$0xff] %vm388_vm4, %v386_v23 }
  0x9e PF: > { %s14_s19 = sadd.s32 1, %s612_s19   ;;  %s768_s15 = smov %s604_s17 }
  0x9f   : > { %p11_p7 = scmp.ge.s32.totalorder %s14_s19, 18   ;;  %s769_s16 = smov %s608_s18 }
  0xa0   : > { %s770_s17 = smov %s773_s20  ;;  %s771_s18 = smov %s777_s21 }
  0xa1   :  { %13 = sbr.rel (!%p11_p7) target bundleno = 3 (0x3), region = 66 }

// kernel: decoder_block_forward.4
= control target key start
LH: loop header
LB: loop body
LE: loop exit
PB: predicated region body
PF: predicated region fallthrough
CT: control target
= control target key end

     0   :  { %s6516_s30 = smov 0   ;;  %s6518_s10 = smov 0   ;;  %s7697_s0 = inlined_call_operand.vmem [shape: f32[80,1], index: 0, kind: input, shape index: {}]   ;;  %s7698_s1 = inlined_call_operand.vmem [shape: f32[120,1], index: 1, kind: input, shape index: {}]   ;;  %s7699_s2 = inlined_call_operand.vmem [shape: f32[1,8], index: 2, kind: input, shape index: {}]   ;;  %s7700_s3 = inlined_call_operand.vmem [shape: f32[1,8], index: 3, kind: input, shape index: {}]   ;;  %s7701_s4 = inlined_call_operand.vmem [shape: bf16[2,10,120,8], index: 4, kind: input, shape index: {}, may-alias: {4,5,6}]   ;;  %s7702_s5 = inlined_call_operand.vmem [shape: bf16[2,10,120,8], index: 5, kind: input, shape index: {}, may-alias: {4,5,6}]   ;;  %s7703_s6 = inlined_call_operand.vmem [shape: bf16[2,10,120,8], index: 6, kind: input, shape index: {}, may-alias: {4,5,6}]   ;;  %s7704_s7 = inlined_call_operand.vmem [shape: bf16[27,8,8], index: 7, kind: input, shape index: {}]   ;;  %s7705_s8 = inlined_call_operand.vmem [shape: bf16[2,8,80,8], index: 8, kind: output, shape index: {0}]   ;;  %s7706_s9 = inlined_call_operand.vmem [shape: f32[2,8,2,8], index: 9, kind: output, shape index: {1}]  }
   0x1   :  { %s6520_s11 = smov 0   ;;  %s6522_s12 = smov 0  }
   0x2   :  { %s6524_s13 = smov 0  }
   0x3 LB: > { %s29_s14 = sadd.s32 1, %s6453_s11  ;;  %s32_s15 = sadd.s32 1, %s6457_s12  ;;  %s6461_s13 = sphi %s6524_s13, %s20_s13   ;;  %s6457_s12 = sphi %s6522_s12, %s7713_s12   ;;  %s6453_s11 = sphi %s6520_s11, %s7712_s11   ;;  %s6449_s10 = sphi %s6518_s10, %s7711_s10   ;;  %s6445_s30 = sphi %s6516_s30, %s7710_s30  }
   0x4   : > { %p30_p0 = scmp.ge.s32.totalorder %s29_s14, 8  ;;  %p4800_p1 = scmp.ge.s32.totalorder %s6461_s13, 1 }
   0x5   : > { %p352_p2 = scmp.lt.s32.totalorder %s6461_s13, 17 }
   0x6   : > { %s7715_s14 = smov (%p30_p0, %s29_s14), 0  ;;  %s7717_s15 = smov (!%p30_p0, %s32_s15), %s6457_s12 }
   0x7   : > { %p353_p3 = pnand %p4800_p1, %p352_p2  ;;  %p34_p4 = scmp.ge.s32.totalorder %s7717_s15, 2 }
   0x8   : > { %v858_v0 = vld [vmem:[%s7698_s1 + $0x20] sm:$0xff] (!%p353_p3)  ;;  %v856_v1 = vld [vmem:[%s7698_s1 + $0x10] sm:$0xff] (!%p353_p3)  ;;  %v6463_v2 = vmov (!%p353_p3), 0   ;;  %v857_v3 = vld [vmem:[%s7698_s1 + $0x18] sm:$0xff] (!%p353_p3)  ;;  %vm1309_vm0 = vcmask (!%p353_p3), 1043456   ;;  %v6464_v8 = vmov (!%p353_p3), 0.0  }
   0x9   : > { %s7719_s15 = smov (%p34_p4, %s7717_s15), 0  ;;  %356 = sbr.rel (%p353_p3) target bundleno = 930 (0x3a2), region = 52 }
   0xa   : > { %6419 = vset.pattern.permute.xlu1 (!%p353_p3), %v6463_v2  ;;  %6418 = vset.pattern.permute.xlu0 (!%p353_p3), %v6463_v2  ;;  %v593_v4 = vld [vmem:[%s7698_s1 + $0x8] sm:$0xff] (!%p353_p3)  ;;  %v860_v6 = vld [vmem:[%s7698_s1 + $0x30] sm:$0xff] (!%p353_p3)  ;;  %v861_v10 = vld [vmem:[%s7698_s1 + $0x38] sm:$0xff] (!%p353_p3)  ;;  %vm6465_vm1 = vmmov (!%p353_p3), 0   ;;  %s6618_s24 = sadd.s32 (!%p353_p3), 1, %s6445_s30  ;;  %p424_p5 = scmp.lt.s32.totalorder (!%p353_p3), %s6449_s10, 1 }
   0xb   : > { %891 = vperm.xlu1 (!%p353_p3), %6419, %v858_v0   ;;  %881 = vperm.xlu0 (!%p353_p3), %6418, %v856_v1   ;;  %v859_v5 = vld [vmem:[%s7698_s1 + $0x28] sm:$0xff] (!%p353_p3)  ;;  %v4893_v7 = vld [vmem:[%s7704_s7 + $0x34] sm:$0xf] (!%p353_p3)  ;;  %v862_v11 = vld [vmem:[%s7698_s1 + $0x40] sm:$0xff] (!%p353_p3)  ;;  %p436_p6 = scmp.lt.s32.totalorder (!%p353_p3), %s6618_s24, 9  ;;  %p426_p7 = scmp.lt.s32.totalorder (!%p353_p3), %s6445_s30, 9 }
   0xc   : > { %5549 = vmatprep.subr.bf16.mxu0 (!%p353_p3), %v6464_v8  ;;  %5263 = vmatprep.subr.bf16.mxu1 (!%p353_p3), %v6464_v8  ;;  %v6574_v9 = vsel (!%p353_p3), %vm1309_vm0, %v4893_v7, 0  ;;  %v4816_v12 = vld [vmem:[%s7704_s7 + $0x4] sm:$0xf] (!%p353_p3)  ;;  %v601_v14 = vld [vmem:[%s7698_s1 + $0x48] sm:$0xff] (!%p353_p3)  ;;  %v602_v15 = vld [vmem:[%s7698_s1 + $0x50] sm:$0xff] (!%p353_p3)  ;;  %p960_p8 = scmp.ge.s32.totalorder (!%p353_p3), %s6618_s24, 1 }
   0xd   : > { %5550 = vmatpush3.bf16.msra.mxu0 (!%p353_p3), %v6574_v9  ;;  %5551 = vmatprep.mubr.msk.bf16.mxu0 (!%p353_p3), %vm6465_vm1, %v6464_v8  ;;  %v1311_v13 = vsel (!%p353_p3), %vm1309_vm0, %v4816_v12, 0  ;;  %v603_v16 = vld [vmem:[%s7698_s1 + $0x58] sm:$0xff] (!%p353_p3)  ;;  %v866_v17 = vld [vmem:[%s7698_s1 + $0x60] sm:$0xff] (!%p353_p3)  ;;  %v867_v18 = vld [vmem:[%s7698_s1 + $0x68] sm:$0xff] (!%p353_p3)  ;;  %p961_p9 = scmp.le.s32.totalorder (!%p353_p3), %s6618_s24, 8  ;;  %p697_p10 = scmp.ge.s32.totalorder (!%p353_p3), %s6445_s30, 1 }
   0xe   : > { %5571 = vmatprep.subr.bf16.mxu0 (!%p353_p3), %v6464_v8  ;;  %5265 = vmatprep.mubr.msk.bf16.mxu1 (!%p353_p3), %vm6465_vm1, %v6464_v8  ;;  %v4478_v19 = vld [vmem:[%s7697_s0] sm:$0xff] (!%p353_p3)  ;;  %v4479_v20 = vld [vmem:[%s7697_s0 + $0x8] sm:$0xff] (!%p353_p3)  ;;  %v4480_v21 = vld [vmem:[%s7697_s0 + $0x10] sm:$0xff] (!%p353_p3)  ;;  %p698_p11 = scmp.le.s32.totalorder (!%p353_p3), %s6445_s30, 8  ;;  %vm719_vm4 = vcmask (!%p353_p3), 64512   ;;  %p457_p4 = scmp.lt.s32.totalorder (!%p353_p3), %s6445_s30, 7 }
   0xf   : > { %886 = vperm.xlu0 (!%p353_p3), %6418, %v857_v3   ;;  %614 = vperm.xlu1 (!%p353_p3), %6419, %v593_v4   ;;  %v4481_v22 = vld [vmem:[%s7697_s0 + $0x18] sm:$0xff] (!%p353_p3)  ;;  %v4482_v23 = vld [vmem:[%s7697_s0 + $0x20] sm:$0xff] (!%p353_p3)  ;;  %v4483_v24 = vld [vmem:[%s7697_s0 + $0x28] sm:$0xff] (!%p353_p3)  ;;  %p6671_p12 = pnand (!%p353_p3), %p961_p9, %p960_p8 }
  0x10   : > { %5264 = vmatpush3.bf16.msra.mxu1 %v1311_v13  ;;  %v4484_v25 = vld [vmem:[%s7697_s0 + $0x30] sm:$0xff]  ;;  %s7721_s10 = smov (!%p424_p5, %s6449_s10), 1  ;;  %v4485_v26 = vld [vmem:[%s7697_s0 + $0x38] sm:$0xff]  ;;  %v4486_v27 = vld [vmem:[%s7697_s0 + $0x40] sm:$0xff]  ;;  %p6686_p13 = pnand %p698_p11, %p697_p10 }
  0x11   : > { %5285 = vmatprep.subr.bf16.mxu1 %v6464_v8  ;;  %s437_s19 = scalar_select %p436_p6, %s6618_s24, 9  ;;  %v4487_v28 = vld [vmem:[%s7697_s0 + $0x48] sm:$0xff]  ;;  %v592_v29 = vld [vmem:[%s7698_s1] sm:$0xff]  ;;  %v606_v30 = vld [vmem:[%s7698_s1 + $0x70] sm:$0xff] }
  0x12   : > { %s6646_s25 = smul.u32 150, %s7721_s10  ;;  %v6684_v35 = vld [vmem:[%s7699_s2] ss:$0 sm:$0xff]  ;;  %s6735_s24 = sadd.s32 2, %s6445_s30 }
  0x13   : > { %619 = vperm.xlu0 %6418, %v856_v1   ;;  %624 = vperm.xlu1 %6419, %v857_v3   ;;  %s6371_s26 = smul.u32 15, %s437_s19  ;;  %v6697_v42 = vld [vmem:[%s7700_s3] ss:$0 sm:$0xff]  ;;  %p447_p0 = scmp.lt.s32.totalorder %s6735_s24, 9 }
  0x14   : > { %s427_s17 = scalar_select %p426_p7, %s6445_s30, 9 }
  0x15   : > { %s440_s18 = sadd.s32 %s6371_s26, %s6646_s25  ;;  %p1223_p1 = scmp.ge.s32.totalorder %s6735_s24, 1 }
  0x16   : > { %s6369_s19 = smul.u32 15, %s427_s17  ;;  %s4802_s22 = sshll.u32 %s440_s18, 2 }
  0x17   : > { %896 = vperm.xlu0 %6418, %v859_v5   ;;  %901 = vperm.xlu1 %6419, %v860_v6   ;;  %s6662_s28 = scalar_lea.vmem %s7702_s5, %s4802_s22  ;;  %p1224_p2 = scmp.le.s32.totalorder %s6735_s24, 8 }
  0x18   : > { %s430_s26 = sadd.s32 %s6646_s25, %s6369_s19  ;;  %v5090_v31 = vld [vmem:[%s6662_s28 + $0x10] sm:$0xff]   ;;  %v5089_v32 = vld [vmem:[%s6662_s28 + $0x8] sm:$0xff]   ;;  %v5091_v34 = vld [vmem:[%s6662_s28 + $0x18] sm:$0xff]   ;;  %s7723_s30 = smov (!%p457_p4, %s6445_s30), 7 }
  0x19   : > { %s4801_s29 = sshll.u32 %s430_s26, 2  ;;  %v5037_v33 = vunpack.c.l.bf16 %v5090_v31  ;;  %v5033_v36 = vunpack.c.l.bf16 %v5089_v32  ;;  %v5034_v37 = vunpack.c.h.bf16 %v5089_v32  ;;  %v5038_v39 = vunpack.c.h.bf16 %v5090_v31  ;;  %v6709_v52 = vld [vmem:[%s6662_s28 + $0x20] sm:$0xff]   ;;  %p6874_p3 = pnand %p1224_p2, %p1223_p1 }
  0x1a   : > { %s6678_s20 = scalar_lea.vmem %s7701_s4, %s4801_s29  ;;  %v5041_v40 = vunpack.c.l.bf16 %v5091_v34  ;;  %v5042_v51 = vunpack.c.h.bf16 %v5091_v34  ;;  %v5045_v62 = vunpack.c.l.bf16 %v6709_v52  ;;  %s6373_s23 = smul.u32 10, %s7723_s30 }
  0x1b   : > { %629 = vperm.xlu0 %6418, %v858_v0   ;;  %634 = vperm.xlu1 %6419, %v859_v5   ;;  %v5000_v38 = vld [vmem:[%s6678_s20] sm:$0xff]   ;;  %v776_v41 = vmul.f32 %v5037_v33, %v6684_v35  ;;  %s4812_s22 = scalar_select %p6671_p12, 0, 1  ;;  %v774_v43 = vmul.f32 %v5033_v36, %v6684_v35  ;;  %v775_v44 = vmul.f32 %v5034_v37, %v6684_v35  ;;  %v5083_v46 = vld [vmem:[%s6678_s20 + $0x8] sm:$0xff]   ;;  %v5084_v57 = vld [vmem:[%s6678_s20 + $0x10] sm:$0xff]  }
  0x1c   : > { %v5002_v45 = vunpack.c.h.bf16 %v5000_v38  ;;  %s4809_s26 = scalar_select %p6686_p13, 0, 1  ;;  %v777_v47 = vmul.f32 %v5038_v39, %v6684_v35  ;;  %v778_v48 = vmul.f32 %v5041_v40, %v6684_v35  ;;  %v5005_v55 = vunpack.c.l.bf16 %v5083_v46  ;;  %v5085_v13 = vld [vmem:[%s6678_s20 + $0x18] sm:$0xff]   ;;  %v5086_v39 = vld [vmem:[%s6678_s20 + $0x20] sm:$0xff]  }
  0x1d   : > { %v798_v49 = vadd.f32 %v6697_v42, %v776_v41  ;;  %s965_s29 = scvt.s32.f32 %s4812_s22  ;;  %v796_v50 = vadd.f32 %v6697_v42, %v774_v43  ;;  %v797_v53 = vadd.f32 %v6697_v42, %v775_v44  ;;  %v5006_v56 = vunpack.c.h.bf16 %v5083_v46  ;;  %v5087_v44 = vld [vmem:[%s6678_s20 + $0x28] sm:$0xff]   ;;  %s6374_s22 = smul.u32 80, %s7721_s10 }
  0x1e   : > { %v511_v54 = vmul.f32 %v5002_v45, %v6684_v35  ;;  %s702_s16 = scvt.s32.f32 %s4809_s26  ;;  %v799_v58 = vadd.f32 %v6697_v42, %v777_v47  ;;  %v800_v59 = vadd.f32 %v6697_v42, %v778_v48  ;;  %v780_v12 = vmul.f32 %v5045_v62, %v6684_v35 }
  0x1f   : > { %906 = vperm.xlu0 %6418, %v861_v10   ;;  %911 = vperm.xlu1 %6419, %v862_v11   ;;  %vm813_vm2 = vcmp.gt.f32.partialorder %v798_v49, 0.0  ;;  %v828_v60 = vmul.f32 0.01, %v798_v49  ;;  %v6716_v61 = vstv %s965_s29  ;;  %vm811_vm3 = vcmp.gt.f32.partialorder %v796_v50, 0.0  ;;  %s6762_s21 = scalar_select %p447_p0, %s6735_s24, 9 }
  0x20   : > { %v826_v63 = vmul.f32 0.01, %v796_v50  ;;  %v827_v2 = vmul.f32 0.01, %v797_v53  ;;  %vm812_vm5 = vcmp.gt.f32.partialorder %v797_v53, 0.0  ;;  %vm814_vm6 = vcmp.gt.f32.partialorder %v799_v58, 0.0 }
  0x21   : > { %v829_v7 = vmul.f32 0.01, %v799_v58  ;;  %vm815_vm7 = vcmp.gt.f32.partialorder %v800_v59, 0.0  ;;  %v5014_v31 = vunpack.c.h.bf16 %v5085_v13  ;;  %s6372_s19 = smul.u32 15, %s6762_s21 }
  0x22   : > { %s4815_s24 = scalar_select %p6874_p3, 0, 1 }
  0x23   : > { %639 = vperm.xlu0 %6418, %v860_v6   ;;  %644 = vperm.xlu1 %6419, %v861_v10   ;;  %s6793_s27 = sadd.s32 %s6372_s19, %s6646_s25 }
  0x24   : > { %s4803_s25 = sshll.u32 %s6793_s27, 2  ;;  %s1228_s21 = scvt.s32.f32 %s4815_s24 }
  0x25   : > { %s461_s27 = sadd.s32 %s6374_s22, %s6373_s23 }
  0x27   : > { %649 = vperm.xlu0 %6418, %v862_v11   ;;  %654 = vperm.xlu1 %6419, %v601_v14  }
  0x2b   : > { %659 = vperm.xlu0 %6418, %v602_v15   ;;  %664 = vperm.xlu1 %6419, %v603_v16  }
  0x2f   : > { %916 = vperm.xlu0 %6418, %v601_v14   ;;  %921 = vperm.xlu1 %6419, %v602_v15  }
  0x33   : > { %926 = vperm.xlu0 %6418, %v603_v16   ;;  %931 = vperm.xlu1 %6419, %v866_v17  }
  0x37   : > { %936 = vperm.xlu0 %6418, %v867_v18   ;;  %669 = vperm.xlu1 %6419, %v866_v17  }
  0x3b   : > { %1139 = vperm.xlu0 %6418, %v593_v4   ;;  %1144 = vperm.xlu1 %6419, %v856_v1   ;;  %v779_v1 = vmul.f32 %v5042_v51, %v6684_v35 }
  0x3f   : > { %1149 = vperm.xlu0 %6418, %v857_v3   ;;  %1154 = vperm.xlu1 %6419, %v858_v0   ;;  %v5009_v0 = vunpack.c.l.bf16 %v5084_v57  ;;  %v533_v3 = vadd.f32 %v6697_v42, %v511_v54 }
  0x41   : > { %vm548_vm8 = vcmp.gt.f32.partialorder %v533_v3, 0.0 }
  0x43   : > { %1159 = vperm.xlu0 %6418, %v859_v5   ;;  %1164 = vperm.xlu1 %6419, %v860_v6   ;;  %v513_v5 = vmul.f32 %v5006_v56, %v6684_v35  ;;  %v6723_v6 = vstv %s702_s16  ;;  %s6822_s16 = scalar_lea.vmem %s7703_s6, %s4803_s25  ;;  %s4804_s25 = sshll.u32 %s461_s27, 2 }
  0x47   : > { %1169 = vperm.xlu0 %6418, %v861_v10   ;;  %1174 = vperm.xlu1 %6419, %v862_v11   ;;  %v830_v10 = vmul.f32 0.01, %v800_v59  ;;  %v5010_v11 = vunpack.c.h.bf16 %v5084_v57 }
  0x4b   : > { %1179 = vperm.xlu0 %6418, %v601_v14   ;;  %1184 = vperm.xlu1 %6419, %v602_v15   ;;  %v843_v14 = vsel %vm813_vm2, %v798_v49, %v828_v60  ;;  %v841_v15 = vsel %vm811_vm3, %v796_v50, %v826_v63  ;;  %v517_v50 = vmul.f32 %v5014_v31, %v6684_v35 }
  0x4f   : > { %1189 = vperm.xlu0 %6418, %v603_v16   ;;  %674 = vperm.xlu1 %6419, %v867_v18   ;;  %v514_v16 = vmul.f32 %v5009_v0, %v6684_v35 }
  0x51   : > { %v536_v34 = vadd.f32 %v6697_v42, %v514_v16 }
  0x53   : > { %1194 = vperm.xlu0 %6418, %v866_v17   ;;  %876 = vperm.xlu1 %6419, %v593_v4   ;;  %v512_v4 = vmul.f32 %v5005_v55, %v6684_v35  ;;  %v4899_v17 = vld [vmem:[%s7704_s7 + $0x38] sm:$0xf]  ;;  %v566_v54 = vmul.f32 0.01, %v536_v34  ;;  %v5017_v55 = vunpack.c.l.bf16 %v5086_v39  ;;  %vm551_vm12 = vcmp.gt.f32.partialorder %v536_v34, 0.0 }
  0x57   : > { %1199 = vperm.xlu0 %6418, %v867_v18   ;;  %4490 = vperm.xlu1 %6419, %v4478_v19   ;;  %v801_v18 = vadd.f32 %v6697_v42, %v779_v1  ;;  %v842_v19 = vsel %vm812_vm5, %v797_v53, %v827_v2 }
  0x59   : > { %vm816_vm9 = vcmp.gt.f32.partialorder %v801_v18, 0.0  ;;  %v831_v48 = vmul.f32 0.01, %v801_v18 }
  0x5b   : > { %4495 = vperm.xlu0 %6418, %v4479_v20   ;;  %4500 = vperm.xlu1 %6419, %v4480_v21   ;;  %v563_v20 = vmul.f32 0.01, %v533_v3  ;;  %v534_v21 = vadd.f32 %v6697_v42, %v512_v4  ;;  %v6772_v2 = vsel %vm816_vm9, %v801_v18, %v831_v48  ;;  %v5022_v4 = vunpack.c.h.bf16 %v5087_v44 }
  0x5d   : > { %v578_v36 = vsel %vm548_vm8, %v533_v3, %v563_v20  ;;  %vm549_vm10 = vcmp.gt.f32.partialorder %v534_v21, 0.0  ;;  %v564_v37 = vmul.f32 0.01, %v534_v21  ;;  %v539_v3 = vadd.f32 %v6697_v42, %v517_v50  ;;  %v5094_v50 = vld [vmem:[%s6662_s28 + $0x30] sm:$0xff]  }
  0x5f   : > { %4505 = vperm.xlu0 %6418, %v4481_v22   ;;  %4510 = vperm.xlu1 %6419, %v4482_v23   ;;  %v535_v22 = vadd.f32 %v6697_v42, %v513_v5  ;;  %v6740_v23 = vsel %vm814_vm6, %v799_v58, %v829_v7  ;;  %v579_v56 = vsel %vm549_vm10, %v534_v21, %v564_v37  ;;  %v5018_v58 = vunpack.c.h.bf16 %v5086_v39 }
  0x60   : > { %vm554_vm2 = vcmp.gt.f32.partialorder %v539_v3, 0.0 }
  0x61   : > { %v565_v38 = vmul.f32 0.01, %v535_v22  ;;  %vm550_vm11 = vcmp.gt.f32.partialorder %v535_v22, 0.0 }
  0x63   : > { %4515 = vperm.xlu0 %6418, %v4483_v24   ;;  %4520 = vperm.xlu1 %6419, %v4484_v25   ;;  %v6743_v24 = vsel %vm815_vm7, %v800_v59, %v830_v10  ;;  %v5013_v25 = vunpack.c.l.bf16 %v5085_v13  ;;  %v580_v57 = vsel %vm550_vm11, %v535_v22, %v565_v38  ;;  %v5021_v59 = vunpack.c.l.bf16 %v5087_v44 }
  0x64   : > { %v518_v10 = vmul.f32 %v5017_v55, %v6684_v35  ;;  %v519_v13 = vmul.f32 %v5018_v58, %v6684_v35  ;;  %v569_v22 = vmul.f32 0.01, %v539_v3  ;;  %v6829_v58 = vld [vmem:[%s6678_s20 + $0x30] sm:$0xff]   ;;  %s4805_s20 = sshll.u32 %s7721_s10, 3 }
  0x65   : > { %v516_v43 = vmul.f32 %v5013_v25, %v6684_v35  ;;  %v521_v25 = vmul.f32 %v5022_v4, %v6684_v35  ;;  %s469_s17 = sadd.s32 %s4805_s20, %s7723_s30 }
  0x66   : > { %v540_v31 = vadd.f32 %v6697_v42, %v518_v10  ;;  %v5056_v10 = vld [vmem:[%s6822_s16] sm:$0xff]   ;;  %s4806_s18 = sshll.u32 %s469_s17, 1 }
  0x67   : > { %4525 = vperm.xlu0 %6418, %v4485_v26   ;;  %4530 = vperm.xlu1 %6419, %v4486_v27   ;;  %v538_v63 = vadd.f32 %v6697_v42, %v516_v43  ;;  %v6812_v43 = vsel %vm554_vm2, %v539_v3, %v569_v22  ;;  %v543_v44 = vadd.f32 %v6697_v42, %v521_v25  ;;  %v5053_v3 = vunpack.c.l.bf16 %v5094_v50 }
  0x68   : > { %vm555_vm3 = vcmp.gt.f32.partialorder %v540_v31, 0.0 }
  0x69   : > { %v568_v18 = vmul.f32 0.01, %v538_v63  ;;  %vm553_vm15 = vcmp.gt.f32.partialorder %v538_v63, 0.0  ;;  %vm558_vm7 = vcmp.gt.f32.partialorder %v543_v44, 0.0 }
  0x6b   : > { %4535 = vperm.xlu0 %6418, %v4487_v28   ;;  %609 = vperm.xlu1 %6419, %v592_v29   ;;  %v515_v28 = vmul.f32 %v5010_v11, %v6684_v35  ;;  %v581_v11 = vsel %vm551_vm12, %v536_v34, %v566_v54 }
  0x6d   : > { %v537_v47 = vadd.f32 %v6697_v42, %v515_v28 }
  0x6f   : > { %679 = vperm.xlu0 %6418, %v606_v30   ;;  %871 = vperm.xlu1 %6419, %v592_v29   ;;  %vm552_vm14 = vcmp.gt.f32.partialorder %v537_v47, 0.0 }
  0x73   : > { %941 = vperm.xlu0 %6418, %v606_v30   ;;  %1134 = vperm.xlu1 %6419, %v592_v29   ;;  %v6747_v29 = vsel %vm1309_vm0, %v4899_v17, 0 }
  0x77   : > { %1204 = vperm.xlu0 %6418, %v606_v30   ;;  %v802_v30 = vadd.f32 %v6697_v42, %v780_v12  ;;  %v567_v12 = vmul.f32 0.01, %v537_v47 }
  0x79   : > { %v832_v49 = vmul.f32 0.01, %v802_v30  ;;  %vm817_vm13 = vcmp.gt.f32.partialorder %v802_v30, 0.0 }
  0x7b   : > { %v6784_v17 = vsel %vm817_vm13, %v802_v30, %v832_v49 }
  0x8a   : > { %v892_v26 = vpop.permute.xlu1 %891  ;;  %v882_v27 = vpop.permute.xlu0 %881 }
  0x8b   : > { %v948_v32 = vmul.f32 %v892_v26, %v843_v14  ;;  %v946_v33 = vmul.f32 %v882_v27, %v841_v15  ;;  %v520_v14 = vmul.f32 %v5021_v59, %v6684_v35  ;;  %v5046_v26 = vunpack.c.h.bf16 %v6709_v52  ;;  %v5093_v27 = vld [vmem:[%s6662_s28 + $0x28] sm:$0xff]  }
  0x8c   : > { %v541_v52 = vadd.f32 %v6697_v42, %v519_v13 }
  0x8d   : > { %v971_v40 = vmul.f32 %v6716_v61, %v948_v32  ;;  %v969_v41 = vmul.f32 %v6716_v61, %v946_v33  ;;  %v582_v32 = vsel %vm552_vm14, %v537_v47, %v567_v12  ;;  %v542_v34 = vadd.f32 %v6697_v42, %v520_v14 }
  0x8e   : > { %v887_v45 = vpop.permute.xlu0 %886  ;;  %v615_v46 = vpop.permute.xlu1 %614  ;;  %vm556_vm5 = vcmp.gt.f32.partialorder %v541_v52, 0.0  ;;  %v5025_v14 = vunpack.c.l.bf16 %v6829_v58 }
  0x8f   : > { %987 = vst.msk [vmem:[#allocation2 + $0x98] sm:$0xff] %vm719_vm4, %v971_v40  ;;  %985 = vst.msk [vmem:[#allocation2 + $0x88] sm:$0xff] %vm719_vm4, %v969_v41  ;;  %v947_v51 = vmul.f32 %v887_v45, %v842_v19  ;;  %v683_v53 = vmul.f32 %v615_v46, %v578_v36  ;;  %v1276_v19 = vld [vmem:[%s7704_s7] sm:$0xf]  ;;  %v781_v45 = vmul.f32 %v5046_v26, %v6684_v35  ;;  %v5050_v46 = vunpack.c.h.bf16 %v5093_v27 }
  0x90   : > { %v6802_v33 = vsel %vm1309_vm0, %v1276_v19, 0  ;;  %vm557_vm6 = vcmp.gt.f32.partialorder %v542_v34, 0.0 }
  0x91   : > { %v970_v60 = vmul.f32 %v6716_v61, %v947_v51  ;;  %v705_v62 = vmul.f32 %v6723_v6, %v683_v53  ;;  %v570_v51 = vmul.f32 0.01, %v540_v31  ;;  %v571_v53 = vmul.f32 0.01, %v541_v52 }
  0x92   : > { %v620_v0 = vpop.permute.xlu0 %619  ;;  %v625_v1 = vpop.permute.xlu1 %624  ;;  %v803_v13 = vadd.f32 %v6697_v42, %v781_v45 }
  0x93   : > { %986 = vst.msk [vmem:[#allocation2 + $0x90] sm:$0xff] %vm719_vm4, %v970_v60  ;;  %721 = vst.msk [vmem:[#allocation2 + $0x8] sm:$0xff] %vm719_vm4, %v705_v62  ;;  %v684_v5 = vmul.f32 %v620_v0, %v579_v56  ;;  %v685_v7 = vmul.f32 %v625_v1, %v580_v57  ;;  %v572_v56 = vmul.f32 0.01, %v542_v34  ;;  %v573_v0 = vmul.f32 0.01, %v543_v44 }
  0x94   : > { %v783_v1 = vmul.f32 %v5050_v46, %v6684_v35  ;;  %v586_v12 = vsel %vm556_vm5, %v541_v52, %v571_v53  ;;  %vm818_vm8 = vcmp.gt.f32.partialorder %v803_v13, 0.0  ;;  %v833_v52 = vmul.f32 0.01, %v803_v13 }
  0x95   : > { %v706_v15 = vmul.f32 %v6723_v6, %v684_v5  ;;  %v707_v16 = vmul.f32 %v6723_v6, %v685_v7  ;;  %v5054_v7 = vunpack.c.h.bf16 %v5094_v50  ;;  %v588_v25 = vsel %vm558_vm7, %v543_v44, %v573_v0 }
  0x96   : > { %v897_v20 = vpop.permute.xlu0 %896  ;;  %v902_v21 = vpop.permute.xlu1 %901  ;;  %v805_v26 = vadd.f32 %v6697_v42, %v783_v1 }
  0x97   : > { %722 = vst.msk [vmem:[#allocation2 + $0x10] sm:$0xff] %vm719_vm4, %v706_v15  ;;  %723 = vst.msk [vmem:[#allocation2 + $0x18] sm:$0xff] %vm719_vm4, %v707_v16  ;;  %v949_v28 = vmul.f32 %v897_v20, %v6740_v23  ;;  %v950_v30 = vmul.f32 %v902_v21, %v6743_v24  ;;  %v6809_v23 = vsel %vm553_vm15, %v538_v63, %v568_v18  ;;  %v5049_v24 = vunpack.c.l.bf16 %v5093_v27  ;;  %v6855_v18 = vld [vmem:[%s6822_s16 + $0x8] sm:$0xff]  }
  0x98   : > { %v6851_v16 = vsel %vm557_vm6, %v542_v34, %v572_v56  ;;  %v784_v27 = vmul.f32 %v5053_v3, %v6684_v35  ;;  %v522_v34 = vmul.f32 %v5025_v14, %v6684_v35  ;;  %vm820_vm10 = vcmp.gt.f32.partialorder %v805_v26, 0.0 }
  0x99   : > { %v972_v36 = vmul.f32 %v6716_v61, %v949_v28  ;;  %v973_v37 = vmul.f32 %v6716_v61, %v950_v30  ;;  %v782_v57 = vmul.f32 %v5049_v24, %v6684_v35  ;;  %v5058_v28 = vunpack.c.h.bf16 %v5056_v10 }
  0x9a   : > { %v630_v38 = vpop.permute.xlu0 %629  ;;  %v635_v39 = vpop.permute.xlu1 %634  ;;  %v2775_v40 = vld [vmem:[#allocation2 + $0x8c] sm:$0xff]  ;;  %v2776_v41 = vld [vmem:[#allocation2 + $0x94] sm:$0xff]  ;;  %v835_v44 = vmul.f32 0.01, %v805_v26  ;;  %v806_v45 = vadd.f32 %v6697_v42, %v784_v27 }
  0x9b   : > { %988 = vst.msk [vmem:[#allocation2 + $0xa0] sm:$0xff] %vm719_vm4, %v972_v36  ;;  %989 = vst.msk [vmem:[#allocation2 + $0xa8] sm:$0xff] %vm719_vm4, %v973_v37  ;;  %v686_v47 = vmul.f32 %v630_v38, %v581_v11  ;;  %v687_v48 = vmul.f32 %v635_v39, %v582_v32  ;;  %v2785_v49 = vpack.c.bf16 %v2776_v41, %v2775_v40  ;;  %v5061_v36 = vunpack.c.l.bf16 %v6855_v18  ;;  %v4905_v38 = vld [vmem:[%s7704_s7 + $0x3c] sm:$0xf] }
  0x9c   : > { %v585_v11 = vsel %vm555_vm3, %v540_v31, %v570_v51  ;;  %v1036_v46 = vmul.f32 %v5058_v28, %v6684_v35  ;;  %v848_v51 = vsel %vm818_vm8, %v803_v13, %v833_v52  ;;  %v6896_v53 = vsel %vm1309_vm0, %v4905_v38, 0  ;;  %v6935_v28 = vld [vmem:[%s6822_s16 + $0x20] sm:$0xff]   ;;  %v2893_v52 = vld [vmem:[#allocation2 + $0x8d] sm:$0xff] }
  0x9d   : > { %v708_v54 = vmul.f32 %v6723_v6, %v686_v47  ;;  %v709_v55 = vmul.f32 %v6723_v6, %v687_v48  ;;  %5552 = vmatmul.mubr.msk.bf16.vlgmr.msra.gmra.mrb[0].mxu0 %vm719_vm4, %v2785_v49  ;;  %vm821_vm11 = vcmp.gt.f32.partialorder %v806_v45, 0.0 }
  0x9e   : > { %5572 = vmatpush3.bf16.msra.mxu0 %v6747_v29  ;;  %v907_v59 = vpop.permute.xlu0 %906  ;;  %v912_v60 = vpop.permute.xlu1 %911  ;;  %v1277_v62 = vld [vmem:[#allocation2 + $0xa] sm:$0xff]  ;;  %v1278_v63 = vld [vmem:[#allocation2 + $0x12] sm:$0xff]  ;;  %5555 = vmatprep.mubr.msk.bf16.mxu0 %vm6465_vm1, %v6464_v8 }
  0x9f   : > { %724 = vst.msk [vmem:[#allocation2 + $0x20] sm:$0xff] %vm719_vm4, %v708_v54  ;;  %725 = vst.msk [vmem:[#allocation2 + $0x28] sm:$0xff] %vm719_vm4, %v709_v55  ;;  %v951_v29 = vmul.f32 %v907_v59, %v6772_v2  ;;  %v952_v4 = vmul.f32 %v912_v60, %v6784_v17  ;;  %v1287_v5 = vpack.c.bf16 %v1278_v63, %v1277_v62  ;;  %5593 = vmatprep.subr.bf16.mxu0 %v6464_v8  ;;  %v5096_v62 = vld [vmem:[%s6822_s16 + $0x10] sm:$0xff]  }
  0xa0   : > { %v804_v17 = vadd.f32 %v6697_v42, %v782_v57  ;;  %v6899_v54 = vadd.f32 %v6697_v42, %v522_v34  ;;  %v5062_v55 = vunpack.c.h.bf16 %v6855_v18  ;;  %v1037_v60 = vmul.f32 %v5061_v36, %v6684_v35  ;;  %v6939_v34 = vld [vmem:[#allocation2 + $0x95] sm:$0xff] }
  0xa1   : > { %v974_v2 = vmul.f32 %v6716_v61, %v951_v29  ;;  %v975_v15 = vmul.f32 %v6716_v61, %v952_v4  ;;  %5266 = vmatmul.mubr.msk.bf16.vlgmr.msra.gmra.mrb[0].mxu1 %vm719_vm4, %v1287_v5  ;;  %v850_v29 = vsel %vm820_vm10, %v805_v26, %v835_v44  ;;  %v836_v4 = vmul.f32 0.01, %v806_v45 }
  0xa2   : > { %v640_v19 = vpop.permute.xlu0 %639  ;;  %v645_v20 = vpop.permute.xlu1 %644  ;;  %5286 = vmatpush3.bf16.msra.mxu1 %v6802_v33  ;;  %v2777_v21 = vld [vmem:[#allocation2 + $0x9c] sm:$0xff]  ;;  %v2778_v22 = vld [vmem:[#allocation2 + $0xa4] sm:$0xff]  ;;  %5269 = vmatprep.mubr.msk.bf16.mxu1 %vm6465_vm1, %v6464_v8  ;;  %v785_v33 = vmul.f32 %v5054_v7, %v6684_v35  ;;  %vm819_vm9 = vcmp.gt.f32.partialorder %v804_v17, 0.0  ;;  %v834_v24 = vmul.f32 0.01, %v804_v17  ;;  %v6914_v5 = vadd.f32 %v6697_v42, %v1036_v46 }
  0xa3   : > { %990 = vst.msk [vmem:[#allocation2 + $0xb0] sm:$0xff] %vm719_vm4, %v974_v2  ;;  %991 = vst.msk [vmem:[#allocation2 + $0xb8] sm:$0xff] %vm719_vm4, %v975_v15  ;;  %v688_v30 = vmul.f32 %v640_v19, %v6809_v23  ;;  %v689_v31 = vmul.f32 %v645_v20, %v6812_v43  ;;  %v2786_v32 = vpack.c.bf16 %v2778_v22, %v2777_v21  ;;  %5307 = vmatprep.subr.bf16.mxu1 %v6464_v8  ;;  %v5097_v2 = vld [vmem:[%s6822_s16 + $0x18] sm:$0xff]  }
  0xa4   : > { %v6892_v50 = vadd.f32 %v6697_v42, %v785_v33  ;;  %v849_v59 = vsel %vm819_vm9, %v804_v17, %v834_v24  ;;  %vm559_vm13 = vcmp.gt.f32.partialorder %v6899_v54, 0.0  ;;  %v1038_v13 = vmul.f32 %v5062_v55, %v6684_v35 }
  0xa5   : > { %v710_v37 = vmul.f32 %v6723_v6, %v688_v30  ;;  %v711_v23 = vmul.f32 %v6723_v6, %v689_v31  ;;  %5556 = vmatmul.mubr.msk.bf16.gmra.mrb[4].mxu0 %vm719_vm4, %v2786_v32  ;;  %v5065_v14 = vunpack.c.l.bf16 %v5096_v62  ;;  %v5066_v18 = vunpack.c.h.bf16 %v5096_v62 }
  0xa6   : > { %v650_v39 = vpop.permute.xlu0 %649  ;;  %v655_v40 = vpop.permute.xlu1 %654  ;;  %v1279_v41 = vld [vmem:[#allocation2 + $0x1a] sm:$0xff]  ;;  %v1280_v43 = vld [vmem:[#allocation2 + $0x22] sm:$0xff]  ;;  %5559 = vmatprep.mubr.msk.bf16.mxu0 %vm6465_vm1, %v6464_v8  ;;  %vm822_vm12 = vcmp.gt.f32.partialorder %v6892_v50, 0.0  ;;  %vm1073_vm14 = vcmp.gt.f32.partialorder %v6914_v5, 0.0  ;;  %v1088_v26 = vmul.f32 0.01, %v6914_v5  ;;  %v1059_v27 = vadd.f32 %v6697_v42, %v1037_v60 }
  0xa7   : > { %726 = vst.msk [vmem:[#allocation2 + $0x30] sm:$0xff] %vm719_vm4, %v710_v37  ;;  %727 = vst.msk [vmem:[#allocation2 + $0x38] sm:$0xff] %vm719_vm4, %v711_v23  ;;  %v690_v47 = vmul.f32 %v650_v39, %v585_v11  ;;  %v691_v48 = vmul.f32 %v655_v40, %v586_v12  ;;  %v1288_v49 = vpack.c.bf16 %v1280_v43, %v1279_v41  ;;  %v837_v12 = vmul.f32 0.01, %v6892_v50 }
  0xa8   : > { %v5069_v33 = vunpack.c.l.bf16 %v5097_v2  ;;  %v6941_v36 = vstv %s1228_s21  ;;  %v1060_v37 = vadd.f32 %v6697_v42, %v1038_v13  ;;  %v1039_v23 = vmul.f32 %v5065_v14, %v6684_v35 }
  0xa9   : > { %v712_v56 = vmul.f32 %v6723_v6, %v690_v47  ;;  %v713_v57 = vmul.f32 %v6723_v6, %v691_v48  ;;  %5270 = vmatmul.mubr.msk.bf16.gmra.mrb[4].mxu1 %vm719_vm4, %v1288_v49  ;;  %v5070_v24 = vunpack.c.h.bf16 %v5097_v2  ;;  %v1040_v40 = vmul.f32 %v5066_v18, %v6684_v35  ;;  %v6989_v2 = vld [vmem:[#allocation2 + $0xa5] sm:$0xff] }
  0xaa   : > { %v660_v63 = vpop.permute.xlu0 %659  ;;  %v665_v0 = vpop.permute.xlu1 %664  ;;  %v2779_v1 = vld [vmem:[#allocation2 + $0xac] sm:$0xff]  ;;  %v2780_v3 = vld [vmem:[#allocation2 + $0xb4] sm:$0xff]  ;;  %5273 = vmatprep.mubr.msk.bf16.mxu1 %vm6465_vm1, %v6464_v8  ;;  %v5073_v41 = vunpack.c.l.bf16 %v6935_v28  ;;  %vm1074_vm15 = vcmp.gt.f32.partialorder %v1059_v27, 0.0  ;;  %v1089_v47 = vmul.f32 0.01, %v1059_v27  ;;  %v1041_v55 = vmul.f32 %v5069_v33, %v6684_v35 }
  0xab   : > { %728 = vst.msk [vmem:[#allocation2 + $0x40] sm:$0xff] %vm719_vm4, %v712_v56  ;;  %729 = vst.msk [vmem:[#allocation2 + $0x48] sm:$0xff] %vm719_vm4, %v713_v57  ;;  %v692_v7 = vmul.f32 %v660_v63, %v6851_v16  ;;  %v693_v10 = vmul.f32 %v665_v0, %v588_v25  ;;  %v2787_v11 = vpack.c.bf16 %v2780_v3, %v2779_v1  ;;  %v574_v16 = vmul.f32 0.01, %v6899_v54 }
  0xac   : > { %v851_v25 = vsel %vm821_vm11, %v806_v45, %v836_v4  ;;  %v852_v45 = vsel %vm822_vm12, %v6892_v50, %v837_v12  ;;  %v6963_v50 = vld [vmem:[%s6822_s16 + $0x28] sm:$0xff]   ;;  %vm1075_vm2 = vcmp.gt.f32.partialorder %v1060_v37, 0.0  ;;  %v1042_v60 = vmul.f32 %v5070_v24, %v6684_v35 }
  0xad   : > { %v714_v15 = vmul.f32 %v6723_v6, %v692_v7  ;;  %v715_v17 = vmul.f32 %v6723_v6, %v693_v10  ;;  %5560 = vmatmul.mubr.msk.bf16.gmra.mrb[8].mxu0 %vm719_vm4, %v2787_v11  ;;  %v589_v46 = vsel %vm559_vm13, %v6899_v54, %v574_v16  ;;  %v1090_v54 = vmul.f32 0.01, %v1060_v37 }
  0xae   : > { %v917_v19 = vpop.permute.xlu0 %916  ;;  %v922_v20 = vpop.permute.xlu1 %921  ;;  %v1281_v21 = vld [vmem:[#allocation2 + $0x2a] sm:$0xff]  ;;  %v1282_v22 = vld [vmem:[#allocation2 + $0x32] sm:$0xff]  ;;  %5573 = vmatprep.mubr.msk.bf16.mxu0 %vm6465_vm1, %v6464_v8  ;;  %v6971_v0 = vadd.f32 %v6697_v42, %v1040_v40  ;;  %v1043_v1 = vmul.f32 %v5073_v41, %v6684_v35  ;;  %v1103_v4 = vsel %vm1073_vm14, %v6914_v5, %v1088_v26  ;;  %v1104_v7 = vsel %vm1074_vm15, %v1059_v27, %v1089_v47  ;;  %v6987_v5 = vld [vmem:[#allocation2 + $0x9d] sm:$0xff] }
  0xaf   : > { %730 = vst.msk [vmem:[#allocation2 + $0x50] sm:$0xff] %vm719_vm4, %v714_v15  ;;  %731 = vst.msk [vmem:[#allocation2 + $0x58] sm:$0xff] %vm719_vm4, %v715_v17  ;;  %v953_v30 = vmul.f32 %v917_v19, %v848_v51  ;;  %v954_v31 = vmul.f32 %v922_v20, %v849_v59  ;;  %v1289_v32 = vpack.c.bf16 %v1282_v22, %v1281_v21  ;;  %v5074_v10 = vunpack.c.h.bf16 %v6935_v28 }
  0xb0   : > { %v2903_v51 = vpack.c.bf16 %v6939_v34, %v2893_v52  ;;  %v1061_v59 = vadd.f32 %v6697_v42, %v1039_v23  ;;  %v5077_v11 = vunpack.c.l.bf16 %v6963_v50  ;;  %v1063_v14 = vadd.f32 %v6697_v42, %v1041_v55 }
  0xb1   : > { %v976_v38 = vmul.f32 %v6716_v61, %v953_v30  ;;  %v977_v39 = vmul.f32 %v6716_v61, %v954_v31  ;;  %5274 = vmatmul.mubr.msk.bf16.gmra.mrb[8].mxu1 %vm719_vm4, %v1289_v32  ;;  %v1105_v15 = vsel %vm1075_vm2, %v1060_v37, %v1090_v54  ;;  %v1064_v16 = vadd.f32 %v6697_v42, %v1042_v60  ;;  %v7030_v54 = vld [vmem:[#allocation2 + $0xb5] sm:$0xff] }
  0xb2   : > { %v927_v43 = vpop.permute.xlu0 %926  ;;  %v932_v44 = vpop.permute.xlu1 %931  ;;  %5277 = vmatprep.mubr.msk.bf16.mxu1 %vm6465_vm1, %v6464_v8  ;;  %v1283_v56 = vld [vmem:[#allocation2 + $0x3a] sm:$0xff]  ;;  %v1284_v57 = vld [vmem:[#allocation2 + $0x42] sm:$0xff]  ;;  %vm1076_vm3 = vcmp.gt.f32.partialorder %v1061_v59, 0.0  ;;  %v1091_v17 = vmul.f32 0.01, %v1061_v59  ;;  %vm1077_vm5 = vcmp.gt.f32.partialorder %v6971_v0, 0.0  ;;  %v1065_v20 = vadd.f32 %v6697_v42, %v1043_v1 }
  0xb3   : > { %992 = vst.msk [vmem:[#allocation2 + $0xc0] sm:$0xff] %vm719_vm4, %v976_v38  ;;  %993 = vst.msk [vmem:[#allocation2 + $0xc8] sm:$0xff] %vm719_vm4, %v977_v39  ;;  %v955_v48 = vmul.f32 %v927_v43, %v850_v29  ;;  %v956_v49 = vmul.f32 %v932_v44, %v851_v25  ;;  %v1290_v13 = vpack.c.bf16 %v1284_v57, %v1283_v56  ;;  %v1092_v25 = vmul.f32 0.01, %v6971_v0  ;;  %v7014_v43 = vld [vmem:[%s6822_s16 + $0x30] sm:$0xff]   ;;  %v5028_v44 = vld [vmem:[%s6662_s28] sm:$0xff]   ;;  %s7625_s16 = scalar_lea.vmem %s7705_s8, %s4804_s25  ;;  %s471_s28 = scalar_lea.vmem %s7706_s9, %s4806_s18 }
  0xb4   : > { %v1044_v26 = vmul.f32 %v5074_v10, %v6684_v35  ;;  %v1045_v27 = vmul.f32 %v5077_v11, %v6684_v35  ;;  %v5078_v28 = vunpack.c.h.bf16 %v6963_v50  ;;  %v2904_v32 = vpack.c.bf16 %v6989_v2, %v6987_v5  ;;  %v7028_v57 = vld [vmem:[#allocation2 + $0xad] sm:$0xff] }
  0xb5   : > { %v978_v62 = vmul.f32 %v6716_v61, %v955_v48  ;;  %v979_v63 = vmul.f32 %v6716_v61, %v956_v49  ;;  %5574 = vmatmul.mubr.msk.bf16.vlgmr.msra.gmra.mrb[0].mxu0 %vm719_vm4, %v2903_v51  ;;  %vm1078_vm6 = vcmp.gt.f32.partialorder %v1063_v14, 0.0  ;;  %v1106_v33 = vsel %vm1076_vm3, %v1061_v59, %v1091_v17  ;;  %v4827_v17 = vld [vmem:[%s7704_s7 + $0x8] sm:$0xf] }
  0xb6   : > { %5594 = vmatpush3.bf16.msra.mxu0 %v6896_v53  ;;  %v937_v3 = vpop.permute.xlu0 %936  ;;  %v670_v29 = vpop.permute.xlu1 %669  ;;  %5577 = vmatprep.mubr.msk.bf16.mxu0 %vm6465_vm1, %v6464_v8  ;;  %v1285_v52 = vld [vmem:[#allocation2 + $0x4a] sm:$0xff]  ;;  %v1286_v37 = vld [vmem:[#allocation2 + $0x52] sm:$0xff]  ;;  %v1093_v23 = vmul.f32 0.01, %v1063_v14  ;;  %vm1079_vm7 = vcmp.gt.f32.partialorder %v1064_v16, 0.0  ;;  %v5026_v24 = vunpack.c.h.bf16 %v6829_v58  ;;  %vm1080_vm8 = vcmp.gt.f32.partialorder %v1065_v20, 0.0 }
  0xb7   : > { %994 = vst.msk [vmem:[#allocation2 + $0xd0] sm:$0xff] %vm719_vm4, %v978_v62  ;;  %995 = vst.msk [vmem:[#allocation2 + $0xd8] sm:$0xff] %vm719_vm4, %v979_v63  ;;  %v957_v53 = vmul.f32 %v937_v3, %v852_v45  ;;  %v694_v12 = vmul.f32 %v670_v29, %v589_v46  ;;  %5615 = vmatprep.subr.bf16.mxu0 %v6464_v8  ;;  %v1094_v40 = vmul.f32 0.01, %v1064_v16  ;;  %v1095_v41 = vmul.f32 0.01, %v1065_v20 }
  0xb8   : > { %v1066_v47 = vadd.f32 %v6697_v42, %v1044_v26  ;;  %v1067_v58 = vadd.f32 %v6697_v42, %v1045_v27  ;;  %v1046_v48 = vmul.f32 %v5078_v28, %v6684_v35  ;;  %v1291_v55 = vpack.c.bf16 %v1286_v37, %v1285_v52 }
  0xb9   : > { %v980_v18 = vmul.f32 %v6716_v61, %v957_v53  ;;  %v716_v19 = vmul.f32 %v6723_v6, %v694_v12  ;;  %5278 = vmatmul.mubr.msk.bf16.gmra.mrb[12].mxu1 %vm719_vm4, %v1290_v13  ;;  %v1107_v50 = vsel %vm1077_vm5, %v6971_v0, %v1092_v25  ;;  %v1108_v56 = vsel %vm1078_vm6, %v1063_v14, %v1093_v23  ;;  %v1261_v14 = vld [vmem:[#allocation2 + $0x9] sm:$0xff] }
  0xba   : > { %v1140_v21 = vpop.permute.xlu0 %1139  ;;  %v1145_v22 = vpop.permute.xlu1 %1144  ;;  %5281 = vmatprep.mubr.msk.bf16.mxu1 %vm6465_vm1, %v6464_v8  ;;  %v523_v59 = vmul.f32 %v5026_v24, %v6684_v35  ;;  %v5081_v60 = vunpack.c.l.bf16 %v7014_v43  ;;  %v5030_v62 = vunpack.c.h.bf16 %v5028_v44  ;;  %v1109_v3 = vsel %vm1079_vm7, %v1064_v16, %v1094_v40  ;;  %v7062_v37 = vld [vmem:[#allocation2 + $0xbd] sm:$0xff]  ;;  %v7064_v23 = vld [vmem:[#allocation2 + $0xc5] sm:$0xff] }
  0xbb   : > { %996 = vst.msk [vmem:[#allocation2 + $0xe0] sm:$0xff] %vm719_vm4, %v980_v18  ;;  %732 = vst.msk [vmem:[#allocation2 + $0x60] sm:$0xff] %vm719_vm4, %v716_v19  ;;  %v1208_v30 = vmul.f32 %v1140_v21, %v1103_v4  ;;  %v1209_v31 = vmul.f32 %v1145_v22, %v1104_v7  ;;  %v1110_v0 = vsel %vm1080_vm8, %v1065_v20, %v1095_v41  ;;  %vm1081_vm9 = vcmp.gt.f32.partialorder %v1066_v47, 0.0 }
  0xbc   : > { %v1096_v7 = vmul.f32 0.01, %v1066_v47  ;;  %v1097_v10 = vmul.f32 0.01, %v1067_v58  ;;  %v1068_v11 = vadd.f32 %v6697_v42, %v1046_v48  ;;  %v2905_v13 = vpack.c.bf16 %v7030_v54, %v7028_v57 }
  0xbd   : > { %v1231_v38 = vmul.f32 %v6941_v36, %v1208_v30  ;;  %v1232_v39 = vmul.f32 %v6941_v36, %v1209_v31  ;;  %5578 = vmatmul.mubr.msk.bf16.gmra.mrb[4].mxu0 %vm719_vm4, %v2904_v32  ;;  %vm1082_vm10 = vcmp.gt.f32.partialorder %v1067_v58, 0.0  ;;  %v545_v16 = vadd.f32 %v6697_v42, %v523_v59 }
  0xbe   : > { %v1150_v45 = vpop.permute.xlu0 %1149  ;;  %v1155_v46 = vpop.permute.xlu1 %1154  ;;  %5581 = vmatprep.mubr.msk.bf16.mxu0 %vm6465_vm1, %v6464_v8  ;;  %v1047_v18 = vmul.f32 %v5081_v60, %v6684_v35  ;;  %v773_v19 = vmul.f32 %v5030_v62, %v6684_v35  ;;  %v5082_v20 = vunpack.c.h.bf16 %v7014_v43  ;;  %v1111_v27 = vsel %vm1081_vm9, %v1066_v47, %v1096_v7  ;;  %v7090_v7 = vld [vmem:[#allocation2 + $0xd5] sm:$0xff] }
  0xbf   : > { %1247 = vst.msk [vmem:[#allocation2 + $0xf8] sm:$0xff] %vm719_vm4, %v1231_v38  ;;  %1248 = vst.msk [vmem:[#allocation2 + $0x100] sm:$0xff] %vm719_vm4, %v1232_v39  ;;  %v1210_v49 = vmul.f32 %v1150_v45, %v1105_v15  ;;  %v1211_v51 = vmul.f32 %v1155_v46, %v1106_v33  ;;  %v1262_v15 = vld [vmem:[#allocation2 + $0x11] sm:$0xff]  ;;  %v1112_v28 = vsel %vm1082_vm10, %v1067_v58, %v1097_v10  ;;  %vm1083_vm11 = vcmp.gt.f32.partialorder %v1068_v11, 0.0 }
  0xc0   : > { %v1098_v30 = vmul.f32 0.01, %v1068_v11  ;;  %v1271_v33 = vpack.c.bf16 %v1262_v15, %v1261_v14  ;;  %v1510_v52 = vsel %vm1309_vm0, %v4827_v17, 0  ;;  %v575_v24 = vmul.f32 0.01, %v545_v16 }
  0xc1   : > { %v1233_v63 = vmul.f32 %v6941_v36, %v1210_v49  ;;  %v1234_v1 = vmul.f32 %v6941_v36, %v1211_v51  ;;  %5282 = vmatmul.mubr.msk.bf16.gmra.mrb[16].mxu1 %vm719_vm4, %v1291_v55  ;;  %v1069_v38 = vadd.f32 %v6697_v42, %v1047_v18  ;;  %v795_v39 = vadd.f32 %v6697_v42, %v773_v19  ;;  %v1263_v49 = vld [vmem:[#allocation2 + $0x19] sm:$0xff]  ;;  %v1264_v51 = vld [vmem:[#allocation2 + $0x21] sm:$0xff]  ;;  %v1265_v18 = vld [vmem:[#allocation2 + $0x29] sm:$0xff] }
  0xc2   : > { %v1160_v29 = vpop.permute.xlu0 %1159  ;;  %v1165_v4 = vpop.permute.xlu1 %1164  ;;  %5287 = vmatprep.mubr.msk.bf16.mxu1 %vm6465_vm1, %v6464_v8  ;;  %v1048_v40 = vmul.f32 %v5082_v20, %v6684_v35  ;;  %vm560_vm12 = vcmp.gt.f32.partialorder %v545_v16, 0.0  ;;  %v2906_v35 = vpack.c.bf16 %v7064_v23, %v7062_v37  ;;  %v1113_v58 = vsel %vm1083_vm11, %v1068_v11, %v1098_v30 }
  0xc3   : > { %1249 = vst.msk [vmem:[#allocation2 + $0x108] sm:$0xff] %vm719_vm4, %v1233_v63  ;;  %1250 = vst.msk [vmem:[#allocation2 + $0x110] sm:$0xff] %vm719_vm4, %v1234_v1  ;;  %v1212_v53 = vmul.f32 %v1160_v29, %v1107_v50  ;;  %v1213_v12 = vmul.f32 %v1165_v4, %v1108_v56  ;;  %v590_v48 = vsel %vm560_vm12, %v545_v16, %v575_v24  ;;  %v1099_v55 = vmul.f32 0.01, %v1069_v38  ;;  %v7088_v4 = vld [vmem:[#allocation2 + $0xcd] sm:$0xff] }
  0xc4   : > { %v825_v50 = vmul.f32 0.01, %v795_v39  ;;  %v1070_v56 = vadd.f32 %v6697_v42, %v1048_v40  ;;  %vm1084_vm13 = vcmp.gt.f32.partialorder %v1069_v38, 0.0  ;;  %vm810_vm14 = vcmp.gt.f32.partialorder %v795_v39, 0.0  ;;  %v1269_v40 = vld [vmem:[#allocation2 + $0x49] sm:$0xff] }
  0xc5   : > { %v1235_v21 = vmul.f32 %v6941_v36, %v1212_v53  ;;  %v1236_v22 = vmul.f32 %v6941_v36, %v1213_v12  ;;  %5582 = vmatmul.mubr.msk.bf16.gmra.mrb[8].mxu0 %vm719_vm4, %v2905_v13  ;;  %v1272_v42 = vpack.c.bf16 %v1264_v51, %v1263_v49  ;;  %v2907_v17 = vpack.c.bf16 %v7090_v7, %v7088_v4 }
  0xc6   : > { %v1170_v25 = vpop.permute.xlu0 %1169  ;;  %v1175_v26 = vpop.permute.xlu1 %1174  ;;  %5585 = vmatprep.mubr.msk.bf16.mxu0 %vm6465_vm1, %v6464_v8  ;;  %v840_v29 = vsel %vm810_vm14, %v795_v39, %v825_v50  ;;  %v1100_v10 = vmul.f32 0.01, %v1070_v56  ;;  %vm1085_vm15 = vcmp.gt.f32.partialorder %v1070_v56, 0.0  ;;  %v3022_v39 = vpack.c.bf16 %v7028_v57, %v6989_v2  ;;  %v1477_v57 = vld [vmem:[#allocation2 + $0xb] sm:$0xff] }
  0xc7   : > { %1251 = vst.msk [vmem:[#allocation2 + $0x118] sm:$0xff] %vm719_vm4, %v1235_v21  ;;  %1252 = vst.msk [vmem:[#allocation2 + $0x120] sm:$0xff] %vm719_vm4, %v1236_v22  ;;  %v1214_v31 = vmul.f32 %v1170_v25, %v1109_v3  ;;  %v1215_v32 = vmul.f32 %v1175_v26, %v1110_v0  ;;  %v1114_v0 = vsel %vm1084_vm13, %v1069_v38, %v1099_v55 }
  0xc8   : > { %v1115_v16 = vsel %vm1085_vm15, %v1070_v56, %v1100_v10  ;;  %v3023_v2 = vpack.c.bf16 %v7062_v37, %v7030_v54  ;;  %v3024_v50 = vpack.c.bf16 %v7088_v4, %v7064_v23  ;;  %v1479_v56 = vld [vmem:[#allocation2 + $0x1b] sm:$0xff]  ;;  %v1481_v23 = vld [vmem:[#allocation2 + $0x2b] sm:$0xff] }
  0xc9   : > { %v1237_v41 = vmul.f32 %v6941_v36, %v1214_v31  ;;  %v1238_v43 = vmul.f32 %v6941_v36, %v1215_v32  ;;  %5288 = vmatmul.mubr.msk.bf16.vlgmr.msra.gmra.mrb[0].mxu1 %vm719_vm4, %v1271_v33  ;;  %v3021_v31 = vpack.c.bf16 %v6987_v5, %v6939_v34  ;;  %v1267_v33 = vld [vmem:[#allocation2 + $0x39] sm:$0xff] }
  0xca   : > { %v1180_v44 = vpop.permute.xlu0 %1179  ;;  %v1185_v45 = vpop.permute.xlu1 %1184  ;;  %5308 = vmatpush3.bf16.msra.mxu1 %v1510_v52  ;;  %5291 = vmatprep.mubr.msk.bf16.mxu1 %vm6465_vm1, %v6464_v8  ;;  %v1268_v52 = vld [vmem:[#allocation2 + $0x41] sm:$0xff]  ;;  %v3129_v4 = vld [vmem:[#allocation2 + $0x96] sm:$0xff] }
  0xcb   : > { %1253 = vst.msk [vmem:[#allocation2 + $0x128] sm:$0xff] %vm719_vm4, %v1237_v41  ;;  %1254 = vst.msk [vmem:[#allocation2 + $0x130] sm:$0xff] %vm719_vm4, %v1238_v43  ;;  %v1216_v46 = vmul.f32 %v1180_v44, %v1111_v27  ;;  %v1217_v47 = vmul.f32 %v1185_v45, %v1112_v28  ;;  %5329 = vmatprep.subr.bf16.mxu1 %v6464_v8  ;;  %v4911_v27 = vld [vmem:[%s7704_s7 + $0x40] sm:$0xf]  ;;  %v1274_v38 = vpack.c.bf16 %v1268_v52, %v1267_v33  ;;  %v1270_v41 = vld [vmem:[#allocation2 + $0x51] sm:$0xff] }
  0xcc   : > { %v3162_v32 = vsel %vm1309_vm0, %v4911_v27, 0  ;;  %v1275_v45 = vpack.c.bf16 %v1270_v41, %v1269_v40  ;;  %v3136_v27 = vld [vmem:[#allocation2 + $0xce] sm:$0xff]  ;;  %v3138_v33 = vld [vmem:[#allocation2 + $0xde] sm:$0xff]  ;;  %v3137_v52 = vld [vmem:[#allocation2 + $0xd6] sm:$0xff] }
  0xcd   : > { %v1239_v59 = vmul.f32 %v6941_v36, %v1216_v46  ;;  %v1240_v60 = vmul.f32 %v6941_v36, %v1217_v47  ;;  %5586 = vmatmul.mubr.msk.bf16.gmra.mrb[12].mxu0 %vm719_vm4, %v2906_v35  ;;  %v7156_v35 = vld [vmem:[#allocation2 + $0x13] sm:$0xff]  ;;  %v3248_v40 = vld [vmem:[#allocation2 + $0x9f] sm:$0xff]  ;;  %v4923_v41 = vld [vmem:[%s7704_s7 + $0x48] sm:$0xf] }
  0xce   : > { %v1190_v62 = vpop.permute.xlu0 %1189  ;;  %v675_v63 = vpop.permute.xlu1 %674  ;;  %5589 = vmatprep.mubr.msk.bf16.mxu0 %vm6465_vm1, %v6464_v8  ;;  %v1487_v51 = vpack.c.bf16 %v7156_v35, %v1477_v57 }
  0xcf   : > { %1255 = vst.msk [vmem:[#allocation2 + $0x138] sm:$0xff] %vm719_vm4, %v1239_v59  ;;  %1256 = vst.msk [vmem:[#allocation2 + $0x140] sm:$0xff] %vm719_vm4, %v1240_v60  ;;  %v1218_v1 = vmul.f32 %v1190_v62, %v1113_v58  ;;  %v695_v3 = vmul.f32 %v675_v63, %v590_v48  ;;  %v4833_v58 = vld [vmem:[%s7704_s7 + $0xc] sm:$0xf]  ;;  %v1480_v59 = vld [vmem:[#allocation2 + $0x23] sm:$0xff] }
  0xd0   : > { %v1628_v55 = vsel %vm1309_vm0, %v4833_v58, 0  ;;  %v1488_v62 = vpack.c.bf16 %v1480_v59, %v1479_v56  ;;  %v3020_v63 = vld [vmem:[#allocation2 + $0xdd] sm:$0xff]  ;;  %v3249_v58 = vld [vmem:[#allocation2 + $0xa7] sm:$0xff] }
  0xd1   : > { %v1241_v11 = vmul.f32 %v6941_v36, %v1218_v1  ;;  %v717_v53 = vmul.f32 %v6723_v6, %v695_v3  ;;  %5292 = vmatmul.mubr.msk.bf16.gmra.mrb[4].mxu1 %vm719_vm4, %v1272_v42  ;;  %v1266_v6 = vld [vmem:[#allocation2 + $0x31] sm:$0xff]  ;;  %v3025_v1 = vpack.c.bf16 %v3020_v63, %v7090_v7 }
  0xd2   : > { %v1195_v12 = vpop.permute.xlu0 %1194  ;;  %v877_v13 = vpop.permute.xlu1 %876  ;;  %5295 = vmatprep.mubr.msk.bf16.mxu1 %vm6465_vm1, %v6464_v8  ;;  %v1273_v26 = vpack.c.bf16 %v1266_v6, %v1265_v18  ;;  %v1482_v3 = vld [vmem:[#allocation2 + $0x33] sm:$0xff]  ;;  %v3134_v6 = vld [vmem:[#allocation2 + $0xbe] sm:$0xff] }
  0xd3   : > { %1257 = vst.msk [vmem:[#allocation2 + $0x148] sm:$0xff] %vm719_vm4, %v1241_v11  ;;  %733 = vst.msk [vmem:[#allocation2 + $0x68] sm:$0xff] %vm719_vm4, %v717_v53  ;;  %v1219_v14 = vmul.f32 %v1195_v12, %v1114_v0  ;;  %v945_v15 = vmul.f32 %v877_v13, %v840_v29  ;;  %v1489_v42 = vpack.c.bf16 %v1482_v3, %v1481_v23  ;;  %v3130_v0 = vld [vmem:[#allocation2 + $0x9e] sm:$0xff]  ;;  %v3132_v13 = vld [vmem:[#allocation2 + $0xae] sm:$0xff] }
  0xd4   : > { %v4917_v29 = vld [vmem:[%s7704_s7 + $0x44] sm:$0xf]  ;;  %v3139_v7 = vpack.c.bf16 %v3130_v0, %v3129_v4  ;;  %v1483_v11 = vld [vmem:[#allocation2 + $0x3b] sm:$0xff]  ;;  %v3254_v63 = vld [vmem:[#allocation2 + $0xcf] sm:$0xff] }
  0xd5   : > { %v1242_v19 = vmul.f32 %v6941_v36, %v1219_v14  ;;  %v968_v20 = vmul.f32 %v6716_v61, %v945_v15  ;;  %5590 = vmatmul.mubr.msk.bf16.gmra.mrb[16].mxu0 %vm719_vm4, %v2907_v17  ;;  %v3280_v10 = vsel %vm1309_vm0, %v4917_v29, 0  ;;  %v1484_v53 = vld [vmem:[#allocation2 + $0x43] sm:$0xff]  ;;  %v1485_v17 = vld [vmem:[#allocation2 + $0x4b] sm:$0xff]  ;;  %v3255_v4 = vld [vmem:[#allocation2 + $0xd7] sm:$0xff] }
  0xd6   : > { %v1200_v21 = vpop.permute.xlu0 %1199  ;;  %v7104_v22 = vpop.permute.xlu1 %4490  ;;  %5595 = vmatprep.mubr.msk.bf16.mxu0 %vm6465_vm1, %v6464_v8  ;;  %v1490_v12 = vpack.c.bf16 %v1484_v53, %v1483_v11  ;;  %v3131_v14 = vld [vmem:[#allocation2 + $0xa6] sm:$0xff]  ;;  %v1608_v57 = vpack.c.bf16 %v1485_v17, %v1484_v53 }
  0xd7   : > { %1258 = vst.msk [vmem:[#allocation2 + $0x150] sm:$0xff] %vm719_vm4, %v1242_v19  ;;  %984 = vst.msk [vmem:[#allocation2 + $0x80] sm:$0xff] %vm719_vm4, %v968_v20  ;;  %v1220_v25 = vmul.f32 %v1200_v21, %v1115_v16  ;;  %v3140_v15 = vpack.c.bf16 %v3132_v13, %v3131_v14  ;;  %v1486_v16 = vld [vmem:[#allocation2 + $0x53] sm:$0xff]  ;;  %v3256_v29 = vld [vmem:[#allocation2 + $0xdf] sm:$0xff] }
  0xd8   : > { %v1491_v18 = vpack.c.bf16 %v1486_v16, %v1485_v17  ;;  %v3133_v19 = vld [vmem:[#allocation2 + $0xb6] sm:$0xff]  ;;  %v4839_v21 = vld [vmem:[%s7704_s7 + $0x10] sm:$0xf]  ;;  %v4929_v13 = vld [vmem:[%s7704_s7 + $0x4c] sm:$0xf] }
  0xd9   : > { %v1243_v61 = vmul.f32 %v6941_v36, %v1220_v25  ;;  %5296 = vmatmul.mubr.msk.bf16.gmra.mrb[8].mxu1 %vm719_vm4, %v1273_v26  ;;  %v3141_v20 = vpack.c.bf16 %v3134_v6, %v3133_v19  ;;  %v1605_v25 = vpack.c.bf16 %v1479_v56, %v7156_v35  ;;  %v1746_v26 = vsel %vm1309_vm0, %v4839_v21, 0  ;;  %v3250_v35 = vld [vmem:[#allocation2 + $0xaf] sm:$0xff]  ;;  %v3365_v14 = vld [vmem:[#allocation2 + $0xf9] sm:$0xff] }
  0xda   : > { %v7115_v28 = vpop.permute.xlu0 %4495  ;;  %v7117_v30 = vpop.permute.xlu1 %4500  ;;  %5299 = vmatprep.mubr.msk.bf16.mxu1 %vm6465_vm1, %v6464_v8  ;;  %v4845_v56 = vld [vmem:[%s7704_s7 + $0x14] sm:$0xf]  ;;  %v3516_v17 = vsel %vm1309_vm0, %v4929_v13, 0 }
  0xdb   : > { %1259 = vst.msk [vmem:[#allocation2 + $0x158] sm:$0xff] %vm719_vm4, %v1243_v61  ;;  %v3135_v61 = vld [vmem:[#allocation2 + $0xc6] sm:$0xff]  ;;  %v3368_v19 = vld [vmem:[#allocation2 + $0x111] sm:$0xff] }
  0xdd   : > { %5596 = vmatmul.mubr.msk.bf16.vlgmr.msra.gmra.mrb[0].mxu0 %vm719_vm4, %v3021_v31  ;;  %v3142_v31 = vpack.c.bf16 %v3136_v27, %v3135_v61  ;;  %v3370_v61 = vld [vmem:[#allocation2 + $0x121] sm:$0xff] }
  0xde   : > { %5616 = vmatpush3.bf16.msra.mxu0 %v3162_v32  ;;  %v7126_v36 = vpop.permute.xlu0 %4505  ;;  %v7128_v24 = vpop.permute.xlu1 %4510  ;;  %5599 = vmatprep.mubr.msk.bf16.mxu0 %vm6465_vm1, %v6464_v8  ;;  %v1606_v32 = vpack.c.bf16 %v1481_v23, %v1480_v59  ;;  %v1713_v59 = vld [vmem:[#allocation2 + $0x14] sm:$0xff] }
  0xdf   : > { %5637 = vmatprep.subr.bf16.mxu0 %v6464_v8 }
  0xe1   : > { %5300 = vmatmul.mubr.msk.bf16.gmra.mrb[12].mxu1 %vm719_vm4, %v1274_v38  ;;  %v3143_v38 = vpack.c.bf16 %v3138_v33, %v3137_v52  ;;  %v7283_v33 = vld [vmem:[#allocation2 + $0x1d] sm:$0xff]  ;;  %v4851_v52 = vld [vmem:[%s7704_s7 + $0x18] sm:$0xf] }
  0xe2   : > { %v7134_v34 = vpop.permute.xlu0 %4515  ;;  %v7136_v5 = vpop.permute.xlu1 %4520  ;;  %5303 = vmatprep.mubr.msk.bf16.mxu1 %vm6465_vm1, %v6464_v8 }
  0xe5   : > { %5600 = vmatmul.mubr.msk.bf16.gmra.mrb[4].mxu0 %vm719_vm4, %v3022_v39  ;;  %v1607_v39 = vpack.c.bf16 %v1483_v11, %v1482_v3  ;;  %v1716_v3 = vld [vmem:[#allocation2 + $0x2c] sm:$0xff]  ;;  %v1717_v11 = vld [vmem:[#allocation2 + $0x34] sm:$0xff] }
  0xe6   : > { %v7143_v43 = vpop.permute.xlu0 %4525  ;;  %v7145_v44 = vpop.permute.xlu1 %4530  ;;  %5603 = vmatprep.mubr.msk.bf16.mxu0 %vm6465_vm1, %v6464_v8 }
  0xe9   : > { %5304 = vmatmul.mubr.msk.bf16.gmra.mrb[16].mxu1 %vm719_vm4, %v1275_v45  ;;  %v3247_v45 = vld [vmem:[#allocation2 + $0x97] sm:$0xff] }
  0xea   : > { %v7150_v46 = vpop.permute.xlu0 %4535  ;;  %v610_v47 = vpop.permute.xlu1 %609  ;;  %5309 = vmatprep.mubr.msk.bf16.mxu1 %vm6465_vm1, %v6464_v8 }
  0xeb   : > { %v3257_v47 = vpack.c.bf16 %v3248_v40, %v3247_v45  ;;  %v1982_v40 = vsel %vm1309_vm0, %v4851_v52, 0  ;;  %v3371_v45 = vld [vmem:[#allocation2 + $0x129] sm:$0xff] }
  0xed   : > { %5604 = vmatmul.mubr.msk.bf16.gmra.mrb[8].mxu0 %vm719_vm4, %v3023_v2  ;;  %v3398_v2 = vsel %vm1309_vm0, %v4923_v41, 0  ;;  %v3372_v41 = vld [vmem:[#allocation2 + $0x131] sm:$0xff] }
  0xee   : > { %v680_v48 = vpop.permute.xlu0 %679  ;;  %v872_v49 = vpop.permute.xlu1 %871  ;;  %5607 = vmatprep.mubr.msk.bf16.mxu0 %vm6465_vm1, %v6464_v8 }
  0xef   : > { %v3258_v48 = vpack.c.bf16 %v3250_v35, %v3249_v58  ;;  %v1604_v49 = vld [vmem:[#allocation2 + $0x5b] sm:$0xff] }
  0xf0   : > { %v3374_v58 = vld [vmem:[#allocation2 + $0x141] sm:$0xff] }
  0xf1   : > { %5310 = vmatmul.mubr.msk.bf16.vlgmr.msra.gmra.mrb[0].mxu1 %vm719_vm4, %v1487_v51  ;;  %v1609_v51 = vpack.c.bf16 %v1604_v49, %v1486_v16  ;;  %v1720_v16 = vld [vmem:[#allocation2 + $0x4c] sm:$0xff] }
  0xf2   : > { %v942_v54 = vpop.permute.xlu0 %941  ;;  %v1135_v37 = vpop.permute.xlu1 %1134  ;;  %5330 = vmatpush3.bf16.msra.mxu1 %v1628_v55  ;;  %5313 = vmatprep.mubr.msk.bf16.mxu1 %vm6465_vm1, %v6464_v8  ;;  %v3252_v55 = vld [vmem:[#allocation2 + $0xbf] sm:$0xff] }
  0xf3   : > { %5351 = vmatprep.subr.bf16.mxu1 %v6464_v8  ;;  %v3251_v54 = vld [vmem:[#allocation2 + $0xb7] sm:$0xff] }
  0xf4   : > { %v3259_v37 = vpack.c.bf16 %v3252_v55, %v3251_v54  ;;  %v1835_v55 = vld [vmem:[#allocation2 + $0x35] sm:$0xff] }
  0xf5   : > { %5608 = vmatmul.mubr.msk.bf16.gmra.mrb[12].mxu0 %vm719_vm4, %v3024_v50  ;;  %v1714_v50 = vld [vmem:[#allocation2 + $0x1c] sm:$0xff] }
  0xf6   : > { %v1205_v60 = vpop.permute.xlu0 %1204  ;;  %5611 = vmatprep.mubr.msk.bf16.mxu0 %vm6465_vm1, %v6464_v8 }
  0xf7   : > { %v1723_v60 = vpack.c.bf16 %v1714_v50, %v1713_v59  ;;  %v4935_v50 = vld [vmem:[%s7704_s7 + $0x50] sm:$0xf] }
  0xf9   : > { %5314 = vmatmul.mubr.msk.bf16.gmra.mrb[4].mxu1 %vm719_vm4, %v1488_v62  ;;  %v1864_v62 = vsel %vm1309_vm0, %v4845_v56, 0  ;;  %v3483_v56 = vld [vmem:[#allocation2 + $0xfa] sm:$0xff] }
  0xfa   : > { %5317 = vmatprep.mubr.msk.bf16.mxu1 %vm6465_vm1, %v6464_v8 }
  0xfd   : > { %5612 = vmatmul.mubr.msk.bf16.gmra.mrb[16].mxu0 %vm719_vm4, %v3025_v1  ;;  %v3253_v1 = vld [vmem:[#allocation2 + $0xc7] sm:$0xff] }
  0xfe   : > { %5617 = vmatprep.mubr.msk.bf16.mxu0 %vm6465_vm1, %v6464_v8  ;;  %v3260_v23 = vpack.c.bf16 %v3254_v63, %v3253_v1  ;;  %v1837_v63 = vld [vmem:[#allocation2 + $0x45] sm:$0xff] }
 0x101   : > { %5318 = vmatmul.mubr.msk.bf16.gmra.mrb[8].mxu1 %vm719_vm4, %v1489_v42  ;;  %v1715_v42 = vld [vmem:[#allocation2 + $0x24] sm:$0xff] }
 0x102   : > { %5321 = vmatprep.mubr.msk.bf16.mxu1 %vm6465_vm1, %v6464_v8  ;;  %v1724_v0 = vpack.c.bf16 %v1716_v3, %v1715_v42  ;;  %v3485_v3 = vld [vmem:[#allocation2 + $0x10a] sm:$0xff] }
 0x105   : > { %5618 = vmatmul.mubr.msk.bf16.vlgmr.msra.gmra.mrb[0].mxu0 %vm719_vm4, %v3139_v7  ;;  %v3261_v7 = vpack.c.bf16 %v3256_v29, %v3255_v4  ;;  %v1839_v29 = vld [vmem:[#allocation2 + $0x55] sm:$0xff] }
 0x106   : > { %5638 = vmatpush3.bf16.msra.mxu0 %v3280_v10  ;;  %5621 = vmatprep.mubr.msk.bf16.mxu0 %vm6465_vm1, %v6464_v8  ;;  %v1718_v10 = vld [vmem:[#allocation2 + $0x3c] sm:$0xff] }
 0x107   : > { %5659 = vmatprep.subr.bf16.mxu0 %v6464_v8  ;;  %v1725_v53 = vpack.c.bf16 %v1718_v10, %v1717_v11  ;;  %v3487_v10 = vld [vmem:[#allocation2 + $0x11a] sm:$0xff] }
 0x109   : > { %5322 = vmatmul.mubr.msk.bf16.gmra.mrb[12].mxu1 %vm719_vm4, %v1490_v12  ;;  %v3366_v12 = vld [vmem:[#allocation2 + $0x101] sm:$0xff] }
 0x10a   : > { %5325 = vmatprep.mubr.msk.bf16.mxu1 %vm6465_vm1, %v6464_v8 }
 0x10d   : > { %5622 = vmatmul.mubr.msk.bf16.gmra.mrb[4].mxu0 %vm719_vm4, %v3140_v15  ;;  %v3375_v15 = vpack.c.bf16 %v3366_v12, %v3365_v14  ;;  %v3490_v14 = vld [vmem:[#allocation2 + $0x132] sm:$0xff] }
 0x10e   : > { %5625 = vmatprep.mubr.msk.bf16.mxu0 %vm6465_vm1, %v6464_v8 }
 0x111   : > { %5326 = vmatmul.mubr.msk.bf16.gmra.mrb[16].mxu1 %vm719_vm4, %v1491_v18  ;;  %v1719_v18 = vld [vmem:[#allocation2 + $0x44] sm:$0xff] }
 0x112   : > { %5331 = vmatprep.mubr.msk.bf16.mxu1 %vm6465_vm1, %v6464_v8  ;;  %v1726_v6 = vpack.c.bf16 %v1720_v16, %v1719_v18  ;;  %v3492_v18 = vld [vmem:[#allocation2 + $0x142] sm:$0xff] }
 0x115   : > { %5626 = vmatmul.mubr.msk.bf16.gmra.mrb[8].mxu0 %vm719_vm4, %v3141_v20  ;;  %v3367_v20 = vld [vmem:[#allocation2 + $0x109] sm:$0xff] }
 0x116   : > { %5629 = vmatprep.mubr.msk.bf16.mxu0 %vm6465_vm1, %v6464_v8  ;;  %v3376_v21 = vpack.c.bf16 %v3368_v19, %v3367_v20 }
 0x119   : > { %5332 = vmatmul.mubr.msk.bf16.vlgmr.msra.gmra.mrb[0].mxu1 %vm719_vm4, %v1605_v25  ;;  %v1722_v25 = vld [vmem:[#allocation2 + $0x5c] sm:$0xff] }
 0x11a   : > { %5352 = vmatpush3.bf16.msra.mxu1 %v1746_v26  ;;  %5335 = vmatprep.mubr.msk.bf16.mxu1 %vm6465_vm1, %v6464_v8  ;;  %v1721_v26 = vld [vmem:[#allocation2 + $0x54] sm:$0xff] }
 0x11b   : > { %5373 = vmatprep.subr.bf16.mxu1 %v6464_v8  ;;  %v1727_v27 = vpack.c.bf16 %v1722_v25, %v1721_v26  ;;  %v4941_v25 = vld [vmem:[%s7704_s7 + $0x54] sm:$0xf]  ;;  %v3601_v26 = vld [vmem:[#allocation2 + $0xfb] sm:$0xff] }
 0x11d   : > { %5630 = vmatmul.mubr.msk.bf16.gmra.mrb[12].mxu0 %vm719_vm4, %v3142_v31  ;;  %v3369_v31 = vld [vmem:[#allocation2 + $0x119] sm:$0xff] }
 0x11e   : > { %5633 = vmatprep.mubr.msk.bf16.mxu0 %vm6465_vm1, %v6464_v8 }
 0x121   : > { %5336 = vmatmul.mubr.msk.bf16.gmra.mrb[4].mxu1 %vm719_vm4, %v1606_v32  ;;  %v3377_v32 = vpack.c.bf16 %v3370_v61, %v3369_v31  ;;  %v3752_v61 = vsel %vm1309_vm0, %v4941_v25, 0  ;;  %v2189_v25 = vld [vmem:[#allocation2 + $0x3f] sm:$0xff] }
 0x122   : > { %5339 = vmatprep.mubr.msk.bf16.mxu1 %vm6465_vm1, %v6464_v8 }
 0x125   : > { %5634 = vmatmul.mubr.msk.bf16.gmra.mrb[16].mxu0 %vm719_vm4, %v3143_v38  ;;  %v1831_v38 = vld [vmem:[#allocation2 + $0x15] sm:$0xff] }
 0x126   : > { %5639 = vmatprep.mubr.msk.bf16.mxu0 %vm6465_vm1, %v6464_v8 }
 0x129   : > { %5340 = vmatmul.mubr.msk.bf16.gmra.mrb[8].mxu1 %vm719_vm4, %v1607_v39  ;;  %v1841_v39 = vpack.c.bf16 %v7283_v33, %v1831_v38  ;;  %v1958_v38 = vld [vmem:[#allocation2 + $0x65] sm:$0xff] }
 0x12a   : > { %5343 = vmatprep.mubr.msk.bf16.mxu1 %vm6465_vm1, %v6464_v8 }
 0x12d   : > { %5640 = vmatmul.mubr.msk.bf16.vlgmr.msra.gmra.mrb[0].mxu0 %vm719_vm4, %v3257_v47  ;;  %v3378_v47 = vpack.c.bf16 %v3372_v41, %v3371_v45  ;;  %v3605_v41 = vld [vmem:[#allocation2 + $0x11b] sm:$0xff] }
 0x12e   : > { %5660 = vmatpush3.bf16.msra.mxu0 %v3398_v2  ;;  %5643 = vmatprep.mubr.msk.bf16.mxu0 %vm6465_vm1, %v6464_v8  ;;  %v1834_v2 = vld [vmem:[#allocation2 + $0x2d] sm:$0xff] }
 0x12f   : > { %5681 = vmatprep.subr.bf16.mxu0 %v6464_v8  ;;  %v1960_v16 = vpack.c.bf16 %v1835_v55, %v1834_v2 }
 0x131   : > { %5344 = vmatmul.mubr.msk.bf16.gmra.mrb[12].mxu1 %vm719_vm4, %v1608_v57  ;;  %v1833_v57 = vld [vmem:[#allocation2 + $0x25] sm:$0xff] }
 0x132   : > { %5347 = vmatprep.mubr.msk.bf16.mxu1 %vm6465_vm1, %v6464_v8  ;;  %v1842_v35 = vpack.c.bf16 %v1834_v2, %v1833_v57  ;;  %v1959_v12 = vpack.c.bf16 %v1833_v57, %v7283_v33  ;;  %v3603_v33 = vld [vmem:[#allocation2 + $0x10b] sm:$0xff]  ;;  %v4863_v57 = vld [vmem:[%s7704_s7 + $0x20] sm:$0xf] }
 0x133   : > { %v2068_v2 = vld [vmem:[#allocation2 + $0x26] sm:$0xff] }
 0x135   : > { %5644 = vmatmul.mubr.msk.bf16.gmra.mrb[4].mxu0 %vm719_vm4, %v3258_v48  ;;  %v3373_v48 = vld [vmem:[#allocation2 + $0x139] sm:$0xff] }
 0x136   : > { %5647 = vmatprep.mubr.msk.bf16.mxu0 %vm6465_vm1, %v6464_v8  ;;  %v3379_v49 = vpack.c.bf16 %v3374_v58, %v3373_v48  ;;  %v2218_v58 = vsel %vm1309_vm0, %v4863_v57, 0  ;;  %v3608_v48 = vld [vmem:[#allocation2 + $0x133] sm:$0xff]  ;;  %v2193_v57 = vld [vmem:[#allocation2 + $0x5f] sm:$0xff] }
 0x139   : > { %5348 = vmatmul.mubr.msk.bf16.gmra.mrb[16].mxu1 %vm719_vm4, %v1609_v51  ;;  %v1836_v51 = vld [vmem:[#allocation2 + $0x3d] sm:$0xff] }
 0x13a   : > { %5353 = vmatprep.mubr.msk.bf16.mxu1 %vm6465_vm1, %v6464_v8  ;;  %v1843_v54 = vpack.c.bf16 %v1836_v51, %v1835_v55  ;;  %v1961_v20 = vpack.c.bf16 %v1837_v63, %v1836_v51  ;;  %v2069_v55 = vld [vmem:[#allocation2 + $0x2e] sm:$0xff] }
 0x13d   : > { %5648 = vmatmul.mubr.msk.bf16.gmra.mrb[8].mxu0 %vm719_vm4, %v3259_v37  ;;  %v3484_v37 = vld [vmem:[#allocation2 + $0x102] sm:$0xff] }
 0x13e   : > { %5651 = vmatprep.mubr.msk.bf16.mxu0 %vm6465_vm1, %v6464_v8  ;;  %v3493_v59 = vpack.c.bf16 %v3484_v37, %v3483_v56  ;;  %v3609_v56 = vld [vmem:[#allocation2 + $0x13b] sm:$0xff] }
 0x141   : > { %5354 = vmatmul.mubr.msk.bf16.vlgmr.msra.gmra.mrb[0].mxu1 %vm719_vm4, %v1723_v60  ;;  %v3634_v60 = vsel %vm1309_vm0, %v4935_v50, 0  ;;  %v3610_v50 = vld [vmem:[#allocation2 + $0x143] sm:$0xff] }
 0x142   : > { %5374 = vmatpush3.bf16.msra.mxu1 %v1864_v62  ;;  %5357 = vmatprep.mubr.msk.bf16.mxu1 %vm6465_vm1, %v6464_v8  ;;  %v1838_v62 = vld [vmem:[#allocation2 + $0x4d] sm:$0xff] }
 0x143   : > { %5395 = vmatprep.subr.bf16.mxu1 %v6464_v8  ;;  %v1844_v1 = vpack.c.bf16 %v1838_v62, %v1837_v63  ;;  %v1962_v31 = vpack.c.bf16 %v1839_v29, %v1838_v62  ;;  %v2072_v62 = vld [vmem:[#allocation2 + $0x46] sm:$0xff] }
 0x145   : > { %5652 = vmatmul.mubr.msk.bf16.gmra.mrb[12].mxu0 %vm719_vm4, %v3260_v23  ;;  %v3486_v23 = vld [vmem:[#allocation2 + $0x112] sm:$0xff] }
 0x146   : > { %5655 = vmatprep.mubr.msk.bf16.mxu0 %vm6465_vm1, %v6464_v8  ;;  %v3494_v42 = vpack.c.bf16 %v3486_v23, %v3485_v3 }
 0x149   : > { %5358 = vmatmul.mubr.msk.bf16.gmra.mrb[4].mxu1 %vm719_vm4, %v1724_v0  ;;  %v1840_v0 = vld [vmem:[#allocation2 + $0x5d] sm:$0xff] }
 0x14a   : > { %5361 = vmatprep.mubr.msk.bf16.mxu1 %vm6465_vm1, %v6464_v8  ;;  %v1845_v4 = vpack.c.bf16 %v1840_v0, %v1839_v29 }
 0x14d   : > { %5656 = vmatmul.mubr.msk.bf16.gmra.mrb[16].mxu0 %vm719_vm4, %v3261_v7  ;;  %v3488_v7 = vld [vmem:[#allocation2 + $0x122] sm:$0xff] }
 0x14e   : > { %5661 = vmatprep.mubr.msk.bf16.mxu0 %vm6465_vm1, %v6464_v8  ;;  %v3495_v11 = vpack.c.bf16 %v3488_v7, %v3487_v10  ;;  %v2076_v7 = vld [vmem:[#allocation2 + $0x66] sm:$0xff]  ;;  %v2075_v10 = vld [vmem:[#allocation2 + $0x5e] sm:$0xff] }
 0x151   : > { %5362 = vmatmul.mubr.msk.bf16.gmra.mrb[8].mxu1 %vm719_vm4, %v1725_v53  ;;  %v4857_v53 = vld [vmem:[%s7704_s7 + $0x1c] sm:$0xf] }
 0x152   : > { %5365 = vmatprep.mubr.msk.bf16.mxu1 %vm6465_vm1, %v6464_v8  ;;  %v2100_v13 = vsel %vm1309_vm0, %v4857_v53, 0 }
 0x155   : > { %5662 = vmatmul.mubr.msk.bf16.vlgmr.msra.gmra.mrb[0].mxu0 %vm719_vm4, %v3375_v15  ;;  %v3489_v15 = vld [vmem:[#allocation2 + $0x12a] sm:$0xff] }
 0x156   : > { %5682 = vmatpush3.bf16.msra.mxu0 %v3516_v17  ;;  %5665 = vmatprep.mubr.msk.bf16.mxu0 %vm6465_vm1, %v6464_v8  ;;  %v3496_v17 = vpack.c.bf16 %v3490_v14, %v3489_v15  ;;  %v4869_v14 = vld [vmem:[%s7704_s7 + $0x24] sm:$0xf] }
 0x157   : > { %5703 = vmatprep.subr.bf16.mxu0 %v6464_v8 }
 0x159   : > { %5366 = vmatmul.mubr.msk.bf16.gmra.mrb[12].mxu1 %vm719_vm4, %v1726_v6  ;;  %v3491_v6 = vld [vmem:[#allocation2 + $0x13a] sm:$0xff] }
 0x15a   : > { %5369 = vmatprep.mubr.msk.bf16.mxu1 %vm6465_vm1, %v6464_v8  ;;  %v3497_v19 = vpack.c.bf16 %v3492_v18, %v3491_v6  ;;  %v2187_v18 = vld [vmem:[#allocation2 + $0x2f] sm:$0xff]  ;;  %v2188_v6 = vld [vmem:[#allocation2 + $0x37] sm:$0xff] }
 0x15d   : > { %5666 = vmatmul.mubr.msk.bf16.gmra.mrb[4].mxu0 %vm719_vm4, %v3376_v21  ;;  %v7347_v21 = vld [vmem:[#allocation2 + $0x103] sm:$0xff] }
 0x15e   : > { %5669 = vmatprep.mubr.msk.bf16.mxu0 %vm6465_vm1, %v6464_v8  ;;  %v3729_v23 = vpack.c.bf16 %v3603_v33, %v7347_v21 }
 0x161   : > { %5370 = vmatmul.mubr.msk.bf16.gmra.mrb[16].mxu1 %vm719_vm4, %v1727_v27  ;;  %v3611_v27 = vpack.c.bf16 %v7347_v21, %v3601_v26  ;;  %v2190_v26 = vld [vmem:[#allocation2 + $0x47] sm:$0xff] }
 0x162   : > { %5375 = vmatprep.mubr.msk.bf16.mxu1 %vm6465_vm1, %v6464_v8 }
 0x165   : > { %5670 = vmatmul.mubr.msk.bf16.gmra.mrb[8].mxu0 %vm719_vm4, %v3377_v32  ;;  %v3604_v32 = vld [vmem:[#allocation2 + $0x113] sm:$0xff] }
 0x166   : > { %5673 = vmatprep.mubr.msk.bf16.mxu0 %vm6465_vm1, %v6464_v8  ;;  %v3612_v52 = vpack.c.bf16 %v3604_v32, %v3603_v33 }
 0x169   : > { %5376 = vmatmul.mubr.msk.bf16.vlgmr.msra.gmra.mrb[0].mxu1 %vm719_vm4, %v1841_v39  ;;  %v1963_v39 = vpack.c.bf16 %v1958_v38, %v1840_v0  ;;  %v2074_v0 = vld [vmem:[#allocation2 + $0x56] sm:$0xff] }
 0x16a   : > { %5396 = vmatpush3.bf16.msra.mxu1 %v1982_v40  ;;  %5379 = vmatprep.mubr.msk.bf16.mxu1 %vm6465_vm1, %v6464_v8  ;;  %v3606_v40 = vld [vmem:[#allocation2 + $0x123] sm:$0xff]  ;;  %v2191_v38 = vld [vmem:[#allocation2 + $0x4f] sm:$0xff] }
 0x16b   : > { %5417 = vmatprep.subr.bf16.mxu1 %v6464_v8  ;;  %v3613_v45 = vpack.c.bf16 %v3606_v40, %v3605_v41 }
 0x16d   : > { %5674 = vmatmul.mubr.msk.bf16.gmra.mrb[12].mxu0 %vm719_vm4, %v3378_v47  ;;  %v2067_v47 = vld [vmem:[#allocation2 + $0x1e] sm:$0xff] }
 0x16e   : > { %5677 = vmatprep.mubr.msk.bf16.mxu0 %vm6465_vm1, %v6464_v8 }
 0x171   : > { %5380 = vmatmul.mubr.msk.bf16.gmra.mrb[4].mxu1 %vm719_vm4, %v1842_v35  ;;  %v2077_v35 = vpack.c.bf16 %v2068_v2, %v2067_v47  ;;  %v2194_v2 = vld [vmem:[#allocation2 + $0x67] sm:$0xff] }
 0x172   : > { %5383 = vmatprep.mubr.msk.bf16.mxu1 %vm6465_vm1, %v6464_v8 }
 0x175   : > { %5678 = vmatmul.mubr.msk.bf16.gmra.mrb[16].mxu0 %vm719_vm4, %v3379_v49  ;;  %v3607_v49 = vld [vmem:[#allocation2 + $0x12b] sm:$0xff] }
 0x176   : > { %5683 = vmatprep.mubr.msk.bf16.mxu0 %vm6465_vm1, %v6464_v8  ;;  %v3614_v51 = vpack.c.bf16 %v3608_v48, %v3607_v49  ;;  %v3731_v53 = vpack.c.bf16 %v3607_v49, %v3606_v40 }
 0x179   : > { %5384 = vmatmul.mubr.msk.bf16.gmra.mrb[8].mxu1 %vm719_vm4, %v1843_v54  ;;  %v2070_v54 = vld [vmem:[#allocation2 + $0x36] sm:$0xff] }
 0x17a   : > { %5387 = vmatprep.mubr.msk.bf16.mxu1 %vm6465_vm1, %v6464_v8  ;;  %v2078_v37 = vpack.c.bf16 %v2070_v54, %v2069_v55  ;;  %v4875_v55 = vld [vmem:[%s7704_s7 + $0x28] sm:$0xf] }
 0x17b   : > { %v2304_v54 = vld [vmem:[#allocation2 + $0x89] sm:$0xff] }
 0x17d   : > { %5684 = vmatmul.mubr.msk.bf16.vlgmr.msra.gmra.mrb[0].mxu0 %vm719_vm4, %v3493_v59  ;;  %v3615_v59 = vpack.c.bf16 %v3610_v50, %v3609_v56 }
 0x17e   : > { %5704 = vmatpush3.bf16.msra.mxu0 %v3634_v60  ;;  %5687 = vmatprep.mubr.msk.bf16.mxu0 %vm6465_vm1, %v6464_v8  ;;  %v2071_v60 = vld [vmem:[#allocation2 + $0x3e] sm:$0xff] }
 0x17f   : > { %5725 = vmatprep.subr.bf16.mxu0 %v6464_v8  ;;  %v2079_v63 = vpack.c.bf16 %v2072_v62, %v2071_v60  ;;  %v2306_v62 = vld [vmem:[#allocation2 + $0x99] sm:$0xff] }
 0x181   : > { %5388 = vmatmul.mubr.msk.bf16.gmra.mrb[12].mxu1 %vm719_vm4, %v1844_v1  ;;  %v4947_v1 = vld [vmem:[%s7704_s7 + $0x58] sm:$0xf] }
 0x182   : > { %5391 = vmatprep.mubr.msk.bf16.mxu1 %vm6465_vm1, %v6464_v8  ;;  %v3870_v3 = vsel %vm1309_vm0, %v4947_v1, 0 }
 0x185   : > { %5688 = vmatmul.mubr.msk.bf16.gmra.mrb[4].mxu0 %vm719_vm4, %v3494_v42  ;;  %v2073_v42 = vld [vmem:[#allocation2 + $0x4e] sm:$0xff] }
 0x186   : > { %5691 = vmatprep.mubr.msk.bf16.mxu0 %vm6465_vm1, %v6464_v8  ;;  %v2080_v29 = vpack.c.bf16 %v2074_v0, %v2073_v42  ;;  %v2308_v0 = vld [vmem:[#allocation2 + $0xa9] sm:$0xff] }
 0x189   : > { %5392 = vmatmul.mubr.msk.bf16.gmra.mrb[16].mxu1 %vm719_vm4, %v1845_v4  ;;  %v3730_v4 = vpack.c.bf16 %v3605_v41, %v3604_v32  ;;  %v4953_v32 = vld [vmem:[%s7704_s7 + $0x5c] sm:$0xf]  ;;  %v3839_v41 = vld [vmem:[#allocation2 + $0x114] sm:$0xff] }
 0x18a   : > { %5397 = vmatprep.mubr.msk.bf16.mxu1 %vm6465_vm1, %v6464_v8 }
 0x18d   : > { %5692 = vmatmul.mubr.msk.bf16.gmra.mrb[8].mxu0 %vm719_vm4, %v3495_v11  ;;  %v2081_v11 = vpack.c.bf16 %v2076_v7, %v2075_v10  ;;  %v3955_v7 = vld [vmem:[#allocation2 + $0x105] sm:$0xff]  ;;  %v7471_v10 = vld [vmem:[#allocation2 + $0x10d] sm:$0xff] }
 0x18e   : > { %5695 = vmatprep.mubr.msk.bf16.mxu0 %vm6465_vm1, %v6464_v8 }
 0x191   : > { %5398 = vmatmul.mubr.msk.bf16.vlgmr.msra.gmra.mrb[0].mxu1 %vm719_vm4, %v1959_v12  ;;  %v2185_v12 = vld [vmem:[#allocation2 + $0x1f] sm:$0xff] }
 0x192   : > { %5418 = vmatpush3.bf16.msra.mxu1 %v2100_v13  ;;  %5401 = vmatprep.mubr.msk.bf16.mxu1 %vm6465_vm1, %v6464_v8  ;;  %v2186_v13 = vld [vmem:[#allocation2 + $0x27] sm:$0xff] }
 0x193   : > { %5439 = vmatprep.subr.bf16.mxu1 %v6464_v8  ;;  %v2195_v15 = vpack.c.bf16 %v2186_v13, %v2185_v12  ;;  %v2310_v13 = vld [vmem:[#allocation2 + $0xb9] sm:$0xff] }
 0x195   : > { %5696 = vmatmul.mubr.msk.bf16.gmra.mrb[12].mxu0 %vm719_vm4, %v3496_v17  ;;  %v2336_v17 = vsel %vm1309_vm0, %v4869_v14, 0  ;;  %v2309_v14 = vld [vmem:[#allocation2 + $0xb1] sm:$0xff] }
 0x196   : > { %5699 = vmatprep.mubr.msk.bf16.mxu0 %vm6465_vm1, %v6464_v8 }
 0x199   : > { %5402 = vmatmul.mubr.msk.bf16.gmra.mrb[4].mxu1 %vm719_vm4, %v1960_v16  ;;  %v3732_v16 = vpack.c.bf16 %v3609_v56, %v3608_v48  ;;  %v3842_v48 = vld [vmem:[#allocation2 + $0x12c] sm:$0xff]  ;;  %v3843_v56 = vld [vmem:[#allocation2 + $0x134] sm:$0xff] }
 0x19a   : > { %5405 = vmatprep.mubr.msk.bf16.mxu1 %vm6465_vm1, %v6464_v8 }
 0x19d   : > { %5700 = vmatmul.mubr.msk.bf16.gmra.mrb[16].mxu0 %vm719_vm4, %v3497_v19  ;;  %v2196_v19 = vpack.c.bf16 %v2188_v6, %v2187_v18  ;;  %v2312_v6 = vld [vmem:[#allocation2 + $0xc9] sm:$0xff] }
 0x19e   : > { %5705 = vmatprep.mubr.msk.bf16.mxu0 %vm6465_vm1, %v6464_v8 }
 0x1a1   : > { %5406 = vmatmul.mubr.msk.bf16.gmra.mrb[8].mxu1 %vm719_vm4, %v1961_v20  ;;  %v3728_v20 = vld [vmem:[#allocation2 + $0x14b] sm:$0xff] }
 0x1a2   : > { %5409 = vmatprep.mubr.msk.bf16.mxu1 %vm6465_vm1, %v6464_v8  ;;  %v3733_v21 = vpack.c.bf16 %v3728_v20, %v3610_v50  ;;  %v2454_v50 = vsel %vm1309_vm0, %v4875_v55, 0 }
 0x1a5   : > { %5706 = vmatmul.mubr.msk.bf16.vlgmr.msra.gmra.mrb[0].mxu0 %vm719_vm4, %v3611_v27  ;;  %v2197_v27 = vpack.c.bf16 %v2190_v26, %v2189_v25  ;;  %v3960_v25 = vld [vmem:[#allocation2 + $0x12d] sm:$0xff] }
 0x1a6   : > { %5726 = vmatpush3.bf16.msra.mxu0 %v3752_v61  ;;  %5709 = vmatprep.mubr.msk.bf16.mxu0 %vm6465_vm1, %v6464_v8  ;;  %v3837_v61 = vld [vmem:[#allocation2 + $0x104] sm:$0xff] }
 0x1a7   : > { %5747 = vmatprep.subr.bf16.mxu0 %v6464_v8 }
 0x1a9   : > { %5410 = vmatmul.mubr.msk.bf16.gmra.mrb[12].mxu1 %vm719_vm4, %v1962_v31  ;;  %v3838_v31 = vld [vmem:[#allocation2 + $0x10c] sm:$0xff] }
 0x1aa   : > { %5413 = vmatprep.mubr.msk.bf16.mxu1 %vm6465_vm1, %v6464_v8  ;;  %v3847_v33 = vpack.c.bf16 %v3838_v31, %v3837_v61  ;;  %v4881_v61 = vld [vmem:[%s7704_s7 + $0x2c] sm:$0xf] }
 0x1ab   : > { %v2422_v31 = vld [vmem:[#allocation2 + $0x8a] sm:$0xff] }
 0x1ad   : > { %5710 = vmatmul.mubr.msk.bf16.gmra.mrb[4].mxu0 %vm719_vm4, %v3612_v52  ;;  %v3988_v52 = vsel %vm1309_vm0, %v4953_v32, 0 }
 0x1ae   : > { %5713 = vmatprep.mubr.msk.bf16.mxu0 %vm6465_vm1, %v6464_v8 }
 0x1b1   : > { %5414 = vmatmul.mubr.msk.bf16.gmra.mrb[16].mxu1 %vm719_vm4, %v1963_v39  ;;  %v2192_v39 = vld [vmem:[#allocation2 + $0x57] sm:$0xff] }
 0x1b2   : > { %5419 = vmatprep.mubr.msk.bf16.mxu1 %vm6465_vm1, %v6464_v8  ;;  %v2198_v40 = vpack.c.bf16 %v2192_v39, %v2191_v38  ;;  %v3962_v38 = vld [vmem:[#allocation2 + $0x13d] sm:$0xff] }
 0x1b5   : > { %5714 = vmatmul.mubr.msk.bf16.gmra.mrb[8].mxu0 %vm719_vm4, %v3613_v45  ;;  %v3840_v45 = vld [vmem:[#allocation2 + $0x11c] sm:$0xff] }
 0x1b6   : > { %5717 = vmatprep.mubr.msk.bf16.mxu0 %vm6465_vm1, %v6464_v8  ;;  %v3848_v47 = vpack.c.bf16 %v3840_v45, %v3839_v41  ;;  %v2423_v41 = vld [vmem:[#allocation2 + $0x92] sm:$0xff] }
 0x1b9   : > { %5420 = vmatmul.mubr.msk.bf16.vlgmr.msra.gmra.mrb[0].mxu1 %vm719_vm4, %v2077_v35  ;;  %v2199_v35 = vpack.c.bf16 %v2194_v2, %v2193_v57  ;;  %v3963_v2 = vld [vmem:[#allocation2 + $0x145] sm:$0xff] }
 0x1ba   : > { %5440 = vmatpush3.bf16.msra.mxu1 %v2218_v58  ;;  %5423 = vmatprep.mubr.msk.bf16.mxu1 %vm6465_vm1, %v6464_v8  ;;  %v3841_v58 = vld [vmem:[#allocation2 + $0x124] sm:$0xff] }
 0x1bb   : > { %5461 = vmatprep.subr.bf16.mxu1 %v6464_v8  ;;  %v3849_v49 = vpack.c.bf16 %v3842_v48, %v3841_v58  ;;  %v2425_v58 = vld [vmem:[#allocation2 + $0xa2] sm:$0xff] }
 0x1bd   : > { %5718 = vmatmul.mubr.msk.bf16.gmra.mrb[12].mxu0 %vm719_vm4, %v3614_v51  ;;  %v2303_v51 = vld [vmem:[#allocation2 + $0x81] sm:$0xff] }
 0x1be   : > { %5721 = vmatprep.mubr.msk.bf16.mxu0 %vm6465_vm1, %v6464_v8 }
 0x1c1   : > { %5424 = vmatmul.mubr.msk.bf16.gmra.mrb[4].mxu1 %vm719_vm4, %v2078_v37  ;;  %v2313_v37 = vpack.c.bf16 %v2304_v54, %v2303_v51  ;;  %v2428_v54 = vld [vmem:[#allocation2 + $0xba] sm:$0xff] }
 0x1c2   : > { %5427 = vmatprep.mubr.msk.bf16.mxu1 %vm6465_vm1, %v6464_v8 }
 0x1c5   : > { %5722 = vmatmul.mubr.msk.bf16.gmra.mrb[16].mxu0 %vm719_vm4, %v3615_v59  ;;  %v3844_v59 = vld [vmem:[#allocation2 + $0x13c] sm:$0xff] }
 0x1c6   : > { %5727 = vmatprep.mubr.msk.bf16.mxu0 %vm6465_vm1, %v6464_v8  ;;  %v3850_v60 = vpack.c.bf16 %v3844_v59, %v3843_v56  ;;  %v2430_v59 = vld [vmem:[#allocation2 + $0xca] sm:$0xff] }
 0x1c9   : > { %5428 = vmatmul.mubr.msk.bf16.gmra.mrb[8].mxu1 %vm719_vm4, %v2079_v63  ;;  %v2305_v63 = vld [vmem:[#allocation2 + $0x91] sm:$0xff] }
 0x1ca   : > { %5431 = vmatprep.mubr.msk.bf16.mxu1 %vm6465_vm1, %v6464_v8  ;;  %v2314_v1 = vpack.c.bf16 %v2306_v62, %v2305_v63 }
 0x1cd   : > { %5728 = vmatmul.mubr.msk.bf16.vlgmr.msra.gmra.mrb[0].mxu0 %vm719_vm4, %v3729_v23  ;;  %v3846_v23 = vld [vmem:[#allocation2 + $0x14c] sm:$0xff] }
 0x1ce   : > { %5748 = vmatpush3.bf16.msra.mxu0 %v3870_v3  ;;  %5731 = vmatprep.mubr.msk.bf16.mxu0 %vm6465_vm1, %v6464_v8  ;;  %v3845_v3 = vld [vmem:[#allocation2 + $0x144] sm:$0xff] }
 0x1cf   : > { %5769 = vmatprep.subr.bf16.mxu0 %v6464_v8  ;;  %v3851_v42 = vpack.c.bf16 %v3846_v23, %v3845_v3  ;;  %v4887_v23 = vld [vmem:[%s7704_s7 + $0x30] sm:$0xf] }
 0x1d0   : > { %v2540_v3 = vld [vmem:[#allocation2 + $0x8b] sm:$0xff] }
 0x1d1   : > { %5432 = vmatmul.mubr.msk.bf16.gmra.mrb[12].mxu1 %vm719_vm4, %v2080_v29  ;;  %v2307_v29 = vld [vmem:[#allocation2 + $0xa1] sm:$0xff] }
 0x1d2   : > { %5435 = vmatprep.mubr.msk.bf16.mxu1 %vm6465_vm1, %v6464_v8 }
 0x1d5   : > { %5732 = vmatmul.mubr.msk.bf16.gmra.mrb[4].mxu0 %vm719_vm4, %v3730_v4  ;;  %v2315_v4 = vpack.c.bf16 %v2308_v0, %v2307_v29  ;;  %v2690_v0 = vsel %vm1309_vm0, %v4887_v23, 0  ;;  %v4086_v29 = vpack.c.bf16 %v3963_v2, %v3962_v38 }
 0x1d6   : > { %5735 = vmatprep.mubr.msk.bf16.mxu0 %vm6465_vm1, %v6464_v8 }
 0x1d9   : > { %5436 = vmatmul.mubr.msk.bf16.gmra.mrb[16].mxu1 %vm719_vm4, %v2081_v11  ;;  %v4959_v11 = vld [vmem:[%s7704_s7 + $0x60] sm:$0xf] }
 0x1da   : > { %5441 = vmatprep.mubr.msk.bf16.mxu1 %vm6465_vm1, %v6464_v8  ;;  %v4106_v12 = vsel %vm1309_vm0, %v4959_v11, 0  ;;  %v4082_v11 = vld [vmem:[#allocation2 + $0x155] sm:$0xff] }
 0x1dd   : > { %5736 = vmatmul.mubr.msk.bf16.gmra.mrb[8].mxu0 %vm719_vm4, %v3731_v53  ;;  %v3965_v53 = vpack.c.bf16 %v7471_v10, %v3955_v7  ;;  %v2541_v7 = vld [vmem:[#allocation2 + $0x93] sm:$0xff] }
 0x1de   : > { %5739 = vmatprep.mubr.msk.bf16.mxu0 %vm6465_vm1, %v6464_v8 }
 0x1e1   : > { %5442 = vmatmul.mubr.msk.bf16.vlgmr.msra.gmra.mrb[0].mxu1 %vm719_vm4, %v2195_v15  ;;  %v2316_v15 = vpack.c.bf16 %v2310_v13, %v2309_v14  ;;  %v2543_v13 = vld [vmem:[#allocation2 + $0xa3] sm:$0xff] }
 0x1e2   : > { %5462 = vmatpush3.bf16.msra.mxu1 %v2336_v17  ;;  %5445 = vmatprep.mubr.msk.bf16.mxu1 %vm6465_vm1, %v6464_v8  ;;  %v3957_v17 = vld [vmem:[#allocation2 + $0x115] sm:$0xff] }
 0x1e3   : > { %5483 = vmatprep.subr.bf16.mxu1 %v6464_v8  ;;  %v4083_v51 = vpack.c.bf16 %v3957_v17, %v7471_v10 }
 0x1e5   : > { %5740 = vmatmul.mubr.msk.bf16.gmra.mrb[12].mxu0 %vm719_vm4, %v3732_v16  ;;  %v3958_v16 = vld [vmem:[#allocation2 + $0x11d] sm:$0xff] }
 0x1e6   : > { %5743 = vmatprep.mubr.msk.bf16.mxu0 %vm6465_vm1, %v6464_v8  ;;  %v3966_v18 = vpack.c.bf16 %v3958_v16, %v3957_v17  ;;  %v4971_v17 = vld [vmem:[%s7704_s7 + $0x68] sm:$0xf] }
 0x1e9   : > { %5446 = vmatmul.mubr.msk.bf16.gmra.mrb[4].mxu1 %vm719_vm4, %v2196_v19  ;;  %v2311_v19 = vld [vmem:[#allocation2 + $0xc1] sm:$0xff] }
 0x1ea   : > { %5449 = vmatprep.mubr.msk.bf16.mxu1 %vm6465_vm1, %v6464_v8  ;;  %v2317_v20 = vpack.c.bf16 %v2312_v6, %v2311_v19  ;;  %v4342_v6 = vsel %vm1309_vm0, %v4971_v17, 0  ;;  %v2546_v19 = vld [vmem:[#allocation2 + $0xbb] sm:$0xff] }
 0x1ed   : > { %5744 = vmatmul.mubr.msk.bf16.gmra.mrb[16].mxu0 %vm719_vm4, %v3733_v21  ;;  %v3959_v21 = vld [vmem:[#allocation2 + $0x125] sm:$0xff] }
 0x1ee   : > { %5749 = vmatprep.mubr.msk.bf16.mxu0 %vm6465_vm1, %v6464_v8  ;;  %v3967_v26 = vpack.c.bf16 %v3960_v25, %v3959_v21  ;;  %v4084_v56 = vpack.c.bf16 %v3959_v21, %v3958_v16  ;;  %v4191_v16 = vld [vmem:[#allocation2 + $0x10e] sm:$0xff] }
 0x1f1   : > { %5450 = vmatmul.mubr.msk.bf16.gmra.mrb[8].mxu1 %vm719_vm4, %v2197_v27  ;;  %v2421_v27 = vld [vmem:[#allocation2 + $0x82] sm:$0xff] }
 0x1f2   : > { %5453 = vmatprep.mubr.msk.bf16.mxu1 %vm6465_vm1, %v6464_v8  ;;  %v2431_v32 = vpack.c.bf16 %v2422_v31, %v2421_v27  ;;  %v2547_v31 = vld [vmem:[#allocation2 + $0xc3] sm:$0xff] }
 0x1f5   : > { %5750 = vmatmul.mubr.msk.bf16.vlgmr.msra.gmra.mrb[0].mxu0 %vm719_vm4, %v3847_v33  ;;  %v2572_v33 = vsel %vm1309_vm0, %v4881_v61, 0  ;;  %v2548_v61 = vld [vmem:[#allocation2 + $0xcb] sm:$0xff] }
 0x1f6   : > { %5770 = vmatpush3.bf16.msra.mxu0 %v3988_v52  ;;  %5753 = vmatprep.mubr.msk.bf16.mxu0 %vm6465_vm1, %v6464_v8  ;;  %v3961_v52 = vld [vmem:[#allocation2 + $0x135] sm:$0xff] }
 0x1f7   : > { %5791 = vmatprep.subr.bf16.mxu0 %v6464_v8  ;;  %v3968_v39 = vpack.c.bf16 %v3962_v38, %v3961_v52  ;;  %v4085_v63 = vpack.c.bf16 %v3961_v52, %v3960_v25  ;;  %v4194_v25 = vld [vmem:[#allocation2 + $0x126] sm:$0xff]  ;;  %v4195_v52 = vld [vmem:[#allocation2 + $0x12e] sm:$0xff] }
 0x1f9   : > { %5454 = vmatmul.mubr.msk.bf16.gmra.mrb[12].mxu1 %vm719_vm4, %v2198_v40  ;;  %v2424_v40 = vld [vmem:[#allocation2 + $0x9a] sm:$0xff] }
 0x1fa   : > { %5457 = vmatprep.mubr.msk.bf16.mxu1 %vm6465_vm1, %v6464_v8  ;;  %v2432_v45 = vpack.c.bf16 %v2424_v40, %v2423_v41  ;;  %v4198_v40 = vld [vmem:[#allocation2 + $0x146] sm:$0xff]  ;;  %v4197_v41 = vld [vmem:[#allocation2 + $0x13e] sm:$0xff] }
 0x1fd   : > { %5754 = vmatmul.mubr.msk.bf16.gmra.mrb[4].mxu0 %vm719_vm4, %v3848_v47  ;;  %v3964_v47 = vld [vmem:[#allocation2 + $0x14d] sm:$0xff] }
 0x1fe   : > { %5757 = vmatprep.mubr.msk.bf16.mxu0 %vm6465_vm1, %v6464_v8  ;;  %v3969_v57 = vpack.c.bf16 %v3964_v47, %v3963_v2  ;;  %v4200_v2 = vld [vmem:[#allocation2 + $0x156] sm:$0xff] }
 0x201   : > { %5458 = vmatmul.mubr.msk.bf16.gmra.mrb[16].mxu1 %vm719_vm4, %v2199_v35  ;;  %v2426_v35 = vld [vmem:[#allocation2 + $0xaa] sm:$0xff] }
 0x202   : > { %5463 = vmatprep.mubr.msk.bf16.mxu1 %vm6465_vm1, %v6464_v8  ;;  %v2433_v48 = vpack.c.bf16 %v2426_v35, %v2425_v58  ;;  %v4310_v58 = vld [vmem:[#allocation2 + $0x117] sm:$0xff] }
 0x205   : > { %5758 = vmatmul.mubr.msk.bf16.gmra.mrb[8].mxu0 %vm719_vm4, %v3849_v49  ;;  %v4965_v49 = vld [vmem:[%s7704_s7 + $0x64] sm:$0xf] }
 0x206   : > { %5761 = vmatprep.mubr.msk.bf16.mxu0 %vm6465_vm1, %v6464_v8  ;;  %v4224_v55 = vsel %vm1309_vm0, %v4965_v49, 0  ;;  %vm4467_vm0 = vcmask 60416  }
 0x209   : > { %5464 = vmatmul.mubr.msk.bf16.vlgmr.msra.gmra.mrb[0].mxu1 %vm719_vm4, %v2313_v37  ;;  %v2427_v37 = vld [vmem:[#allocation2 + $0xb2] sm:$0xff] }
 0x20a   : > { %5484 = vmatpush3.bf16.msra.mxu1 %v2454_v50  ;;  %5467 = vmatprep.mubr.msk.bf16.mxu1 %vm6465_vm1, %v6464_v8  ;;  %v2434_v50 = vpack.c.bf16 %v2428_v54, %v2427_v37  ;;  %v4311_v54 = vld [vmem:[#allocation2 + $0x11f] sm:$0xff] }
 0x20b   : > { %5505 = vmatprep.subr.bf16.mxu1 %v6464_v8 }
 0x20d   : > { %5762 = vmatmul.mubr.msk.bf16.gmra.mrb[12].mxu0 %vm719_vm4, %v3850_v60  ;;  %v2429_v60 = vld [vmem:[#allocation2 + $0xc2] sm:$0xff] }
 0x20e   : > { %5765 = vmatprep.mubr.msk.bf16.mxu0 %vm6465_vm1, %v6464_v8  ;;  %v2435_v62 = vpack.c.bf16 %v2430_v59, %v2429_v60  ;;  %v4314_v59 = vld [vmem:[#allocation2 + $0x137] sm:$0xff]  ;;  %v4313_v60 = vld [vmem:[#allocation2 + $0x12f] sm:$0xff] }
 0x211   : > { %5468 = vmatmul.mubr.msk.bf16.gmra.mrb[4].mxu1 %vm719_vm4, %v2314_v1  ;;  %v2539_v1 = vld [vmem:[#allocation2 + $0x83] sm:$0xff] }
 0x212   : > { %5471 = vmatprep.mubr.msk.bf16.mxu1 %vm6465_vm1, %v6464_v8 }
 0x215   : > { %5766 = vmatmul.mubr.msk.bf16.gmra.mrb[16].mxu0 %vm719_vm4, %v3851_v42  ;;  %v2549_v42 = vpack.c.bf16 %v2540_v3, %v2539_v1  ;;  %v2782_v1 = vld [vmem:[#allocation2 + $0xc4] sm:$0xff] }
 0x216   : > { %5771 = vmatprep.mubr.msk.bf16.mxu0 %vm6465_vm1, %v6464_v8 }
 0x219   : > { %5472 = vmatmul.mubr.msk.bf16.gmra.mrb[8].mxu1 %vm719_vm4, %v2315_v4  ;;  %v2542_v4 = vld [vmem:[#allocation2 + $0x9b] sm:$0xff] }
 0x21a   : > { %5475 = vmatprep.mubr.msk.bf16.mxu1 %vm6465_vm1, %v6464_v8  ;;  %v2550_v10 = vpack.c.bf16 %v2542_v4, %v2541_v7 }
 0x21d   : > { %5772 = vmatmul.mubr.msk.bf16.vlgmr.msra.gmra.mrb[0].mxu0 %vm719_vm4, %v3965_v53  ;;  %v4087_v53 = vpack.c.bf16 %v4082_v11, %v3964_v47  ;;  %v2668_v47 = vpack.c.bf16 %v2543_v13, %v2542_v4  ;;  %v2784_v4 = vld [vmem:[#allocation2 + $0xd4] sm:$0xff] }
 0x21e   : > { %5792 = vmatpush3.bf16.msra.mxu0 %v4106_v12  ;;  %5775 = vmatprep.mubr.msk.bf16.mxu0 %vm6465_vm1, %v6464_v8  ;;  %v2544_v12 = vld [vmem:[#allocation2 + $0xab] sm:$0xff] }
 0x21f   : > { %5813 = vmatprep.subr.bf16.mxu0 %v6464_v8  ;;  %v2551_v14 = vpack.c.bf16 %v2544_v12, %v2543_v13  ;;  %v4317_v11 = vld [vmem:[#allocation2 + $0x14f] sm:$0xff] }
 0x221   : > { %5476 = vmatmul.mubr.msk.bf16.gmra.mrb[12].mxu1 %vm719_vm4, %v2316_v15  ;;  %v4192_v15 = vld [vmem:[#allocation2 + $0x116] sm:$0xff] }
 0x222   : > { %5479 = vmatprep.mubr.msk.bf16.mxu1 %vm6465_vm1, %v6464_v8 }
 0x225   : > { %5776 = vmatmul.mubr.msk.bf16.gmra.mrb[4].mxu0 %vm719_vm4, %v3966_v18  ;;  %v4201_v18 = vpack.c.bf16 %v4192_v15, %v4191_v16 }
 0x226   : > { %5779 = vmatprep.mubr.msk.bf16.mxu0 %vm6465_vm1, %v6464_v8 }
 0x229   : > { %5480 = vmatmul.mubr.msk.bf16.gmra.mrb[16].mxu1 %vm719_vm4, %v2317_v20  ;;  %v2545_v20 = vld [vmem:[#allocation2 + $0xb3] sm:$0xff] }
 0x22a   : > { %5485 = vmatprep.mubr.msk.bf16.mxu1 %vm6465_vm1, %v6464_v8  ;;  %v2552_v21 = vpack.c.bf16 %v2546_v19, %v2545_v20 }
 0x22d   : > { %5780 = vmatmul.mubr.msk.bf16.gmra.mrb[8].mxu0 %vm719_vm4, %v3967_v26  ;;  %v4193_v26 = vld [vmem:[#allocation2 + $0x11e] sm:$0xff] }
 0x22e   : > { %5783 = vmatprep.mubr.msk.bf16.mxu0 %vm6465_vm1, %v6464_v8  ;;  %v4202_v27 = vpack.c.bf16 %v4194_v25, %v4193_v26 }
 0x231   : > { %5486 = vmatmul.mubr.msk.bf16.vlgmr.msra.gmra.mrb[0].mxu1 %vm719_vm4, %v2431_v32  ;;  %v2553_v32 = vpack.c.bf16 %v2548_v61, %v2547_v31 }
 0x232   : > { %5506 = vmatpush3.bf16.msra.mxu1 %v2572_v33  ;;  %5489 = vmatprep.mubr.msk.bf16.mxu1 %vm6465_vm1, %v6464_v8  ;;  %v4196_v33 = vld [vmem:[#allocation2 + $0x136] sm:$0xff] }
 0x233   : > { %5527 = vmatprep.subr.bf16.mxu1 %v6464_v8  ;;  %v4203_v38 = vpack.c.bf16 %v4196_v33, %v4195_v52 }
 0x235   : > { %5784 = vmatmul.mubr.msk.bf16.gmra.mrb[12].mxu0 %vm719_vm4, %v3968_v39  ;;  %v2667_v39 = vpack.c.bf16 %v2541_v7, %v2540_v3  ;;  %v4316_v3 = vld [vmem:[#allocation2 + $0x147] sm:$0xff] }
 0x236   : > { %5787 = vmatprep.mubr.msk.bf16.mxu0 %vm6465_vm1, %v6464_v8 }
 0x239   : > { %5490 = vmatmul.mubr.msk.bf16.gmra.mrb[4].mxu1 %vm719_vm4, %v2432_v45  ;;  %v4204_v45 = vpack.c.bf16 %v4198_v40, %v4197_v41 }
 0x23a   : > { %5493 = vmatprep.mubr.msk.bf16.mxu1 %vm6465_vm1, %v6464_v8 }
 0x23d   : > { %5788 = vmatmul.mubr.msk.bf16.gmra.mrb[16].mxu0 %vm719_vm4, %v3969_v57  ;;  %v4199_v57 = vld [vmem:[#allocation2 + $0x14e] sm:$0xff] }
 0x23e   : > { %5793 = vmatprep.mubr.msk.bf16.mxu0 %vm6465_vm1, %v6464_v8  ;;  %v4205_v35 = vpack.c.bf16 %v4200_v2, %v4199_v57 }
 0x241   : > { %5494 = vmatmul.mubr.msk.bf16.gmra.mrb[8].mxu1 %vm719_vm4, %v2433_v48  ;;  %v4309_v48 = vld [vmem:[#allocation2 + $0x10f] sm:$0xff] }
 0x242   : > { %5497 = vmatprep.mubr.msk.bf16.mxu1 %vm6465_vm1, %v6464_v8  ;;  %v4319_v49 = vpack.c.bf16 %v4310_v58, %v4309_v48 }
 0x245   : > { %5794 = vmatmul.mubr.msk.bf16.vlgmr.msra.gmra.mrb[0].mxu0 %vm719_vm4, %v4083_v51  ;;  %v2670_v51 = vpack.c.bf16 %v2547_v31, %v2546_v19 }
 0x246   : > { %5814 = vmatpush3.bf16.msra.mxu0 %v4224_v55  ;;  %5797 = vmatprep.mubr.msk.bf16.mxu0 %vm6465_vm1, %v6464_v8  ;;  %v4312_v55 = vld [vmem:[#allocation2 + $0x127] sm:$0xff] }
 0x247   : > { %5835 = vmatprep.subr.bf16.mxu0 %v6464_v8  ;;  %v4320_v37 = vpack.c.bf16 %v4312_v55, %v4311_v54 }
 0x249   : > { %5498 = vmatmul.mubr.msk.bf16.gmra.mrb[12].mxu1 %vm719_vm4, %v2434_v50  ;;  %v2666_v50 = vld [vmem:[#allocation2 + $0xd3] sm:$0xff] }
 0x24a   : > { %5501 = vmatprep.mubr.msk.bf16.mxu1 %vm6465_vm1, %v6464_v8 }
 0x24d   : > { %5798 = vmatmul.mubr.msk.bf16.gmra.mrb[4].mxu0 %vm719_vm4, %v4084_v56  ;;  %v2671_v56 = vpack.c.bf16 %v2666_v50, %v2548_v61 }
 0x24e   : > { %5801 = vmatprep.mubr.msk.bf16.mxu0 %vm6465_vm1, %v6464_v8 }
 0x251   : > { %5502 = vmatmul.mubr.msk.bf16.gmra.mrb[16].mxu1 %vm719_vm4, %v2435_v62  ;;  %v4321_v62 = vpack.c.bf16 %v4314_v59, %v4313_v60 }
 0x252   : > { %5507 = vmatprep.mubr.msk.bf16.mxu1 %vm6465_vm1, %v6464_v8 }
 0x255   : > { %5802 = vmatmul.mubr.msk.bf16.gmra.mrb[8].mxu0 %vm719_vm4, %v4085_v63  ;;  %v2781_v63 = vld [vmem:[#allocation2 + $0xbc] sm:$0xff] }
 0x256   : > { %5805 = vmatprep.mubr.msk.bf16.mxu0 %vm6465_vm1, %v6464_v8  ;;  %v2788_v23 = vpack.c.bf16 %v2782_v1, %v2781_v63 }
 0x259   : > { %5508 = vmatmul.mubr.msk.bf16.vlgmr.msra.gmra.mrb[0].mxu1 %vm719_vm4, %v2549_v42  ;;  %v4315_v42 = vld [vmem:[#allocation2 + $0x13f] sm:$0xff] }
 0x25a   : > { %5528 = vmatpush3.bf16.msra.mxu1 %v2690_v0  ;;  %5511 = vmatprep.mubr.msk.bf16.mxu1 %vm6465_vm1, %v6464_v8  ;;  %v4322_v0 = vpack.c.bf16 %v4316_v3, %v4315_v42 }
 0x25b   : > { %5857 = vmatprep.subr.bf16.mxu1 %v6464_v8 }
 0x25d   : > { %5806 = vmatmul.mubr.msk.bf16.gmra.mrb[12].mxu0 %vm719_vm4, %v4086_v29  ;;  %v2783_v29 = vld [vmem:[#allocation2 + $0xcc] sm:$0xff] }
 0x25e   : > { %5809 = vmatprep.mubr.msk.bf16.mxu0 %vm6465_vm1, %v6464_v8  ;;  %v2789_v7 = vpack.c.bf16 %v2784_v4, %v2783_v29 }
 0x261   : > { %5512 = vmatmul.mubr.msk.bf16.gmra.mrb[4].mxu1 %vm719_vm4, %v2550_v10  ;;  %v4318_v10 = vld [vmem:[#allocation2 + $0x157] sm:$0xff] }
 0x262   : > { %5515 = vmatprep.mubr.msk.bf16.mxu1 %vm6465_vm1, %v6464_v8 }
 0x265   : > { %5810 = vmatmul.mubr.msk.bf16.gmra.mrb[16].mxu0 %vm719_vm4, %v4087_v53  ;;  %v4323_v53 = vpack.c.bf16 %v4318_v10, %v4317_v11 }
 0x266   : > { %5815 = vmatprep.mubr.msk.bf16.mxu0 %vm6465_vm1, %v6464_v8 }
 0x269   : > { %5516 = vmatmul.mubr.msk.bf16.gmra.mrb[8].mxu1 %vm719_vm4, %v2551_v14 }
 0x26a   : > { %5519 = vmatprep.mubr.msk.bf16.mxu1 %vm6465_vm1, %v6464_v8 }
 0x26d   : > { %5816 = vmatmul.mubr.msk.bf16.vlgmr.msra.gmra.mrb[0].mxu0 %vm719_vm4, %v4201_v18 }
 0x26e   : > { %5836 = vmatpush3.bf16.msra.mxu0 %v4342_v6  ;;  %5819 = vmatprep.mubr.msk.bf16.mxu0 %vm6465_vm1, %v6464_v8 }
 0x271   : > { %5520 = vmatmul.mubr.msk.bf16.gmra.mrb[12].mxu1 %vm719_vm4, %v2552_v21 }
 0x272   : > { %5523 = vmatprep.mubr.msk.bf16.mxu1 %vm6465_vm1, %v6464_v8 }
 0x275   : > { %5820 = vmatmul.mubr.msk.bf16.gmra.mrb[4].mxu0 %vm719_vm4, %v4202_v27 }
 0x276   : > { %5823 = vmatprep.mubr.msk.bf16.mxu0 %vm6465_vm1, %v6464_v8 }
 0x279   : > { %5524 = vmatmul.mubr.msk.bf16.gmra.mrb[16].mxu1 %vm719_vm4, %v2553_v32 }
 0x27a   : > { %5529 = vmatprep.mubr.msk.bf16.mxu1 %vm6465_vm1, %v6464_v8 }
 0x27d   : > { %5824 = vmatmul.mubr.msk.bf16.gmra.mrb[8].mxu0 %vm719_vm4, %v4203_v38 }
 0x27e   : > { %5827 = vmatprep.mubr.msk.bf16.mxu0 %vm6465_vm1, %v6464_v8 }
 0x281   : > { %5530 = vmatmul.mubr.msk.bf16.vlgmr.msra.gmra.mrb[0].mxu1 %vm719_vm4, %v2667_v39 }
 0x282   : > { %5858 = vmatpush3.bf16.msra.mxu1 %v6574_v9  ;;  %5533 = vmatprep.mubr.msk.bf16.mxu1 %vm6465_vm1, %v6464_v8  ;;  %v2669_v9 = vpack.c.bf16 %v2545_v20, %v2544_v12 }
 0x285   : > { %5828 = vmatmul.mubr.msk.bf16.gmra.mrb[12].mxu0 %vm719_vm4, %v4204_v45 }
 0x286   : > { %5831 = vmatprep.mubr.msk.bf16.mxu0 %vm6465_vm1, %v6464_v8 }
 0x289   : > { %5534 = vmatmul.mubr.msk.bf16.gmra.mrb[4].mxu1 %vm719_vm4, %v2668_v47 }
 0x28a   : > { %5537 = vmatprep.mubr.msk.bf16.mxu1 %vm6465_vm1, %v6464_v8 }
 0x28d   : > { %5832 = vmatmul.mubr.msk.bf16.gmra.mrb[16].mxu0 %vm719_vm4, %v4205_v35 }
 0x28e   : > { %5837 = vmatprep.mubr.msk.bf16.mxu0 %vm6465_vm1, %v6464_v8 }
 0x291   : > { %5538 = vmatmul.mubr.msk.bf16.gmra.mrb[8].mxu1 %vm719_vm4, %v2669_v9 }
 0x292   : > { %5541 = vmatprep.mubr.msk.bf16.mxu1 %vm6465_vm1, %v6464_v8 }
 0x295   : > { %5838 = vmatmul.mubr.msk.bf16.vlgmr.msra.gmra.mrb[0].mxu0 %vm719_vm4, %v4319_v49 }
 0x296   : > { %5841 = vmatprep.mubr.msk.bf16.mxu0 %vm6465_vm1, %v6464_v8 }
 0x299   : > { %5542 = vmatmul.mubr.msk.bf16.gmra.mrb[12].mxu1 %vm719_vm4, %v2670_v51 }
 0x29a   : > { %5545 = vmatprep.mubr.msk.bf16.mxu1 %vm6465_vm1, %v6464_v8 }
 0x29d   : > { %5842 = vmatmul.mubr.msk.bf16.gmra.mrb[4].mxu0 %vm719_vm4, %v4320_v37 }
 0x29e   : > { %5845 = vmatprep.mubr.msk.bf16.mxu0 %vm6465_vm1, %v6464_v8 }
 0x2a1   : > { %5546 = vmatmul.mubr.msk.bf16.gmra.mrb[16].mxu1 %vm719_vm4, %v2671_v56 }
 0x2a2   : > { %5563 = vmatprep.mubr.msk.bf16.mxu1 %vm6465_vm1, %v6464_v8 }
 0x2a5   : > { %5846 = vmatmul.mubr.msk.bf16.gmra.mrb[8].mxu0 %vm719_vm4, %v4321_v62 }
 0x2a6   : > { %5849 = vmatprep.mubr.msk.bf16.mxu0 %vm6465_vm1, %v6464_v8 }
 0x2a9   : > { %5564 = vmatmul.mubr.msk.bf16.vlgmr.msra.gmra.mrb[12].mxu1 %vm719_vm4, %v2788_v23 }
 0x2aa   : > { %5567 = vmatprep.mubr.msk.bf16.mxu1 %vm6465_vm1, %v6464_v8 }
 0x2ad   : > { %5850 = vmatmul.mubr.msk.bf16.gmra.mrb[12].mxu0 %vm719_vm4, %v4322_v0 }
 0x2ae   : > { %5853 = vmatprep.mubr.msk.bf16.mxu0 %vm6465_vm1, %v6464_v8  ;;  %vm4608_vm1 = vcmask 1040384  }
 0x2b1   : > { %5568 = vmatmul.mubr.msk.bf16.gmra.mrb[16].mxu1 %vm719_vm4, %v2789_v7 }
 0x2b5   : > { %5854 = vmatmul.mubr.msk.bf16.gmra.mrb[16].mxu0 %vm719_vm4, %v4323_v53 }
 0x354   : > { %v2726_v12 = vpop.f32.mrb[0].mxu1 }
 0x355   : > { %v5531_v13 = vpop.f32.mrb[1].mxu1 }
 0x356   : > { %v2729_v14 = vpop.f32.mrb[2].mxu1 }
 0x357   : > { %v5532_v15 = vpop.f32.mrb[3].mxu1 }
 0x35c   : > { %v2734_v17 = vpop.f32.mrb[4].mxu1 }
 0x35d   : > { %v5535_v16 = vpop.f32.mrb[5].mxu1 }
 0x35e   : > { %v2737_v8 = vpop.f32.mrb[6].mxu1 }
 0x35f   : > { %v5536_v18 = vpop.f32.mrb[7].mxu1 }
 0x364   : > { %v2742_v6 = vpop.f32.mrb[8].mxu1 }
 0x365   : > { %v5539_v19 = vpop.f32.mrb[9].mxu1 }
 0x366   : > { %v2745_v20 = vpop.f32.mrb[10].mxu1 }
 0x367   : > { %v5540_v21 = vpop.f32.mrb[11].mxu1 }
 0x368   : > { %v4378_v25 = vpop.f32.mrb[0].mxu0 }
 0x369   : > { %v5859_v26 = vadd.f32 %v4378_v25, %v2726_v12  ;;  %v5839_v27 = vpop.f32.mrb[1].mxu0 }
 0x36a   : > { %v4381_v61 = vpop.f32.mrb[2].mxu0 }
 0x36b   : > { %v4989_v31 = vpack.c.bf16 %v5859_v26, %v5859_v26  ;;  %v4538_v32 = vmul.f32 %v5859_v26, %v7104_v22  ;;  %v5860_v33 = vadd.f32 %v4381_v61, %v2729_v14  ;;  %v5840_v52 = vpop.f32.mrb[3].mxu0 }
 0x36d   : > { %4468 = vst.msk [vmem:[%s7625_s16] sm:$0xf] %vm4467_vm0, %v4989_v31  ;;  %v4573_v38 = vmul.f32 %v5859_v26, %v4538_v32  ;;  %v4990_v39 = vpack.c.bf16 %v5860_v33, %v5860_v33  ;;  %v4539_v40 = vmul.f32 %v5860_v33, %v7115_v28  ;;  %v4548_v41 = vsel %vm719_vm4, %v4538_v32, 0.0 }
 0x36f   : > { %4469 = vst.msk [vmem:[%s7625_s16 + $0x4] sm:$0xf] %vm4467_vm0, %v4990_v39  ;;  %v4549_v45 = vsel %vm719_vm4, %v4539_v40, 0.0  ;;  %v4574_v47 = vmul.f32 %v5860_v33, %v4539_v40  ;;  %v4583_v22 = vsel %vm719_vm4, %v4573_v38, 0.0 }
 0x370   : > { %v4550_v2 = vadd.f32 %v4549_v45, %v4548_v41  ;;  %v4386_v57 = vpop.f32.mrb[4].mxu0 }
 0x371   : > { %v4584_v35 = vsel %vm719_vm4, %v4574_v47, 0.0  ;;  %v5861_v9 = vadd.f32 %v4386_v57, %v2734_v17  ;;  %v5843_v58 = vpop.f32.mrb[5].mxu0 }
 0x372   : > { %v4585_v48 = vadd.f32 %v4584_v35, %v4583_v22  ;;  %v4389_v49 = vpop.f32.mrb[6].mxu0 }
 0x373   : > { %v4991_v28 = vpack.c.bf16 %v5861_v9, %v5861_v9  ;;  %v4540_v51 = vmul.f32 %v5861_v9, %v7117_v30  ;;  %v5862_v55 = vadd.f32 %v4389_v49, %v2737_v8  ;;  %v5844_v54 = vpop.f32.mrb[7].mxu0 }
 0x375   : > { %4470 = vst.msk [vmem:[%s7625_s16 + $0x8] sm:$0xf] %vm4467_vm0, %v4991_v28  ;;  %v4551_v37 = vsel %vm719_vm4, %v4540_v51, 0.0  ;;  %v4575_v50 = vmul.f32 %v5861_v9, %v4540_v51  ;;  %v4992_v56 = vpack.c.bf16 %v5862_v55, %v5862_v55  ;;  %v4541_v59 = vmul.f32 %v5862_v55, %v7126_v36 }
 0x376   : > { %v4552_v60 = vadd.f32 %v4551_v37, %v4550_v2 }
 0x377   : > { %v4586_v62 = vsel %vm719_vm4, %v4575_v50, 0.0  ;;  %4471 = vst.msk [vmem:[%s7625_s16 + $0xc] sm:$0xf] %vm4467_vm0, %v4992_v56  ;;  %v4553_v63 = vsel %vm719_vm4, %v4541_v59, 0.0  ;;  %v4576_v1 = vmul.f32 %v5862_v55, %v4541_v59 }
 0x378   : > { %v4587_v30 = vadd.f32 %v4586_v62, %v4585_v48  ;;  %v4554_v23 = vadd.f32 %v4553_v63, %v4552_v60  ;;  %v4394_v3 = vpop.f32.mrb[8].mxu0 }
 0x379   : > { %v4588_v42 = vsel %vm719_vm4, %v4576_v1, 0.0  ;;  %v5863_v0 = vadd.f32 %v4394_v3, %v2742_v6  ;;  %v5847_v29 = vpop.f32.mrb[9].mxu0 }
 0x37a   : > { %v4589_v4 = vadd.f32 %v4588_v42, %v4587_v30  ;;  %v4397_v7 = vpop.f32.mrb[10].mxu0 }
 0x37b   : > { %v4993_v36 = vpack.c.bf16 %v5863_v0, %v5863_v0  ;;  %v4542_v10 = vmul.f32 %v5863_v0, %v7128_v24  ;;  %v5864_v11 = vadd.f32 %v4397_v7, %v2745_v20  ;;  %v5848_v53 = vpop.f32.mrb[11].mxu0 }
 0x37c   : > { %v2868_v12 = vpop.f32.mrb[12].mxu1 }
 0x37d   : > { %4472 = vst.msk [vmem:[%s7625_s16 + $0x10] sm:$0xf] %vm4467_vm0, %v4993_v36  ;;  %v4555_v13 = vsel %vm719_vm4, %v4542_v10, 0.0  ;;  %v4577_v14 = vmul.f32 %v5863_v0, %v4542_v10  ;;  %v4994_v15 = vpack.c.bf16 %v5864_v11, %v5864_v11  ;;  %v4543_v17 = vmul.f32 %v5864_v11, %v7134_v34  ;;  %v5565_v16 = vpop.f32.mrb[13].mxu1 }
 0x37e   : > { %v4556_v8 = vadd.f32 %v4555_v13, %v4554_v23  ;;  %v2871_v18 = vpop.f32.mrb[14].mxu1 }
 0x37f   : > { %v4590_v6 = vsel %vm719_vm4, %v4577_v14, 0.0  ;;  %4473 = vst.msk [vmem:[%s7625_s16 + $0x14] sm:$0xf] %vm4467_vm0, %v4994_v15  ;;  %v4557_v24 = vsel %vm719_vm4, %v4543_v17, 0.0  ;;  %v4578_v19 = vmul.f32 %v5864_v11, %v4543_v17  ;;  %v5566_v20 = vpop.f32.mrb[15].mxu1 }
 0x380   : > { %v4591_v21 = vadd.f32 %v4590_v6, %v4589_v4  ;;  %v4558_v25 = vadd.f32 %v4557_v24, %v4556_v8  ;;  %v4402_v26 = vpop.f32.mrb[12].mxu0 }
 0x381   : > { %v4592_v27 = vsel %vm719_vm4, %v4578_v19, 0.0  ;;  %v5865_v61 = vadd.f32 %v4402_v26, %v2868_v12  ;;  %v5851_v31 = vpop.f32.mrb[13].mxu0 }
 0x382   : > { %v4593_v34 = vadd.f32 %v4592_v27, %v4591_v21  ;;  %v4405_v32 = vpop.f32.mrb[14].mxu0 }
 0x383   : > { %v4995_v33 = vpack.c.bf16 %v5865_v61, %v5865_v61  ;;  %v4544_v52 = vmul.f32 %v5865_v61, %v7136_v5  ;;  %v5866_v38 = vadd.f32 %v4405_v32, %v2871_v18  ;;  %v5852_v39 = vpop.f32.mrb[15].mxu0 }
 0x384   : > { %v2876_v40 = vpop.f32.mrb[16].mxu1 }
 0x385   : > { %4474 = vst.msk [vmem:[%s7625_s16 + $0x18] sm:$0xf] %vm4467_vm0, %v4995_v33  ;;  %v4559_v41 = vsel %vm719_vm4, %v4544_v52, 0.0  ;;  %v4579_v45 = vmul.f32 %v5865_v61, %v4544_v52  ;;  %v4996_v47 = vpack.c.bf16 %v5866_v38, %v5866_v38  ;;  %v4545_v2 = vmul.f32 %v5866_v38, %v7143_v43  ;;  %v5569_v57 = vpop.f32.mrb[17].mxu1 }
 0x386   : > { %v4560_v22 = vadd.f32 %v4559_v41, %v4558_v25  ;;  %v2879_v35 = vpop.f32.mrb[18].mxu1 }
 0x387   : > { %v4594_v9 = vsel %vm719_vm4, %v4579_v45, 0.0  ;;  %4475 = vst.msk [vmem:[%s7625_s16 + $0x1c] sm:$0xf] %vm4467_vm0, %v4996_v47  ;;  %v4561_v5 = vsel %vm719_vm4, %v4545_v2, 0.0  ;;  %v4580_v58 = vmul.f32 %v5866_v38, %v4545_v2  ;;  %v5570_v48 = vpop.f32.mrb[19].mxu1 }
 0x388   : > { %v4595_v49 = vadd.f32 %v4594_v9, %v4593_v34  ;;  %v4562_v28 = vadd.f32 %v4561_v5, %v4560_v22  ;;  %v4410_v51 = vpop.f32.mrb[16].mxu0 }
 0x389   : > { %v4596_v55 = vsel %vm719_vm4, %v4580_v58, 0.0  ;;  %v5867_v54 = vadd.f32 %v4410_v51, %v2876_v40  ;;  %v5855_v43 = vpop.f32.mrb[17].mxu0 }
 0x38a   : > { %v4597_v37 = vadd.f32 %v4596_v55, %v4595_v49  ;;  %v4413_v50 = vpop.f32.mrb[18].mxu0 }
 0x38b   : > { %v4997_v56 = vpack.c.bf16 %v5867_v54, %v5867_v54  ;;  %v4546_v59 = vmul.f32 %v5867_v54, %v7145_v44  ;;  %v5868_v60 = vadd.f32 %v4413_v50, %v2879_v35  ;;  %v5856_v62 = vpop.f32.mrb[19].mxu0 }
 0x38d   : > { %4476 = vst.msk [vmem:[%s7625_s16 + $0x20] sm:$0xf] %vm4467_vm0, %v4997_v56  ;;  %v4563_v63 = vsel %vm719_vm4, %v4546_v59, 0.0  ;;  %v4581_v1 = vmul.f32 %v5867_v54, %v4546_v59  ;;  %v4998_v30 = vpack.c.bf16 %v5868_v60, %v5868_v60  ;;  %v4547_v23 = vmul.f32 %v5868_v60, %v7150_v46 }
 0x38e   : > { %v4564_v3 = vadd.f32 %v4563_v63, %v4562_v28 }
 0x38f   : > { %v4598_v42 = vsel %vm719_vm4, %v4581_v1, 0.0  ;;  %4477 = vst.msk [vmem:[%s7625_s16 + $0x24] sm:$0xf] %vm4467_vm0, %v4998_v30  ;;  %v4565_v0 = vsel %vm719_vm4, %v4547_v23, 0.0  ;;  %v4582_v44 = vmul.f32 %v5868_v60, %v4547_v23 }
 0x390   : > { %v4599_v29 = vadd.f32 %v4598_v42, %v4597_v37  ;;  %v4566_v4 = vadd.f32 %v4565_v0, %v4564_v3 }
 0x391   : > { %v4600_v7 = vsel %vm719_vm4, %v4582_v44, 0.0  ;;  %vm4610_vm4 = vcmask 58368  }
 0x392   : > { %v4567_v36 = vrot.slane %v4566_v4, 4  ;;  %v4601_v10 = vadd.f32 %v4600_v7, %v4599_v29 }
 0x394   : > { %v4568_v11 = vadd.f32 %v4567_v36, %v4566_v4  ;;  %v4602_v53 = vrot.slane %v4601_v10, 4 }
 0x396   : > { %v4569_v12 = vrot.slane %v4568_v11, 2  ;;  %v4603_v46 = vadd.f32 %v4602_v53, %v4601_v10 }
 0x398   : > { %v4570_v13 = vadd.f32 %v4569_v12, %v4568_v11  ;;  %v4604_v14 = vrot.slane %v4603_v46, 2 }
 0x39a   : > { %v4571_v15 = vrot.slane %v4570_v13, 1  ;;  %v4605_v17 = vadd.f32 %v4604_v14, %v4603_v46 }
 0x39c   : > { %v4606_v16 = vrot.slane %v4605_v17, 1  ;;  %v4572_v8 = vadd.f32 %v4571_v15, %v4570_v13 }
 0x39e   : > { %v4607_v18 = vadd.f32 %v4606_v16, %v4605_v17 }
 0x3a0   : > { %v4609_v6 = vsel %vm4608_vm1, %v4572_v8, %v4607_v18 }
 0x3a1   : > { %4611 = vst.msk [vmem:[%s471_s28] sm:$0x3] %vm4610_vm4, %v4609_v6 }
 0x3a2 PF: > { %s20_s13 = sadd.s32 1, %s6461_s13   ;;  %s7710_s30 = smov %s6453_s11 }
 0x3a3   : > { %p17_p5 = scmp.ge.s32.totalorder %s20_s13, 18   ;;  %s7711_s10 = smov %s6457_s12 }
 0x3a4   : > { %s7712_s11 = smov %s7715_s14  ;;  %s7713_s12 = smov %s7719_s15 }
 0x3a5   :  { %19 = sbr.rel (!%p17_p5) target bundleno = 3 (0x3), region = 128 }

</bundles_post_ra>
